<compile_context>
chip_gen: v5e
topology: v5e:2x2
jax: 0.10.0
libtpu: 0.0.40
codegen_flags: <defaults>
</compile_context>

<pallas_src>
import jax
import jax.numpy as jnp
from jax.experimental import pallas as pl
from jax.experimental.pallas import tpu as pltpu

_VMEM_LIMIT = 32 * 1024 * 1024   # explicit scoped-VMEM request (review item, v5e)


# ---------------------------------------------------------------------------
# Pallas kernels
# ---------------------------------------------------------------------------
def _gemm_bias_relu_kernel(a_ref, w_ref, b_ref, o_ref):
    """o = relu(a @ w + b); one full-array, VMEM-resident block."""
    acc = jnp.dot(a_ref[...], w_ref[...], preferred_element_type=jnp.float32)
    o_ref[...] = jnp.maximum(acc + b_ref[...], 0.0).astype(o_ref.dtype)


def _tail_kernel(p3_ref, w3_ref, b3_ref, w1_ref, b1_ref, w2_ref, b2_ref, o_ref):
    """Fused conv3 (9 output positions x 2 towers of small GEMMs over
    pre-gathered patches) + torch-order flatten / tower-concat (absorbed into
    the fc1 weight layout) + fc1(+bias+ReLU) + fc2(+bias) + exact softmax.

    p3_ref: (9, 2, B, 144)  f32  conv3 im2col patches [spatial s, tower t, batch, K]
    w3_ref: (144, 60)       f32  conv3 weight, K order (i, j, c)
    b3_ref: (1, 60)         f32
    w1_ref: (2, 9, 60, H)   bf16 fc1 weight as [tower, s, conv3 channel, hidden]
    b1_ref: (1, H)          f32
    w2_ref: (H, n_cls)      bf16
    b2_ref: (1, n_cls)      f32
    o_ref : (B, n_cls)      f32  softmax probabilities
    """
    bsz = p3_ref.shape[2]
    n_hidden = w1_ref.shape[-1]
    h = jnp.zeros((bsz, n_hidden), jnp.float32)
    for t in range(p3_ref.shape[1]):            # 2 weight-shared towers
        for s in range(p3_ref.shape[0]):        # 9 conv3 output positions
            f = jnp.dot(p3_ref[s, t], w3_ref[...],
                        preferred_element_type=jnp.float32) + b3_ref[...]
            f = jnp.maximum(f, 0.0)                                    # (B, 60)
            h = h + jnp.dot(f.astype(jnp.bfloat16), w1_ref[t, s],
                            preferred_element_type=jnp.float32)        # (B, H)
    h = jnp.maximum(h + b1_ref[...], 0.0)                              # fc1 + ReLU
    logits = jnp.dot(h.astype(jnp.bfloat16), w2_ref[...],
                     preferred_element_type=jnp.float32) + b2_ref[...]
    m = jnp.max(logits, axis=-1, keepdims=True)
    e = jnp.exp(logits - m)
    # Exact divide: row sums are 1 to f32 rounding (no approx reciprocal).
    o_ref[...] = (e / jnp.sum(e, axis=-1, keepdims=True)).astype(o_ref.dtype)


# ---------------------------------------------------------------------------
# pallas_call wrappers (single full-array blocks: the whole net is VMEM-sized)
# ---------------------------------------------------------------------------
def _full_spec(shape):
    nd = len(shape)
    return pl.BlockSpec(shape, lambda i, _nd=nd: (0,) * _nd)


def pallas_gemm_bias_relu(a, w, b):
    m, k = a.shape
    n = w.shape[1]
    return pl.pallas_call(
        _gemm_bias_relu_kernel,
        out_shape=jax.ShapeDtypeStruct((m, n), jnp.float32),
        grid=(1,),
        in_specs=[_full_spec((m, k)), _full_spec((k, n)), _full_spec((1, n))],
        out_specs=_full_spec((m, n)),
        compiler_params=pltpu.CompilerParams(
            dimension_semantics=("arbitrary",),
            vmem_limit_bytes=_VMEM_LIMIT),
    )(a, w, b)


def pallas_tail(p3, w3, b3, w1, b1, w2, b2):
    bsz = p3.shape[2]
    n_cls = w2.shape[1]
    return pl.pallas_call(
        _tail_kernel,
        out_shape=jax.ShapeDtypeStruct((bsz, n_cls), jnp.float32),
        grid=(1,),
        in_specs=[_full_spec(p3.shape), _full_spec(w3.shape), _full_spec(b3.shape),
                  _full_spec(w1.shape), _full_spec(b1.shape),
                  _full_spec(w2.shape), _full_spec(b2.shape)],
        out_specs=_full_spec((bsz, n_cls)),
        compiler_params=pltpu.CompilerParams(
            dimension_semantics=("arbitrary",),
            vmem_limit_bytes=_VMEM_LIMIT),
    )(p3, w3, b3, w1, b1, w2, b2)


# ---------------------------------------------------------------------------
# Layout glue (zero FLOPs; stays channel-last NHWC, no 128-padding)
# ---------------------------------------------------------------------------
def _im2col_nhwc(x, kh, kw):
    """x: (N, H, W, C) -> (N*OH*OW, kh*kw*C), valid conv, stride 1.
    K index order is (i, j, c), matching the pre-reshaped conv weights."""
    n, h, w, c = x.shape
    oh, ow = h - kh + 1, w - kw + 1
    cols = [x[:, i:i + oh, j:j + ow, :] for i in range(kh) for j in range(kw)]
    a = jnp.concatenate(cols, axis=-1)                   # (N, OH, OW, kh*kw*C)
    return a.reshape(n * oh * ow, kh * kw * c), (n, oh, ow)


def _avg_pool2_nhwc(x):
    """AvgPool2d(kernel_size=2) with torch semantics (floor; odd edge dropped)."""
    n, h, w, c = x.shape
    h2, w2 = (h // 2) * 2, (w // 2) * 2
    x = x[:, :h2, :w2, :]
    return x.reshape(n, h2 // 2, 2, w2 // 2, 2, c).mean(axis=(2, 4))


# ---------------------------------------------------------------------------
# Parameters
# ---------------------------------------------------------------------------
def init_params(n_classes, key):
    """Deterministic synthetic parameters in the exact torch layouts of SuNet."""
    ks = jax.random.split(key, 10)

    def init(k, shape, fan_in):
        bound = 1.0 / jnp.sqrt(fan_in)
        return jax.random.uniform(k, shape, jnp.float32, -bound, bound)

    return {
        "conv1_w": init(ks[0], (6, 1, 3, 3), 1 * 9),
        "conv1_b": init(ks[1], (6,), 1 * 9),
        "conv2_w": init(ks[2], (16, 6, 3, 3), 6 * 9),
        "conv2_b": init(ks[3], (16,), 6 * 9),
        "conv3_w": init(ks[4], (60, 16, 3, 3), 16 * 9),
        "conv3_b": init(ks[5], (60,), 16 * 9),
        "fc1_w":   init(ks[6], (420, 1080), 1080),   # torch Linear: (out, in)
        "fc1_b":   init(ks[7], (420,), 1080),
        "fc2_w":   init(ks[8], (n_classes, 420), 420),
        "fc2_b":   init(ks[9], (n_classes,), 420),
    }


def prepare_params(p):
    """One-time (outside jit) relayout of torch-layout weights into GEMM form.
    Conv weights: (outC, inC, 3, 3) -> (9*inC, outC) with K order (i, j, c),
    matching the im2col lane order.  fc1 is split per tower / per conv3 spatial
    position so the torch (c, h, w) flatten order and the tower concat are
    absorbed into the weight layout; classifier weights stored in bf16."""
    def prep_conv(w, bias):
        o, c, kh, kw = w.shape
        wg = jnp.transpose(w, (2, 3, 1, 0)).reshape(kh * kw * c, o)
        return wg.astype(jnp.float32), bias.reshape(1, o).astype(jnp.float32)

    c1w, c1b = prep_conv(p["conv1_w"], p["conv1_b"])
    c2w, c2b = prep_conv(p["conv2_w"], p["conv2_b"])
    c3w, c3b = prep_conv(p["conv3_w"], p["conv3_b"])

    n_hidden, n_in = p["fc1_w"].shape                     # (420, 1080)
    c3o = p["conv3_w"].shape[0]                           # 60
    sp = int(round((n_in // (2 * c3o)) ** 0.5))           # 3 = conv3 output extent
    # torch fc1 input index = tower*540 + c*9 + (h*3 + w); relay to
    # (tower, s=h*3+w, c, hidden).
    w1 = p["fc1_w"].reshape(n_hidden, 2, c3o, sp, sp)     # (k, t, c, h, w)
    w1 = jnp.transpose(w1, (1, 3, 4, 2, 0))               # (t, h, w, c, k)
    w1 = w1.reshape(2, sp * sp, c3o, n_hidden).astype(jnp.bfloat16)
    b1 = p["fc1_b"].reshape(1, n_hidden).astype(jnp.float32)

    w2 = p["fc2_w"].T.astype(jnp.bfloat16)                # (420, n_classes)
    b2 = p["fc2_b"].reshape(1, -1).astype(jnp.float32)

    return {"c1w": c1w, "c1b": c1b, "c2w": c2w, "c2b": c2b,
            "c3w": c3w, "c3b": c3b, "w1": w1, "b1": b1, "w2": w2, "b2": b2}


# ---------------------------------------------------------------------------
# SuNet forward
# ---------------------------------------------------------------------------
def sunet_forward(pp, x1, x2):
    b = x1.shape[0]
    c1o = pp["c1w"].shape[1]
    c2o = pp["c2w"].shape[1]

    # Weight-shared towers: stack along batch, run the conv pipeline once.
    x = jnp.concatenate([x1, x2], axis=0)                # (2B, 1, 28, 28) NCHW
    x = jnp.transpose(x, (0, 2, 3, 1))                   # NHWC (C=1), once

    a1, (n, oh, ow) = _im2col_nhwc(x, 3, 3)              # (2B*26*26, 9)
    y = pallas_gemm_bias_relu(a1, pp["c1w"], pp["c1b"])  # (2B*26*26, 6)
    y = _avg_pool2_nhwc(y.reshape(n, oh, ow, c1o))       # (2B, 13, 13, 6)

    a2, (n, oh, ow) = _im2col_nhwc(y, 3, 3)              # (2B*11*11, 54)
    y = pallas_gemm_bias_relu(a2, pp["c2w"], pp["c2b"])  # (2B*11*11, 16)
    y = _avg_pool2_nhwc(y.reshape(n, oh, ow, c2o))       # (2B, 5, 5, 16)

    # conv3 im2col patches arranged (spatial pos, tower, batch, K) so the fused
    # tail kernel only needs leading-dim indexing and 2-D matmuls.
    k3 = 9 * c2o
    cols = [y[:, i:i + 3, j:j + 3, :] for i in range(3) for j in range(3)]
    p3 = jnp.concatenate(cols, axis=-1)                  # (2B, 3, 3, 144)
    p3 = jnp.transpose(p3, (1, 2, 0, 3)).reshape(9, 2, b, k3)

    return pallas_tail(p3, pp["c3w"], pp["c3b"],
                       pp["w1"], pp["b1"], pp["w2"], pp["b2"])   # (B, n_classes)


# ---------------------------------------------------------------------------
if __name__ == "__main__":
    n_classes = 19   # sum of two digits: 0..18
    batch = 2

    key = jax.random.PRNGKey(0)
    k1, k2, kp = jax.random.split(key, 3)
    # 28x28 single-channel inputs (1080 = 2 * 60*3*3 classifier in_features).
    x1 = jax.random.normal(k1, (batch, 1, 28, 28), jnp.float32)
    x2 = jax.random.normal(k2, (batch, 1, 28, 28), jnp.float32)

    torch_layout_params = init_params(n_classes, kp)
    gemm_params = prepare_params(torch_layout_params)    # hoisted out of jit

    fwd = jax.jit(sunet_forward)
    probs = jax.block_until_ready(fwd(gemm_params, x1, x2))

    assert probs.shape == (batch, n_classes), probs.shape
    assert bool(jnp.all(jnp.isfinite(probs)))
    # Exact-divide softmax: rows sum to 1 within f32 rounding.
    assert bool(jnp.allclose(jnp.sum(probs, axis=1), 1.0, atol=1e-4))
    print("KERNEL_OK")
</pallas_src>

<mosaic_0001>
module attributes {stable_mosaic.version = 11 : i64} {
  func.func @_gemm_bias_relu_kernel(%arg0: i32, %arg1: memref<2704x9xf32, #tpu.memory_space<vmem>>, %arg2: memref<9x6xf32, #tpu.memory_space<vmem>>, %arg3: memref<1x6xf32, #tpu.memory_space<vmem>>, %arg4: memref<2704x6xf32, #tpu.memory_space<vmem>>) attributes {dimension_semantics = [#tpu.dimension_semantics<arbitrary>], iteration_bounds = array<i64: 1>, scalar_prefetch = 0 : i64, scratch_operands = 0 : i64, tpu.core_type = #tpu.core_type<tc>, window_params = [{pipeline_mode = #tpu.pipeline_mode<synchronous>, transform_indices = @transform_0, window_bounds = array<i64: 2704, 9>}, {pipeline_mode = #tpu.pipeline_mode<synchronous>, transform_indices = @transform_1, window_bounds = array<i64: 9, 6>}, {pipeline_mode = #tpu.pipeline_mode<synchronous>, transform_indices = @transform_2, window_bounds = array<i64: 1, 6>}, {pipeline_mode = #tpu.pipeline_mode<synchronous>, transform_indices = @transform_3, window_bounds = array<i64: 2704, 6>}]} {
    %c0 = arith.constant 0 : index
    %c0_0 = arith.constant 0 : index
    %0 = vector.load %arg1[%c0, %c0_0] : memref<2704x9xf32, #tpu.memory_space<vmem>>, vector<2704x9xf32>
    %c0_1 = arith.constant 0 : index
    %c0_2 = arith.constant 0 : index
    %1 = vector.load %arg2[%c0_1, %c0_2] : memref<9x6xf32, #tpu.memory_space<vmem>>, vector<9x6xf32>
    %cst = arith.constant dense<0.000000e+00> : vector<2704x6xf32>
    %2 = tpu.matmul %0, %1, %cst {dimension_numbers = #tpu.dot_dimension_numbers<[1], [0], [0], [1], [0, 0, 1, 1], [], []>} : vector<2704x9xf32>, vector<9x6xf32>, vector<2704x6xf32> -> vector<2704x6xf32>
    %c0_3 = arith.constant 0 : index
    %c0_4 = arith.constant 0 : index
    %3 = vector.load %arg3[%c0_3, %c0_4] : memref<1x6xf32, #tpu.memory_space<vmem>>, vector<1x6xf32>
    %4 = vector.broadcast %3 : vector<1x6xf32> to vector<2704x6xf32>
    %5 = arith.addf %2, %4 : vector<2704x6xf32>
    %cst_5 = arith.constant 0.000000e+00 : f32
    %6 = vector.broadcast %cst_5 : f32 to vector<2704x6xf32>
    %7 = arith.maximumf %5, %6 : vector<2704x6xf32>
    %c0_6 = arith.constant 0 : index
    %c0_7 = arith.constant 0 : index
    %8 = vector.load %arg4[%c0_6, %c0_7] : memref<2704x6xf32, #tpu.memory_space<vmem>>, vector<2704x6xf32>
    tpu.vector_store %arg4[%c0_6, %c0_7], %7 {strides = array<i32>} : memref<2704x6xf32, #tpu.memory_space<vmem>>, vector<2704x6xf32>,
    return
  }
  func.func @transform_0(%arg0: i32) -> (i32, i32) {
    %c0_i32 = arith.constant 0 : i32
    %c0_i32_0 = arith.constant 0 : i32
    %c0_i32_1 = arith.constant 0 : i32
    return %c0_i32, %c0_i32_0 : i32, i32
  }
  func.func @transform_1(%arg0: i32) -> (i32, i32) {
    %c0_i32 = arith.constant 0 : i32
    %c0_i32_0 = arith.constant 0 : i32
    %c0_i32_1 = arith.constant 0 : i32
    return %c0_i32, %c0_i32_0 : i32, i32
  }
  func.func @transform_2(%arg0: i32) -> (i32, i32) {
    %c0_i32 = arith.constant 0 : i32
    %c0_i32_0 = arith.constant 0 : i32
    %c0_i32_1 = arith.constant 0 : i32
    return %c0_i32, %c0_i32_0 : i32, i32
  }
  func.func @transform_3(%arg0: i32) -> (i32, i32) {
    %c0_i32 = arith.constant 0 : i32
    %c0_i32_0 = arith.constant 0 : i32
    %c0_i32_1 = arith.constant 0 : i32
    return %c0_i32, %c0_i32_0 : i32, i32
  }
}

module attributes {stable_mosaic.version = 11 : i64} {
  func.func @_gemm_bias_relu_kernel(%arg0: i32, %arg1: memref<484x54xf32, #tpu.memory_space<vmem>>, %arg2: memref<54x16xf32, #tpu.memory_space<vmem>>, %arg3: memref<1x16xf32, #tpu.memory_space<vmem>>, %arg4: memref<484x16xf32, #tpu.memory_space<vmem>>) attributes {dimension_semantics = [#tpu.dimension_semantics<arbitrary>], iteration_bounds = array<i64: 1>, scalar_prefetch = 0 : i64, scratch_operands = 0 : i64, tpu.core_type = #tpu.core_type<tc>, window_params = [{pipeline_mode = #tpu.pipeline_mode<synchronous>, transform_indices = @transform_0, window_bounds = array<i64: 484, 54>}, {pipeline_mode = #tpu.pipeline_mode<synchronous>, transform_indices = @transform_1, window_bounds = array<i64: 54, 16>}, {pipeline_mode = #tpu.pipeline_mode<synchronous>, transform_indices = @transform_2, window_bounds = array<i64: 1, 16>}, {pipeline_mode = #tpu.pipeline_mode<synchronous>, transform_indices = @transform_3, window_bounds = array<i64: 484, 16>}]} {
    %c0 = arith.constant 0 : index
    %c0_0 = arith.constant 0 : index
    %0 = vector.load %arg1[%c0, %c0_0] : memref<484x54xf32, #tpu.memory_space<vmem>>, vector<484x54xf32>
    %c0_1 = arith.constant 0 : index
    %c0_2 = arith.constant 0 : index
    %1 = vector.load %arg2[%c0_1, %c0_2] : memref<54x16xf32, #tpu.memory_space<vmem>>, vector<54x16xf32>
    %cst = arith.constant dense<0.000000e+00> : vector<484x16xf32>
    %2 = tpu.matmul %0, %1, %cst {dimension_numbers = #tpu.dot_dimension_numbers<[1], [0], [0], [1], [0, 0, 1, 1], [], []>} : vector<484x54xf32>, vector<54x16xf32>, vector<484x16xf32> -> vector<484x16xf32>
    %c0_3 = arith.constant 0 : index
    %c0_4 = arith.constant 0 : index
    %3 = vector.load %arg3[%c0_3, %c0_4] : memref<1x16xf32, #tpu.memory_space<vmem>>, vector<1x16xf32>
    %4 = vector.broadcast %3 : vector<1x16xf32> to vector<484x16xf32>
    %5 = arith.addf %2, %4 : vector<484x16xf32>
    %cst_5 = arith.constant 0.000000e+00 : f32
    %6 = vector.broadcast %cst_5 : f32 to vector<484x16xf32>
    %7 = arith.maximumf %5, %6 : vector<484x16xf32>
    %c0_6 = arith.constant 0 : index
    %c0_7 = arith.constant 0 : index
    %8 = vector.load %arg4[%c0_6, %c0_7] : memref<484x16xf32, #tpu.memory_space<vmem>>, vector<484x16xf32>
    tpu.vector_store %arg4[%c0_6, %c0_7], %7 {strides = array<i32>} : memref<484x16xf32, #tpu.memory_space<vmem>>, vector<484x16xf32>,
    return
  }
  func.func @transform_0(%arg0: i32) -> (i32, i32) {
    %c0_i32 = arith.constant 0 : i32
    %c0_i32_0 = arith.constant 0 : i32
    %c0_i32_1 = arith.constant 0 : i32
    return %c0_i32, %c0_i32_0 : i32, i32
  }
  func.func @transform_1(%arg0: i32) -> (i32, i32) {
    %c0_i32 = arith.constant 0 : i32
    %c0_i32_0 = arith.constant 0 : i32
    %c0_i32_1 = arith.constant 0 : i32
    return %c0_i32, %c0_i32_0 : i32, i32
  }
  func.func @transform_2(%arg0: i32) -> (i32, i32) {
    %c0_i32 = arith.constant 0 : i32
    %c0_i32_0 = arith.constant 0 : i32
    %c0_i32_1 = arith.constant 0 : i32
    return %c0_i32, %c0_i32_0 : i32, i32
  }
  func.func @transform_3(%arg0: i32) -> (i32, i32) {
    %c0_i32 = arith.constant 0 : i32
    %c0_i32_0 = arith.constant 0 : i32
    %c0_i32_1 = arith.constant 0 : i32
    return %c0_i32, %c0_i32_0 : i32, i32
  }
}

module attributes {stable_mosaic.version = 11 : i64} {
  func.func @_tail_kernel(%arg0: i32, %arg1: memref<9x2x2x144xf32, #tpu.memory_space<vmem>>, %arg2: memref<144x60xf32, #tpu.memory_space<vmem>>, %arg3: memref<1x60xf32, #tpu.memory_space<vmem>>, %arg4: memref<2x9x60x420xbf16, #tpu.memory_space<vmem>>, %arg5: memref<1x420xf32, #tpu.memory_space<vmem>>, %arg6: memref<420x19xbf16, #tpu.memory_space<vmem>>, %arg7: memref<1x19xf32, #tpu.memory_space<vmem>>, %arg8: memref<2x19xf32, #tpu.memory_space<vmem>>) attributes {dimension_semantics = [#tpu.dimension_semantics<arbitrary>], iteration_bounds = array<i64: 1>, scalar_prefetch = 0 : i64, scratch_operands = 0 : i64, tpu.core_type = #tpu.core_type<tc>, window_params = [{pipeline_mode = #tpu.pipeline_mode<synchronous>, transform_indices = @transform_0, window_bounds = array<i64: 9, 2, 2, 144>}, {pipeline_mode = #tpu.pipeline_mode<synchronous>, transform_indices = @transform_1, window_bounds = array<i64: 144, 60>}, {pipeline_mode = #tpu.pipeline_mode<synchronous>, transform_indices = @transform_2, window_bounds = array<i64: 1, 60>}, {pipeline_mode = #tpu.pipeline_mode<synchronous>, transform_indices = @transform_3, window_bounds = array<i64: 2, 9, 60, 420>}, {pipeline_mode = #tpu.pipeline_mode<synchronous>, transform_indices = @transform_4, window_bounds = array<i64: 1, 420>}, {pipeline_mode = #tpu.pipeline_mode<synchronous>, transform_indices = @transform_5, window_bounds = array<i64: 420, 19>}, {pipeline_mode = #tpu.pipeline_mode<synchronous>, transform_indices = @transform_6, window_bounds = array<i64: 1, 19>}, {pipeline_mode = #tpu.pipeline_mode<synchronous>, transform_indices = @transform_7, window_bounds = array<i64: 2, 19>}]} {
    %cst = arith.constant 0.000000e+00 : f32
    %0 = vector.broadcast %cst : f32 to vector<2x420xf32>
    %c0 = arith.constant 0 : index
    %c0_0 = arith.constant 0 : index
    %c0_1 = arith.constant 0 : index
    %c0_2 = arith.constant 0 : index
    %1 = vector.load %arg1[%c0, %c0_0, %c0_1, %c0_2] : memref<9x2x2x144xf32, #tpu.memory_space<vmem>>, vector<1x1x2x144xf32>
    %2 = vector.shape_cast %1 : vector<1x1x2x144xf32> to vector<2x144xf32>
    %c0_3 = arith.constant 0 : index
    %c0_4 = arith.constant 0 : index
    %3 = vector.load %arg2[%c0_3, %c0_4] : memref<144x60xf32, #tpu.memory_space<vmem>>, vector<144x60xf32>
    %cst_5 = arith.constant dense<0.000000e+00> : vector<2x60xf32>
    %4 = tpu.matmul %2, %3, %cst_5 {dimension_numbers = #tpu.dot_dimension_numbers<[1], [0], [0], [1], [0, 0, 1, 1], [], []>} : vector<2x144xf32>, vector<144x60xf32>, vector<2x60xf32> -> vector<2x60xf32>
    %c0_6 = arith.constant 0 : index
    %c0_7 = arith.constant 0 : index
    %5 = vector.load %arg3[%c0_6, %c0_7] : memref<1x60xf32, #tpu.memory_space<vmem>>, vector<1x60xf32>
    %6 = vector.broadcast %5 : vector<1x60xf32> to vector<2x60xf32>
    %7 = arith.addf %4, %6 : vector<2x60xf32>
    %cst_8 = arith.constant 0.000000e+00 : f32
    %8 = vector.broadcast %cst_8 : f32 to vector<2x60xf32>
    %9 = arith.maximumf %7, %8 : vector<2x60xf32>
    %10 = arith.truncf %9 : vector<2x60xf32> to vector<2x60xbf16>
    %c0_9 = arith.constant 0 : index
    %c0_10 = arith.constant 0 : index
    %c0_11 = arith.constant 0 : index
    %c0_12 = arith.constant 0 : index
    %11 = vector.load %arg4[%c0_9, %c0_10, %c0_11, %c0_12] : memref<2x9x60x420xbf16, #tpu.memory_space<vmem>>, vector<1x1x60x420xbf16>
    %12 = vector.shape_cast %11 : vector<1x1x60x420xbf16> to vector<60x420xbf16>
    %cst_13 = arith.constant dense<0.000000e+00> : vector<2x420xf32>
    %13 = tpu.matmul %10, %12, %cst_13 {dimension_numbers = #tpu.dot_dimension_numbers<[1], [0], [0], [1], [0, 0, 1, 1], [], []>} : vector<2x60xbf16>, vector<60x420xbf16>, vector<2x420xf32> -> vector<2x420xf32>
    %14 = arith.addf %0, %13 : vector<2x420xf32>
    %c1 = arith.constant 1 : index
    %c0_14 = arith.constant 0 : index
    %c0_15 = arith.constant 0 : index
    %c0_16 = arith.constant 0 : index
    %15 = vector.load %arg1[%c1, %c0_14, %c0_15, %c0_16] : memref<9x2x2x144xf32, #tpu.memory_space<vmem>>, vector<1x1x2x144xf32>
    %16 = vector.shape_cast %15 : vector<1x1x2x144xf32> to vector<2x144xf32>
    %c0_17 = arith.constant 0 : index
    %c0_18 = arith.constant 0 : index
    %17 = vector.load %arg2[%c0_17, %c0_18] : memref<144x60xf32, #tpu.memory_space<vmem>>, vector<144x60xf32>
    %cst_19 = arith.constant dense<0.000000e+00> : vector<2x60xf32>
    %18 = tpu.matmul %16, %17, %cst_19 {dimension_numbers = #tpu.dot_dimension_numbers<[1], [0], [0], [1], [0, 0, 1, 1], [], []>} : vector<2x144xf32>, vector<144x60xf32>, vector<2x60xf32> -> vector<2x60xf32>
    %c0_20 = arith.constant 0 : index
    %c0_21 = arith.constant 0 : index
    %19 = vector.load %arg3[%c0_20, %c0_21] : memref<1x60xf32, #tpu.memory_space<vmem>>, vector<1x60xf32>
    %20 = vector.broadcast %19 : vector<1x60xf32> to vector<2x60xf32>
    %21 = arith.addf %18, %20 : vector<2x60xf32>
    %cst_22 = arith.constant 0.000000e+00 : f32
    %22 = vector.broadcast %cst_22 : f32 to vector<2x60xf32>
    %23 = arith.maximumf %21, %22 : vector<2x60xf32>
    %24 = arith.truncf %23 : vector<2x60xf32> to vector<2x60xbf16>
    %c0_23 = arith.constant 0 : index
    %c1_24 = arith.constant 1 : index
    %c0_25 = arith.constant 0 : index
    %c0_26 = arith.constant 0 : index
    %25 = vector.load %arg4[%c0_23, %c1_24, %c0_25, %c0_26] : memref<2x9x60x420xbf16, #tpu.memory_space<vmem>>, vector<1x1x60x420xbf16>
    %26 = vector.shape_cast %25 : vector<1x1x60x420xbf16> to vector<60x420xbf16>
    %cst_27 = arith.constant dense<0.000000e+00> : vector<2x420xf32>
    %27 = tpu.matmul %24, %26, %cst_27 {dimension_numbers = #tpu.dot_dimension_numbers<[1], [0], [0], [1], [0, 0, 1, 1], [], []>} : vector<2x60xbf16>, vector<60x420xbf16>, vector<2x420xf32> -> vector<2x420xf32>
    %28 = arith.addf %14, %27 : vector<2x420xf32>
    %c2 = arith.constant 2 : index
    %c0_28 = arith.constant 0 : index
    %c0_29 = arith.constant 0 : index
    %c0_30 = arith.constant 0 : index
    %29 = vector.load %arg1[%c2, %c0_28, %c0_29, %c0_30] : memref<9x2x2x144xf32, #tpu.memory_space<vmem>>, vector<1x1x2x144xf32>
    %30 = vector.shape_cast %29 : vector<1x1x2x144xf32> to vector<2x144xf32>
    %c0_31 = arith.constant 0 : index
    %c0_32 = arith.constant 0 : index
    %31 = vector.load %arg2[%c0_31, %c0_32] : memref<144x60xf32, #tpu.memory_space<vmem>>, vector<144x60xf32>
    %cst_33 = arith.constant dense<0.000000e+00> : vector<2x60xf32>
    %32 = tpu.matmul %30, %31, %cst_33 {dimension_numbers = #tpu.dot_dimension_numbers<[1], [0], [0], [1], [0, 0, 1, 1], [], []>} : vector<2x144xf32>, vector<144x60xf32>, vector<2x60xf32> -> vector<2x60xf32>
    %c0_34 = arith.constant 0 : index
    %c0_35 = arith.constant 0 : index
    %33 = vector.load %arg3[%c0_34, %c0_35] : memref<1x60xf32, #tpu.memory_space<vmem>>, vector<1x60xf32>
    %34 = vector.broadcast %33 : vector<1x60xf32> to vector<2x60xf32>
    %35 = arith.addf %32, %34 : vector<2x60xf32>
    %cst_36 = arith.constant 0.000000e+00 : f32
    %36 = vector.broadcast %cst_36 : f32 to vector<2x60xf32>
    %37 = arith.maximumf %35, %36 : vector<2x60xf32>
    %38 = arith.truncf %37 : vector<2x60xf32> to vector<2x60xbf16>
    %c0_37 = arith.constant 0 : index
    %c2_38 = arith.constant 2 : index
    %c0_39 = arith.constant 0 : index
    %c0_40 = arith.constant 0 : index
    %39 = vector.load %arg4[%c0_37, %c2_38, %c0_39, %c0_40] : memref<2x9x60x420xbf16, #tpu.memory_space<vmem>>, vector<1x1x60x420xbf16>
    %40 = vector.shape_cast %39 : vector<1x1x60x420xbf16> to vector<60x420xbf16>
    %cst_41 = arith.constant dense<0.000000e+00> : vector<2x420xf32>
    %41 = tpu.matmul %38, %40, %cst_41 {dimension_numbers = #tpu.dot_dimension_numbers<[1], [0], [0], [1], [0, 0, 1, 1], [], []>} : vector<2x60xbf16>, vector<60x420xbf16>, vector<2x420xf32> -> vector<2x420xf32>
    %42 = arith.addf %28, %41 : vector<2x420xf32>
    %c3 = arith.constant 3 : index
    %c0_42 = arith.constant 0 : index
    %c0_43 = arith.constant 0 : index
    %c0_44 = arith.constant 0 : index
    %43 = vector.load %arg1[%c3, %c0_42, %c0_43, %c0_44] : memref<9x2x2x144xf32, #tpu.memory_space<vmem>>, vector<1x1x2x144xf32>
    %44 = vector.shape_cast %43 : vector<1x1x2x144xf32> to vector<2x144xf32>
    %c0_45 = arith.constant 0 : index
    %c0_46 = arith.constant 0 : index
    %45 = vector.load %arg2[%c0_45, %c0_46] : memref<144x60xf32, #tpu.memory_space<vmem>>, vector<144x60xf32>
    %cst_47 = arith.constant dense<0.000000e+00> : vector<2x60xf32>
    %46 = tpu.matmul %44, %45, %cst_47 {dimension_numbers = #tpu.dot_dimension_numbers<[1], [0], [0], [1], [0, 0, 1, 1], [], []>} : vector<2x144xf32>, vector<144x60xf32>, vector<2x60xf32> -> vector<2x60xf32>
    %c0_48 = arith.constant 0 : index
    %c0_49 = arith.constant 0 : index
    %47 = vector.load %arg3[%c0_48, %c0_49] : memref<1x60xf32, #tpu.memory_space<vmem>>, vector<1x60xf32>
    %48 = vector.broadcast %47 : vector<1x60xf32> to vector<2x60xf32>
    %49 = arith.addf %46, %48 : vector<2x60xf32>
    %cst_50 = arith.constant 0.000000e+00 : f32
    %50 = vector.broadcast %cst_50 : f32 to vector<2x60xf32>
    %51 = arith.maximumf %49, %50 : vector<2x60xf32>
    %52 = arith.truncf %51 : vector<2x60xf32> to vector<2x60xbf16>
    %c0_51 = arith.constant 0 : index
    %c3_52 = arith.constant 3 : index
    %c0_53 = arith.constant 0 : index
    %c0_54 = arith.constant 0 : index
    %53 = vector.load %arg4[%c0_51, %c3_52, %c0_53, %c0_54] : memref<2x9x60x420xbf16, #tpu.memory_space<vmem>>, vector<1x1x60x420xbf16>
    %54 = vector.shape_cast %53 : vector<1x1x60x420xbf16> to vector<60x420xbf16>
    %cst_55 = arith.constant dense<0.000000e+00> : vector<2x420xf32>
    %55 = tpu.matmul %52, %54, %cst_55 {dimension_numbers = #tpu.dot_dimension_numbers<[1], [0], [0], [1], [0, 0, 1, 1], [], []>} : vector<2x60xbf16>, vector<60x420xbf16>, vector<2x420xf32> -> vector<2x420xf32>
    %56 = arith.addf %42, %55 : vector<2x420xf32>
    %c4 = arith.constant 4 : index
    %c0_56 = arith.constant 0 : index
    %c0_57 = arith.constant 0 : index
    %c0_58 = arith.constant 0 : index
    %57 = vector.load %arg1[%c4, %c0_56, %c0_57, %c0_58] : memref<9x2x2x144xf32, #tpu.memory_space<vmem>>, vector<1x1x2x144xf32>
    %58 = vector.shape_cast %57 : vector<1x1x2x144xf32> to vector<2x144xf32>
    %c0_59 = arith.constant 0 : index
    %c0_60 = arith.constant 0 : index
    %59 = vector.load %arg2[%c0_59, %c0_60] : memref<144x60xf32, #tpu.memory_space<vmem>>, vector<144x60xf32>
    %cst_61 = arith.constant dense<0.000000e+00> : vector<2x60xf32>
    %60 = tpu.matmul %58, %59, %cst_61 {dimension_numbers = #tpu.dot_dimension_numbers<[1], [0], [0], [1], [0, 0, 1, 1], [], []>} : vector<2x144xf32>, vector<144x60xf32>, vector<2x60xf32> -> vector<2x60xf32>
    %c0_62 = arith.constant 0 : index
    %c0_63 = arith.constant 0 : index
    %61 = vector.load %arg3[%c0_62, %c0_63] : memref<1x60xf32, #tpu.memory_space<vmem>>, vector<1x60xf32>
    %62 = vector.broadcast %61 : vector<1x60xf32> to vector<2x60xf32>
    %63 = arith.addf %60, %62 : vector<2x60xf32>
    %cst_64 = arith.constant 0.000000e+00 : f32
    %64 = vector.broadcast %cst_64 : f32 to vector<2x60xf32>
    %65 = arith.maximumf %63, %64 : vector<2x60xf32>
    %66 = arith.truncf %65 : vector<2x60xf32> to vector<2x60xbf16>
    %c0_65 = arith.constant 0 : index
    %c4_66 = arith.constant 4 : index
    %c0_67 = arith.constant 0 : index
    %c0_68 = arith.constant 0 : index
    %67 = vector.load %arg4[%c0_65, %c4_66, %c0_67, %c0_68] : memref<2x9x60x420xbf16, #tpu.memory_space<vmem>>, vector<1x1x60x420xbf16>
    %68 = vector.shape_cast %67 : vector<1x1x60x420xbf16> to vector<60x420xbf16>
    %cst_69 = arith.constant dense<0.000000e+00> : vector<2x420xf32>
    %69 = tpu.matmul %66, %68, %cst_69 {dimension_numbers = #tpu.dot_dimension_numbers<[1], [0], [0], [1], [0, 0, 1, 1], [], []>} : vector<2x60xbf16>, vector<60x420xbf16>, vector<2x420xf32> -> vector<2x420xf32>
    %70 = arith.addf %56, %69 : vector<2x420xf32>
    %c5 = arith.constant 5 : index
    %c0_70 = arith.constant 0 : index
    %c0_71 = arith.constant 0 : index
    %c0_72 = arith.constant 0 : index
    %71 = vector.load %arg1[%c5, %c0_70, %c0_71, %c0_72] : memref<9x2x2x144xf32, #tpu.memory_space<vmem>>, vector<1x1x2x144xf32>
    %72 = vector.shape_cast %71 : vector<1x1x2x144xf32> to vector<2x144xf32>
    %c0_73 = arith.constant 0 : index
    %c0_74 = arith.constant 0 : index
    %73 = vector.load %arg2[%c0_73, %c0_74] : memref<144x60xf32, #tpu.memory_space<vmem>>, vector<144x60xf32>
    %cst_75 = arith.constant dense<0.000000e+00> : vector<2x60xf32>
    %74 = tpu.matmul %72, %73, %cst_75 {dimension_numbers = #tpu.dot_dimension_numbers<[1], [0], [0], [1], [0, 0, 1, 1], [], []>} : vector<2x144xf32>, vector<144x60xf32>, vector<2x60xf32> -> vector<2x60xf32>
    %c0_76 = arith.constant 0 : index
    %c0_77 = arith.constant 0 : index
    %75 = vector.load %arg3[%c0_76, %c0_77] : memref<1x60xf32, #tpu.memory_space<vmem>>, vector<1x60xf32>
    %76 = vector.broadcast %75 : vector<1x60xf32> to vector<2x60xf32>
    %77 = arith.addf %74, %76 : vector<2x60xf32>
    %cst_78 = arith.constant 0.000000e+00 : f32
    %78 = vector.broadcast %cst_78 : f32 to vector<2x60xf32>
    %79 = arith.maximumf %77, %78 : vector<2x60xf32>
    %80 = arith.truncf %79 : vector<2x60xf32> to vector<2x60xbf16>
    %c0_79 = arith.constant 0 : index
    %c5_80 = arith.constant 5 : index
    %c0_81 = arith.constant 0 : index
    %c0_82 = arith.constant 0 : index
    %81 = vector.load %arg4[%c0_79, %c5_80, %c0_81, %c0_82] : memref<2x9x60x420xbf16, #tpu.memory_space<vmem>>, vector<1x1x60x420xbf16>
    %82 = vector.shape_cast %81 : vector<1x1x60x420xbf16> to vector<60x420xbf16>
    %cst_83 = arith.constant dense<0.000000e+00> : vector<2x420xf32>
    %83 = tpu.matmul %80, %82, %cst_83 {dimension_numbers = #tpu.dot_dimension_numbers<[1], [0], [0], [1], [0, 0, 1, 1], [], []>} : vector<2x60xbf16>, vector<60x420xbf16>, vector<2x420xf32> -> vector<2x420xf32>
    %84 = arith.addf %70, %83 : vector<2x420xf32>
    %c6 = arith.constant 6 : index
    %c0_84 = arith.constant 0 : index
    %c0_85 = arith.constant 0 : index
    %c0_86 = arith.constant 0 : index
    %85 = vector.load %arg1[%c6, %c0_84, %c0_85, %c0_86] : memref<9x2x2x144xf32, #tpu.memory_space<vmem>>, vector<1x1x2x144xf32>
    %86 = vector.shape_cast %85 : vector<1x1x2x144xf32> to vector<2x144xf32>
    %c0_87 = arith.constant 0 : index
    %c0_88 = arith.constant 0 : index
    %87 = vector.load %arg2[%c0_87, %c0_88] : memref<144x60xf32, #tpu.memory_space<vmem>>, vector<144x60xf32>
    %cst_89 = arith.constant dense<0.000000e+00> : vector<2x60xf32>
    %88 = tpu.matmul %86, %87, %cst_89 {dimension_numbers = #tpu.dot_dimension_numbers<[1], [0], [0], [1], [0, 0, 1, 1], [], []>} : vector<2x144xf32>, vector<144x60xf32>, vector<2x60xf32> -> vector<2x60xf32>
    %c0_90 = arith.constant 0 : index
    %c0_91 = arith.constant 0 : index
    %89 = vector.load %arg3[%c0_90, %c0_91] : memref<1x60xf32, #tpu.memory_space<vmem>>, vector<1x60xf32>
    %90 = vector.broadcast %89 : vector<1x60xf32> to vector<2x60xf32>
    %91 = arith.addf %88, %90 : vector<2x60xf32>
    %cst_92 = arith.constant 0.000000e+00 : f32
    %92 = vector.broadcast %cst_92 : f32 to vector<2x60xf32>
    %93 = arith.maximumf %91, %92 : vector<2x60xf32>
    %94 = arith.truncf %93 : vector<2x60xf32> to vector<2x60xbf16>
    %c0_93 = arith.constant 0 : index
    %c6_94 = arith.constant 6 : index
    %c0_95 = arith.constant 0 : index
    %c0_96 = arith.constant 0 : index
    %95 = vector.load %arg4[%c0_93, %c6_94, %c0_95, %c0_96] : memref<2x9x60x420xbf16, #tpu.memory_space<vmem>>, vector<1x1x60x420xbf16>
    %96 = vector.shape_cast %95 : vector<1x1x60x420xbf16> to vector<60x420xbf16>
    %cst_97 = arith.constant dense<0.000000e+00> : vector<2x420xf32>
    %97 = tpu.matmul %94, %96, %cst_97 {dimension_numbers = #tpu.dot_dimension_numbers<[1], [0], [0], [1], [0, 0, 1, 1], [], []>} : vector<2x60xbf16>, vector<60x420xbf16>, vector<2x420xf32> -> vector<2x420xf32>
    %98 = arith.addf %84, %97 : vector<2x420xf32>
    %c7 = arith.constant 7 : index
    %c0_98 = arith.constant 0 : index
    %c0_99 = arith.constant 0 : index
    %c0_100 = arith.constant 0 : index
    %99 = vector.load %arg1[%c7, %c0_98, %c0_99, %c0_100] : memref<9x2x2x144xf32, #tpu.memory_space<vmem>>, vector<1x1x2x144xf32>
    %100 = vector.shape_cast %99 : vector<1x1x2x144xf32> to vector<2x144xf32>
    %c0_101 = arith.constant 0 : index
    %c0_102 = arith.constant 0 : index
    %101 = vector.load %arg2[%c0_101, %c0_102] : memref<144x60xf32, #tpu.memory_space<vmem>>, vector<144x60xf32>
    %cst_103 = arith.constant dense<0.000000e+00> : vector<2x60xf32>
    %102 = tpu.matmul %100, %101, %cst_103 {dimension_numbers = #tpu.dot_dimension_numbers<[1], [0], [0], [1], [0, 0, 1, 1], [], []>} : vector<2x144xf32>, vector<144x60xf32>, vector<2x60xf32> -> vector<2x60xf32>
    %c0_104 = arith.constant 0 : index
    %c0_105 = arith.constant 0 : index
    %103 = vector.load %arg3[%c0_104, %c0_105] : memref<1x60xf32, #tpu.memory_space<vmem>>, vector<1x60xf32>
    %104 = vector.broadcast %103 : vector<1x60xf32> to vector<2x60xf32>
    %105 = arith.addf %102, %104 : vector<2x60xf32>
    %cst_106 = arith.constant 0.000000e+00 : f32
    %106 = vector.broadcast %cst_106 : f32 to vector<2x60xf32>
    %107 = arith.maximumf %105, %106 : vector<2x60xf32>
    %108 = arith.truncf %107 : vector<2x60xf32> to vector<2x60xbf16>
    %c0_107 = arith.constant 0 : index
    %c7_108 = arith.constant 7 : index
    %c0_109 = arith.constant 0 : index
    %c0_110 = arith.constant 0 : index
    %109 = vector.load %arg4[%c0_107, %c7_108, %c0_109, %c0_110] : memref<2x9x60x420xbf16, #tpu.memory_space<vmem>>, vector<1x1x60x420xbf16>
    %110 = vector.shape_cast %109 : vector<1x1x60x420xbf16> to vector<60x420xbf16>
    %cst_111 = arith.constant dense<0.000000e+00> : vector<2x420xf32>
    %111 = tpu.matmul %108, %110, %cst_111 {dimension_numbers = #tpu.dot_dimension_numbers<[1], [0], [0], [1], [0, 0, 1, 1], [], []>} : vector<2x60xbf16>, vector<60x420xbf16>, vector<2x420xf32> -> vector<2x420xf32>
    %112 = arith.addf %98, %111 : vector<2x420xf32>
    %c8 = arith.constant 8 : index
    %c0_112 = arith.constant 0 : index
    %c0_113 = arith.constant 0 : index
    %c0_114 = arith.constant 0 : index
    %113 = vector.load %arg1[%c8, %c0_112, %c0_113, %c0_114] : memref<9x2x2x144xf32, #tpu.memory_space<vmem>>, vector<1x1x2x144xf32>
    %114 = vector.shape_cast %113 : vector<1x1x2x144xf32> to vector<2x144xf32>
    %c0_115 = arith.constant 0 : index
    %c0_116 = arith.constant 0 : index
    %115 = vector.load %arg2[%c0_115, %c0_116] : memref<144x60xf32, #tpu.memory_space<vmem>>, vector<144x60xf32>
    %cst_117 = arith.constant dense<0.000000e+00> : vector<2x60xf32>
    %116 = tpu.matmul %114, %115, %cst_117 {dimension_numbers = #tpu.dot_dimension_numbers<[1], [0], [0], [1], [0, 0, 1, 1], [], []>} : vector<2x144xf32>, vector<144x60xf32>, vector<2x60xf32> -> vector<2x60xf32>
    %c0_118 = arith.constant 0 : index
    %c0_119 = arith.constant 0 : index
    %117 = vector.load %arg3[%c0_118, %c0_119] : memref<1x60xf32, #tpu.memory_space<vmem>>, vector<1x60xf32>
    %118 = vector.broadcast %117 : vector<1x60xf32> to vector<2x60xf32>
    %119 = arith.addf %116, %118 : vector<2x60xf32>
    %cst_120 = arith.constant 0.000000e+00 : f32
    %120 = vector.broadcast %cst_120 : f32 to vector<2x60xf32>
    %121 = arith.maximumf %119, %120 : vector<2x60xf32>
    %122 = arith.truncf %121 : vector<2x60xf32> to vector<2x60xbf16>
    %c0_121 = arith.constant 0 : index
    %c8_122 = arith.constant 8 : index
    %c0_123 = arith.constant 0 : index
    %c0_124 = arith.constant 0 : index
    %123 = vector.load %arg4[%c0_121, %c8_122, %c0_123, %c0_124] : memref<2x9x60x420xbf16, #tpu.memory_space<vmem>>, vector<1x1x60x420xbf16>
    %124 = vector.shape_cast %123 : vector<1x1x60x420xbf16> to vector<60x420xbf16>
    %cst_125 = arith.constant dense<0.000000e+00> : vector<2x420xf32>
    %125 = tpu.matmul %122, %124, %cst_125 {dimension_numbers = #tpu.dot_dimension_numbers<[1], [0], [0], [1], [0, 0, 1, 1], [], []>} : vector<2x60xbf16>, vector<60x420xbf16>, vector<2x420xf32> -> vector<2x420xf32>
    %126 = arith.addf %112, %125 : vector<2x420xf32>
    %c0_126 = arith.constant 0 : index
    %c1_127 = arith.constant 1 : index
    %c0_128 = arith.constant 0 : index
    %c0_129 = arith.constant 0 : index
    %127 = vector.load %arg1[%c0_126, %c1_127, %c0_128, %c0_129] : memref<9x2x2x144xf32, #tpu.memory_space<vmem>>, vector<1x1x2x144xf32>
    %128 = vector.shape_cast %127 : vector<1x1x2x144xf32> to vector<2x144xf32>
    %c0_130 = arith.constant 0 : index
    %c0_131 = arith.constant 0 : index
    %129 = vector.load %arg2[%c0_130, %c0_131] : memref<144x60xf32, #tpu.memory_space<vmem>>, vector<144x60xf32>
    %cst_132 = arith.constant dense<0.000000e+00> : vector<2x60xf32>
    %130 = tpu.matmul %128, %129, %cst_132 {dimension_numbers = #tpu.dot_dimension_numbers<[1], [0], [0], [1], [0, 0, 1, 1], [], []>} : vector<2x144xf32>, vector<144x60xf32>, vector<2x60xf32> -> vector<2x60xf32>
    %c0_133 = arith.constant 0 : index
    %c0_134 = arith.constant 0 : index
    %131 = vector.load %arg3[%c0_133, %c0_134] : memref<1x60xf32, #tpu.memory_space<vmem>>, vector<1x60xf32>
    %132 = vector.broadcast %131 : vector<1x60xf32> to vector<2x60xf32>
    %133 = arith.addf %130, %132 : vector<2x60xf32>
    %cst_135 = arith.constant 0.000000e+00 : f32
    %134 = vector.broadcast %cst_135 : f32 to vector<2x60xf32>
    %135 = arith.maximumf %133, %134 : vector<2x60xf32>
    %136 = arith.truncf %135 : vector<2x60xf32> to vector<2x60xbf16>
    %c1_136 = arith.constant 1 : index
    %c0_137 = arith.constant 0 : index
    %c0_138 = arith.constant 0 : index
    %c0_139 = arith.constant 0 : index
    %137 = vector.load %arg4[%c1_136, %c0_137, %c0_138, %c0_139] : memref<2x9x60x420xbf16, #tpu.memory_space<vmem>>, vector<1x1x60x420xbf16>
    %138 = vector.shape_cast %137 : vector<1x1x60x420xbf16> to vector<60x420xbf16>
    %cst_140 = arith.constant dense<0.000000e+00> : vector<2x420xf32>
    %139 = tpu.matmul %136, %138, %cst_140 {dimension_numbers = #tpu.dot_dimension_numbers<[1], [0], [0], [1], [0, 0, 1, 1], [], []>} : vector<2x60xbf16>, vector<60x420xbf16>, vector<2x420xf32> -> vector<2x420xf32>
    %140 = arith.addf %126, %139 : vector<2x420xf32>
    %c1_141 = arith.constant 1 : index
    %c1_142 = arith.constant 1 : index
    %c0_143 = arith.constant 0 : index
    %c0_144 = arith.constant 0 : index
    %141 = vector.load %arg1[%c1_141, %c1_142, %c0_143, %c0_144] : memref<9x2x2x144xf32, #tpu.memory_space<vmem>>, vector<1x1x2x144xf32>
    %142 = vector.shape_cast %141 : vector<1x1x2x144xf32> to vector<2x144xf32>
    %c0_145 = arith.constant 0 : index
    %c0_146 = arith.constant 0 : index
    %143 = vector.load %arg2[%c0_145, %c0_146] : memref<144x60xf32, #tpu.memory_space<vmem>>, vector<144x60xf32>
    %cst_147 = arith.constant dense<0.000000e+00> : vector<2x60xf32>
    %144 = tpu.matmul %142, %143, %cst_147 {dimension_numbers = #tpu.dot_dimension_numbers<[1], [0], [0], [1], [0, 0, 1, 1], [], []>} : vector<2x144xf32>, vector<144x60xf32>, vector<2x60xf32> -> vector<2x60xf32>
    %c0_148 = arith.constant 0 : index
    %c0_149 = arith.constant 0 : index
    %145 = vector.load %arg3[%c0_148, %c0_149] : memref<1x60xf32, #tpu.memory_space<vmem>>, vector<1x60xf32>
    %146 = vector.broadcast %145 : vector<1x60xf32> to vector<2x60xf32>
    %147 = arith.addf %144, %146 : vector<2x60xf32>
    %cst_150 = arith.constant 0.000000e+00 : f32
    %148 = vector.broadcast %cst_150 : f32 to vector<2x60xf32>
    %149 = arith.maximumf %147, %148 : vector<2x60xf32>
    %150 = arith.truncf %149 : vector<2x60xf32> to vector<2x60xbf16>
    %c1_151 = arith.constant 1 : index
    %c1_152 = arith.constant 1 : index
    %c0_153 = arith.constant 0 : index
    %c0_154 = arith.constant 0 : index
    %151 = vector.load %arg4[%c1_151, %c1_152, %c0_153, %c0_154] : memref<2x9x60x420xbf16, #tpu.memory_space<vmem>>, vector<1x1x60x420xbf16>
    %152 = vector.shape_cast %151 : vector<1x1x60x420xbf16> to vector<60x420xbf16>
    %cst_155 = arith.constant dense<0.000000e+00> : vector<2x420xf32>
    %153 = tpu.matmul %150, %152, %cst_155 {dimension_numbers = #tpu.dot_dimension_numbers<[1], [0], [0], [1], [0, 0, 1, 1], [], []>} : vector<2x60xbf16>, vector<60x420xbf16>, vector<2x420xf32> -> vector<2x420xf32>
    %154 = arith.addf %140, %153 : vector<2x420xf32>
    %c2_156 = arith.constant 2 : index
    %c1_157 = arith.constant 1 : index
    %c0_158 = arith.constant 0 : index
    %c0_159 = arith.constant 0 : index
    %155 = vector.load %arg1[%c2_156, %c1_157, %c0_158, %c0_159] : memref<9x2x2x144xf32, #tpu.memory_space<vmem>>, vector<1x1x2x144xf32>
    %156 = vector.shape_cast %155 : vector<1x1x2x144xf32> to vector<2x144xf32>
    %c0_160 = arith.constant 0 : index
    %c0_161 = arith.constant 0 : index
    %157 = vector.load %arg2[%c0_160, %c0_161] : memref<144x60xf32, #tpu.memory_space<vmem>>, vector<144x60xf32>
    %cst_162 = arith.constant dense<0.000000e+00> : vector<2x60xf32>
    %158 = tpu.matmul %156, %157, %cst_162 {dimension_numbers = #tpu.dot_dimension_numbers<[1], [0], [0], [1], [0, 0, 1, 1], [], []>} : vector<2x144xf32>, vector<144x60xf32>, vector<2x60xf32> -> vector<2x60xf32>
    %c0_163 = arith.constant 0 : index
    %c0_164 = arith.constant 0 : index
    %159 = vector.load %arg3[%c0_163, %c0_164] : memref<1x60xf32, #tpu.memory_space<vmem>>, vector<1x60xf32>
    %160 = vector.broadcast %159 : vector<1x60xf32> to vector<2x60xf32>
    %161 = arith.addf %158, %160 : vector<2x60xf32>
    %cst_165 = arith.constant 0.000000e+00 : f32
    %162 = vector.broadcast %cst_165 : f32 to vector<2x60xf32>
    %163 = arith.maximumf %161, %162 : vector<2x60xf32>
    %164 = arith.truncf %163 : vector<2x60xf32> to vector<2x60xbf16>
    %c1_166 = arith.constant 1 : index
    %c2_167 = arith.constant 2 : index
    %c0_168 = arith.constant 0 : index
    %c0_169 = arith.constant 0 : index
    %165 = vector.load %arg4[%c1_166, %c2_167, %c0_168, %c0_169] : memref<2x9x60x420xbf16, #tpu.memory_space<vmem>>, vector<1x1x60x420xbf16>
    %166 = vector.shape_cast %165 : vector<1x1x60x420xbf16> to vector<60x420xbf16>
    %cst_170 = arith.constant dense<0.000000e+00> : vector<2x420xf32>
    %167 = tpu.matmul %164, %166, %cst_170 {dimension_numbers = #tpu.dot_dimension_numbers<[1], [0], [0], [1], [0, 0, 1, 1], [], []>} : vector<2x60xbf16>, vector<60x420xbf16>, vector<2x420xf32> -> vector<2x420xf32>
    %168 = arith.addf %154, %167 : vector<2x420xf32>
    %c3_171 = arith.constant 3 : index
    %c1_172 = arith.constant 1 : index
    %c0_173 = arith.constant 0 : index
    %c0_174 = arith.constant 0 : index
    %169 = vector.load %arg1[%c3_171, %c1_172, %c0_173, %c0_174] : memref<9x2x2x144xf32, #tpu.memory_space<vmem>>, vector<1x1x2x144xf32>
    %170 = vector.shape_cast %169 : vector<1x1x2x144xf32> to vector<2x144xf32>
    %c0_175 = arith.constant 0 : index
    %c0_176 = arith.constant 0 : index
    %171 = vector.load %arg2[%c0_175, %c0_176] : memref<144x60xf32, #tpu.memory_space<vmem>>, vector<144x60xf32>
    %cst_177 = arith.constant dense<0.000000e+00> : vector<2x60xf32>
    %172 = tpu.matmul %170, %171, %cst_177 {dimension_numbers = #tpu.dot_dimension_numbers<[1], [0], [0], [1], [0, 0, 1, 1], [], []>} : vector<2x144xf32>, vector<144x60xf32>, vector<2x60xf32> -> vector<2x60xf32>
    %c0_178 = arith.constant 0 : index
    %c0_179 = arith.constant 0 : index
    %173 = vector.load %arg3[%c0_178, %c0_179] : memref<1x60xf32, #tpu.memory_space<vmem>>, vector<1x60xf32>
    %174 = vector.broadcast %173 : vector<1x60xf32> to vector<2x60xf32>
    %175 = arith.addf %172, %174 : vector<2x60xf32>
    %cst_180 = arith.constant 0.000000e+00 : f32
    %176 = vector.broadcast %cst_180 : f32 to vector<2x60xf32>
    %177 = arith.maximumf %175, %176 : vector<2x60xf32>
    %178 = arith.truncf %177 : vector<2x60xf32> to vector<2x60xbf16>
    %c1_181 = arith.constant 1 : index
    %c3_182 = arith.constant 3 : index
    %c0_183 = arith.constant 0 : index
    %c0_184 = arith.constant 0 : index
    %179 = vector.load %arg4[%c1_181, %c3_182, %c0_183, %c0_184] : memref<2x9x60x420xbf16, #tpu.memory_space<vmem>>, vector<1x1x60x420xbf16>
    %180 = vector.shape_cast %179 : vector<1x1x60x420xbf16> to vector<60x420xbf16>
    %cst_185 = arith.constant dense<0.000000e+00> : vector<2x420xf32>
    %181 = tpu.matmul %178, %180, %cst_185 {dimension_numbers = #tpu.dot_dimension_numbers<[1], [0], [0], [1], [0, 0, 1, 1], [], []>} : vector<2x60xbf16>, vector<60x420xbf16>, vector<2x420xf32> -> vector<2x420xf32>
    %182 = arith.addf %168, %181 : vector<2x420xf32>
    %c4_186 = arith.constant 4 : index
    %c1_187 = arith.constant 1 : index
    %c0_188 = arith.constant 0 : index
    %c0_189 = arith.constant 0 : index
    %183 = vector.load %arg1[%c4_186, %c1_187, %c0_188, %c0_189] : memref<9x2x2x144xf32, #tpu.memory_space<vmem>>, vector<1x1x2x144xf32>
    %184 = vector.shape_cast %183 : vector<1x1x2x144xf32> to vector<2x144xf32>
    %c0_190 = arith.constant 0 : index
    %c0_191 = arith.constant 0 : index
    %185 = vector.load %arg2[%c0_190, %c0_191] : memref<144x60xf32, #tpu.memory_space<vmem>>, vector<144x60xf32>
    %cst_192 = arith.constant dense<0.000000e+00> : vector<2x60xf32>
    %186 = tpu.matmul %184, %185, %cst_192 {dimension_numbers = #tpu.dot_dimension_numbers<[1], [0], [0], [1], [0, 0, 1, 1], [], []>} : vector<2x144xf32>, vector<144x60xf32>, vector<2x60xf32> -> vector<2x60xf32>
    %c0_193 = arith.constant 0 : index
    %c0_194 = arith.constant 0 : index
    %187 = vector.load %arg3[%c0_193, %c0_194] : memref<1x60xf32, #tpu.memory_space<vmem>>, vector<1x60xf32>
    %188 = vector.broadcast %187 : vector<1x60xf32> to vector<2x60xf32>
    %189 = arith.addf %186, %188 : vector<2x60xf32>
    %cst_195 = arith.constant 0.000000e+00 : f32
    %190 = vector.broadcast %cst_195 : f32 to vector<2x60xf32>
    %191 = arith.maximumf %189, %190 : vector<2x60xf32>
    %192 = arith.truncf %191 : vector<2x60xf32> to vector<2x60xbf16>
    %c1_196 = arith.constant 1 : index
    %c4_197 = arith.constant 4 : index
    %c0_198 = arith.constant 0 : index
    %c0_199 = arith.constant 0 : index
    %193 = vector.load %arg4[%c1_196, %c4_197, %c0_198, %c0_199] : memref<2x9x60x420xbf16, #tpu.memory_space<vmem>>, vector<1x1x60x420xbf16>
    %194 = vector.shape_cast %193 : vector<1x1x60x420xbf16> to vector<60x420xbf16>
    %cst_200 = arith.constant dense<0.000000e+00> : vector<2x420xf32>
    %195 = tpu.matmul %192, %194, %cst_200 {dimension_numbers = #tpu.dot_dimension_numbers<[1], [0], [0], [1], [0, 0, 1, 1], [], []>} : vector<2x60xbf16>, vector<60x420xbf16>, vector<2x420xf32> -> vector<2x420xf32>
    %196 = arith.addf %182, %195 : vector<2x420xf32>
    %c5_201 = arith.constant 5 : index
    %c1_202 = arith.constant 1 : index
    %c0_203 = arith.constant 0 : index
    %c0_204 = arith.constant 0 : index
    %197 = vector.load %arg1[%c5_201, %c1_202, %c0_203, %c0_204] : memref<9x2x2x144xf32, #tpu.memory_space<vmem>>, vector<1x1x2x144xf32>
    %198 = vector.shape_cast %197 : vector<1x1x2x144xf32> to vector<2x144xf32>
    %c0_205 = arith.constant 0 : index
    %c0_206 = arith.constant 0 : index
    %199 = vector.load %arg2[%c0_205, %c0_206] : memref<144x60xf32, #tpu.memory_space<vmem>>, vector<144x60xf32>
    %cst_207 = arith.constant dense<0.000000e+00> : vector<2x60xf32>
    %200 = tpu.matmul %198, %199, %cst_207 {dimension_numbers = #tpu.dot_dimension_numbers<[1], [0], [0], [1], [0, 0, 1, 1], [], []>} : vector<2x144xf32>, vector<144x60xf32>, vector<2x60xf32> -> vector<2x60xf32>
    %c0_208 = arith.constant 0 : index
    %c0_209 = arith.constant 0 : index
    %201 = vector.load %arg3[%c0_208, %c0_209] : memref<1x60xf32, #tpu.memory_space<vmem>>, vector<1x60xf32>
    %202 = vector.broadcast %201 : vector<1x60xf32> to vector<2x60xf32>
    %203 = arith.addf %200, %202 : vector<2x60xf32>
    %cst_210 = arith.constant 0.000000e+00 : f32
    %204 = vector.broadcast %cst_210 : f32 to vector<2x60xf32>
    %205 = arith.maximumf %203, %204 : vector<2x60xf32>
    %206 = arith.truncf %205 : vector<2x60xf32> to vector<2x60xbf16>
    %c1_211 = arith.constant 1 : index
    %c5_212 = arith.constant 5 : index
    %c0_213 = arith.constant 0 : index
    %c0_214 = arith.constant 0 : index
    %207 = vector.load %arg4[%c1_211, %c5_212, %c0_213, %c0_214] : memref<2x9x60x420xbf16, #tpu.memory_space<vmem>>, vector<1x1x60x420xbf16>
    %208 = vector.shape_cast %207 : vector<1x1x60x420xbf16> to vector<60x420xbf16>
    %cst_215 = arith.constant dense<0.000000e+00> : vector<2x420xf32>
    %209 = tpu.matmul %206, %208, %cst_215 {dimension_numbers = #tpu.dot_dimension_numbers<[1], [0], [0], [1], [0, 0, 1, 1], [], []>} : vector<2x60xbf16>, vector<60x420xbf16>, vector<2x420xf32> -> vector<2x420xf32>
    %210 = arith.addf %196, %209 : vector<2x420xf32>
    %c6_216 = arith.constant 6 : index
    %c1_217 = arith.constant 1 : index
    %c0_218 = arith.constant 0 : index
    %c0_219 = arith.constant 0 : index
    %211 = vector.load %arg1[%c6_216, %c1_217, %c0_218, %c0_219] : memref<9x2x2x144xf32, #tpu.memory_space<vmem>>, vector<1x1x2x144xf32>
    %212 = vector.shape_cast %211 : vector<1x1x2x144xf32> to vector<2x144xf32>
    %c0_220 = arith.constant 0 : index
    %c0_221 = arith.constant 0 : index
    %213 = vector.load %arg2[%c0_220, %c0_221] : memref<144x60xf32, #tpu.memory_space<vmem>>, vector<144x60xf32>
    %cst_222 = arith.constant dense<0.000000e+00> : vector<2x60xf32>
    %214 = tpu.matmul %212, %213, %cst_222 {dimension_numbers = #tpu.dot_dimension_numbers<[1], [0], [0], [1], [0, 0, 1, 1], [], []>} : vector<2x144xf32>, vector<144x60xf32>, vector<2x60xf32> -> vector<2x60xf32>
    %c0_223 = arith.constant 0 : index
    %c0_224 = arith.constant 0 : index
    %215 = vector.load %arg3[%c0_223, %c0_224] : memref<1x60xf32, #tpu.memory_space<vmem>>, vector<1x60xf32>
    %216 = vector.broadcast %215 : vector<1x60xf32> to vector<2x60xf32>
    %217 = arith.addf %214, %216 : vector<2x60xf32>
    %cst_225 = arith.constant 0.000000e+00 : f32
    %218 = vector.broadcast %cst_225 : f32 to vector<2x60xf32>
    %219 = arith.maximumf %217, %218 : vector<2x60xf32>
    %220 = arith.truncf %219 : vector<2x60xf32> to vector<2x60xbf16>
    %c1_226 = arith.constant 1 : index
    %c6_227 = arith.constant 6 : index
    %c0_228 = arith.constant 0 : index
    %c0_229 = arith.constant 0 : index
    %221 = vector.load %arg4[%c1_226, %c6_227, %c0_228, %c0_229] : memref<2x9x60x420xbf16, #tpu.memory_space<vmem>>, vector<1x1x60x420xbf16>
    %222 = vector.shape_cast %221 : vector<1x1x60x420xbf16> to vector<60x420xbf16>
    %cst_230 = arith.constant dense<0.000000e+00> : vector<2x420xf32>
    %223 = tpu.matmul %220, %222, %cst_230 {dimension_numbers = #tpu.dot_dimension_numbers<[1], [0], [0], [1], [0, 0, 1, 1], [], []>} : vector<2x60xbf16>, vector<60x420xbf16>, vector<2x420xf32> -> vector<2x420xf32>
    %224 = arith.addf %210, %223 : vector<2x420xf32>
    %c7_231 = arith.constant 7 : index
    %c1_232 = arith.constant 1 : index
    %c0_233 = arith.constant 0 : index
    %c0_234 = arith.constant 0 : index
    %225 = vector.load %arg1[%c7_231, %c1_232, %c0_233, %c0_234] : memref<9x2x2x144xf32, #tpu.memory_space<vmem>>, vector<1x1x2x144xf32>
    %226 = vector.shape_cast %225 : vector<1x1x2x144xf32> to vector<2x144xf32>
    %c0_235 = arith.constant 0 : index
    %c0_236 = arith.constant 0 : index
    %227 = vector.load %arg2[%c0_235, %c0_236] : memref<144x60xf32, #tpu.memory_space<vmem>>, vector<144x60xf32>
    %cst_237 = arith.constant dense<0.000000e+00> : vector<2x60xf32>
    %228 = tpu.matmul %226, %227, %cst_237 {dimension_numbers = #tpu.dot_dimension_numbers<[1], [0], [0], [1], [0, 0, 1, 1], [], []>} : vector<2x144xf32>, vector<144x60xf32>, vector<2x60xf32> -> vector<2x60xf32>
    %c0_238 = arith.constant 0 : index
    %c0_239 = arith.constant 0 : index
    %229 = vector.load %arg3[%c0_238, %c0_239] : memref<1x60xf32, #tpu.memory_space<vmem>>, vector<1x60xf32>
    %230 = vector.broadcast %229 : vector<1x60xf32> to vector<2x60xf32>
    %231 = arith.addf %228, %230 : vector<2x60xf32>
    %cst_240 = arith.constant 0.000000e+00 : f32
    %232 = vector.broadcast %cst_240 : f32 to vector<2x60xf32>
    %233 = arith.maximumf %231, %232 : vector<2x60xf32>
    %234 = arith.truncf %233 : vector<2x60xf32> to vector<2x60xbf16>
    %c1_241 = arith.constant 1 : index
    %c7_242 = arith.constant 7 : index
    %c0_243 = arith.constant 0 : index
    %c0_244 = arith.constant 0 : index
    %235 = vector.load %arg4[%c1_241, %c7_242, %c0_243, %c0_244] : memref<2x9x60x420xbf16, #tpu.memory_space<vmem>>, vector<1x1x60x420xbf16>
    %236 = vector.shape_cast %235 : vector<1x1x60x420xbf16> to vector<60x420xbf16>
    %cst_245 = arith.constant dense<0.000000e+00> : vector<2x420xf32>
    %237 = tpu.matmul %234, %236, %cst_245 {dimension_numbers = #tpu.dot_dimension_numbers<[1], [0], [0], [1], [0, 0, 1, 1], [], []>} : vector<2x60xbf16>, vector<60x420xbf16>, vector<2x420xf32> -> vector<2x420xf32>
    %238 = arith.addf %224, %237 : vector<2x420xf32>
    %c8_246 = arith.constant 8 : index
    %c1_247 = arith.constant 1 : index
    %c0_248 = arith.constant 0 : index
    %c0_249 = arith.constant 0 : index
    %239 = vector.load %arg1[%c8_246, %c1_247, %c0_248, %c0_249] : memref<9x2x2x144xf32, #tpu.memory_space<vmem>>, vector<1x1x2x144xf32>
    %240 = vector.shape_cast %239 : vector<1x1x2x144xf32> to vector<2x144xf32>
    %c0_250 = arith.constant 0 : index
    %c0_251 = arith.constant 0 : index
    %241 = vector.load %arg2[%c0_250, %c0_251] : memref<144x60xf32, #tpu.memory_space<vmem>>, vector<144x60xf32>
    %cst_252 = arith.constant dense<0.000000e+00> : vector<2x60xf32>
    %242 = tpu.matmul %240, %241, %cst_252 {dimension_numbers = #tpu.dot_dimension_numbers<[1], [0], [0], [1], [0, 0, 1, 1], [], []>} : vector<2x144xf32>, vector<144x60xf32>, vector<2x60xf32> -> vector<2x60xf32>
    %c0_253 = arith.constant 0 : index
    %c0_254 = arith.constant 0 : index
    %243 = vector.load %arg3[%c0_253, %c0_254] : memref<1x60xf32, #tpu.memory_space<vmem>>, vector<1x60xf32>
    %244 = vector.broadcast %243 : vector<1x60xf32> to vector<2x60xf32>
    %245 = arith.addf %242, %244 : vector<2x60xf32>
    %cst_255 = arith.constant 0.000000e+00 : f32
    %246 = vector.broadcast %cst_255 : f32 to vector<2x60xf32>
    %247 = arith.maximumf %245, %246 : vector<2x60xf32>
    %248 = arith.truncf %247 : vector<2x60xf32> to vector<2x60xbf16>
    %c1_256 = arith.constant 1 : index
    %c8_257 = arith.constant 8 : index
    %c0_258 = arith.constant 0 : index
    %c0_259 = arith.constant 0 : index
    %249 = vector.load %arg4[%c1_256, %c8_257, %c0_258, %c0_259] : memref<2x9x60x420xbf16, #tpu.memory_space<vmem>>, vector<1x1x60x420xbf16>
    %250 = vector.shape_cast %249 : vector<1x1x60x420xbf16> to vector<60x420xbf16>
    %cst_260 = arith.constant dense<0.000000e+00> : vector<2x420xf32>
    %251 = tpu.matmul %248, %250, %cst_260 {dimension_numbers = #tpu.dot_dimension_numbers<[1], [0], [0], [1], [0, 0, 1, 1], [], []>} : vector<2x60xbf16>, vector<60x420xbf16>, vector<2x420xf32> -> vector<2x420xf32>
    %252 = arith.addf %238, %251 : vector<2x420xf32>
    %c0_261 = arith.constant 0 : index
    %c0_262 = arith.constant 0 : index
    %253 = vector.load %arg5[%c0_261, %c0_262] : memref<1x420xf32, #tpu.memory_space<vmem>>, vector<1x420xf32>
    %254 = vector.broadcast %253 : vector<1x420xf32> to vector<2x420xf32>
    %255 = arith.addf %252, %254 : vector<2x420xf32>
    %cst_263 = arith.constant 0.000000e+00 : f32
    %256 = vector.broadcast %cst_263 : f32 to vector<2x420xf32>
    %257 = arith.maximumf %255, %256 : vector<2x420xf32>
    %258 = arith.truncf %257 : vector<2x420xf32> to vector<2x420xbf16>
    %c0_264 = arith.constant 0 : index
    %c0_265 = arith.constant 0 : index
    %259 = vector.load %arg6[%c0_264, %c0_265] : memref<420x19xbf16, #tpu.memory_space<vmem>>, vector<420x19xbf16>
    %cst_266 = arith.constant dense<0.000000e+00> : vector<2x19xf32>
    %260 = tpu.matmul %258, %259, %cst_266 {dimension_numbers = #tpu.dot_dimension_numbers<[1], [0], [0], [1], [0, 0, 1, 1], [], []>} : vector<2x420xbf16>, vector<420x19xbf16>, vector<2x19xf32> -> vector<2x19xf32>
    %c0_267 = arith.constant 0 : index
    %c0_268 = arith.constant 0 : index
    %261 = vector.load %arg7[%c0_267, %c0_268] : memref<1x19xf32, #tpu.memory_space<vmem>>, vector<1x19xf32>
    %262 = vector.broadcast %261 : vector<1x19xf32> to vector<2x19xf32>
    %263 = arith.addf %260, %262 : vector<2x19xf32>
    %cst_269 = arith.constant dense<0xFF800000> : vector<2xf32>
    %264 = vector.multi_reduction <maximumf>, %263, %cst_269 [1] : vector<2x19xf32> to vector<2xf32>
    %265 = vector.shape_cast %264 : vector<2xf32> to vector<2x1xf32>
    %266 = vector.broadcast %265 : vector<2x1xf32> to vector<2x19xf32>
    %267 = arith.subf %263, %266 : vector<2x19xf32>
    %268 = math.exp %267 : vector<2x19xf32>
    %cst_270 = arith.constant dense<0.000000e+00> : vector<2xf32>
    %269 = vector.multi_reduction <add>, %268, %cst_270 [1] : vector<2x19xf32> to vector<2xf32>
    %270 = vector.shape_cast %269 : vector<2xf32> to vector<2x1xf32>
    %271 = vector.broadcast %270 : vector<2x1xf32> to vector<2x19xf32>
    %272 = arith.divf %268, %271 : vector<2x19xf32>
    %c0_271 = arith.constant 0 : index
    %c0_272 = arith.constant 0 : index
    %273 = vector.load %arg8[%c0_271, %c0_272] : memref<2x19xf32, #tpu.memory_space<vmem>>, vector<2x19xf32>
    tpu.vector_store %arg8[%c0_271, %c0_272], %272 {strides = array<i32>} : memref<2x19xf32, #tpu.memory_space<vmem>>, vector<2x19xf32>,
    return
  }
  func.func @transform_0(%arg0: i32) -> (i32, i32, i32, i32) {
    %c0_i32 = arith.constant 0 : i32
    %c0_i32_0 = arith.constant 0 : i32
    %c0_i32_1 = arith.constant 0 : i32
    %c0_i32_2 = arith.constant 0 : i32
    %c0_i32_3 = arith.constant 0 : i32
    return %c0_i32, %c0_i32_0, %c0_i32_1, %c0_i32_2 : i32, i32, i32, i32
  }
  func.func @transform_1(%arg0: i32) -> (i32, i32) {
    %c0_i32 = arith.constant 0 : i32
    %c0_i32_0 = arith.constant 0 : i32
    %c0_i32_1 = arith.constant 0 : i32
    return %c0_i32, %c0_i32_0 : i32, i32
  }
  func.func @transform_2(%arg0: i32) -> (i32, i32) {
    %c0_i32 = arith.constant 0 : i32
    %c0_i32_0 = arith.constant 0 : i32
    %c0_i32_1 = arith.constant 0 : i32
    return %c0_i32, %c0_i32_0 : i32, i32
  }
  func.func @transform_3(%arg0: i32) -> (i32, i32, i32, i32) {
    %c0_i32 = arith.constant 0 : i32
    %c0_i32_0 = arith.constant 0 : i32
    %c0_i32_1 = arith.constant 0 : i32
    %c0_i32_2 = arith.constant 0 : i32
    %c0_i32_3 = arith.constant 0 : i32
    return %c0_i32, %c0_i32_0, %c0_i32_1, %c0_i32_2 : i32, i32, i32, i32
  }
  func.func @transform_4(%arg0: i32) -> (i32, i32) {
    %c0_i32 = arith.constant 0 : i32
    %c0_i32_0 = arith.constant 0 : i32
    %c0_i32_1 = arith.constant 0 : i32
    return %c0_i32, %c0_i32_0 : i32, i32
  }
  func.func @transform_5(%arg0: i32) -> (i32, i32) {
    %c0_i32 = arith.constant 0 : i32
    %c0_i32_0 = arith.constant 0 : i32
    %c0_i32_1 = arith.constant 0 : i32
    return %c0_i32, %c0_i32_0 : i32, i32
  }
  func.func @transform_6(%arg0: i32) -> (i32, i32) {
    %c0_i32 = arith.constant 0 : i32
    %c0_i32_0 = arith.constant 0 : i32
    %c0_i32_1 = arith.constant 0 : i32
    return %c0_i32, %c0_i32_0 : i32, i32
  }
  func.func @transform_7(%arg0: i32) -> (i32, i32) {
    %c0_i32 = arith.constant 0 : i32
    %c0_i32_0 = arith.constant 0 : i32
    %c0_i32_1 = arith.constant 0 : i32
    return %c0_i32, %c0_i32_0 : i32, i32
  }
}

</mosaic_0001>

<bundles_post_ra>
// kernel: sunet_forward.3
= control target key start
LH: loop header
LB: loop body
LE: loop exit
PB: predicated region body
PF: predicated region fallthrough
CT: control target
= control target key end

     0   :  { %vm1373_vm0 = vcmask 1040384   ;;  %vm358_vm1 = vcmask 72704   ;;  %vm2746_vm2 = vcmask 48128   ;;  %s6526_s1 = inlined_call_operand.vmem [shape: f32[9,6], index: 1, kind: input, shape index: {}]   ;;  %s6527_s0 = inlined_call_operand.vmem [shape: f32[2704,9], index: 0, kind: input, shape index: {}]   ;;  %s6528_s2 = inlined_call_operand.vmem [shape: f32[1,6], index: 2, kind: input, shape index: {}]   ;;  %s6529_s3 = inlined_call_operand.vmem [shape: f32[2704,6], index: 3, kind: output, shape index: {}]  }
   0x1   :  { %v353_v0 = vld [vmem:[%s6526_s1 + $0x8] sm:$0x1]  ;;  %v352_v1 = vld [vmem:[%s6526_s1] sm:$0xff]  ;;  %v184_v2 = vld [vmem:[%s6527_s0 + $0x550] sm:$0xff] }
   0x2   :  { %3429 = vmatpush.msk.msra.mxu2 %vm1373_vm0, %v353_v0  ;;  %3089 = vmatpush.msk.msra.mxu0 %vm1373_vm0, %v353_v0  ;;  %v14_v3 = vld [vmem:[%s6527_s0] sm:$0xff]  ;;  %v99_v4 = vld [vmem:[%s6527_s0 + $0x2a8] sm:$0xff]  ;;  %v269_v5 = vld [vmem:[%s6527_s0 + $0x7f8] sm:$0xff] }
   0x3   :  { %3428 = vmatpush.msk.msra.mxu1 %vm1373_vm0, %v353_v0  ;;  %3430 = vmatpush.msk.msra.mxu3 %vm1373_vm0, %v353_v0  ;;  %v185_v6 = vld [vmem:[%s6527_s0 + $0x558] sm:$0xff]  ;;  %v15_v7 = vld [vmem:[%s6527_s0 + $0x8] sm:$0xff]  ;;  %v100_v8 = vld [vmem:[%s6527_s0 + $0x2b0] sm:$0xff] }
   0x4   :  { %3432 = vmatpush.msra.mxu2 %v352_v1  ;;  %1392 = vmatpush.msra.mxu0 %v352_v1  ;;  %v270_v9 = vld [vmem:[%s6527_s0 + $0x800] sm:$0xff]  ;;  %v16_v11 = vld [vmem:[%s6527_s0 + $0x10] sm:$0xff]  ;;  %v101_v12 = vld [vmem:[%s6527_s0 + $0x2b8] sm:$0xff] }
   0x5   :  { %3260 = vmatmul.msk.f32.vlgmr.msra.gmra.mxu2 %vm358_vm1, %v184_v2  ;;  %3431 = vmatpush.msra.mxu1 %v352_v1  ;;  %v186_v10 = vld [vmem:[%s6527_s0 + $0x560] sm:$0xff]  ;;  %v271_v13 = vld [vmem:[%s6527_s0 + $0x808] sm:$0xff]  ;;  %v17_v15 = vld [vmem:[%s6527_s0 + $0x18] sm:$0xff] }
   0x6   :  { %3090 = vmatmul.msk.f32.vlgmr.msra.gmra.mxu0 %vm358_vm1, %v14_v3  ;;  %3175 = vmatmul.msk.f32.vlgmr.msra.gmra.mxu1 %vm358_vm1, %v99_v4  ;;  %v187_v14 = vld [vmem:[%s6527_s0 + $0x568] sm:$0xff]  ;;  %v102_v16 = vld [vmem:[%s6527_s0 + $0x2c0] sm:$0xff]  ;;  %v272_v17 = vld [vmem:[%s6527_s0 + $0x810] sm:$0xff] }
   0x7   :  { %3433 = vmatpush.msra.mxu3 %v352_v1  ;;  %v188_v18 = vld [vmem:[%s6527_s0 + $0x570] sm:$0xff]  ;;  %v18_v19 = vld [vmem:[%s6527_s0 + $0x20] sm:$0xff]  ;;  %v103_v20 = vld [vmem:[%s6527_s0 + $0x2c8] sm:$0xff] }
   0x8   :  { %3345 = vmatmul.msk.f32.vlgmr.msra.gmra.mxu3 %vm358_vm1, %v269_v5  ;;  %v273_v21 = vld [vmem:[%s6527_s0 + $0x818] sm:$0xff]  ;;  %v19_v23 = vld [vmem:[%s6527_s0 + $0x28] sm:$0xff]  ;;  %v104_v24 = vld [vmem:[%s6527_s0 + $0x2d0] sm:$0xff] }
   0x9   :  { %v189_v22 = vld [vmem:[%s6527_s0 + $0x578] sm:$0xff]  ;;  %v274_v25 = vld [vmem:[%s6527_s0 + $0x820] sm:$0xff]  ;;  %v20_v27 = vld [vmem:[%s6527_s0 + $0x30] sm:$0xff] }
   0xa   :  { %v190_v26 = vld [vmem:[%s6527_s0 + $0x580] sm:$0xff]  ;;  %v105_v28 = vld [vmem:[%s6527_s0 + $0x2d8] sm:$0xff]  ;;  %v275_v29 = vld [vmem:[%s6527_s0 + $0x828] sm:$0xff] }
   0xb   :  { %v191_v30 = vld [vmem:[%s6527_s0 + $0x588] sm:$0xff]  ;;  %v21_v31 = vld [vmem:[%s6527_s0 + $0x38] sm:$0xff]  ;;  %v106_v32 = vld [vmem:[%s6527_s0 + $0x2e0] sm:$0xff] }
   0xc   :  { %v276_v33 = vld [vmem:[%s6527_s0 + $0x830] sm:$0xff]  ;;  %v22_v35 = vld [vmem:[%s6527_s0 + $0x40] sm:$0xff]  ;;  %v107_v36 = vld [vmem:[%s6527_s0 + $0x2e8] sm:$0xff] }
   0xd   :  { %3261 = vmatmul.msk.f32.gmra.mxu2 %vm358_vm1, %v185_v6  ;;  %v192_v34 = vld [vmem:[%s6527_s0 + $0x590] sm:$0xff]  ;;  %v277_v37 = vld [vmem:[%s6527_s0 + $0x838] sm:$0xff]  ;;  %v23_v39 = vld [vmem:[%s6527_s0 + $0x48] sm:$0xff] }
   0xe   :  { %3091 = vmatmul.msk.f32.gmra.mxu0 %vm358_vm1, %v15_v7  ;;  %3176 = vmatmul.msk.f32.gmra.mxu1 %vm358_vm1, %v100_v8  ;;  %v193_v38 = vld [vmem:[%s6527_s0 + $0x598] sm:$0xff]  ;;  %v108_v40 = vld [vmem:[%s6527_s0 + $0x2f0] sm:$0xff]  ;;  %v278_v41 = vld [vmem:[%s6527_s0 + $0x840] sm:$0xff] }
   0xf   :  { %v194_v42 = vld [vmem:[%s6527_s0 + $0x5a0] sm:$0xff]  ;;  %v24_v43 = vld [vmem:[%s6527_s0 + $0x50] sm:$0xff]  ;;  %v109_v44 = vld [vmem:[%s6527_s0 + $0x2f8] sm:$0xff] }
  0x10   :  { %3346 = vmatmul.msk.f32.gmra.mxu3 %vm358_vm1, %v270_v9  ;;  %v279_v45 = vld [vmem:[%s6527_s0 + $0x848] sm:$0xff]  ;;  %v25_v47 = vld [vmem:[%s6527_s0 + $0x58] sm:$0xff]  ;;  %v110_v48 = vld [vmem:[%s6527_s0 + $0x300] sm:$0xff] }
  0x11   :  { %v195_v46 = vld [vmem:[%s6527_s0 + $0x5a8] sm:$0xff]  ;;  %v280_v49 = vld [vmem:[%s6527_s0 + $0x850] sm:$0xff]  ;;  %v26_v51 = vld [vmem:[%s6527_s0 + $0x60] sm:$0xff] }
  0x12   :  { %v196_v50 = vld [vmem:[%s6527_s0 + $0x5b0] sm:$0xff]  ;;  %v111_v52 = vld [vmem:[%s6527_s0 + $0x308] sm:$0xff]  ;;  %v281_v53 = vld [vmem:[%s6527_s0 + $0x858] sm:$0xff] }
  0x13   :  { %v197_v54 = vld [vmem:[%s6527_s0 + $0x5b8] sm:$0xff]  ;;  %v27_v55 = vld [vmem:[%s6527_s0 + $0x68] sm:$0xff]  ;;  %v112_v56 = vld [vmem:[%s6527_s0 + $0x310] sm:$0xff] }
  0x14   :  { %v282_v57 = vld [vmem:[%s6527_s0 + $0x860] sm:$0xff]  ;;  %v28_v59 = vld [vmem:[%s6527_s0 + $0x70] sm:$0xff]  ;;  %v113_v60 = vld [vmem:[%s6527_s0 + $0x318] sm:$0xff] }
  0x15   :  { %3262 = vmatmul.msk.f32.gmra.mxu2 %vm358_vm1, %v186_v10  ;;  %v198_v58 = vld [vmem:[%s6527_s0 + $0x5c0] sm:$0xff]  ;;  %v283_v61 = vld [vmem:[%s6527_s0 + $0x868] sm:$0xff]  ;;  %v29_v63 = vld [vmem:[%s6527_s0 + $0x78] sm:$0xff] }
  0x16   :  { %3092 = vmatmul.msk.f32.gmra.mxu0 %vm358_vm1, %v16_v11  ;;  %3177 = vmatmul.msk.f32.gmra.mxu1 %vm358_vm1, %v101_v12  ;;  %v199_v62 = vld [vmem:[%s6527_s0 + $0x5c8] sm:$0xff]  ;;  %v114_v0 = vld [vmem:[%s6527_s0 + $0x320] sm:$0xff]  ;;  %v284_v1 = vld [vmem:[%s6527_s0 + $0x870] sm:$0xff] }
  0x17   :  { %v3722_v2 = vld [vmem:[%s6528_s2] ss:$0 sm:$0xff]  ;;  %v200_v3 = vld [vmem:[%s6527_s0 + $0x5d0] sm:$0xff]  ;;  %v115_v7 = vld [vmem:[%s6527_s0 + $0x328] sm:$0xff] }
  0x18   :  { %3347 = vmatmul.msk.f32.gmra.mxu3 %vm358_vm1, %v271_v13  ;;  %v30_v6 = vld [vmem:[%s6527_s0 + $0x80] sm:$0xff]  ;;  %v285_v10 = vld [vmem:[%s6527_s0 + $0x878] sm:$0xff] }
  0x1d   :  { %3263 = vmatmul.msk.f32.gmra.mxu2 %vm358_vm1, %v187_v14 }
  0x1e   :  { %3093 = vmatmul.msk.f32.gmra.mxu0 %vm358_vm1, %v17_v15  ;;  %3178 = vmatmul.msk.f32.gmra.mxu1 %vm358_vm1, %v102_v16  ;;  %v201_v15 = vld [vmem:[%s6527_s0 + $0x5d8] sm:$0xff] }
  0x20   :  { %3348 = vmatmul.msk.f32.gmra.mxu3 %vm358_vm1, %v272_v17 }
  0x25   :  { %3264 = vmatmul.msk.f32.gmra.mxu2 %vm358_vm1, %v188_v18 }
  0x26   :  { %3094 = vmatmul.msk.f32.gmra.mxu0 %vm358_vm1, %v18_v19  ;;  %3179 = vmatmul.msk.f32.gmra.mxu1 %vm358_vm1, %v103_v20  ;;  %v31_v19 = vld [vmem:[%s6527_s0 + $0x88] sm:$0xff]  ;;  %v116_v20 = vld [vmem:[%s6527_s0 + $0x330] sm:$0xff] }
  0x28   :  { %3349 = vmatmul.msk.f32.gmra.mxu3 %vm358_vm1, %v273_v21 }
  0x2d   :  { %3265 = vmatmul.msk.f32.gmra.mxu2 %vm358_vm1, %v189_v22 }
  0x2e   :  { %3095 = vmatmul.msk.f32.gmra.mxu0 %vm358_vm1, %v19_v23  ;;  %3180 = vmatmul.msk.f32.gmra.mxu1 %vm358_vm1, %v104_v24 }
  0x30   :  { %3350 = vmatmul.msk.f32.gmra.mxu3 %vm358_vm1, %v274_v25  ;;  %v286_v25 = vld [vmem:[%s6527_s0 + $0x880] sm:$0xff] }
  0x35   :  { %3266 = vmatmul.msk.f32.gmra.mxu2 %vm358_vm1, %v190_v26 }
  0x36   :  { %3096 = vmatmul.msk.f32.gmra.mxu0 %vm358_vm1, %v20_v27  ;;  %3181 = vmatmul.msk.f32.gmra.mxu1 %vm358_vm1, %v105_v28 }
  0x38   :  { %3351 = vmatmul.msk.f32.gmra.mxu3 %vm358_vm1, %v275_v29 }
  0x3d   :  { %3267 = vmatmul.msk.f32.gmra.mxu2 %vm358_vm1, %v191_v30 }
  0x3e   :  { %3097 = vmatmul.msk.f32.gmra.mxu0 %vm358_vm1, %v21_v31  ;;  %3182 = vmatmul.msk.f32.gmra.mxu1 %vm358_vm1, %v106_v32  ;;  %v202_v31 = vld [vmem:[%s6527_s0 + $0x5e0] sm:$0xff] }
  0x40   :  { %3352 = vmatmul.msk.f32.gmra.mxu3 %vm358_vm1, %v276_v33 }
  0x45   :  { %3268 = vmatmul.msk.f32.gmra.mxu2 %vm358_vm1, %v192_v34 }
  0x46   :  { %3098 = vmatmul.msk.f32.gmra.mxu0 %vm358_vm1, %v22_v35  ;;  %3183 = vmatmul.msk.f32.gmra.mxu1 %vm358_vm1, %v107_v36  ;;  %v32_v35 = vld [vmem:[%s6527_s0 + $0x90] sm:$0xff]  ;;  %v117_v36 = vld [vmem:[%s6527_s0 + $0x338] sm:$0xff] }
  0x48   :  { %3353 = vmatmul.msk.f32.gmra.mxu3 %vm358_vm1, %v277_v37 }
  0x4d   :  { %3269 = vmatmul.msk.f32.gmra.mxu2 %vm358_vm1, %v193_v38 }
  0x4e   :  { %3099 = vmatmul.msk.f32.gmra.mxu0 %vm358_vm1, %v23_v39  ;;  %3184 = vmatmul.msk.f32.gmra.mxu1 %vm358_vm1, %v108_v40 }
  0x50   :  { %3354 = vmatmul.msk.f32.gmra.mxu3 %vm358_vm1, %v278_v41  ;;  %v287_v41 = vld [vmem:[%s6527_s0 + $0x888] sm:$0xff] }
  0x55   :  { %3270 = vmatmul.msk.f32.gmra.mxu2 %vm358_vm1, %v194_v42 }
  0x56   :  { %3100 = vmatmul.msk.f32.gmra.mxu0 %vm358_vm1, %v24_v43  ;;  %3185 = vmatmul.msk.f32.gmra.mxu1 %vm358_vm1, %v109_v44 }
  0x58   :  { %3355 = vmatmul.msk.f32.gmra.mxu3 %vm358_vm1, %v279_v45 }
  0x5d   :  { %3271 = vmatmul.msk.f32.gmra.mxu2 %vm358_vm1, %v195_v46 }
  0x5e   :  { %3101 = vmatmul.msk.f32.gmra.mxu0 %vm358_vm1, %v25_v47  ;;  %3186 = vmatmul.msk.f32.gmra.mxu1 %vm358_vm1, %v110_v48  ;;  %v203_v47 = vld [vmem:[%s6527_s0 + $0x5e8] sm:$0xff] }
  0x60   :  { %3356 = vmatmul.msk.f32.gmra.mxu3 %vm358_vm1, %v280_v49 }
  0x65   :  { %3272 = vmatmul.msk.f32.gmra.mxu2 %vm358_vm1, %v196_v50 }
  0x66   :  { %3102 = vmatmul.msk.f32.gmra.mxu0 %vm358_vm1, %v26_v51  ;;  %3187 = vmatmul.msk.f32.gmra.mxu1 %vm358_vm1, %v111_v52  ;;  %v33_v51 = vld [vmem:[%s6527_s0 + $0x98] sm:$0xff]  ;;  %v118_v52 = vld [vmem:[%s6527_s0 + $0x340] sm:$0xff] }
  0x68   :  { %3357 = vmatmul.msk.f32.gmra.mxu3 %vm358_vm1, %v281_v53 }
  0x6d   :  { %3273 = vmatmul.msk.f32.gmra.mxu2 %vm358_vm1, %v197_v54 }
  0x6e   :  { %3103 = vmatmul.msk.f32.gmra.mxu0 %vm358_vm1, %v27_v55  ;;  %3188 = vmatmul.msk.f32.gmra.mxu1 %vm358_vm1, %v112_v56 }
  0x70   :  { %3358 = vmatmul.msk.f32.gmra.mxu3 %vm358_vm1, %v282_v57  ;;  %v288_v57 = vld [vmem:[%s6527_s0 + $0x890] sm:$0xff] }
  0x75   :  { %3274 = vmatmul.msk.f32.gmra.mxu2 %vm358_vm1, %v198_v58 }
  0x76   :  { %3104 = vmatmul.msk.f32.gmra.mxu0 %vm358_vm1, %v28_v59  ;;  %3189 = vmatmul.msk.f32.gmra.mxu1 %vm358_vm1, %v113_v60 }
  0x78   :  { %3359 = vmatmul.msk.f32.gmra.mxu3 %vm358_vm1, %v283_v61 }
  0x7d   :  { %3275 = vmatmul.msk.f32.gmra.mxu2 %vm358_vm1, %v199_v62 }
  0x7e   :  { %3105 = vmatmul.msk.f32.gmra.mxu0 %vm358_vm1, %v29_v63  ;;  %3190 = vmatmul.msk.f32.gmra.mxu1 %vm358_vm1, %v114_v0  ;;  %v204_v63 = vld [vmem:[%s6527_s0 + $0x5f0] sm:$0xff] }
  0x80   :  { %3360 = vmatmul.msk.f32.gmra.mxu3 %vm358_vm1, %v284_v1 }
  0x83   :  { %v1394_v4 = vpop.f32.mrf.mxu0  ;;  %v1649_v5 = vpop.f32.mrf.mxu1 }
  0x84   :  { %v1395_v8 = vadd.f32 %v3722_v2, %v1394_v4  ;;  %v1650_v9 = vadd.f32 %v3722_v2, %v1649_v5  ;;  %v34_v4 = vld [vmem:[%s6527_s0 + $0xa0] sm:$0xff]  ;;  %v119_v5 = vld [vmem:[%s6527_s0 + $0x348] sm:$0xff] }
  0x85   :  { %3276 = vmatmul.msk.f32.gmra.mxu2 %vm358_vm1, %v200_v3 }
  0x86   :  { %v2408_v11 = vmax.f32 %v1395_v8, 0.0  ;;  %v2493_v12 = vmax.f32 %v1650_v9, 0.0  ;;  %3106 = vmatmul.msk.f32.gmra.mxu0 %vm358_vm1, %v30_v6  ;;  %3191 = vmatmul.msk.f32.gmra.mxu1 %vm358_vm1, %v115_v7 }
  0x88   :  { %2747 = vst.msk [vmem:[%s6529_s3] sm:$0xff] %vm2746_vm2, %v2408_v11  ;;  %v1904_v13 = vpop.f32.mrf.mxu2  ;;  %3361 = vmatmul.msk.f32.gmra.mxu3 %vm358_vm1, %v285_v10  ;;  %v289_v10 = vld [vmem:[%s6527_s0 + $0x898] sm:$0xff] }
  0x89   :  { %2832 = vst.msk [vmem:[%s6529_s3 + $0x2a8] sm:$0xff] %vm2746_vm2, %v2493_v12  ;;  %v1905_v14 = vadd.f32 %v3722_v2, %v1904_v13 }
  0x8b   :  { %v2578_v16 = vmax.f32 %v1905_v14, 0.0  ;;  %v1397_v17 = vpop.f32.mrf.mxu0  ;;  %v1652_v18 = vpop.f32.mrf.mxu1 }
  0x8c   :  { %v1398_v21 = vadd.f32 %v3722_v2, %v1397_v17  ;;  %v1653_v22 = vadd.f32 %v3722_v2, %v1652_v18  ;;  %v2159_v23 = vpop.f32.mrf.mxu3 }
  0x8d   :  { %2917 = vst.msk [vmem:[%s6529_s3 + $0x550] sm:$0xff] %vm2746_vm2, %v2578_v16  ;;  %3277 = vmatmul.msk.f32.gmra.mxu2 %vm358_vm1, %v201_v15  ;;  %v2160_v24 = vadd.f32 %v3722_v2, %v2159_v23  ;;  %v205_v16 = vld [vmem:[%s6527_s0 + $0x5f8] sm:$0xff] }
  0x8e   :  { %v2409_v26 = vmax.f32 %v1398_v21, 0.0  ;;  %v2494_v27 = vmax.f32 %v1653_v22, 0.0  ;;  %3107 = vmatmul.msk.f32.gmra.mxu0 %vm358_vm1, %v31_v19  ;;  %3192 = vmatmul.msk.f32.gmra.mxu1 %vm358_vm1, %v116_v20  ;;  %v35_v20 = vld [vmem:[%s6527_s0 + $0xa8] sm:$0xff]  ;;  %v120_v21 = vld [vmem:[%s6527_s0 + $0x350] sm:$0xff] }
  0x8f   :  { %v2663_v28 = vmax.f32 %v2160_v24, 0.0 }
  0x90   :  { %2748 = vst.msk [vmem:[%s6529_s3 + $0x8] sm:$0xff] %vm2746_vm2, %v2409_v26  ;;  %v1907_v29 = vpop.f32.mrf.mxu2  ;;  %3362 = vmatmul.msk.f32.gmra.mxu3 %vm358_vm1, %v286_v25  ;;  %v290_v26 = vld [vmem:[%s6527_s0 + $0x8a0] sm:$0xff] }
  0x91   :  { %2833 = vst.msk [vmem:[%s6529_s3 + $0x2b0] sm:$0xff] %vm2746_vm2, %v2494_v27  ;;  %v1908_v30 = vadd.f32 %v3722_v2, %v1907_v29 }
  0x92   :  { %3002 = vst.msk [vmem:[%s6529_s3 + $0x7f8] sm:$0xff] %vm2746_vm2, %v2663_v28 }
  0x93   :  { %v2579_v32 = vmax.f32 %v1908_v30, 0.0  ;;  %v1400_v33 = vpop.f32.mrf.mxu0  ;;  %v1655_v34 = vpop.f32.mrf.mxu1 }
  0x94   :  { %v1401_v37 = vadd.f32 %v3722_v2, %v1400_v33  ;;  %v1656_v38 = vadd.f32 %v3722_v2, %v1655_v34  ;;  %v2162_v39 = vpop.f32.mrf.mxu3 }
  0x95   :  { %2918 = vst.msk [vmem:[%s6529_s3 + $0x558] sm:$0xff] %vm2746_vm2, %v2579_v32  ;;  %3278 = vmatmul.msk.f32.gmra.mxu2 %vm358_vm1, %v202_v31  ;;  %v2163_v40 = vadd.f32 %v3722_v2, %v2162_v39  ;;  %v206_v32 = vld [vmem:[%s6527_s0 + $0x600] sm:$0xff] }
  0x96   :  { %v2410_v42 = vmax.f32 %v1401_v37, 0.0  ;;  %v2495_v43 = vmax.f32 %v1656_v38, 0.0  ;;  %3108 = vmatmul.msk.f32.gmra.mxu0 %vm358_vm1, %v32_v35  ;;  %3193 = vmatmul.msk.f32.gmra.mxu1 %vm358_vm1, %v117_v36  ;;  %v36_v36 = vld [vmem:[%s6527_s0 + $0xb0] sm:$0xff]  ;;  %v121_v37 = vld [vmem:[%s6527_s0 + $0x358] sm:$0xff] }
  0x97   :  { %v2664_v44 = vmax.f32 %v2163_v40, 0.0 }
  0x98   :  { %2749 = vst.msk [vmem:[%s6529_s3 + $0x10] sm:$0xff] %vm2746_vm2, %v2410_v42  ;;  %v1910_v45 = vpop.f32.mrf.mxu2  ;;  %3363 = vmatmul.msk.f32.gmra.mxu3 %vm358_vm1, %v287_v41  ;;  %v291_v42 = vld [vmem:[%s6527_s0 + $0x8a8] sm:$0xff] }
  0x99   :  { %2834 = vst.msk [vmem:[%s6529_s3 + $0x2b8] sm:$0xff] %vm2746_vm2, %v2495_v43  ;;  %v1911_v46 = vadd.f32 %v3722_v2, %v1910_v45 }
  0x9a   :  { %3003 = vst.msk [vmem:[%s6529_s3 + $0x800] sm:$0xff] %vm2746_vm2, %v2664_v44 }
  0x9b   :  { %v2580_v48 = vmax.f32 %v1911_v46, 0.0  ;;  %v1403_v49 = vpop.f32.mrf.mxu0  ;;  %v1658_v50 = vpop.f32.mrf.mxu1 }
  0x9c   :  { %v1404_v53 = vadd.f32 %v3722_v2, %v1403_v49  ;;  %v1659_v54 = vadd.f32 %v3722_v2, %v1658_v50  ;;  %v2165_v55 = vpop.f32.mrf.mxu3 }
  0x9d   :  { %2919 = vst.msk [vmem:[%s6529_s3 + $0x560] sm:$0xff] %vm2746_vm2, %v2580_v48  ;;  %3279 = vmatmul.msk.f32.gmra.mxu2 %vm358_vm1, %v203_v47  ;;  %v2166_v56 = vadd.f32 %v3722_v2, %v2165_v55  ;;  %v207_v48 = vld [vmem:[%s6527_s0 + $0x608] sm:$0xff] }
  0x9e   :  { %v2411_v58 = vmax.f32 %v1404_v53, 0.0  ;;  %v2496_v59 = vmax.f32 %v1659_v54, 0.0  ;;  %3109 = vmatmul.msk.f32.gmra.mxu0 %vm358_vm1, %v33_v51  ;;  %3194 = vmatmul.msk.f32.gmra.mxu1 %vm358_vm1, %v118_v52  ;;  %v37_v52 = vld [vmem:[%s6527_s0 + $0xb8] sm:$0xff]  ;;  %v122_v53 = vld [vmem:[%s6527_s0 + $0x360] sm:$0xff] }
  0x9f   :  { %v2665_v60 = vmax.f32 %v2166_v56, 0.0 }
  0xa0   :  { %2750 = vst.msk [vmem:[%s6529_s3 + $0x18] sm:$0xff] %vm2746_vm2, %v2411_v58  ;;  %v1913_v61 = vpop.f32.mrf.mxu2  ;;  %3364 = vmatmul.msk.f32.gmra.mxu3 %vm358_vm1, %v288_v57  ;;  %v292_v58 = vld [vmem:[%s6527_s0 + $0x8b0] sm:$0xff] }
  0xa1   :  { %2835 = vst.msk [vmem:[%s6529_s3 + $0x2c0] sm:$0xff] %vm2746_vm2, %v2496_v59  ;;  %v1914_v62 = vadd.f32 %v3722_v2, %v1913_v61 }
  0xa2   :  { %3004 = vst.msk [vmem:[%s6529_s3 + $0x808] sm:$0xff] %vm2746_vm2, %v2665_v60 }
  0xa3   :  { %v2581_v0 = vmax.f32 %v1914_v62, 0.0  ;;  %v1406_v1 = vpop.f32.mrf.mxu0  ;;  %v1661_v3 = vpop.f32.mrf.mxu1 }
  0xa4   :  { %v1407_v6 = vadd.f32 %v3722_v2, %v1406_v1  ;;  %v1662_v7 = vadd.f32 %v3722_v2, %v1661_v3  ;;  %v2168_v8 = vpop.f32.mrf.mxu3 }
  0xa5   :  { %2920 = vst.msk [vmem:[%s6529_s3 + $0x568] sm:$0xff] %vm2746_vm2, %v2581_v0  ;;  %3280 = vmatmul.msk.f32.gmra.mxu2 %vm358_vm1, %v204_v63  ;;  %v2169_v9 = vadd.f32 %v3722_v2, %v2168_v8  ;;  %v208_v0 = vld [vmem:[%s6527_s0 + $0x610] sm:$0xff] }
  0xa6   :  { %v2412_v11 = vmax.f32 %v1407_v6, 0.0  ;;  %v2497_v12 = vmax.f32 %v1662_v7, 0.0  ;;  %3110 = vmatmul.msk.f32.gmra.mxu0 %vm358_vm1, %v34_v4  ;;  %3195 = vmatmul.msk.f32.gmra.mxu1 %vm358_vm1, %v119_v5  ;;  %v38_v5 = vld [vmem:[%s6527_s0 + $0xc0] sm:$0xff]  ;;  %v123_v6 = vld [vmem:[%s6527_s0 + $0x368] sm:$0xff] }
  0xa7   :  { %v2666_v13 = vmax.f32 %v2169_v9, 0.0 }
  0xa8   :  { %2751 = vst.msk [vmem:[%s6529_s3 + $0x20] sm:$0xff] %vm2746_vm2, %v2412_v11  ;;  %v1916_v14 = vpop.f32.mrf.mxu2  ;;  %3365 = vmatmul.msk.f32.gmra.mxu3 %vm358_vm1, %v289_v10  ;;  %v293_v11 = vld [vmem:[%s6527_s0 + $0x8b8] sm:$0xff] }
  0xa9   :  { %2836 = vst.msk [vmem:[%s6529_s3 + $0x2c8] sm:$0xff] %vm2746_vm2, %v2497_v12  ;;  %v1917_v15 = vadd.f32 %v3722_v2, %v1916_v14 }
  0xaa   :  { %3005 = vst.msk [vmem:[%s6529_s3 + $0x810] sm:$0xff] %vm2746_vm2, %v2666_v13 }
  0xab   :  { %v2582_v17 = vmax.f32 %v1917_v15, 0.0  ;;  %v1409_v18 = vpop.f32.mrf.mxu0  ;;  %v1664_v19 = vpop.f32.mrf.mxu1 }
  0xac   :  { %v1410_v22 = vadd.f32 %v3722_v2, %v1409_v18  ;;  %v1665_v23 = vadd.f32 %v3722_v2, %v1664_v19  ;;  %v2171_v24 = vpop.f32.mrf.mxu3 }
  0xad   :  { %2921 = vst.msk [vmem:[%s6529_s3 + $0x570] sm:$0xff] %vm2746_vm2, %v2582_v17  ;;  %3281 = vmatmul.msk.f32.gmra.mxu2 %vm358_vm1, %v205_v16  ;;  %v2172_v25 = vadd.f32 %v3722_v2, %v2171_v24  ;;  %v209_v17 = vld [vmem:[%s6527_s0 + $0x618] sm:$0xff] }
  0xae   :  { %v2413_v27 = vmax.f32 %v1410_v22, 0.0  ;;  %v2498_v28 = vmax.f32 %v1665_v23, 0.0  ;;  %3111 = vmatmul.msk.f32.gmra.mxu0 %vm358_vm1, %v35_v20  ;;  %3196 = vmatmul.msk.f32.gmra.mxu1 %vm358_vm1, %v120_v21  ;;  %v39_v21 = vld [vmem:[%s6527_s0 + $0xc8] sm:$0xff]  ;;  %v124_v22 = vld [vmem:[%s6527_s0 + $0x370] sm:$0xff] }
  0xaf   :  { %v2667_v29 = vmax.f32 %v2172_v25, 0.0 }
  0xb0   :  { %2752 = vst.msk [vmem:[%s6529_s3 + $0x28] sm:$0xff] %vm2746_vm2, %v2413_v27  ;;  %v1919_v30 = vpop.f32.mrf.mxu2  ;;  %3366 = vmatmul.msk.f32.gmra.mxu3 %vm358_vm1, %v290_v26  ;;  %v294_v27 = vld [vmem:[%s6527_s0 + $0x8c0] sm:$0xff] }
  0xb1   :  { %2837 = vst.msk [vmem:[%s6529_s3 + $0x2d0] sm:$0xff] %vm2746_vm2, %v2498_v28  ;;  %v1920_v31 = vadd.f32 %v3722_v2, %v1919_v30 }
  0xb2   :  { %3006 = vst.msk [vmem:[%s6529_s3 + $0x818] sm:$0xff] %vm2746_vm2, %v2667_v29 }
  0xb3   :  { %v2583_v33 = vmax.f32 %v1920_v31, 0.0  ;;  %v1412_v34 = vpop.f32.mrf.mxu0  ;;  %v1667_v35 = vpop.f32.mrf.mxu1 }
  0xb4   :  { %v1413_v38 = vadd.f32 %v3722_v2, %v1412_v34  ;;  %v1668_v39 = vadd.f32 %v3722_v2, %v1667_v35  ;;  %v2174_v40 = vpop.f32.mrf.mxu3 }
  0xb5   :  { %2922 = vst.msk [vmem:[%s6529_s3 + $0x578] sm:$0xff] %vm2746_vm2, %v2583_v33  ;;  %3282 = vmatmul.msk.f32.gmra.mxu2 %vm358_vm1, %v206_v32  ;;  %v2175_v41 = vadd.f32 %v3722_v2, %v2174_v40  ;;  %v210_v33 = vld [vmem:[%s6527_s0 + $0x620] sm:$0xff] }
  0xb6   :  { %v2414_v43 = vmax.f32 %v1413_v38, 0.0  ;;  %v2499_v44 = vmax.f32 %v1668_v39, 0.0  ;;  %3112 = vmatmul.msk.f32.gmra.mxu0 %vm358_vm1, %v36_v36  ;;  %3197 = vmatmul.msk.f32.gmra.mxu1 %vm358_vm1, %v121_v37  ;;  %v40_v37 = vld [vmem:[%s6527_s0 + $0xd0] sm:$0xff]  ;;  %v125_v38 = vld [vmem:[%s6527_s0 + $0x378] sm:$0xff] }
  0xb7   :  { %v2668_v45 = vmax.f32 %v2175_v41, 0.0 }
  0xb8   :  { %2753 = vst.msk [vmem:[%s6529_s3 + $0x30] sm:$0xff] %vm2746_vm2, %v2414_v43  ;;  %v1922_v46 = vpop.f32.mrf.mxu2  ;;  %3367 = vmatmul.msk.f32.gmra.mxu3 %vm358_vm1, %v291_v42  ;;  %v295_v43 = vld [vmem:[%s6527_s0 + $0x8c8] sm:$0xff] }
  0xb9   :  { %2838 = vst.msk [vmem:[%s6529_s3 + $0x2d8] sm:$0xff] %vm2746_vm2, %v2499_v44  ;;  %v1923_v47 = vadd.f32 %v3722_v2, %v1922_v46 }
  0xba   :  { %3007 = vst.msk [vmem:[%s6529_s3 + $0x820] sm:$0xff] %vm2746_vm2, %v2668_v45 }
  0xbb   :  { %v2584_v49 = vmax.f32 %v1923_v47, 0.0  ;;  %v1415_v50 = vpop.f32.mrf.mxu0  ;;  %v1670_v51 = vpop.f32.mrf.mxu1 }
  0xbc   :  { %v1416_v54 = vadd.f32 %v3722_v2, %v1415_v50  ;;  %v1671_v55 = vadd.f32 %v3722_v2, %v1670_v51  ;;  %v2177_v56 = vpop.f32.mrf.mxu3 }
  0xbd   :  { %2923 = vst.msk [vmem:[%s6529_s3 + $0x580] sm:$0xff] %vm2746_vm2, %v2584_v49  ;;  %3283 = vmatmul.msk.f32.gmra.mxu2 %vm358_vm1, %v207_v48  ;;  %v2178_v57 = vadd.f32 %v3722_v2, %v2177_v56  ;;  %v211_v49 = vld [vmem:[%s6527_s0 + $0x628] sm:$0xff] }
  0xbe   :  { %v2415_v59 = vmax.f32 %v1416_v54, 0.0  ;;  %v2500_v60 = vmax.f32 %v1671_v55, 0.0  ;;  %3113 = vmatmul.msk.f32.gmra.mxu0 %vm358_vm1, %v37_v52  ;;  %3198 = vmatmul.msk.f32.gmra.mxu1 %vm358_vm1, %v122_v53  ;;  %v41_v53 = vld [vmem:[%s6527_s0 + $0xd8] sm:$0xff]  ;;  %v126_v54 = vld [vmem:[%s6527_s0 + $0x380] sm:$0xff] }
  0xbf   :  { %v2669_v61 = vmax.f32 %v2178_v57, 0.0 }
  0xc0   :  { %2754 = vst.msk [vmem:[%s6529_s3 + $0x38] sm:$0xff] %vm2746_vm2, %v2415_v59  ;;  %v1925_v62 = vpop.f32.mrf.mxu2  ;;  %3368 = vmatmul.msk.f32.gmra.mxu3 %vm358_vm1, %v292_v58  ;;  %v296_v59 = vld [vmem:[%s6527_s0 + $0x8d0] sm:$0xff] }
  0xc1   :  { %2839 = vst.msk [vmem:[%s6529_s3 + $0x2e0] sm:$0xff] %vm2746_vm2, %v2500_v60  ;;  %v1926_v63 = vadd.f32 %v3722_v2, %v1925_v62 }
  0xc2   :  { %3008 = vst.msk [vmem:[%s6529_s3 + $0x828] sm:$0xff] %vm2746_vm2, %v2669_v61 }
  0xc3   :  { %v2585_v1 = vmax.f32 %v1926_v63, 0.0  ;;  %v1418_v3 = vpop.f32.mrf.mxu0  ;;  %v1673_v4 = vpop.f32.mrf.mxu1 }
  0xc4   :  { %v1419_v7 = vadd.f32 %v3722_v2, %v1418_v3  ;;  %v1674_v8 = vadd.f32 %v3722_v2, %v1673_v4  ;;  %v2180_v9 = vpop.f32.mrf.mxu3 }
  0xc5   :  { %2924 = vst.msk [vmem:[%s6529_s3 + $0x588] sm:$0xff] %vm2746_vm2, %v2585_v1  ;;  %3284 = vmatmul.msk.f32.gmra.mxu2 %vm358_vm1, %v208_v0  ;;  %v2181_v10 = vadd.f32 %v3722_v2, %v2180_v9  ;;  %v212_v1 = vld [vmem:[%s6527_s0 + $0x630] sm:$0xff] }
  0xc6   :  { %v2416_v12 = vmax.f32 %v1419_v7, 0.0  ;;  %v2501_v13 = vmax.f32 %v1674_v8, 0.0  ;;  %3114 = vmatmul.msk.f32.gmra.mxu0 %vm358_vm1, %v38_v5  ;;  %3199 = vmatmul.msk.f32.gmra.mxu1 %vm358_vm1, %v123_v6  ;;  %v42_v6 = vld [vmem:[%s6527_s0 + $0xe0] sm:$0xff]  ;;  %v127_v7 = vld [vmem:[%s6527_s0 + $0x388] sm:$0xff] }
  0xc7   :  { %v2670_v14 = vmax.f32 %v2181_v10, 0.0 }
  0xc8   :  { %2755 = vst.msk [vmem:[%s6529_s3 + $0x40] sm:$0xff] %vm2746_vm2, %v2416_v12  ;;  %v1928_v15 = vpop.f32.mrf.mxu2  ;;  %3369 = vmatmul.msk.f32.gmra.mxu3 %vm358_vm1, %v293_v11  ;;  %v297_v12 = vld [vmem:[%s6527_s0 + $0x8d8] sm:$0xff] }
  0xc9   :  { %2840 = vst.msk [vmem:[%s6529_s3 + $0x2e8] sm:$0xff] %vm2746_vm2, %v2501_v13  ;;  %v1929_v16 = vadd.f32 %v3722_v2, %v1928_v15 }
  0xca   :  { %3009 = vst.msk [vmem:[%s6529_s3 + $0x830] sm:$0xff] %vm2746_vm2, %v2670_v14 }
  0xcb   :  { %v2586_v18 = vmax.f32 %v1929_v16, 0.0  ;;  %v1421_v19 = vpop.f32.mrf.mxu0  ;;  %v1676_v20 = vpop.f32.mrf.mxu1 }
  0xcc   :  { %v1422_v23 = vadd.f32 %v3722_v2, %v1421_v19  ;;  %v1677_v24 = vadd.f32 %v3722_v2, %v1676_v20  ;;  %v2183_v25 = vpop.f32.mrf.mxu3 }
  0xcd   :  { %2925 = vst.msk [vmem:[%s6529_s3 + $0x590] sm:$0xff] %vm2746_vm2, %v2586_v18  ;;  %3285 = vmatmul.msk.f32.gmra.mxu2 %vm358_vm1, %v209_v17  ;;  %v2184_v26 = vadd.f32 %v3722_v2, %v2183_v25  ;;  %v213_v18 = vld [vmem:[%s6527_s0 + $0x638] sm:$0xff] }
  0xce   :  { %v2417_v28 = vmax.f32 %v1422_v23, 0.0  ;;  %v2502_v29 = vmax.f32 %v1677_v24, 0.0  ;;  %3115 = vmatmul.msk.f32.gmra.mxu0 %vm358_vm1, %v39_v21  ;;  %3200 = vmatmul.msk.f32.gmra.mxu1 %vm358_vm1, %v124_v22  ;;  %v43_v22 = vld [vmem:[%s6527_s0 + $0xe8] sm:$0xff]  ;;  %v128_v23 = vld [vmem:[%s6527_s0 + $0x390] sm:$0xff] }
  0xcf   :  { %v2671_v30 = vmax.f32 %v2184_v26, 0.0 }
  0xd0   :  { %2756 = vst.msk [vmem:[%s6529_s3 + $0x48] sm:$0xff] %vm2746_vm2, %v2417_v28  ;;  %v1931_v31 = vpop.f32.mrf.mxu2  ;;  %3370 = vmatmul.msk.f32.gmra.mxu3 %vm358_vm1, %v294_v27  ;;  %v298_v28 = vld [vmem:[%s6527_s0 + $0x8e0] sm:$0xff] }
  0xd1   :  { %2841 = vst.msk [vmem:[%s6529_s3 + $0x2f0] sm:$0xff] %vm2746_vm2, %v2502_v29  ;;  %v1932_v32 = vadd.f32 %v3722_v2, %v1931_v31 }
  0xd2   :  { %3010 = vst.msk [vmem:[%s6529_s3 + $0x838] sm:$0xff] %vm2746_vm2, %v2671_v30 }
  0xd3   :  { %v2587_v34 = vmax.f32 %v1932_v32, 0.0  ;;  %v1424_v35 = vpop.f32.mrf.mxu0  ;;  %v1679_v36 = vpop.f32.mrf.mxu1 }
  0xd4   :  { %v1425_v39 = vadd.f32 %v3722_v2, %v1424_v35  ;;  %v1680_v40 = vadd.f32 %v3722_v2, %v1679_v36  ;;  %v2186_v41 = vpop.f32.mrf.mxu3 }
  0xd5   :  { %2926 = vst.msk [vmem:[%s6529_s3 + $0x598] sm:$0xff] %vm2746_vm2, %v2587_v34  ;;  %3286 = vmatmul.msk.f32.gmra.mxu2 %vm358_vm1, %v210_v33  ;;  %v2187_v42 = vadd.f32 %v3722_v2, %v2186_v41  ;;  %v214_v34 = vld [vmem:[%s6527_s0 + $0x640] sm:$0xff] }
  0xd6   :  { %v2418_v44 = vmax.f32 %v1425_v39, 0.0  ;;  %v2503_v45 = vmax.f32 %v1680_v40, 0.0  ;;  %3116 = vmatmul.msk.f32.gmra.mxu0 %vm358_vm1, %v40_v37  ;;  %3201 = vmatmul.msk.f32.gmra.mxu1 %vm358_vm1, %v125_v38  ;;  %v44_v38 = vld [vmem:[%s6527_s0 + $0xf0] sm:$0xff]  ;;  %v129_v39 = vld [vmem:[%s6527_s0 + $0x398] sm:$0xff] }
  0xd7   :  { %v2672_v46 = vmax.f32 %v2187_v42, 0.0 }
  0xd8   :  { %2757 = vst.msk [vmem:[%s6529_s3 + $0x50] sm:$0xff] %vm2746_vm2, %v2418_v44  ;;  %v1934_v47 = vpop.f32.mrf.mxu2  ;;  %3371 = vmatmul.msk.f32.gmra.mxu3 %vm358_vm1, %v295_v43  ;;  %v299_v44 = vld [vmem:[%s6527_s0 + $0x8e8] sm:$0xff] }
  0xd9   :  { %2842 = vst.msk [vmem:[%s6529_s3 + $0x2f8] sm:$0xff] %vm2746_vm2, %v2503_v45  ;;  %v1935_v48 = vadd.f32 %v3722_v2, %v1934_v47 }
  0xda   :  { %3011 = vst.msk [vmem:[%s6529_s3 + $0x840] sm:$0xff] %vm2746_vm2, %v2672_v46 }
  0xdb   :  { %v2588_v50 = vmax.f32 %v1935_v48, 0.0  ;;  %v1427_v51 = vpop.f32.mrf.mxu0  ;;  %v1682_v52 = vpop.f32.mrf.mxu1 }
  0xdc   :  { %v1428_v55 = vadd.f32 %v3722_v2, %v1427_v51  ;;  %v1683_v56 = vadd.f32 %v3722_v2, %v1682_v52  ;;  %v2189_v57 = vpop.f32.mrf.mxu3 }
  0xdd   :  { %2927 = vst.msk [vmem:[%s6529_s3 + $0x5a0] sm:$0xff] %vm2746_vm2, %v2588_v50  ;;  %3287 = vmatmul.msk.f32.gmra.mxu2 %vm358_vm1, %v211_v49  ;;  %v2190_v58 = vadd.f32 %v3722_v2, %v2189_v57  ;;  %v215_v50 = vld [vmem:[%s6527_s0 + $0x648] sm:$0xff] }
  0xde   :  { %v2419_v60 = vmax.f32 %v1428_v55, 0.0  ;;  %v2504_v61 = vmax.f32 %v1683_v56, 0.0  ;;  %3117 = vmatmul.msk.f32.gmra.mxu0 %vm358_vm1, %v41_v53  ;;  %3202 = vmatmul.msk.f32.gmra.mxu1 %vm358_vm1, %v126_v54  ;;  %v45_v54 = vld [vmem:[%s6527_s0 + $0xf8] sm:$0xff]  ;;  %v130_v55 = vld [vmem:[%s6527_s0 + $0x3a0] sm:$0xff] }
  0xdf   :  { %v2673_v62 = vmax.f32 %v2190_v58, 0.0 }
  0xe0   :  { %2758 = vst.msk [vmem:[%s6529_s3 + $0x58] sm:$0xff] %vm2746_vm2, %v2419_v60  ;;  %v1937_v63 = vpop.f32.mrf.mxu2  ;;  %3372 = vmatmul.msk.f32.gmra.mxu3 %vm358_vm1, %v296_v59  ;;  %v300_v60 = vld [vmem:[%s6527_s0 + $0x8f0] sm:$0xff] }
  0xe1   :  { %2843 = vst.msk [vmem:[%s6529_s3 + $0x300] sm:$0xff] %vm2746_vm2, %v2504_v61  ;;  %v1938_v0 = vadd.f32 %v3722_v2, %v1937_v63 }
  0xe2   :  { %3012 = vst.msk [vmem:[%s6529_s3 + $0x848] sm:$0xff] %vm2746_vm2, %v2673_v62 }
  0xe3   :  { %v2589_v3 = vmax.f32 %v1938_v0, 0.0  ;;  %v1430_v4 = vpop.f32.mrf.mxu0  ;;  %v1685_v5 = vpop.f32.mrf.mxu1 }
  0xe4   :  { %v1431_v8 = vadd.f32 %v3722_v2, %v1430_v4  ;;  %v1686_v9 = vadd.f32 %v3722_v2, %v1685_v5  ;;  %v2192_v10 = vpop.f32.mrf.mxu3 }
  0xe5   :  { %2928 = vst.msk [vmem:[%s6529_s3 + $0x5a8] sm:$0xff] %vm2746_vm2, %v2589_v3  ;;  %3288 = vmatmul.msk.f32.gmra.mxu2 %vm358_vm1, %v212_v1  ;;  %v2193_v11 = vadd.f32 %v3722_v2, %v2192_v10  ;;  %v216_v3 = vld [vmem:[%s6527_s0 + $0x650] sm:$0xff] }
  0xe6   :  { %v2420_v13 = vmax.f32 %v1431_v8, 0.0  ;;  %v2505_v14 = vmax.f32 %v1686_v9, 0.0  ;;  %3118 = vmatmul.msk.f32.gmra.mxu0 %vm358_vm1, %v42_v6  ;;  %3203 = vmatmul.msk.f32.gmra.mxu1 %vm358_vm1, %v127_v7  ;;  %v46_v7 = vld [vmem:[%s6527_s0 + $0x100] sm:$0xff]  ;;  %v131_v8 = vld [vmem:[%s6527_s0 + $0x3a8] sm:$0xff] }
  0xe7   :  { %v2674_v15 = vmax.f32 %v2193_v11, 0.0 }
  0xe8   :  { %2759 = vst.msk [vmem:[%s6529_s3 + $0x60] sm:$0xff] %vm2746_vm2, %v2420_v13  ;;  %v1940_v16 = vpop.f32.mrf.mxu2  ;;  %3373 = vmatmul.msk.f32.gmra.mxu3 %vm358_vm1, %v297_v12  ;;  %v301_v13 = vld [vmem:[%s6527_s0 + $0x8f8] sm:$0xff] }
  0xe9   :  { %2844 = vst.msk [vmem:[%s6529_s3 + $0x308] sm:$0xff] %vm2746_vm2, %v2505_v14  ;;  %v1941_v17 = vadd.f32 %v3722_v2, %v1940_v16 }
  0xea   :  { %3013 = vst.msk [vmem:[%s6529_s3 + $0x850] sm:$0xff] %vm2746_vm2, %v2674_v15 }
  0xeb   :  { %v2590_v19 = vmax.f32 %v1941_v17, 0.0  ;;  %v1433_v20 = vpop.f32.mrf.mxu0  ;;  %v1688_v21 = vpop.f32.mrf.mxu1 }
  0xec   :  { %v1434_v24 = vadd.f32 %v3722_v2, %v1433_v20  ;;  %v1689_v25 = vadd.f32 %v3722_v2, %v1688_v21  ;;  %v2195_v26 = vpop.f32.mrf.mxu3 }
  0xed   :  { %2929 = vst.msk [vmem:[%s6529_s3 + $0x5b0] sm:$0xff] %vm2746_vm2, %v2590_v19  ;;  %3289 = vmatmul.msk.f32.gmra.mxu2 %vm358_vm1, %v213_v18  ;;  %v2196_v27 = vadd.f32 %v3722_v2, %v2195_v26  ;;  %v217_v19 = vld [vmem:[%s6527_s0 + $0x658] sm:$0xff] }
  0xee   :  { %v2421_v29 = vmax.f32 %v1434_v24, 0.0  ;;  %v2506_v30 = vmax.f32 %v1689_v25, 0.0  ;;  %3119 = vmatmul.msk.f32.gmra.mxu0 %vm358_vm1, %v43_v22  ;;  %3204 = vmatmul.msk.f32.gmra.mxu1 %vm358_vm1, %v128_v23  ;;  %v47_v23 = vld [vmem:[%s6527_s0 + $0x108] sm:$0xff]  ;;  %v132_v24 = vld [vmem:[%s6527_s0 + $0x3b0] sm:$0xff] }
  0xef   :  { %v2675_v31 = vmax.f32 %v2196_v27, 0.0 }
  0xf0   :  { %2760 = vst.msk [vmem:[%s6529_s3 + $0x68] sm:$0xff] %vm2746_vm2, %v2421_v29  ;;  %v1943_v32 = vpop.f32.mrf.mxu2  ;;  %3374 = vmatmul.msk.f32.gmra.mxu3 %vm358_vm1, %v298_v28  ;;  %v302_v29 = vld [vmem:[%s6527_s0 + $0x900] sm:$0xff] }
  0xf1   :  { %2845 = vst.msk [vmem:[%s6529_s3 + $0x310] sm:$0xff] %vm2746_vm2, %v2506_v30  ;;  %v1944_v33 = vadd.f32 %v3722_v2, %v1943_v32 }
  0xf2   :  { %3014 = vst.msk [vmem:[%s6529_s3 + $0x858] sm:$0xff] %vm2746_vm2, %v2675_v31 }
  0xf3   :  { %v2591_v35 = vmax.f32 %v1944_v33, 0.0  ;;  %v1436_v36 = vpop.f32.mrf.mxu0  ;;  %v1691_v37 = vpop.f32.mrf.mxu1 }
  0xf4   :  { %v1437_v40 = vadd.f32 %v3722_v2, %v1436_v36  ;;  %v1692_v41 = vadd.f32 %v3722_v2, %v1691_v37  ;;  %v2198_v42 = vpop.f32.mrf.mxu3 }
  0xf5   :  { %2930 = vst.msk [vmem:[%s6529_s3 + $0x5b8] sm:$0xff] %vm2746_vm2, %v2591_v35  ;;  %3290 = vmatmul.msk.f32.gmra.mxu2 %vm358_vm1, %v214_v34  ;;  %v2199_v43 = vadd.f32 %v3722_v2, %v2198_v42  ;;  %v218_v35 = vld [vmem:[%s6527_s0 + $0x660] sm:$0xff] }
  0xf6   :  { %v2422_v45 = vmax.f32 %v1437_v40, 0.0  ;;  %v2507_v46 = vmax.f32 %v1692_v41, 0.0  ;;  %3120 = vmatmul.msk.f32.gmra.mxu0 %vm358_vm1, %v44_v38  ;;  %3205 = vmatmul.msk.f32.gmra.mxu1 %vm358_vm1, %v129_v39  ;;  %v48_v39 = vld [vmem:[%s6527_s0 + $0x110] sm:$0xff]  ;;  %v133_v40 = vld [vmem:[%s6527_s0 + $0x3b8] sm:$0xff] }
  0xf7   :  { %v2676_v47 = vmax.f32 %v2199_v43, 0.0 }
  0xf8   :  { %2761 = vst.msk [vmem:[%s6529_s3 + $0x70] sm:$0xff] %vm2746_vm2, %v2422_v45  ;;  %v1946_v48 = vpop.f32.mrf.mxu2  ;;  %3375 = vmatmul.msk.f32.gmra.mxu3 %vm358_vm1, %v299_v44  ;;  %v303_v45 = vld [vmem:[%s6527_s0 + $0x908] sm:$0xff] }
  0xf9   :  { %2846 = vst.msk [vmem:[%s6529_s3 + $0x318] sm:$0xff] %vm2746_vm2, %v2507_v46  ;;  %v1947_v49 = vadd.f32 %v3722_v2, %v1946_v48 }
  0xfa   :  { %3015 = vst.msk [vmem:[%s6529_s3 + $0x860] sm:$0xff] %vm2746_vm2, %v2676_v47 }
  0xfb   :  { %v2592_v51 = vmax.f32 %v1947_v49, 0.0  ;;  %v1439_v52 = vpop.f32.mrf.mxu0  ;;  %v1694_v53 = vpop.f32.mrf.mxu1 }
  0xfc   :  { %v1440_v56 = vadd.f32 %v3722_v2, %v1439_v52  ;;  %v1695_v57 = vadd.f32 %v3722_v2, %v1694_v53  ;;  %v2201_v58 = vpop.f32.mrf.mxu3 }
  0xfd   :  { %2931 = vst.msk [vmem:[%s6529_s3 + $0x5c0] sm:$0xff] %vm2746_vm2, %v2592_v51  ;;  %3291 = vmatmul.msk.f32.gmra.mxu2 %vm358_vm1, %v215_v50  ;;  %v2202_v59 = vadd.f32 %v3722_v2, %v2201_v58  ;;  %v219_v51 = vld [vmem:[%s6527_s0 + $0x668] sm:$0xff] }
  0xfe   :  { %v2423_v61 = vmax.f32 %v1440_v56, 0.0  ;;  %v2508_v62 = vmax.f32 %v1695_v57, 0.0  ;;  %3121 = vmatmul.msk.f32.gmra.mxu0 %vm358_vm1, %v45_v54  ;;  %3206 = vmatmul.msk.f32.gmra.mxu1 %vm358_vm1, %v130_v55  ;;  %v49_v55 = vld [vmem:[%s6527_s0 + $0x118] sm:$0xff]  ;;  %v134_v56 = vld [vmem:[%s6527_s0 + $0x3c0] sm:$0xff] }
  0xff   :  { %v2677_v63 = vmax.f32 %v2202_v59, 0.0 }
 0x100   :  { %2762 = vst.msk [vmem:[%s6529_s3 + $0x78] sm:$0xff] %vm2746_vm2, %v2423_v61  ;;  %v1949_v0 = vpop.f32.mrf.mxu2  ;;  %3376 = vmatmul.msk.f32.gmra.mxu3 %vm358_vm1, %v300_v60  ;;  %v304_v61 = vld [vmem:[%s6527_s0 + $0x910] sm:$0xff] }
 0x101   :  { %2847 = vst.msk [vmem:[%s6529_s3 + $0x320] sm:$0xff] %vm2746_vm2, %v2508_v62  ;;  %v1950_v1 = vadd.f32 %v3722_v2, %v1949_v0 }
 0x102   :  { %3016 = vst.msk [vmem:[%s6529_s3 + $0x868] sm:$0xff] %vm2746_vm2, %v2677_v63 }
 0x103   :  { %v2593_v4 = vmax.f32 %v1950_v1, 0.0  ;;  %v1442_v5 = vpop.f32.mrf.mxu0  ;;  %v1697_v6 = vpop.f32.mrf.mxu1 }
 0x104   :  { %v1443_v9 = vadd.f32 %v3722_v2, %v1442_v5  ;;  %v1698_v10 = vadd.f32 %v3722_v2, %v1697_v6  ;;  %v2204_v11 = vpop.f32.mrf.mxu3 }
 0x105   :  { %2932 = vst.msk [vmem:[%s6529_s3 + $0x5c8] sm:$0xff] %vm2746_vm2, %v2593_v4  ;;  %3292 = vmatmul.msk.f32.gmra.mxu2 %vm358_vm1, %v216_v3  ;;  %v2205_v12 = vadd.f32 %v3722_v2, %v2204_v11  ;;  %v220_v4 = vld [vmem:[%s6527_s0 + $0x670] sm:$0xff] }
 0x106   :  { %v2424_v14 = vmax.f32 %v1443_v9, 0.0  ;;  %v2509_v15 = vmax.f32 %v1698_v10, 0.0  ;;  %3122 = vmatmul.msk.f32.gmra.mxu0 %vm358_vm1, %v46_v7  ;;  %3207 = vmatmul.msk.f32.gmra.mxu1 %vm358_vm1, %v131_v8  ;;  %v50_v8 = vld [vmem:[%s6527_s0 + $0x120] sm:$0xff]  ;;  %v135_v9 = vld [vmem:[%s6527_s0 + $0x3c8] sm:$0xff] }
 0x107   :  { %v2678_v16 = vmax.f32 %v2205_v12, 0.0 }
 0x108   :  { %2763 = vst.msk [vmem:[%s6529_s3 + $0x80] sm:$0xff] %vm2746_vm2, %v2424_v14  ;;  %v1952_v17 = vpop.f32.mrf.mxu2  ;;  %3377 = vmatmul.msk.f32.gmra.mxu3 %vm358_vm1, %v301_v13  ;;  %v305_v14 = vld [vmem:[%s6527_s0 + $0x918] sm:$0xff] }
 0x109   :  { %2848 = vst.msk [vmem:[%s6529_s3 + $0x328] sm:$0xff] %vm2746_vm2, %v2509_v15  ;;  %v1953_v18 = vadd.f32 %v3722_v2, %v1952_v17 }
 0x10a   :  { %3017 = vst.msk [vmem:[%s6529_s3 + $0x870] sm:$0xff] %vm2746_vm2, %v2678_v16 }
 0x10b   :  { %v2594_v20 = vmax.f32 %v1953_v18, 0.0  ;;  %v1445_v21 = vpop.f32.mrf.mxu0  ;;  %v1700_v22 = vpop.f32.mrf.mxu1 }
 0x10c   :  { %v1446_v25 = vadd.f32 %v3722_v2, %v1445_v21  ;;  %v1701_v26 = vadd.f32 %v3722_v2, %v1700_v22  ;;  %v2207_v27 = vpop.f32.mrf.mxu3 }
 0x10d   :  { %2933 = vst.msk [vmem:[%s6529_s3 + $0x5d0] sm:$0xff] %vm2746_vm2, %v2594_v20  ;;  %3293 = vmatmul.msk.f32.gmra.mxu2 %vm358_vm1, %v217_v19  ;;  %v2208_v28 = vadd.f32 %v3722_v2, %v2207_v27  ;;  %v221_v20 = vld [vmem:[%s6527_s0 + $0x678] sm:$0xff] }
 0x10e   :  { %v2425_v30 = vmax.f32 %v1446_v25, 0.0  ;;  %v2510_v31 = vmax.f32 %v1701_v26, 0.0  ;;  %3123 = vmatmul.msk.f32.gmra.mxu0 %vm358_vm1, %v47_v23  ;;  %3208 = vmatmul.msk.f32.gmra.mxu1 %vm358_vm1, %v132_v24  ;;  %v51_v24 = vld [vmem:[%s6527_s0 + $0x128] sm:$0xff]  ;;  %v136_v25 = vld [vmem:[%s6527_s0 + $0x3d0] sm:$0xff] }
 0x10f   :  { %v2679_v32 = vmax.f32 %v2208_v28, 0.0 }
 0x110   :  { %2764 = vst.msk [vmem:[%s6529_s3 + $0x88] sm:$0xff] %vm2746_vm2, %v2425_v30  ;;  %v1955_v33 = vpop.f32.mrf.mxu2  ;;  %3378 = vmatmul.msk.f32.gmra.mxu3 %vm358_vm1, %v302_v29  ;;  %v4491_v29 = vld [vmem:[%s6528_s2] ss:$0 sm:$0xff] }
 0x111   :  { %2849 = vst.msk [vmem:[%s6529_s3 + $0x330] sm:$0xff] %vm2746_vm2, %v2510_v31  ;;  %v1956_v34 = vadd.f32 %v3722_v2, %v1955_v33  ;;  %v306_v31 = vld [vmem:[%s6527_s0 + $0x920] sm:$0xff] }
 0x112   :  { %3018 = vst.msk [vmem:[%s6529_s3 + $0x878] sm:$0xff] %vm2746_vm2, %v2679_v32 }
 0x113   :  { %v2595_v36 = vmax.f32 %v1956_v34, 0.0  ;;  %v1448_v37 = vpop.f32.mrf.mxu0  ;;  %v1703_v38 = vpop.f32.mrf.mxu1 }
 0x114   :  { %v1449_v41 = vadd.f32 %v3722_v2, %v1448_v37  ;;  %v1704_v42 = vadd.f32 %v3722_v2, %v1703_v38  ;;  %v2210_v43 = vpop.f32.mrf.mxu3 }
 0x115   :  { %2934 = vst.msk [vmem:[%s6529_s3 + $0x5d8] sm:$0xff] %vm2746_vm2, %v2595_v36  ;;  %3294 = vmatmul.msk.f32.gmra.mxu2 %vm358_vm1, %v218_v35  ;;  %v2211_v44 = vadd.f32 %v3722_v2, %v2210_v43  ;;  %v222_v36 = vld [vmem:[%s6527_s0 + $0x680] sm:$0xff] }
 0x116   :  { %v2426_v46 = vmax.f32 %v1449_v41, 0.0  ;;  %v2511_v47 = vmax.f32 %v1704_v42, 0.0  ;;  %3124 = vmatmul.msk.f32.gmra.mxu0 %vm358_vm1, %v48_v39  ;;  %3209 = vmatmul.msk.f32.gmra.mxu1 %vm358_vm1, %v133_v40  ;;  %v52_v40 = vld [vmem:[%s6527_s0 + $0x130] sm:$0xff]  ;;  %v137_v41 = vld [vmem:[%s6527_s0 + $0x3d8] sm:$0xff] }
 0x117   :  { %v2680_v48 = vmax.f32 %v2211_v44, 0.0 }
 0x118   :  { %2765 = vst.msk [vmem:[%s6529_s3 + $0x90] sm:$0xff] %vm2746_vm2, %v2426_v46  ;;  %v1958_v49 = vpop.f32.mrf.mxu2  ;;  %3379 = vmatmul.msk.f32.gmra.mxu3 %vm358_vm1, %v303_v45  ;;  %v307_v46 = vld [vmem:[%s6527_s0 + $0x928] sm:$0xff] }
 0x119   :  { %2850 = vst.msk [vmem:[%s6529_s3 + $0x338] sm:$0xff] %vm2746_vm2, %v2511_v47  ;;  %v1959_v50 = vadd.f32 %v3722_v2, %v1958_v49 }
 0x11a   :  { %3019 = vst.msk [vmem:[%s6529_s3 + $0x880] sm:$0xff] %vm2746_vm2, %v2680_v48 }
 0x11b   :  { %v2596_v52 = vmax.f32 %v1959_v50, 0.0  ;;  %v1451_v53 = vpop.f32.mrf.mxu0  ;;  %v1706_v54 = vpop.f32.mrf.mxu1 }
 0x11c   :  { %v1452_v57 = vadd.f32 %v3722_v2, %v1451_v53  ;;  %v1707_v58 = vadd.f32 %v3722_v2, %v1706_v54  ;;  %v2213_v59 = vpop.f32.mrf.mxu3 }
 0x11d   :  { %2935 = vst.msk [vmem:[%s6529_s3 + $0x5e0] sm:$0xff] %vm2746_vm2, %v2596_v52  ;;  %3295 = vmatmul.msk.f32.gmra.mxu2 %vm358_vm1, %v219_v51  ;;  %v2214_v60 = vadd.f32 %v3722_v2, %v2213_v59  ;;  %v223_v52 = vld [vmem:[%s6527_s0 + $0x688] sm:$0xff] }
 0x11e   :  { %v2427_v62 = vmax.f32 %v1452_v57, 0.0  ;;  %v2512_v63 = vmax.f32 %v1707_v58, 0.0  ;;  %3125 = vmatmul.msk.f32.gmra.mxu0 %vm358_vm1, %v49_v55  ;;  %3210 = vmatmul.msk.f32.gmra.mxu1 %vm358_vm1, %v134_v56  ;;  %v53_v56 = vld [vmem:[%s6527_s0 + $0x138] sm:$0xff]  ;;  %v138_v57 = vld [vmem:[%s6527_s0 + $0x3e0] sm:$0xff] }
 0x11f   :  { %v2681_v0 = vmax.f32 %v2214_v60, 0.0 }
 0x120   :  { %2766 = vst.msk [vmem:[%s6529_s3 + $0x98] sm:$0xff] %vm2746_vm2, %v2427_v62  ;;  %v1961_v1 = vpop.f32.mrf.mxu2  ;;  %3380 = vmatmul.msk.f32.gmra.mxu3 %vm358_vm1, %v304_v61  ;;  %v308_v62 = vld [vmem:[%s6527_s0 + $0x930] sm:$0xff] }
 0x121   :  { %2851 = vst.msk [vmem:[%s6529_s3 + $0x340] sm:$0xff] %vm2746_vm2, %v2512_v63  ;;  %v1962_v3 = vadd.f32 %v3722_v2, %v1961_v1 }
 0x122   :  { %3020 = vst.msk [vmem:[%s6529_s3 + $0x888] sm:$0xff] %vm2746_vm2, %v2681_v0 }
 0x123   :  { %v2597_v5 = vmax.f32 %v1962_v3, 0.0  ;;  %v1454_v6 = vpop.f32.mrf.mxu0  ;;  %v1709_v7 = vpop.f32.mrf.mxu1 }
 0x124   :  { %v1455_v10 = vadd.f32 %v3722_v2, %v1454_v6  ;;  %v1710_v11 = vadd.f32 %v3722_v2, %v1709_v7  ;;  %v2216_v12 = vpop.f32.mrf.mxu3 }
 0x125   :  { %2936 = vst.msk [vmem:[%s6529_s3 + $0x5e8] sm:$0xff] %vm2746_vm2, %v2597_v5  ;;  %3296 = vmatmul.msk.f32.gmra.mxu2 %vm358_vm1, %v220_v4  ;;  %v2217_v13 = vadd.f32 %v3722_v2, %v2216_v12  ;;  %v224_v5 = vld [vmem:[%s6527_s0 + $0x690] sm:$0xff] }
 0x126   :  { %v2428_v15 = vmax.f32 %v1455_v10, 0.0  ;;  %v2513_v16 = vmax.f32 %v1710_v11, 0.0  ;;  %3126 = vmatmul.msk.f32.gmra.mxu0 %vm358_vm1, %v50_v8  ;;  %3211 = vmatmul.msk.f32.gmra.mxu1 %vm358_vm1, %v135_v9  ;;  %v54_v9 = vld [vmem:[%s6527_s0 + $0x140] sm:$0xff]  ;;  %v139_v10 = vld [vmem:[%s6527_s0 + $0x3e8] sm:$0xff] }
 0x127   :  { %v2682_v17 = vmax.f32 %v2217_v13, 0.0 }
 0x128   :  { %2767 = vst.msk [vmem:[%s6529_s3 + $0xa0] sm:$0xff] %vm2746_vm2, %v2428_v15  ;;  %v1964_v18 = vpop.f32.mrf.mxu2  ;;  %3381 = vmatmul.msk.f32.gmra.mxu3 %vm358_vm1, %v305_v14  ;;  %v309_v15 = vld [vmem:[%s6527_s0 + $0x938] sm:$0xff] }
 0x129   :  { %2852 = vst.msk [vmem:[%s6529_s3 + $0x348] sm:$0xff] %vm2746_vm2, %v2513_v16  ;;  %v1965_v19 = vadd.f32 %v3722_v2, %v1964_v18 }
 0x12a   :  { %3021 = vst.msk [vmem:[%s6529_s3 + $0x890] sm:$0xff] %vm2746_vm2, %v2682_v17 }
 0x12b   :  { %v2598_v21 = vmax.f32 %v1965_v19, 0.0  ;;  %v1457_v22 = vpop.f32.mrf.mxu0  ;;  %v1712_v23 = vpop.f32.mrf.mxu1 }
 0x12c   :  { %v1458_v26 = vadd.f32 %v3722_v2, %v1457_v22  ;;  %v1713_v27 = vadd.f32 %v3722_v2, %v1712_v23  ;;  %v2219_v28 = vpop.f32.mrf.mxu3 }
 0x12d   :  { %2937 = vst.msk [vmem:[%s6529_s3 + $0x5f0] sm:$0xff] %vm2746_vm2, %v2598_v21  ;;  %3297 = vmatmul.msk.f32.gmra.mxu2 %vm358_vm1, %v221_v20  ;;  %v2220_v30 = vadd.f32 %v4491_v29, %v2219_v28  ;;  %v225_v21 = vld [vmem:[%s6527_s0 + $0x698] sm:$0xff] }
 0x12e   :  { %v2429_v2 = vmax.f32 %v1458_v26, 0.0  ;;  %v2514_v32 = vmax.f32 %v1713_v27, 0.0  ;;  %3127 = vmatmul.msk.f32.gmra.mxu0 %vm358_vm1, %v51_v24  ;;  %3212 = vmatmul.msk.f32.gmra.mxu1 %vm358_vm1, %v136_v25  ;;  %v55_v25 = vld [vmem:[%s6527_s0 + $0x148] sm:$0xff]  ;;  %v140_v26 = vld [vmem:[%s6527_s0 + $0x3f0] sm:$0xff] }
 0x12f   :  { %v2683_v33 = vmax.f32 %v2220_v30, 0.0 }
 0x130   :  { %2768 = vst.msk [vmem:[%s6529_s3 + $0xa8] sm:$0xff] %vm2746_vm2, %v2429_v2  ;;  %v1967_v34 = vpop.f32.mrf.mxu2  ;;  %3382 = vmatmul.msk.f32.gmra.mxu3 %vm358_vm1, %v306_v31  ;;  %v310_v2 = vld [vmem:[%s6527_s0 + $0x940] sm:$0xff] }
 0x131   :  { %2853 = vst.msk [vmem:[%s6529_s3 + $0x350] sm:$0xff] %vm2746_vm2, %v2514_v32  ;;  %v1968_v35 = vadd.f32 %v4491_v29, %v1967_v34 }
 0x132   :  { %3022 = vst.msk [vmem:[%s6529_s3 + $0x898] sm:$0xff] %vm2746_vm2, %v2683_v33 }
 0x133   :  { %v2599_v37 = vmax.f32 %v1968_v35, 0.0  ;;  %v1460_v38 = vpop.f32.mrf.mxu0  ;;  %v1715_v39 = vpop.f32.mrf.mxu1 }
 0x134   :  { %v1461_v42 = vadd.f32 %v4491_v29, %v1460_v38  ;;  %v1716_v43 = vadd.f32 %v4491_v29, %v1715_v39  ;;  %v2222_v44 = vpop.f32.mrf.mxu3 }
 0x135   :  { %2938 = vst.msk [vmem:[%s6529_s3 + $0x5f8] sm:$0xff] %vm2746_vm2, %v2599_v37  ;;  %3298 = vmatmul.msk.f32.gmra.mxu2 %vm358_vm1, %v222_v36  ;;  %v2223_v45 = vadd.f32 %v4491_v29, %v2222_v44  ;;  %v226_v37 = vld [vmem:[%s6527_s0 + $0x6a0] sm:$0xff] }
 0x136   :  { %v2430_v47 = vmax.f32 %v1461_v42, 0.0  ;;  %v2515_v48 = vmax.f32 %v1716_v43, 0.0  ;;  %3128 = vmatmul.msk.f32.gmra.mxu0 %vm358_vm1, %v52_v40  ;;  %3213 = vmatmul.msk.f32.gmra.mxu1 %vm358_vm1, %v137_v41  ;;  %v56_v41 = vld [vmem:[%s6527_s0 + $0x150] sm:$0xff]  ;;  %v141_v42 = vld [vmem:[%s6527_s0 + $0x3f8] sm:$0xff] }
 0x137   :  { %v2684_v49 = vmax.f32 %v2223_v45, 0.0 }
 0x138   :  { %2769 = vst.msk [vmem:[%s6529_s3 + $0xb0] sm:$0xff] %vm2746_vm2, %v2430_v47  ;;  %v1970_v50 = vpop.f32.mrf.mxu2  ;;  %3383 = vmatmul.msk.f32.gmra.mxu3 %vm358_vm1, %v307_v46  ;;  %v311_v47 = vld [vmem:[%s6527_s0 + $0x948] sm:$0xff] }
 0x139   :  { %2854 = vst.msk [vmem:[%s6529_s3 + $0x358] sm:$0xff] %vm2746_vm2, %v2515_v48  ;;  %v1971_v51 = vadd.f32 %v4491_v29, %v1970_v50 }
 0x13a   :  { %3023 = vst.msk [vmem:[%s6529_s3 + $0x8a0] sm:$0xff] %vm2746_vm2, %v2684_v49 }
 0x13b   :  { %v2600_v53 = vmax.f32 %v1971_v51, 0.0  ;;  %v1463_v54 = vpop.f32.mrf.mxu0  ;;  %v1718_v55 = vpop.f32.mrf.mxu1 }
 0x13c   :  { %v1464_v58 = vadd.f32 %v4491_v29, %v1463_v54  ;;  %v1719_v59 = vadd.f32 %v4491_v29, %v1718_v55  ;;  %v2225_v60 = vpop.f32.mrf.mxu3 }
 0x13d   :  { %2939 = vst.msk [vmem:[%s6529_s3 + $0x600] sm:$0xff] %vm2746_vm2, %v2600_v53  ;;  %3299 = vmatmul.msk.f32.gmra.mxu2 %vm358_vm1, %v223_v52  ;;  %v2226_v61 = vadd.f32 %v4491_v29, %v2225_v60  ;;  %v227_v53 = vld [vmem:[%s6527_s0 + $0x6a8] sm:$0xff] }
 0x13e   :  { %v2431_v63 = vmax.f32 %v1464_v58, 0.0  ;;  %v2516_v0 = vmax.f32 %v1719_v59, 0.0  ;;  %3129 = vmatmul.msk.f32.gmra.mxu0 %vm358_vm1, %v53_v56  ;;  %3214 = vmatmul.msk.f32.gmra.mxu1 %vm358_vm1, %v138_v57  ;;  %v57_v57 = vld [vmem:[%s6527_s0 + $0x158] sm:$0xff]  ;;  %v142_v58 = vld [vmem:[%s6527_s0 + $0x400] sm:$0xff] }
 0x13f   :  { %v2685_v1 = vmax.f32 %v2226_v61, 0.0 }
 0x140   :  { %2770 = vst.msk [vmem:[%s6529_s3 + $0xb8] sm:$0xff] %vm2746_vm2, %v2431_v63  ;;  %v1973_v3 = vpop.f32.mrf.mxu2  ;;  %3384 = vmatmul.msk.f32.gmra.mxu3 %vm358_vm1, %v308_v62  ;;  %v312_v63 = vld [vmem:[%s6527_s0 + $0x950] sm:$0xff] }
 0x141   :  { %2855 = vst.msk [vmem:[%s6529_s3 + $0x360] sm:$0xff] %vm2746_vm2, %v2516_v0  ;;  %v1974_v4 = vadd.f32 %v4491_v29, %v1973_v3 }
 0x142   :  { %3024 = vst.msk [vmem:[%s6529_s3 + $0x8a8] sm:$0xff] %vm2746_vm2, %v2685_v1 }
 0x143   :  { %v2601_v6 = vmax.f32 %v1974_v4, 0.0  ;;  %v1466_v7 = vpop.f32.mrf.mxu0  ;;  %v1721_v8 = vpop.f32.mrf.mxu1 }
 0x144   :  { %v1467_v11 = vadd.f32 %v4491_v29, %v1466_v7  ;;  %v1722_v12 = vadd.f32 %v4491_v29, %v1721_v8  ;;  %v2228_v13 = vpop.f32.mrf.mxu3 }
 0x145   :  { %2940 = vst.msk [vmem:[%s6529_s3 + $0x608] sm:$0xff] %vm2746_vm2, %v2601_v6  ;;  %3300 = vmatmul.msk.f32.gmra.mxu2 %vm358_vm1, %v224_v5  ;;  %v2229_v14 = vadd.f32 %v4491_v29, %v2228_v13  ;;  %v228_v6 = vld [vmem:[%s6527_s0 + $0x6b0] sm:$0xff] }
 0x146   :  { %v2432_v16 = vmax.f32 %v1467_v11, 0.0  ;;  %v2517_v17 = vmax.f32 %v1722_v12, 0.0  ;;  %3130 = vmatmul.msk.f32.gmra.mxu0 %vm358_vm1, %v54_v9  ;;  %3215 = vmatmul.msk.f32.gmra.mxu1 %vm358_vm1, %v139_v10  ;;  %v58_v10 = vld [vmem:[%s6527_s0 + $0x160] sm:$0xff]  ;;  %v143_v11 = vld [vmem:[%s6527_s0 + $0x408] sm:$0xff] }
 0x147   :  { %v2686_v18 = vmax.f32 %v2229_v14, 0.0 }
 0x148   :  { %2771 = vst.msk [vmem:[%s6529_s3 + $0xc0] sm:$0xff] %vm2746_vm2, %v2432_v16  ;;  %v1976_v19 = vpop.f32.mrf.mxu2  ;;  %3385 = vmatmul.msk.f32.gmra.mxu3 %vm358_vm1, %v309_v15  ;;  %v313_v16 = vld [vmem:[%s6527_s0 + $0x958] sm:$0xff] }
 0x149   :  { %2856 = vst.msk [vmem:[%s6529_s3 + $0x368] sm:$0xff] %vm2746_vm2, %v2517_v17  ;;  %v1977_v20 = vadd.f32 %v4491_v29, %v1976_v19 }
 0x14a   :  { %3025 = vst.msk [vmem:[%s6529_s3 + $0x8b0] sm:$0xff] %vm2746_vm2, %v2686_v18 }
 0x14b   :  { %v2602_v22 = vmax.f32 %v1977_v20, 0.0  ;;  %v1469_v23 = vpop.f32.mrf.mxu0  ;;  %v1724_v24 = vpop.f32.mrf.mxu1 }
 0x14c   :  { %v1470_v27 = vadd.f32 %v4491_v29, %v1469_v23  ;;  %v1725_v28 = vadd.f32 %v4491_v29, %v1724_v24  ;;  %v2231_v30 = vpop.f32.mrf.mxu3 }
 0x14d   :  { %2941 = vst.msk [vmem:[%s6529_s3 + $0x610] sm:$0xff] %vm2746_vm2, %v2602_v22  ;;  %3301 = vmatmul.msk.f32.gmra.mxu2 %vm358_vm1, %v225_v21  ;;  %v2232_v31 = vadd.f32 %v4491_v29, %v2231_v30  ;;  %v229_v22 = vld [vmem:[%s6527_s0 + $0x6b8] sm:$0xff] }
 0x14e   :  { %v2433_v32 = vmax.f32 %v1470_v27, 0.0  ;;  %v2518_v33 = vmax.f32 %v1725_v28, 0.0  ;;  %3131 = vmatmul.msk.f32.gmra.mxu0 %vm358_vm1, %v55_v25  ;;  %3216 = vmatmul.msk.f32.gmra.mxu1 %vm358_vm1, %v140_v26  ;;  %v59_v26 = vld [vmem:[%s6527_s0 + $0x168] sm:$0xff]  ;;  %v144_v27 = vld [vmem:[%s6527_s0 + $0x410] sm:$0xff] }
 0x14f   :  { %v2687_v34 = vmax.f32 %v2232_v31, 0.0 }
 0x150   :  { %2772 = vst.msk [vmem:[%s6529_s3 + $0xc8] sm:$0xff] %vm2746_vm2, %v2433_v32  ;;  %v1979_v35 = vpop.f32.mrf.mxu2  ;;  %3386 = vmatmul.msk.f32.gmra.mxu3 %vm358_vm1, %v310_v2  ;;  %v314_v32 = vld [vmem:[%s6527_s0 + $0x960] sm:$0xff] }
 0x151   :  { %2857 = vst.msk [vmem:[%s6529_s3 + $0x370] sm:$0xff] %vm2746_vm2, %v2518_v33  ;;  %v1980_v36 = vadd.f32 %v4491_v29, %v1979_v35 }
 0x152   :  { %3026 = vst.msk [vmem:[%s6529_s3 + $0x8b8] sm:$0xff] %vm2746_vm2, %v2687_v34 }
 0x153   :  { %v2603_v38 = vmax.f32 %v1980_v36, 0.0  ;;  %v1472_v39 = vpop.f32.mrf.mxu0  ;;  %v1727_v40 = vpop.f32.mrf.mxu1 }
 0x154   :  { %v1473_v43 = vadd.f32 %v4491_v29, %v1472_v39  ;;  %v1728_v44 = vadd.f32 %v4491_v29, %v1727_v40  ;;  %v2234_v45 = vpop.f32.mrf.mxu3 }
 0x155   :  { %2942 = vst.msk [vmem:[%s6529_s3 + $0x618] sm:$0xff] %vm2746_vm2, %v2603_v38  ;;  %3302 = vmatmul.msk.f32.gmra.mxu2 %vm358_vm1, %v226_v37  ;;  %v2235_v46 = vadd.f32 %v4491_v29, %v2234_v45  ;;  %v230_v38 = vld [vmem:[%s6527_s0 + $0x6c0] sm:$0xff] }
 0x156   :  { %v2434_v48 = vmax.f32 %v1473_v43, 0.0  ;;  %v2519_v49 = vmax.f32 %v1728_v44, 0.0  ;;  %3132 = vmatmul.msk.f32.gmra.mxu0 %vm358_vm1, %v56_v41  ;;  %3217 = vmatmul.msk.f32.gmra.mxu1 %vm358_vm1, %v141_v42  ;;  %v60_v42 = vld [vmem:[%s6527_s0 + $0x170] sm:$0xff]  ;;  %v145_v43 = vld [vmem:[%s6527_s0 + $0x418] sm:$0xff] }
 0x157   :  { %v2688_v50 = vmax.f32 %v2235_v46, 0.0 }
 0x158   :  { %2773 = vst.msk [vmem:[%s6529_s3 + $0xd0] sm:$0xff] %vm2746_vm2, %v2434_v48  ;;  %v1982_v51 = vpop.f32.mrf.mxu2  ;;  %3387 = vmatmul.msk.f32.gmra.mxu3 %vm358_vm1, %v311_v47  ;;  %v315_v48 = vld [vmem:[%s6527_s0 + $0x968] sm:$0xff] }
 0x159   :  { %2858 = vst.msk [vmem:[%s6529_s3 + $0x378] sm:$0xff] %vm2746_vm2, %v2519_v49  ;;  %v1983_v52 = vadd.f32 %v4491_v29, %v1982_v51 }
 0x15a   :  { %3027 = vst.msk [vmem:[%s6529_s3 + $0x8c0] sm:$0xff] %vm2746_vm2, %v2688_v50 }
 0x15b   :  { %v2604_v54 = vmax.f32 %v1983_v52, 0.0  ;;  %v1475_v55 = vpop.f32.mrf.mxu0  ;;  %v1730_v56 = vpop.f32.mrf.mxu1 }
 0x15c   :  { %v1476_v59 = vadd.f32 %v4491_v29, %v1475_v55  ;;  %v1731_v60 = vadd.f32 %v4491_v29, %v1730_v56  ;;  %v2237_v61 = vpop.f32.mrf.mxu3 }
 0x15d   :  { %2943 = vst.msk [vmem:[%s6529_s3 + $0x620] sm:$0xff] %vm2746_vm2, %v2604_v54  ;;  %3303 = vmatmul.msk.f32.gmra.mxu2 %vm358_vm1, %v227_v53  ;;  %v2238_v62 = vadd.f32 %v4491_v29, %v2237_v61  ;;  %v231_v54 = vld [vmem:[%s6527_s0 + $0x6c8] sm:$0xff] }
 0x15e   :  { %v2435_v0 = vmax.f32 %v1476_v59, 0.0  ;;  %v2520_v1 = vmax.f32 %v1731_v60, 0.0  ;;  %3133 = vmatmul.msk.f32.gmra.mxu0 %vm358_vm1, %v57_v57  ;;  %3218 = vmatmul.msk.f32.gmra.mxu1 %vm358_vm1, %v142_v58  ;;  %v61_v58 = vld [vmem:[%s6527_s0 + $0x178] sm:$0xff]  ;;  %v146_v59 = vld [vmem:[%s6527_s0 + $0x420] sm:$0xff] }
 0x15f   :  { %v2689_v3 = vmax.f32 %v2238_v62, 0.0 }
 0x160   :  { %2774 = vst.msk [vmem:[%s6529_s3 + $0xd8] sm:$0xff] %vm2746_vm2, %v2435_v0  ;;  %v1985_v4 = vpop.f32.mrf.mxu2  ;;  %3388 = vmatmul.msk.f32.gmra.mxu3 %vm358_vm1, %v312_v63  ;;  %v316_v0 = vld [vmem:[%s6527_s0 + $0x970] sm:$0xff] }
 0x161   :  { %2859 = vst.msk [vmem:[%s6529_s3 + $0x380] sm:$0xff] %vm2746_vm2, %v2520_v1  ;;  %v1986_v5 = vadd.f32 %v4491_v29, %v1985_v4 }
 0x162   :  { %3028 = vst.msk [vmem:[%s6529_s3 + $0x8c8] sm:$0xff] %vm2746_vm2, %v2689_v3 }
 0x163   :  { %v2605_v7 = vmax.f32 %v1986_v5, 0.0  ;;  %v1478_v8 = vpop.f32.mrf.mxu0  ;;  %v1733_v9 = vpop.f32.mrf.mxu1 }
 0x164   :  { %v1479_v12 = vadd.f32 %v4491_v29, %v1478_v8  ;;  %v1734_v13 = vadd.f32 %v4491_v29, %v1733_v9  ;;  %v2240_v14 = vpop.f32.mrf.mxu3 }
 0x165   :  { %2944 = vst.msk [vmem:[%s6529_s3 + $0x628] sm:$0xff] %vm2746_vm2, %v2605_v7  ;;  %3304 = vmatmul.msk.f32.gmra.mxu2 %vm358_vm1, %v228_v6  ;;  %v2241_v15 = vadd.f32 %v4491_v29, %v2240_v14  ;;  %v232_v7 = vld [vmem:[%s6527_s0 + $0x6d0] sm:$0xff] }
 0x166   :  { %v2436_v17 = vmax.f32 %v1479_v12, 0.0  ;;  %v2521_v18 = vmax.f32 %v1734_v13, 0.0  ;;  %3134 = vmatmul.msk.f32.gmra.mxu0 %vm358_vm1, %v58_v10  ;;  %3219 = vmatmul.msk.f32.gmra.mxu1 %vm358_vm1, %v143_v11  ;;  %v62_v11 = vld [vmem:[%s6527_s0 + $0x180] sm:$0xff]  ;;  %v147_v12 = vld [vmem:[%s6527_s0 + $0x428] sm:$0xff] }
 0x167   :  { %v2690_v19 = vmax.f32 %v2241_v15, 0.0 }
 0x168   :  { %2775 = vst.msk [vmem:[%s6529_s3 + $0xe0] sm:$0xff] %vm2746_vm2, %v2436_v17  ;;  %v1988_v20 = vpop.f32.mrf.mxu2  ;;  %3389 = vmatmul.msk.f32.gmra.mxu3 %vm358_vm1, %v313_v16  ;;  %v317_v17 = vld [vmem:[%s6527_s0 + $0x978] sm:$0xff] }
 0x169   :  { %2860 = vst.msk [vmem:[%s6529_s3 + $0x388] sm:$0xff] %vm2746_vm2, %v2521_v18  ;;  %v1989_v21 = vadd.f32 %v4491_v29, %v1988_v20 }
 0x16a   :  { %3029 = vst.msk [vmem:[%s6529_s3 + $0x8d0] sm:$0xff] %vm2746_vm2, %v2690_v19 }
 0x16b   :  { %v2606_v23 = vmax.f32 %v1989_v21, 0.0  ;;  %v1481_v24 = vpop.f32.mrf.mxu0  ;;  %v1736_v25 = vpop.f32.mrf.mxu1 }
 0x16c   :  { %v1482_v28 = vadd.f32 %v4491_v29, %v1481_v24  ;;  %v1737_v30 = vadd.f32 %v4491_v29, %v1736_v25  ;;  %v2243_v31 = vpop.f32.mrf.mxu3 }
 0x16d   :  { %2945 = vst.msk [vmem:[%s6529_s3 + $0x630] sm:$0xff] %vm2746_vm2, %v2606_v23  ;;  %3305 = vmatmul.msk.f32.gmra.mxu2 %vm358_vm1, %v229_v22  ;;  %v2244_v2 = vadd.f32 %v4491_v29, %v2243_v31  ;;  %v233_v23 = vld [vmem:[%s6527_s0 + $0x6d8] sm:$0xff] }
 0x16e   :  { %v2437_v33 = vmax.f32 %v1482_v28, 0.0  ;;  %v2522_v34 = vmax.f32 %v1737_v30, 0.0  ;;  %3135 = vmatmul.msk.f32.gmra.mxu0 %vm358_vm1, %v59_v26  ;;  %3220 = vmatmul.msk.f32.gmra.mxu1 %vm358_vm1, %v144_v27  ;;  %v63_v27 = vld [vmem:[%s6527_s0 + $0x188] sm:$0xff]  ;;  %v148_v28 = vld [vmem:[%s6527_s0 + $0x430] sm:$0xff] }
 0x16f   :  { %v2691_v35 = vmax.f32 %v2244_v2, 0.0 }
 0x170   :  { %2776 = vst.msk [vmem:[%s6529_s3 + $0xe8] sm:$0xff] %vm2746_vm2, %v2437_v33  ;;  %v1991_v36 = vpop.f32.mrf.mxu2  ;;  %3390 = vmatmul.msk.f32.gmra.mxu3 %vm358_vm1, %v314_v32  ;;  %v318_v33 = vld [vmem:[%s6527_s0 + $0x980] sm:$0xff] }
 0x171   :  { %2861 = vst.msk [vmem:[%s6529_s3 + $0x390] sm:$0xff] %vm2746_vm2, %v2522_v34  ;;  %v1992_v37 = vadd.f32 %v4491_v29, %v1991_v36 }
 0x172   :  { %3030 = vst.msk [vmem:[%s6529_s3 + $0x8d8] sm:$0xff] %vm2746_vm2, %v2691_v35 }
 0x173   :  { %v2607_v39 = vmax.f32 %v1992_v37, 0.0  ;;  %v1484_v40 = vpop.f32.mrf.mxu0  ;;  %v1739_v41 = vpop.f32.mrf.mxu1 }
 0x174   :  { %v1485_v44 = vadd.f32 %v4491_v29, %v1484_v40  ;;  %v1740_v45 = vadd.f32 %v4491_v29, %v1739_v41  ;;  %v2246_v46 = vpop.f32.mrf.mxu3 }
 0x175   :  { %2946 = vst.msk [vmem:[%s6529_s3 + $0x638] sm:$0xff] %vm2746_vm2, %v2607_v39  ;;  %3306 = vmatmul.msk.f32.gmra.mxu2 %vm358_vm1, %v230_v38  ;;  %v2247_v47 = vadd.f32 %v4491_v29, %v2246_v46  ;;  %v234_v39 = vld [vmem:[%s6527_s0 + $0x6e0] sm:$0xff] }
 0x176   :  { %v2438_v49 = vmax.f32 %v1485_v44, 0.0  ;;  %v2523_v50 = vmax.f32 %v1740_v45, 0.0  ;;  %3136 = vmatmul.msk.f32.gmra.mxu0 %vm358_vm1, %v60_v42  ;;  %3221 = vmatmul.msk.f32.gmra.mxu1 %vm358_vm1, %v145_v43  ;;  %v64_v43 = vld [vmem:[%s6527_s0 + $0x190] sm:$0xff]  ;;  %v149_v44 = vld [vmem:[%s6527_s0 + $0x438] sm:$0xff] }
 0x177   :  { %v2692_v51 = vmax.f32 %v2247_v47, 0.0 }
 0x178   :  { %2777 = vst.msk [vmem:[%s6529_s3 + $0xf0] sm:$0xff] %vm2746_vm2, %v2438_v49  ;;  %v1994_v52 = vpop.f32.mrf.mxu2  ;;  %3391 = vmatmul.msk.f32.gmra.mxu3 %vm358_vm1, %v315_v48  ;;  %v319_v49 = vld [vmem:[%s6527_s0 + $0x988] sm:$0xff] }
 0x179   :  { %2862 = vst.msk [vmem:[%s6529_s3 + $0x398] sm:$0xff] %vm2746_vm2, %v2523_v50  ;;  %v1995_v53 = vadd.f32 %v4491_v29, %v1994_v52 }
 0x17a   :  { %3031 = vst.msk [vmem:[%s6529_s3 + $0x8e0] sm:$0xff] %vm2746_vm2, %v2692_v51 }
 0x17b   :  { %v2608_v55 = vmax.f32 %v1995_v53, 0.0  ;;  %v1487_v56 = vpop.f32.mrf.mxu0  ;;  %v1742_v57 = vpop.f32.mrf.mxu1 }
 0x17c   :  { %v1488_v60 = vadd.f32 %v4491_v29, %v1487_v56  ;;  %v1743_v61 = vadd.f32 %v4491_v29, %v1742_v57  ;;  %v2249_v62 = vpop.f32.mrf.mxu3 }
 0x17d   :  { %2947 = vst.msk [vmem:[%s6529_s3 + $0x640] sm:$0xff] %vm2746_vm2, %v2608_v55  ;;  %3307 = vmatmul.msk.f32.gmra.mxu2 %vm358_vm1, %v231_v54  ;;  %v2250_v63 = vadd.f32 %v4491_v29, %v2249_v62  ;;  %v235_v55 = vld [vmem:[%s6527_s0 + $0x6e8] sm:$0xff] }
 0x17e   :  { %v2439_v1 = vmax.f32 %v1488_v60, 0.0  ;;  %v2524_v3 = vmax.f32 %v1743_v61, 0.0  ;;  %3137 = vmatmul.msk.f32.gmra.mxu0 %vm358_vm1, %v61_v58  ;;  %3222 = vmatmul.msk.f32.gmra.mxu1 %vm358_vm1, %v146_v59  ;;  %v65_v59 = vld [vmem:[%s6527_s0 + $0x198] sm:$0xff]  ;;  %v150_v60 = vld [vmem:[%s6527_s0 + $0x440] sm:$0xff] }
 0x17f   :  { %v2693_v4 = vmax.f32 %v2250_v63, 0.0 }
 0x180   :  { %2778 = vst.msk [vmem:[%s6529_s3 + $0xf8] sm:$0xff] %vm2746_vm2, %v2439_v1  ;;  %v1997_v5 = vpop.f32.mrf.mxu2  ;;  %3392 = vmatmul.msk.f32.gmra.mxu3 %vm358_vm1, %v316_v0  ;;  %v320_v1 = vld [vmem:[%s6527_s0 + $0x990] sm:$0xff] }
 0x181   :  { %2863 = vst.msk [vmem:[%s6529_s3 + $0x3a0] sm:$0xff] %vm2746_vm2, %v2524_v3  ;;  %v1998_v6 = vadd.f32 %v4491_v29, %v1997_v5 }
 0x182   :  { %3032 = vst.msk [vmem:[%s6529_s3 + $0x8e8] sm:$0xff] %vm2746_vm2, %v2693_v4 }
 0x183   :  { %v2609_v8 = vmax.f32 %v1998_v6, 0.0  ;;  %v1490_v9 = vpop.f32.mrf.mxu0  ;;  %v1745_v10 = vpop.f32.mrf.mxu1 }
 0x184   :  { %v1491_v13 = vadd.f32 %v4491_v29, %v1490_v9  ;;  %v1746_v14 = vadd.f32 %v4491_v29, %v1745_v10  ;;  %v2252_v15 = vpop.f32.mrf.mxu3 }
 0x185   :  { %2948 = vst.msk [vmem:[%s6529_s3 + $0x648] sm:$0xff] %vm2746_vm2, %v2609_v8  ;;  %3308 = vmatmul.msk.f32.gmra.mxu2 %vm358_vm1, %v232_v7  ;;  %v2253_v16 = vadd.f32 %v4491_v29, %v2252_v15  ;;  %v236_v8 = vld [vmem:[%s6527_s0 + $0x6f0] sm:$0xff] }
 0x186   :  { %v2440_v18 = vmax.f32 %v1491_v13, 0.0  ;;  %v2525_v19 = vmax.f32 %v1746_v14, 0.0  ;;  %3138 = vmatmul.msk.f32.gmra.mxu0 %vm358_vm1, %v62_v11  ;;  %3223 = vmatmul.msk.f32.gmra.mxu1 %vm358_vm1, %v147_v12  ;;  %v66_v12 = vld [vmem:[%s6527_s0 + $0x1a0] sm:$0xff]  ;;  %v151_v13 = vld [vmem:[%s6527_s0 + $0x448] sm:$0xff] }
 0x187   :  { %v2694_v20 = vmax.f32 %v2253_v16, 0.0 }
 0x188   :  { %2779 = vst.msk [vmem:[%s6529_s3 + $0x100] sm:$0xff] %vm2746_vm2, %v2440_v18  ;;  %v2000_v21 = vpop.f32.mrf.mxu2  ;;  %3393 = vmatmul.msk.f32.gmra.mxu3 %vm358_vm1, %v317_v17  ;;  %v321_v18 = vld [vmem:[%s6527_s0 + $0x998] sm:$0xff] }
 0x189   :  { %2864 = vst.msk [vmem:[%s6529_s3 + $0x3a8] sm:$0xff] %vm2746_vm2, %v2525_v19  ;;  %v2001_v22 = vadd.f32 %v4491_v29, %v2000_v21 }
 0x18a   :  { %3033 = vst.msk [vmem:[%s6529_s3 + $0x8f0] sm:$0xff] %vm2746_vm2, %v2694_v20 }
 0x18b   :  { %v2610_v24 = vmax.f32 %v2001_v22, 0.0  ;;  %v1493_v25 = vpop.f32.mrf.mxu0  ;;  %v1748_v26 = vpop.f32.mrf.mxu1 }
 0x18c   :  { %v1494_v30 = vadd.f32 %v4491_v29, %v1493_v25  ;;  %v1749_v31 = vadd.f32 %v4491_v29, %v1748_v26  ;;  %v2255_v2 = vpop.f32.mrf.mxu3 }
 0x18d   :  { %2949 = vst.msk [vmem:[%s6529_s3 + $0x650] sm:$0xff] %vm2746_vm2, %v2610_v24  ;;  %3309 = vmatmul.msk.f32.gmra.mxu2 %vm358_vm1, %v233_v23  ;;  %v2256_v32 = vadd.f32 %v4491_v29, %v2255_v2  ;;  %v237_v24 = vld [vmem:[%s6527_s0 + $0x6f8] sm:$0xff] }
 0x18e   :  { %v2441_v34 = vmax.f32 %v1494_v30, 0.0  ;;  %v2526_v35 = vmax.f32 %v1749_v31, 0.0  ;;  %3139 = vmatmul.msk.f32.gmra.mxu0 %vm358_vm1, %v63_v27  ;;  %3224 = vmatmul.msk.f32.gmra.mxu1 %vm358_vm1, %v148_v28  ;;  %v67_v28 = vld [vmem:[%s6527_s0 + $0x1a8] sm:$0xff]  ;;  %v152_v30 = vld [vmem:[%s6527_s0 + $0x450] sm:$0xff] }
 0x18f   :  { %v2695_v36 = vmax.f32 %v2256_v32, 0.0 }
 0x190   :  { %2780 = vst.msk [vmem:[%s6529_s3 + $0x108] sm:$0xff] %vm2746_vm2, %v2441_v34  ;;  %v2003_v37 = vpop.f32.mrf.mxu2  ;;  %3394 = vmatmul.msk.f32.gmra.mxu3 %vm358_vm1, %v318_v33  ;;  %v322_v34 = vld [vmem:[%s6527_s0 + $0x9a0] sm:$0xff] }
 0x191   :  { %2865 = vst.msk [vmem:[%s6529_s3 + $0x3b0] sm:$0xff] %vm2746_vm2, %v2526_v35  ;;  %v2004_v38 = vadd.f32 %v4491_v29, %v2003_v37 }
 0x192   :  { %3034 = vst.msk [vmem:[%s6529_s3 + $0x8f8] sm:$0xff] %vm2746_vm2, %v2695_v36 }
 0x193   :  { %v2611_v40 = vmax.f32 %v2004_v38, 0.0  ;;  %v1496_v41 = vpop.f32.mrf.mxu0  ;;  %v1751_v42 = vpop.f32.mrf.mxu1 }
 0x194   :  { %v1497_v45 = vadd.f32 %v4491_v29, %v1496_v41  ;;  %v1752_v46 = vadd.f32 %v4491_v29, %v1751_v42  ;;  %v2258_v47 = vpop.f32.mrf.mxu3 }
 0x195   :  { %2950 = vst.msk [vmem:[%s6529_s3 + $0x658] sm:$0xff] %vm2746_vm2, %v2611_v40  ;;  %3310 = vmatmul.msk.f32.gmra.mxu2 %vm358_vm1, %v234_v39  ;;  %v2259_v48 = vadd.f32 %v4491_v29, %v2258_v47  ;;  %v238_v40 = vld [vmem:[%s6527_s0 + $0x700] sm:$0xff] }
 0x196   :  { %v2442_v50 = vmax.f32 %v1497_v45, 0.0  ;;  %v2527_v51 = vmax.f32 %v1752_v46, 0.0  ;;  %3140 = vmatmul.msk.f32.gmra.mxu0 %vm358_vm1, %v64_v43  ;;  %3225 = vmatmul.msk.f32.gmra.mxu1 %vm358_vm1, %v149_v44  ;;  %v68_v44 = vld [vmem:[%s6527_s0 + $0x1b0] sm:$0xff]  ;;  %v153_v45 = vld [vmem:[%s6527_s0 + $0x458] sm:$0xff] }
 0x197   :  { %v2696_v52 = vmax.f32 %v2259_v48, 0.0 }
 0x198   :  { %2781 = vst.msk [vmem:[%s6529_s3 + $0x110] sm:$0xff] %vm2746_vm2, %v2442_v50  ;;  %v2006_v53 = vpop.f32.mrf.mxu2  ;;  %3395 = vmatmul.msk.f32.gmra.mxu3 %vm358_vm1, %v319_v49  ;;  %v323_v50 = vld [vmem:[%s6527_s0 + $0x9a8] sm:$0xff] }
 0x199   :  { %2866 = vst.msk [vmem:[%s6529_s3 + $0x3b8] sm:$0xff] %vm2746_vm2, %v2527_v51  ;;  %v2007_v54 = vadd.f32 %v4491_v29, %v2006_v53 }
 0x19a   :  { %3035 = vst.msk [vmem:[%s6529_s3 + $0x900] sm:$0xff] %vm2746_vm2, %v2696_v52 }
 0x19b   :  { %v2612_v56 = vmax.f32 %v2007_v54, 0.0  ;;  %v1499_v57 = vpop.f32.mrf.mxu0  ;;  %v1754_v58 = vpop.f32.mrf.mxu1 }
 0x19c   :  { %v1500_v61 = vadd.f32 %v4491_v29, %v1499_v57  ;;  %v1755_v62 = vadd.f32 %v4491_v29, %v1754_v58  ;;  %v2261_v63 = vpop.f32.mrf.mxu3 }
 0x19d   :  { %2951 = vst.msk [vmem:[%s6529_s3 + $0x660] sm:$0xff] %vm2746_vm2, %v2612_v56  ;;  %3311 = vmatmul.msk.f32.gmra.mxu2 %vm358_vm1, %v235_v55  ;;  %v2262_v0 = vadd.f32 %v4491_v29, %v2261_v63  ;;  %v239_v56 = vld [vmem:[%s6527_s0 + $0x708] sm:$0xff] }
 0x19e   :  { %v2443_v3 = vmax.f32 %v1500_v61, 0.0  ;;  %v2528_v4 = vmax.f32 %v1755_v62, 0.0  ;;  %3141 = vmatmul.msk.f32.gmra.mxu0 %vm358_vm1, %v65_v59  ;;  %3226 = vmatmul.msk.f32.gmra.mxu1 %vm358_vm1, %v150_v60  ;;  %v69_v60 = vld [vmem:[%s6527_s0 + $0x1b8] sm:$0xff]  ;;  %v154_v61 = vld [vmem:[%s6527_s0 + $0x460] sm:$0xff] }
 0x19f   :  { %v2697_v5 = vmax.f32 %v2262_v0, 0.0 }
 0x1a0   :  { %2782 = vst.msk [vmem:[%s6529_s3 + $0x118] sm:$0xff] %vm2746_vm2, %v2443_v3  ;;  %v2009_v6 = vpop.f32.mrf.mxu2  ;;  %3396 = vmatmul.msk.f32.gmra.mxu3 %vm358_vm1, %v320_v1  ;;  %v324_v3 = vld [vmem:[%s6527_s0 + $0x9b0] sm:$0xff] }
 0x1a1   :  { %2867 = vst.msk [vmem:[%s6529_s3 + $0x3c0] sm:$0xff] %vm2746_vm2, %v2528_v4  ;;  %v2010_v7 = vadd.f32 %v4491_v29, %v2009_v6 }
 0x1a2   :  { %3036 = vst.msk [vmem:[%s6529_s3 + $0x908] sm:$0xff] %vm2746_vm2, %v2697_v5 }
 0x1a3   :  { %v2613_v9 = vmax.f32 %v2010_v7, 0.0  ;;  %v1502_v10 = vpop.f32.mrf.mxu0  ;;  %v1757_v11 = vpop.f32.mrf.mxu1 }
 0x1a4   :  { %v1503_v14 = vadd.f32 %v4491_v29, %v1502_v10  ;;  %v1758_v15 = vadd.f32 %v4491_v29, %v1757_v11  ;;  %v2264_v16 = vpop.f32.mrf.mxu3 }
 0x1a5   :  { %2952 = vst.msk [vmem:[%s6529_s3 + $0x668] sm:$0xff] %vm2746_vm2, %v2613_v9  ;;  %3312 = vmatmul.msk.f32.gmra.mxu2 %vm358_vm1, %v236_v8  ;;  %v2265_v17 = vadd.f32 %v4491_v29, %v2264_v16  ;;  %v240_v9 = vld [vmem:[%s6527_s0 + $0x710] sm:$0xff] }
 0x1a6   :  { %v2444_v19 = vmax.f32 %v1503_v14, 0.0  ;;  %v2529_v20 = vmax.f32 %v1758_v15, 0.0  ;;  %3142 = vmatmul.msk.f32.gmra.mxu0 %vm358_vm1, %v66_v12  ;;  %3227 = vmatmul.msk.f32.gmra.mxu1 %vm358_vm1, %v151_v13  ;;  %v70_v13 = vld [vmem:[%s6527_s0 + $0x1c0] sm:$0xff]  ;;  %v155_v14 = vld [vmem:[%s6527_s0 + $0x468] sm:$0xff] }
 0x1a7   :  { %v2698_v21 = vmax.f32 %v2265_v17, 0.0 }
 0x1a8   :  { %2783 = vst.msk [vmem:[%s6529_s3 + $0x120] sm:$0xff] %vm2746_vm2, %v2444_v19  ;;  %v2012_v22 = vpop.f32.mrf.mxu2  ;;  %3397 = vmatmul.msk.f32.gmra.mxu3 %vm358_vm1, %v321_v18  ;;  %v325_v19 = vld [vmem:[%s6527_s0 + $0x9b8] sm:$0xff] }
 0x1a9   :  { %2868 = vst.msk [vmem:[%s6529_s3 + $0x3c8] sm:$0xff] %vm2746_vm2, %v2529_v20  ;;  %v2013_v23 = vadd.f32 %v4491_v29, %v2012_v22 }
 0x1aa   :  { %3037 = vst.msk [vmem:[%s6529_s3 + $0x910] sm:$0xff] %vm2746_vm2, %v2698_v21 }
 0x1ab   :  { %v2614_v25 = vmax.f32 %v2013_v23, 0.0  ;;  %v1505_v26 = vpop.f32.mrf.mxu0  ;;  %v1760_v27 = vpop.f32.mrf.mxu1 }
 0x1ac   :  { %v1506_v31 = vadd.f32 %v4491_v29, %v1505_v26  ;;  %v1761_v2 = vadd.f32 %v4491_v29, %v1760_v27  ;;  %v2267_v32 = vpop.f32.mrf.mxu3 }
 0x1ad   :  { %2953 = vst.msk [vmem:[%s6529_s3 + $0x670] sm:$0xff] %vm2746_vm2, %v2614_v25  ;;  %3313 = vmatmul.msk.f32.gmra.mxu2 %vm358_vm1, %v237_v24  ;;  %v2268_v33 = vadd.f32 %v4491_v29, %v2267_v32  ;;  %v241_v25 = vld [vmem:[%s6527_s0 + $0x718] sm:$0xff] }
 0x1ae   :  { %v2445_v35 = vmax.f32 %v1506_v31, 0.0  ;;  %v2530_v36 = vmax.f32 %v1761_v2, 0.0  ;;  %3143 = vmatmul.msk.f32.gmra.mxu0 %vm358_vm1, %v67_v28  ;;  %3228 = vmatmul.msk.f32.gmra.mxu1 %vm358_vm1, %v152_v30  ;;  %v71_v30 = vld [vmem:[%s6527_s0 + $0x1c8] sm:$0xff]  ;;  %v156_v31 = vld [vmem:[%s6527_s0 + $0x470] sm:$0xff] }
 0x1af   :  { %v2699_v37 = vmax.f32 %v2268_v33, 0.0 }
 0x1b0   :  { %2784 = vst.msk [vmem:[%s6529_s3 + $0x128] sm:$0xff] %vm2746_vm2, %v2445_v35  ;;  %v2015_v38 = vpop.f32.mrf.mxu2  ;;  %3398 = vmatmul.msk.f32.gmra.mxu3 %vm358_vm1, %v322_v34  ;;  %v326_v35 = vld [vmem:[%s6527_s0 + $0x9c0] sm:$0xff] }
 0x1b1   :  { %2869 = vst.msk [vmem:[%s6529_s3 + $0x3d0] sm:$0xff] %vm2746_vm2, %v2530_v36  ;;  %v2016_v39 = vadd.f32 %v4491_v29, %v2015_v38 }
 0x1b2   :  { %3038 = vst.msk [vmem:[%s6529_s3 + $0x918] sm:$0xff] %vm2746_vm2, %v2699_v37 }
 0x1b3   :  { %v2615_v41 = vmax.f32 %v2016_v39, 0.0  ;;  %v1508_v42 = vpop.f32.mrf.mxu0  ;;  %v1763_v43 = vpop.f32.mrf.mxu1 }
 0x1b4   :  { %v1509_v46 = vadd.f32 %v4491_v29, %v1508_v42  ;;  %v1764_v47 = vadd.f32 %v4491_v29, %v1763_v43  ;;  %v2270_v48 = vpop.f32.mrf.mxu3 }
 0x1b5   :  { %2954 = vst.msk [vmem:[%s6529_s3 + $0x678] sm:$0xff] %vm2746_vm2, %v2615_v41  ;;  %3314 = vmatmul.msk.f32.gmra.mxu2 %vm358_vm1, %v238_v40  ;;  %v2271_v49 = vadd.f32 %v4491_v29, %v2270_v48  ;;  %v242_v41 = vld [vmem:[%s6527_s0 + $0x720] sm:$0xff] }
 0x1b6   :  { %v2446_v51 = vmax.f32 %v1509_v46, 0.0  ;;  %v2531_v52 = vmax.f32 %v1764_v47, 0.0  ;;  %3144 = vmatmul.msk.f32.gmra.mxu0 %vm358_vm1, %v68_v44  ;;  %3229 = vmatmul.msk.f32.gmra.mxu1 %vm358_vm1, %v153_v45  ;;  %v72_v45 = vld [vmem:[%s6527_s0 + $0x1d0] sm:$0xff]  ;;  %v157_v46 = vld [vmem:[%s6527_s0 + $0x478] sm:$0xff] }
 0x1b7   :  { %v2700_v53 = vmax.f32 %v2271_v49, 0.0 }
 0x1b8   :  { %2785 = vst.msk [vmem:[%s6529_s3 + $0x130] sm:$0xff] %vm2746_vm2, %v2446_v51  ;;  %v2018_v54 = vpop.f32.mrf.mxu2  ;;  %3399 = vmatmul.msk.f32.gmra.mxu3 %vm358_vm1, %v323_v50  ;;  %v327_v51 = vld [vmem:[%s6527_s0 + $0x9c8] sm:$0xff] }
 0x1b9   :  { %2870 = vst.msk [vmem:[%s6529_s3 + $0x3d8] sm:$0xff] %vm2746_vm2, %v2531_v52  ;;  %v2019_v55 = vadd.f32 %v4491_v29, %v2018_v54 }
 0x1ba   :  { %3039 = vst.msk [vmem:[%s6529_s3 + $0x920] sm:$0xff] %vm2746_vm2, %v2700_v53 }
 0x1bb   :  { %v2616_v57 = vmax.f32 %v2019_v55, 0.0  ;;  %v1511_v58 = vpop.f32.mrf.mxu0  ;;  %v1766_v59 = vpop.f32.mrf.mxu1 }
 0x1bc   :  { %v1512_v62 = vadd.f32 %v4491_v29, %v1511_v58  ;;  %v1767_v63 = vadd.f32 %v4491_v29, %v1766_v59  ;;  %v2273_v0 = vpop.f32.mrf.mxu3 }
 0x1bd   :  { %2955 = vst.msk [vmem:[%s6529_s3 + $0x680] sm:$0xff] %vm2746_vm2, %v2616_v57  ;;  %3315 = vmatmul.msk.f32.gmra.mxu2 %vm358_vm1, %v239_v56  ;;  %v2274_v1 = vadd.f32 %v4491_v29, %v2273_v0  ;;  %v243_v57 = vld [vmem:[%s6527_s0 + $0x728] sm:$0xff] }
 0x1be   :  { %v2447_v4 = vmax.f32 %v1512_v62, 0.0  ;;  %v2532_v5 = vmax.f32 %v1767_v63, 0.0  ;;  %3145 = vmatmul.msk.f32.gmra.mxu0 %vm358_vm1, %v69_v60  ;;  %3230 = vmatmul.msk.f32.gmra.mxu1 %vm358_vm1, %v154_v61  ;;  %v73_v61 = vld [vmem:[%s6527_s0 + $0x1d8] sm:$0xff]  ;;  %v158_v62 = vld [vmem:[%s6527_s0 + $0x480] sm:$0xff] }
 0x1bf   :  { %v2701_v6 = vmax.f32 %v2274_v1, 0.0 }
 0x1c0   :  { %2786 = vst.msk [vmem:[%s6529_s3 + $0x138] sm:$0xff] %vm2746_vm2, %v2447_v4  ;;  %v2021_v7 = vpop.f32.mrf.mxu2  ;;  %3400 = vmatmul.msk.f32.gmra.mxu3 %vm358_vm1, %v324_v3  ;;  %v328_v4 = vld [vmem:[%s6527_s0 + $0x9d0] sm:$0xff] }
 0x1c1   :  { %2871 = vst.msk [vmem:[%s6529_s3 + $0x3e0] sm:$0xff] %vm2746_vm2, %v2532_v5  ;;  %v2022_v8 = vadd.f32 %v4491_v29, %v2021_v7 }
 0x1c2   :  { %3040 = vst.msk [vmem:[%s6529_s3 + $0x928] sm:$0xff] %vm2746_vm2, %v2701_v6 }
 0x1c3   :  { %v2617_v10 = vmax.f32 %v2022_v8, 0.0  ;;  %v1514_v11 = vpop.f32.mrf.mxu0  ;;  %v1769_v12 = vpop.f32.mrf.mxu1 }
 0x1c4   :  { %v1515_v15 = vadd.f32 %v4491_v29, %v1514_v11  ;;  %v1770_v16 = vadd.f32 %v4491_v29, %v1769_v12  ;;  %v2276_v17 = vpop.f32.mrf.mxu3 }
 0x1c5   :  { %2956 = vst.msk [vmem:[%s6529_s3 + $0x688] sm:$0xff] %vm2746_vm2, %v2617_v10  ;;  %3316 = vmatmul.msk.f32.gmra.mxu2 %vm358_vm1, %v240_v9  ;;  %v2277_v18 = vadd.f32 %v4491_v29, %v2276_v17  ;;  %v244_v10 = vld [vmem:[%s6527_s0 + $0x730] sm:$0xff] }
 0x1c6   :  { %v2448_v20 = vmax.f32 %v1515_v15, 0.0  ;;  %v2533_v21 = vmax.f32 %v1770_v16, 0.0  ;;  %3146 = vmatmul.msk.f32.gmra.mxu0 %vm358_vm1, %v70_v13  ;;  %3231 = vmatmul.msk.f32.gmra.mxu1 %vm358_vm1, %v155_v14  ;;  %v74_v14 = vld [vmem:[%s6527_s0 + $0x1e0] sm:$0xff]  ;;  %v159_v15 = vld [vmem:[%s6527_s0 + $0x488] sm:$0xff] }
 0x1c7   :  { %v2702_v22 = vmax.f32 %v2277_v18, 0.0 }
 0x1c8   :  { %2787 = vst.msk [vmem:[%s6529_s3 + $0x140] sm:$0xff] %vm2746_vm2, %v2448_v20  ;;  %v2024_v23 = vpop.f32.mrf.mxu2  ;;  %3401 = vmatmul.msk.f32.gmra.mxu3 %vm358_vm1, %v325_v19  ;;  %v329_v20 = vld [vmem:[%s6527_s0 + $0x9d8] sm:$0xff] }
 0x1c9   :  { %2872 = vst.msk [vmem:[%s6529_s3 + $0x3e8] sm:$0xff] %vm2746_vm2, %v2533_v21  ;;  %v2025_v24 = vadd.f32 %v4491_v29, %v2024_v23 }
 0x1ca   :  { %3041 = vst.msk [vmem:[%s6529_s3 + $0x930] sm:$0xff] %vm2746_vm2, %v2702_v22 }
 0x1cb   :  { %v2618_v26 = vmax.f32 %v2025_v24, 0.0  ;;  %v1517_v27 = vpop.f32.mrf.mxu0  ;;  %v1772_v28 = vpop.f32.mrf.mxu1 }
 0x1cc   :  { %v1518_v2 = vadd.f32 %v4491_v29, %v1517_v27  ;;  %v1773_v32 = vadd.f32 %v4491_v29, %v1772_v28  ;;  %v2279_v33 = vpop.f32.mrf.mxu3 }
 0x1cd   :  { %2957 = vst.msk [vmem:[%s6529_s3 + $0x690] sm:$0xff] %vm2746_vm2, %v2618_v26  ;;  %3317 = vmatmul.msk.f32.gmra.mxu2 %vm358_vm1, %v241_v25  ;;  %v2280_v34 = vadd.f32 %v4491_v29, %v2279_v33  ;;  %v245_v26 = vld [vmem:[%s6527_s0 + $0x738] sm:$0xff] }
 0x1ce   :  { %v2449_v36 = vmax.f32 %v1518_v2, 0.0  ;;  %v2534_v37 = vmax.f32 %v1773_v32, 0.0  ;;  %3147 = vmatmul.msk.f32.gmra.mxu0 %vm358_vm1, %v71_v30  ;;  %3232 = vmatmul.msk.f32.gmra.mxu1 %vm358_vm1, %v156_v31  ;;  %v75_v31 = vld [vmem:[%s6527_s0 + $0x1e8] sm:$0xff]  ;;  %v160_v2 = vld [vmem:[%s6527_s0 + $0x490] sm:$0xff] }
 0x1cf   :  { %v2703_v38 = vmax.f32 %v2280_v34, 0.0 }
 0x1d0   :  { %2788 = vst.msk [vmem:[%s6529_s3 + $0x148] sm:$0xff] %vm2746_vm2, %v2449_v36  ;;  %v2027_v39 = vpop.f32.mrf.mxu2  ;;  %3402 = vmatmul.msk.f32.gmra.mxu3 %vm358_vm1, %v326_v35  ;;  %v330_v36 = vld [vmem:[%s6527_s0 + $0x9e0] sm:$0xff] }
 0x1d1   :  { %2873 = vst.msk [vmem:[%s6529_s3 + $0x3f0] sm:$0xff] %vm2746_vm2, %v2534_v37  ;;  %v2028_v40 = vadd.f32 %v4491_v29, %v2027_v39 }
 0x1d2   :  { %3042 = vst.msk [vmem:[%s6529_s3 + $0x938] sm:$0xff] %vm2746_vm2, %v2703_v38 }
 0x1d3   :  { %v2619_v42 = vmax.f32 %v2028_v40, 0.0  ;;  %v1520_v43 = vpop.f32.mrf.mxu0  ;;  %v1775_v44 = vpop.f32.mrf.mxu1 }
 0x1d4   :  { %v1521_v47 = vadd.f32 %v4491_v29, %v1520_v43  ;;  %v1776_v48 = vadd.f32 %v4491_v29, %v1775_v44  ;;  %v2282_v49 = vpop.f32.mrf.mxu3 }
 0x1d5   :  { %2958 = vst.msk [vmem:[%s6529_s3 + $0x698] sm:$0xff] %vm2746_vm2, %v2619_v42  ;;  %3318 = vmatmul.msk.f32.gmra.mxu2 %vm358_vm1, %v242_v41  ;;  %v2283_v50 = vadd.f32 %v4491_v29, %v2282_v49  ;;  %v5267_v29 = vld [vmem:[%s6528_s2] ss:$0 sm:$0xff] }
 0x1d6   :  { %v2450_v52 = vmax.f32 %v1521_v47, 0.0  ;;  %v2535_v53 = vmax.f32 %v1776_v48, 0.0  ;;  %3148 = vmatmul.msk.f32.gmra.mxu0 %vm358_vm1, %v72_v45  ;;  %3233 = vmatmul.msk.f32.gmra.mxu1 %vm358_vm1, %v157_v46  ;;  %v246_v42 = vld [vmem:[%s6527_s0 + $0x740] sm:$0xff]  ;;  %v76_v46 = vld [vmem:[%s6527_s0 + $0x1f0] sm:$0xff]  ;;  %v161_v47 = vld [vmem:[%s6527_s0 + $0x498] sm:$0xff] }
 0x1d7   :  { %v2704_v54 = vmax.f32 %v2283_v50, 0.0 }
 0x1d8   :  { %2789 = vst.msk [vmem:[%s6529_s3 + $0x150] sm:$0xff] %vm2746_vm2, %v2450_v52  ;;  %v2030_v55 = vpop.f32.mrf.mxu2  ;;  %3403 = vmatmul.msk.f32.gmra.mxu3 %vm358_vm1, %v327_v51  ;;  %v331_v52 = vld [vmem:[%s6527_s0 + $0x9e8] sm:$0xff] }
 0x1d9   :  { %2874 = vst.msk [vmem:[%s6529_s3 + $0x3f8] sm:$0xff] %vm2746_vm2, %v2535_v53  ;;  %v2031_v56 = vadd.f32 %v5267_v29, %v2030_v55 }
 0x1da   :  { %3043 = vst.msk [vmem:[%s6529_s3 + $0x940] sm:$0xff] %vm2746_vm2, %v2704_v54 }
 0x1db   :  { %v2620_v58 = vmax.f32 %v2031_v56, 0.0  ;;  %v1523_v59 = vpop.f32.mrf.mxu0  ;;  %v1778_v60 = vpop.f32.mrf.mxu1 }
 0x1dc   :  { %v1524_v63 = vadd.f32 %v5267_v29, %v1523_v59  ;;  %v1779_v0 = vadd.f32 %v5267_v29, %v1778_v60  ;;  %v2285_v1 = vpop.f32.mrf.mxu3 }
 0x1dd   :  { %2959 = vst.msk [vmem:[%s6529_s3 + $0x6a0] sm:$0xff] %vm2746_vm2, %v2620_v58  ;;  %3319 = vmatmul.msk.f32.gmra.mxu2 %vm358_vm1, %v243_v57  ;;  %v2286_v3 = vadd.f32 %v5267_v29, %v2285_v1  ;;  %v247_v58 = vld [vmem:[%s6527_s0 + $0x748] sm:$0xff] }
 0x1de   :  { %v2451_v5 = vmax.f32 %v1524_v63, 0.0  ;;  %v2536_v6 = vmax.f32 %v1779_v0, 0.0  ;;  %3149 = vmatmul.msk.f32.gmra.mxu0 %vm358_vm1, %v73_v61  ;;  %3234 = vmatmul.msk.f32.gmra.mxu1 %vm358_vm1, %v158_v62  ;;  %v77_v62 = vld [vmem:[%s6527_s0 + $0x1f8] sm:$0xff]  ;;  %v162_v63 = vld [vmem:[%s6527_s0 + $0x4a0] sm:$0xff] }
 0x1df   :  { %v2705_v7 = vmax.f32 %v2286_v3, 0.0 }
 0x1e0   :  { %2790 = vst.msk [vmem:[%s6529_s3 + $0x158] sm:$0xff] %vm2746_vm2, %v2451_v5  ;;  %v2033_v8 = vpop.f32.mrf.mxu2  ;;  %3404 = vmatmul.msk.f32.gmra.mxu3 %vm358_vm1, %v328_v4  ;;  %v332_v5 = vld [vmem:[%s6527_s0 + $0x9f0] sm:$0xff] }
 0x1e1   :  { %2875 = vst.msk [vmem:[%s6529_s3 + $0x400] sm:$0xff] %vm2746_vm2, %v2536_v6  ;;  %v2034_v9 = vadd.f32 %v5267_v29, %v2033_v8 }
 0x1e2   :  { %3044 = vst.msk [vmem:[%s6529_s3 + $0x948] sm:$0xff] %vm2746_vm2, %v2705_v7 }
 0x1e3   :  { %v2621_v11 = vmax.f32 %v2034_v9, 0.0  ;;  %v1526_v12 = vpop.f32.mrf.mxu0  ;;  %v1781_v13 = vpop.f32.mrf.mxu1 }
 0x1e4   :  { %v1527_v16 = vadd.f32 %v5267_v29, %v1526_v12  ;;  %v1782_v17 = vadd.f32 %v5267_v29, %v1781_v13  ;;  %v2288_v18 = vpop.f32.mrf.mxu3 }
 0x1e5   :  { %2960 = vst.msk [vmem:[%s6529_s3 + $0x6a8] sm:$0xff] %vm2746_vm2, %v2621_v11  ;;  %3320 = vmatmul.msk.f32.gmra.mxu2 %vm358_vm1, %v244_v10  ;;  %v2289_v19 = vadd.f32 %v5267_v29, %v2288_v18  ;;  %v248_v11 = vld [vmem:[%s6527_s0 + $0x750] sm:$0xff] }
 0x1e6   :  { %v2452_v21 = vmax.f32 %v1527_v16, 0.0  ;;  %v2537_v22 = vmax.f32 %v1782_v17, 0.0  ;;  %3150 = vmatmul.msk.f32.gmra.mxu0 %vm358_vm1, %v74_v14  ;;  %3235 = vmatmul.msk.f32.gmra.mxu1 %vm358_vm1, %v159_v15  ;;  %v78_v15 = vld [vmem:[%s6527_s0 + $0x200] sm:$0xff]  ;;  %v163_v16 = vld [vmem:[%s6527_s0 + $0x4a8] sm:$0xff] }
 0x1e7   :  { %v2706_v23 = vmax.f32 %v2289_v19, 0.0 }
 0x1e8   :  { %2791 = vst.msk [vmem:[%s6529_s3 + $0x160] sm:$0xff] %vm2746_vm2, %v2452_v21  ;;  %v2036_v24 = vpop.f32.mrf.mxu2  ;;  %3405 = vmatmul.msk.f32.gmra.mxu3 %vm358_vm1, %v329_v20  ;;  %v333_v21 = vld [vmem:[%s6527_s0 + $0x9f8] sm:$0xff] }
 0x1e9   :  { %2876 = vst.msk [vmem:[%s6529_s3 + $0x408] sm:$0xff] %vm2746_vm2, %v2537_v22  ;;  %v2037_v25 = vadd.f32 %v5267_v29, %v2036_v24 }
 0x1ea   :  { %3045 = vst.msk [vmem:[%s6529_s3 + $0x950] sm:$0xff] %vm2746_vm2, %v2706_v23 }
 0x1eb   :  { %v2622_v27 = vmax.f32 %v2037_v25, 0.0  ;;  %v1529_v28 = vpop.f32.mrf.mxu0  ;;  %v1784_v30 = vpop.f32.mrf.mxu1 }
 0x1ec   :  { %v1530_v32 = vadd.f32 %v5267_v29, %v1529_v28  ;;  %v1785_v33 = vadd.f32 %v5267_v29, %v1784_v30  ;;  %v2291_v34 = vpop.f32.mrf.mxu3 }
 0x1ed   :  { %2961 = vst.msk [vmem:[%s6529_s3 + $0x6b0] sm:$0xff] %vm2746_vm2, %v2622_v27  ;;  %3321 = vmatmul.msk.f32.gmra.mxu2 %vm358_vm1, %v245_v26  ;;  %v2292_v35 = vadd.f32 %v5267_v29, %v2291_v34  ;;  %v249_v27 = vld [vmem:[%s6527_s0 + $0x758] sm:$0xff] }
 0x1ee   :  { %v2453_v37 = vmax.f32 %v1530_v32, 0.0  ;;  %v2538_v38 = vmax.f32 %v1785_v33, 0.0  ;;  %3151 = vmatmul.msk.f32.gmra.mxu0 %vm358_vm1, %v75_v31  ;;  %3236 = vmatmul.msk.f32.gmra.mxu1 %vm358_vm1, %v160_v2  ;;  %v79_v2 = vld [vmem:[%s6527_s0 + $0x208] sm:$0xff]  ;;  %v164_v32 = vld [vmem:[%s6527_s0 + $0x4b0] sm:$0xff] }
 0x1ef   :  { %v2707_v39 = vmax.f32 %v2292_v35, 0.0 }
 0x1f0   :  { %2792 = vst.msk [vmem:[%s6529_s3 + $0x168] sm:$0xff] %vm2746_vm2, %v2453_v37  ;;  %v2039_v40 = vpop.f32.mrf.mxu2  ;;  %3406 = vmatmul.msk.f32.gmra.mxu3 %vm358_vm1, %v330_v36  ;;  %v334_v37 = vld [vmem:[%s6527_s0 + $0xa00] sm:$0xff] }
 0x1f1   :  { %2877 = vst.msk [vmem:[%s6529_s3 + $0x410] sm:$0xff] %vm2746_vm2, %v2538_v38  ;;  %v2040_v41 = vadd.f32 %v5267_v29, %v2039_v40 }
 0x1f2   :  { %3046 = vst.msk [vmem:[%s6529_s3 + $0x958] sm:$0xff] %vm2746_vm2, %v2707_v39 }
 0x1f3   :  { %v2623_v43 = vmax.f32 %v2040_v41, 0.0  ;;  %v1532_v44 = vpop.f32.mrf.mxu0  ;;  %v1787_v45 = vpop.f32.mrf.mxu1 }
 0x1f4   :  { %v1533_v48 = vadd.f32 %v5267_v29, %v1532_v44  ;;  %v1788_v49 = vadd.f32 %v5267_v29, %v1787_v45  ;;  %v2294_v50 = vpop.f32.mrf.mxu3 }
 0x1f5   :  { %2962 = vst.msk [vmem:[%s6529_s3 + $0x6b8] sm:$0xff] %vm2746_vm2, %v2623_v43  ;;  %3322 = vmatmul.msk.f32.gmra.mxu2 %vm358_vm1, %v246_v42  ;;  %v2295_v51 = vadd.f32 %v5267_v29, %v2294_v50  ;;  %v250_v43 = vld [vmem:[%s6527_s0 + $0x760] sm:$0xff] }
 0x1f6   :  { %v2454_v53 = vmax.f32 %v1533_v48, 0.0  ;;  %v2539_v54 = vmax.f32 %v1788_v49, 0.0  ;;  %3152 = vmatmul.msk.f32.gmra.mxu0 %vm358_vm1, %v76_v46  ;;  %3237 = vmatmul.msk.f32.gmra.mxu1 %vm358_vm1, %v161_v47  ;;  %v80_v47 = vld [vmem:[%s6527_s0 + $0x210] sm:$0xff]  ;;  %v165_v48 = vld [vmem:[%s6527_s0 + $0x4b8] sm:$0xff] }
 0x1f7   :  { %v2708_v55 = vmax.f32 %v2295_v51, 0.0 }
 0x1f8   :  { %2793 = vst.msk [vmem:[%s6529_s3 + $0x170] sm:$0xff] %vm2746_vm2, %v2454_v53  ;;  %v2042_v56 = vpop.f32.mrf.mxu2  ;;  %3407 = vmatmul.msk.f32.gmra.mxu3 %vm358_vm1, %v331_v52  ;;  %v335_v53 = vld [vmem:[%s6527_s0 + $0xa08] sm:$0xff] }
 0x1f9   :  { %2878 = vst.msk [vmem:[%s6529_s3 + $0x418] sm:$0xff] %vm2746_vm2, %v2539_v54  ;;  %v2043_v57 = vadd.f32 %v5267_v29, %v2042_v56 }
 0x1fa   :  { %3047 = vst.msk [vmem:[%s6529_s3 + $0x960] sm:$0xff] %vm2746_vm2, %v2708_v55 }
 0x1fb   :  { %v2624_v59 = vmax.f32 %v2043_v57, 0.0  ;;  %v1535_v60 = vpop.f32.mrf.mxu0  ;;  %v1790_v61 = vpop.f32.mrf.mxu1 }
 0x1fc   :  { %v1536_v0 = vadd.f32 %v5267_v29, %v1535_v60  ;;  %v1791_v1 = vadd.f32 %v5267_v29, %v1790_v61  ;;  %v2297_v3 = vpop.f32.mrf.mxu3 }
 0x1fd   :  { %2963 = vst.msk [vmem:[%s6529_s3 + $0x6c0] sm:$0xff] %vm2746_vm2, %v2624_v59  ;;  %3323 = vmatmul.msk.f32.gmra.mxu2 %vm358_vm1, %v247_v58  ;;  %v2298_v4 = vadd.f32 %v5267_v29, %v2297_v3  ;;  %v251_v59 = vld [vmem:[%s6527_s0 + $0x768] sm:$0xff] }
 0x1fe   :  { %v2455_v6 = vmax.f32 %v1536_v0, 0.0  ;;  %v2540_v7 = vmax.f32 %v1791_v1, 0.0  ;;  %3153 = vmatmul.msk.f32.gmra.mxu0 %vm358_vm1, %v77_v62  ;;  %3238 = vmatmul.msk.f32.gmra.mxu1 %vm358_vm1, %v162_v63  ;;  %v81_v63 = vld [vmem:[%s6527_s0 + $0x218] sm:$0xff]  ;;  %v166_v0 = vld [vmem:[%s6527_s0 + $0x4c0] sm:$0xff] }
 0x1ff   :  { %v2709_v8 = vmax.f32 %v2298_v4, 0.0 }
 0x200   :  { %2794 = vst.msk [vmem:[%s6529_s3 + $0x178] sm:$0xff] %vm2746_vm2, %v2455_v6  ;;  %v2045_v9 = vpop.f32.mrf.mxu2  ;;  %3408 = vmatmul.msk.f32.gmra.mxu3 %vm358_vm1, %v332_v5  ;;  %v336_v6 = vld [vmem:[%s6527_s0 + $0xa10] sm:$0xff] }
 0x201   :  { %2879 = vst.msk [vmem:[%s6529_s3 + $0x420] sm:$0xff] %vm2746_vm2, %v2540_v7  ;;  %v2046_v10 = vadd.f32 %v5267_v29, %v2045_v9 }
 0x202   :  { %3048 = vst.msk [vmem:[%s6529_s3 + $0x968] sm:$0xff] %vm2746_vm2, %v2709_v8 }
 0x203   :  { %v2625_v12 = vmax.f32 %v2046_v10, 0.0  ;;  %v1538_v13 = vpop.f32.mrf.mxu0  ;;  %v1793_v14 = vpop.f32.mrf.mxu1 }
 0x204   :  { %v1539_v17 = vadd.f32 %v5267_v29, %v1538_v13  ;;  %v1794_v18 = vadd.f32 %v5267_v29, %v1793_v14  ;;  %v2300_v19 = vpop.f32.mrf.mxu3 }
 0x205   :  { %2964 = vst.msk [vmem:[%s6529_s3 + $0x6c8] sm:$0xff] %vm2746_vm2, %v2625_v12  ;;  %3324 = vmatmul.msk.f32.gmra.mxu2 %vm358_vm1, %v248_v11  ;;  %v2301_v20 = vadd.f32 %v5267_v29, %v2300_v19  ;;  %v252_v12 = vld [vmem:[%s6527_s0 + $0x770] sm:$0xff] }
 0x206   :  { %v2456_v22 = vmax.f32 %v1539_v17, 0.0  ;;  %v2541_v23 = vmax.f32 %v1794_v18, 0.0  ;;  %3154 = vmatmul.msk.f32.gmra.mxu0 %vm358_vm1, %v78_v15  ;;  %3239 = vmatmul.msk.f32.gmra.mxu1 %vm358_vm1, %v163_v16  ;;  %v82_v16 = vld [vmem:[%s6527_s0 + $0x220] sm:$0xff]  ;;  %v167_v17 = vld [vmem:[%s6527_s0 + $0x4c8] sm:$0xff] }
 0x207   :  { %v2710_v24 = vmax.f32 %v2301_v20, 0.0 }
 0x208   :  { %2795 = vst.msk [vmem:[%s6529_s3 + $0x180] sm:$0xff] %vm2746_vm2, %v2456_v22  ;;  %v2048_v25 = vpop.f32.mrf.mxu2  ;;  %3409 = vmatmul.msk.f32.gmra.mxu3 %vm358_vm1, %v333_v21  ;;  %v337_v22 = vld [vmem:[%s6527_s0 + $0xa18] sm:$0xff] }
 0x209   :  { %2880 = vst.msk [vmem:[%s6529_s3 + $0x428] sm:$0xff] %vm2746_vm2, %v2541_v23  ;;  %v2049_v26 = vadd.f32 %v5267_v29, %v2048_v25 }
 0x20a   :  { %3049 = vst.msk [vmem:[%s6529_s3 + $0x970] sm:$0xff] %vm2746_vm2, %v2710_v24 }
 0x20b   :  { %v2626_v28 = vmax.f32 %v2049_v26, 0.0  ;;  %v1541_v30 = vpop.f32.mrf.mxu0  ;;  %v1796_v31 = vpop.f32.mrf.mxu1 }
 0x20c   :  { %v1542_v33 = vadd.f32 %v5267_v29, %v1541_v30  ;;  %v1797_v34 = vadd.f32 %v5267_v29, %v1796_v31  ;;  %v2303_v35 = vpop.f32.mrf.mxu3 }
 0x20d   :  { %2965 = vst.msk [vmem:[%s6529_s3 + $0x6d0] sm:$0xff] %vm2746_vm2, %v2626_v28  ;;  %3325 = vmatmul.msk.f32.gmra.mxu2 %vm358_vm1, %v249_v27  ;;  %v2304_v36 = vadd.f32 %v5267_v29, %v2303_v35  ;;  %v253_v28 = vld [vmem:[%s6527_s0 + $0x778] sm:$0xff] }
 0x20e   :  { %v2457_v38 = vmax.f32 %v1542_v33, 0.0  ;;  %v2542_v39 = vmax.f32 %v1797_v34, 0.0  ;;  %3155 = vmatmul.msk.f32.gmra.mxu0 %vm358_vm1, %v79_v2  ;;  %3240 = vmatmul.msk.f32.gmra.mxu1 %vm358_vm1, %v164_v32  ;;  %v83_v32 = vld [vmem:[%s6527_s0 + $0x228] sm:$0xff]  ;;  %v168_v33 = vld [vmem:[%s6527_s0 + $0x4d0] sm:$0xff] }
 0x20f   :  { %v2711_v40 = vmax.f32 %v2304_v36, 0.0 }
 0x210   :  { %2796 = vst.msk [vmem:[%s6529_s3 + $0x188] sm:$0xff] %vm2746_vm2, %v2457_v38  ;;  %v2051_v41 = vpop.f32.mrf.mxu2  ;;  %3410 = vmatmul.msk.f32.gmra.mxu3 %vm358_vm1, %v334_v37  ;;  %v338_v38 = vld [vmem:[%s6527_s0 + $0xa20] sm:$0xff] }
 0x211   :  { %2881 = vst.msk [vmem:[%s6529_s3 + $0x430] sm:$0xff] %vm2746_vm2, %v2542_v39  ;;  %v2052_v42 = vadd.f32 %v5267_v29, %v2051_v41 }
 0x212   :  { %3050 = vst.msk [vmem:[%s6529_s3 + $0x978] sm:$0xff] %vm2746_vm2, %v2711_v40 }
 0x213   :  { %v2627_v44 = vmax.f32 %v2052_v42, 0.0  ;;  %v1544_v45 = vpop.f32.mrf.mxu0  ;;  %v1799_v46 = vpop.f32.mrf.mxu1 }
 0x214   :  { %v1545_v49 = vadd.f32 %v5267_v29, %v1544_v45  ;;  %v1800_v50 = vadd.f32 %v5267_v29, %v1799_v46  ;;  %v2306_v51 = vpop.f32.mrf.mxu3 }
 0x215   :  { %2966 = vst.msk [vmem:[%s6529_s3 + $0x6d8] sm:$0xff] %vm2746_vm2, %v2627_v44  ;;  %3326 = vmatmul.msk.f32.gmra.mxu2 %vm358_vm1, %v250_v43  ;;  %v2307_v52 = vadd.f32 %v5267_v29, %v2306_v51  ;;  %v254_v44 = vld [vmem:[%s6527_s0 + $0x780] sm:$0xff] }
 0x216   :  { %v2458_v54 = vmax.f32 %v1545_v49, 0.0  ;;  %v2543_v55 = vmax.f32 %v1800_v50, 0.0  ;;  %3156 = vmatmul.msk.f32.gmra.mxu0 %vm358_vm1, %v80_v47  ;;  %3241 = vmatmul.msk.f32.gmra.mxu1 %vm358_vm1, %v165_v48  ;;  %v84_v48 = vld [vmem:[%s6527_s0 + $0x230] sm:$0xff]  ;;  %v169_v49 = vld [vmem:[%s6527_s0 + $0x4d8] sm:$0xff] }
 0x217   :  { %v2712_v56 = vmax.f32 %v2307_v52, 0.0 }
 0x218   :  { %2797 = vst.msk [vmem:[%s6529_s3 + $0x190] sm:$0xff] %vm2746_vm2, %v2458_v54  ;;  %v2054_v57 = vpop.f32.mrf.mxu2  ;;  %3411 = vmatmul.msk.f32.gmra.mxu3 %vm358_vm1, %v335_v53  ;;  %v339_v54 = vld [vmem:[%s6527_s0 + $0xa28] sm:$0xff] }
 0x219   :  { %2882 = vst.msk [vmem:[%s6529_s3 + $0x438] sm:$0xff] %vm2746_vm2, %v2543_v55  ;;  %v2055_v58 = vadd.f32 %v5267_v29, %v2054_v57 }
 0x21a   :  { %3051 = vst.msk [vmem:[%s6529_s3 + $0x980] sm:$0xff] %vm2746_vm2, %v2712_v56 }
 0x21b   :  { %v2628_v60 = vmax.f32 %v2055_v58, 0.0  ;;  %v1547_v61 = vpop.f32.mrf.mxu0  ;;  %v1802_v62 = vpop.f32.mrf.mxu1 }
 0x21c   :  { %v1548_v1 = vadd.f32 %v5267_v29, %v1547_v61  ;;  %v1803_v3 = vadd.f32 %v5267_v29, %v1802_v62  ;;  %v2309_v4 = vpop.f32.mrf.mxu3 }
 0x21d   :  { %2967 = vst.msk [vmem:[%s6529_s3 + $0x6e0] sm:$0xff] %vm2746_vm2, %v2628_v60  ;;  %3327 = vmatmul.msk.f32.gmra.mxu2 %vm358_vm1, %v251_v59  ;;  %v2310_v5 = vadd.f32 %v5267_v29, %v2309_v4  ;;  %v255_v60 = vld [vmem:[%s6527_s0 + $0x788] sm:$0xff] }
 0x21e   :  { %v2459_v7 = vmax.f32 %v1548_v1, 0.0  ;;  %v2544_v8 = vmax.f32 %v1803_v3, 0.0  ;;  %3157 = vmatmul.msk.f32.gmra.mxu0 %vm358_vm1, %v81_v63  ;;  %3242 = vmatmul.msk.f32.gmra.mxu1 %vm358_vm1, %v166_v0  ;;  %v85_v0 = vld [vmem:[%s6527_s0 + $0x238] sm:$0xff]  ;;  %v170_v1 = vld [vmem:[%s6527_s0 + $0x4e0] sm:$0xff] }
 0x21f   :  { %v2713_v9 = vmax.f32 %v2310_v5, 0.0 }
 0x220   :  { %2798 = vst.msk [vmem:[%s6529_s3 + $0x198] sm:$0xff] %vm2746_vm2, %v2459_v7  ;;  %v2057_v10 = vpop.f32.mrf.mxu2  ;;  %3412 = vmatmul.msk.f32.gmra.mxu3 %vm358_vm1, %v336_v6  ;;  %v340_v7 = vld [vmem:[%s6527_s0 + $0xa30] sm:$0xff] }
 0x221   :  { %2883 = vst.msk [vmem:[%s6529_s3 + $0x440] sm:$0xff] %vm2746_vm2, %v2544_v8  ;;  %v2058_v11 = vadd.f32 %v5267_v29, %v2057_v10 }
 0x222   :  { %3052 = vst.msk [vmem:[%s6529_s3 + $0x988] sm:$0xff] %vm2746_vm2, %v2713_v9 }
 0x223   :  { %v2629_v13 = vmax.f32 %v2058_v11, 0.0  ;;  %v1550_v14 = vpop.f32.mrf.mxu0  ;;  %v1805_v15 = vpop.f32.mrf.mxu1 }
 0x224   :  { %v1551_v18 = vadd.f32 %v5267_v29, %v1550_v14  ;;  %v1806_v19 = vadd.f32 %v5267_v29, %v1805_v15  ;;  %v2312_v20 = vpop.f32.mrf.mxu3 }
 0x225   :  { %2968 = vst.msk [vmem:[%s6529_s3 + $0x6e8] sm:$0xff] %vm2746_vm2, %v2629_v13  ;;  %3328 = vmatmul.msk.f32.gmra.mxu2 %vm358_vm1, %v252_v12  ;;  %v2313_v21 = vadd.f32 %v5267_v29, %v2312_v20  ;;  %v256_v13 = vld [vmem:[%s6527_s0 + $0x790] sm:$0xff] }
 0x226   :  { %v2460_v23 = vmax.f32 %v1551_v18, 0.0  ;;  %v2545_v24 = vmax.f32 %v1806_v19, 0.0  ;;  %3158 = vmatmul.msk.f32.gmra.mxu0 %vm358_vm1, %v82_v16  ;;  %3243 = vmatmul.msk.f32.gmra.mxu1 %vm358_vm1, %v167_v17  ;;  %v86_v17 = vld [vmem:[%s6527_s0 + $0x240] sm:$0xff]  ;;  %v171_v18 = vld [vmem:[%s6527_s0 + $0x4e8] sm:$0xff] }
 0x227   :  { %v2714_v25 = vmax.f32 %v2313_v21, 0.0 }
 0x228   :  { %2799 = vst.msk [vmem:[%s6529_s3 + $0x1a0] sm:$0xff] %vm2746_vm2, %v2460_v23  ;;  %v2060_v26 = vpop.f32.mrf.mxu2  ;;  %3413 = vmatmul.msk.f32.gmra.mxu3 %vm358_vm1, %v337_v22  ;;  %v341_v23 = vld [vmem:[%s6527_s0 + $0xa38] sm:$0xff] }
 0x229   :  { %2884 = vst.msk [vmem:[%s6529_s3 + $0x448] sm:$0xff] %vm2746_vm2, %v2545_v24  ;;  %v2061_v27 = vadd.f32 %v5267_v29, %v2060_v26 }
 0x22a   :  { %3053 = vst.msk [vmem:[%s6529_s3 + $0x990] sm:$0xff] %vm2746_vm2, %v2714_v25 }
 0x22b   :  { %v2630_v30 = vmax.f32 %v2061_v27, 0.0  ;;  %v1553_v31 = vpop.f32.mrf.mxu0  ;;  %v1808_v2 = vpop.f32.mrf.mxu1 }
 0x22c   :  { %v1554_v34 = vadd.f32 %v5267_v29, %v1553_v31  ;;  %v1809_v35 = vadd.f32 %v5267_v29, %v1808_v2  ;;  %v2315_v36 = vpop.f32.mrf.mxu3 }
 0x22d   :  { %2969 = vst.msk [vmem:[%s6529_s3 + $0x6f0] sm:$0xff] %vm2746_vm2, %v2630_v30  ;;  %3329 = vmatmul.msk.f32.gmra.mxu2 %vm358_vm1, %v253_v28  ;;  %v2316_v37 = vadd.f32 %v5267_v29, %v2315_v36  ;;  %v257_v30 = vld [vmem:[%s6527_s0 + $0x798] sm:$0xff] }
 0x22e   :  { %v2461_v39 = vmax.f32 %v1554_v34, 0.0  ;;  %v2546_v40 = vmax.f32 %v1809_v35, 0.0  ;;  %3159 = vmatmul.msk.f32.gmra.mxu0 %vm358_vm1, %v83_v32  ;;  %3244 = vmatmul.msk.f32.gmra.mxu1 %vm358_vm1, %v168_v33  ;;  %v87_v33 = vld [vmem:[%s6527_s0 + $0x248] sm:$0xff]  ;;  %v172_v34 = vld [vmem:[%s6527_s0 + $0x4f0] sm:$0xff] }
 0x22f   :  { %v2715_v41 = vmax.f32 %v2316_v37, 0.0 }
 0x230   :  { %2800 = vst.msk [vmem:[%s6529_s3 + $0x1a8] sm:$0xff] %vm2746_vm2, %v2461_v39  ;;  %v2063_v42 = vpop.f32.mrf.mxu2  ;;  %3414 = vmatmul.msk.f32.gmra.mxu3 %vm358_vm1, %v338_v38  ;;  %v342_v39 = vld [vmem:[%s6527_s0 + $0xa40] sm:$0xff] }
 0x231   :  { %2885 = vst.msk [vmem:[%s6529_s3 + $0x450] sm:$0xff] %vm2746_vm2, %v2546_v40  ;;  %v2064_v43 = vadd.f32 %v5267_v29, %v2063_v42 }
 0x232   :  { %3054 = vst.msk [vmem:[%s6529_s3 + $0x998] sm:$0xff] %vm2746_vm2, %v2715_v41 }
 0x233   :  { %v2631_v45 = vmax.f32 %v2064_v43, 0.0  ;;  %v1556_v46 = vpop.f32.mrf.mxu0  ;;  %v1811_v47 = vpop.f32.mrf.mxu1 }
 0x234   :  { %v1557_v50 = vadd.f32 %v5267_v29, %v1556_v46  ;;  %v1812_v51 = vadd.f32 %v5267_v29, %v1811_v47  ;;  %v2318_v52 = vpop.f32.mrf.mxu3 }
 0x235   :  { %2970 = vst.msk [vmem:[%s6529_s3 + $0x6f8] sm:$0xff] %vm2746_vm2, %v2631_v45  ;;  %3330 = vmatmul.msk.f32.gmra.mxu2 %vm358_vm1, %v254_v44  ;;  %v2319_v53 = vadd.f32 %v5267_v29, %v2318_v52  ;;  %v258_v45 = vld [vmem:[%s6527_s0 + $0x7a0] sm:$0xff] }
 0x236   :  { %v2462_v55 = vmax.f32 %v1557_v50, 0.0  ;;  %v2547_v56 = vmax.f32 %v1812_v51, 0.0  ;;  %3160 = vmatmul.msk.f32.gmra.mxu0 %vm358_vm1, %v84_v48  ;;  %3245 = vmatmul.msk.f32.gmra.mxu1 %vm358_vm1, %v169_v49  ;;  %v88_v49 = vld [vmem:[%s6527_s0 + $0x250] sm:$0xff]  ;;  %v173_v50 = vld [vmem:[%s6527_s0 + $0x4f8] sm:$0xff] }
 0x237   :  { %v2716_v57 = vmax.f32 %v2319_v53, 0.0 }
 0x238   :  { %2801 = vst.msk [vmem:[%s6529_s3 + $0x1b0] sm:$0xff] %vm2746_vm2, %v2462_v55  ;;  %v2066_v58 = vpop.f32.mrf.mxu2  ;;  %3415 = vmatmul.msk.f32.gmra.mxu3 %vm358_vm1, %v339_v54  ;;  %v343_v55 = vld [vmem:[%s6527_s0 + $0xa48] sm:$0xff] }
 0x239   :  { %2886 = vst.msk [vmem:[%s6529_s3 + $0x458] sm:$0xff] %vm2746_vm2, %v2547_v56  ;;  %v2067_v59 = vadd.f32 %v5267_v29, %v2066_v58 }
 0x23a   :  { %3055 = vst.msk [vmem:[%s6529_s3 + $0x9a0] sm:$0xff] %vm2746_vm2, %v2716_v57 }
 0x23b   :  { %v2632_v61 = vmax.f32 %v2067_v59, 0.0  ;;  %v1559_v62 = vpop.f32.mrf.mxu0  ;;  %v1814_v63 = vpop.f32.mrf.mxu1 }
 0x23c   :  { %v1560_v3 = vadd.f32 %v5267_v29, %v1559_v62  ;;  %v1815_v4 = vadd.f32 %v5267_v29, %v1814_v63  ;;  %v2321_v5 = vpop.f32.mrf.mxu3 }
 0x23d   :  { %2971 = vst.msk [vmem:[%s6529_s3 + $0x700] sm:$0xff] %vm2746_vm2, %v2632_v61  ;;  %3331 = vmatmul.msk.f32.gmra.mxu2 %vm358_vm1, %v255_v60  ;;  %v2322_v6 = vadd.f32 %v5267_v29, %v2321_v5  ;;  %v259_v61 = vld [vmem:[%s6527_s0 + $0x7a8] sm:$0xff] }
 0x23e   :  { %v2463_v8 = vmax.f32 %v1560_v3, 0.0  ;;  %v2548_v9 = vmax.f32 %v1815_v4, 0.0  ;;  %3161 = vmatmul.msk.f32.gmra.mxu0 %vm358_vm1, %v85_v0  ;;  %3246 = vmatmul.msk.f32.gmra.mxu1 %vm358_vm1, %v170_v1  ;;  %v89_v1 = vld [vmem:[%s6527_s0 + $0x258] sm:$0xff]  ;;  %v174_v3 = vld [vmem:[%s6527_s0 + $0x500] sm:$0xff] }
 0x23f   :  { %v2717_v10 = vmax.f32 %v2322_v6, 0.0 }
 0x240   :  { %2802 = vst.msk [vmem:[%s6529_s3 + $0x1b8] sm:$0xff] %vm2746_vm2, %v2463_v8  ;;  %v2069_v11 = vpop.f32.mrf.mxu2  ;;  %3416 = vmatmul.msk.f32.gmra.mxu3 %vm358_vm1, %v340_v7  ;;  %v344_v8 = vld [vmem:[%s6527_s0 + $0xa50] sm:$0xff] }
 0x241   :  { %2887 = vst.msk [vmem:[%s6529_s3 + $0x460] sm:$0xff] %vm2746_vm2, %v2548_v9  ;;  %v2070_v12 = vadd.f32 %v5267_v29, %v2069_v11 }
 0x242   :  { %3056 = vst.msk [vmem:[%s6529_s3 + $0x9a8] sm:$0xff] %vm2746_vm2, %v2717_v10 }
 0x243   :  { %v2633_v14 = vmax.f32 %v2070_v12, 0.0  ;;  %v1562_v15 = vpop.f32.mrf.mxu0  ;;  %v1817_v16 = vpop.f32.mrf.mxu1 }
 0x244   :  { %v1563_v19 = vadd.f32 %v5267_v29, %v1562_v15  ;;  %v1818_v20 = vadd.f32 %v5267_v29, %v1817_v16  ;;  %v2324_v21 = vpop.f32.mrf.mxu3 }
 0x245   :  { %2972 = vst.msk [vmem:[%s6529_s3 + $0x708] sm:$0xff] %vm2746_vm2, %v2633_v14  ;;  %3332 = vmatmul.msk.f32.gmra.mxu2 %vm358_vm1, %v256_v13  ;;  %v2325_v22 = vadd.f32 %v5267_v29, %v2324_v21  ;;  %v260_v14 = vld [vmem:[%s6527_s0 + $0x7b0] sm:$0xff] }
 0x246   :  { %v2464_v24 = vmax.f32 %v1563_v19, 0.0  ;;  %v2549_v25 = vmax.f32 %v1818_v20, 0.0  ;;  %3162 = vmatmul.msk.f32.gmra.mxu0 %vm358_vm1, %v86_v17  ;;  %3247 = vmatmul.msk.f32.gmra.mxu1 %vm358_vm1, %v171_v18  ;;  %v90_v18 = vld [vmem:[%s6527_s0 + $0x260] sm:$0xff]  ;;  %v175_v19 = vld [vmem:[%s6527_s0 + $0x508] sm:$0xff] }
 0x247   :  { %v2718_v26 = vmax.f32 %v2325_v22, 0.0 }
 0x248   :  { %2803 = vst.msk [vmem:[%s6529_s3 + $0x1c0] sm:$0xff] %vm2746_vm2, %v2464_v24  ;;  %v2072_v27 = vpop.f32.mrf.mxu2  ;;  %3417 = vmatmul.msk.f32.gmra.mxu3 %vm358_vm1, %v341_v23  ;;  %v345_v24 = vld [vmem:[%s6527_s0 + $0xa58] sm:$0xff] }
 0x249   :  { %2888 = vst.msk [vmem:[%s6529_s3 + $0x468] sm:$0xff] %vm2746_vm2, %v2549_v25  ;;  %v2073_v28 = vadd.f32 %v5267_v29, %v2072_v27 }
 0x24a   :  { %3057 = vst.msk [vmem:[%s6529_s3 + $0x9b0] sm:$0xff] %vm2746_vm2, %v2718_v26 }
 0x24b   :  { %v2634_v31 = vmax.f32 %v2073_v28, 0.0  ;;  %v1565_v2 = vpop.f32.mrf.mxu0  ;;  %v1820_v32 = vpop.f32.mrf.mxu1 }
 0x24c   :  { %v1566_v35 = vadd.f32 %v5267_v29, %v1565_v2  ;;  %v1821_v36 = vadd.f32 %v5267_v29, %v1820_v32  ;;  %v2327_v37 = vpop.f32.mrf.mxu3 }
 0x24d   :  { %2973 = vst.msk [vmem:[%s6529_s3 + $0x710] sm:$0xff] %vm2746_vm2, %v2634_v31  ;;  %3333 = vmatmul.msk.f32.gmra.mxu2 %vm358_vm1, %v257_v30  ;;  %v2328_v38 = vadd.f32 %v5267_v29, %v2327_v37  ;;  %v261_v31 = vld [vmem:[%s6527_s0 + $0x7b8] sm:$0xff] }
 0x24e   :  { %v2465_v40 = vmax.f32 %v1566_v35, 0.0  ;;  %v2550_v41 = vmax.f32 %v1821_v36, 0.0  ;;  %3163 = vmatmul.msk.f32.gmra.mxu0 %vm358_vm1, %v87_v33  ;;  %3248 = vmatmul.msk.f32.gmra.mxu1 %vm358_vm1, %v172_v34  ;;  %v91_v34 = vld [vmem:[%s6527_s0 + $0x268] sm:$0xff]  ;;  %v176_v35 = vld [vmem:[%s6527_s0 + $0x510] sm:$0xff] }
 0x24f   :  { %v2719_v42 = vmax.f32 %v2328_v38, 0.0 }
 0x250   :  { %2804 = vst.msk [vmem:[%s6529_s3 + $0x1c8] sm:$0xff] %vm2746_vm2, %v2465_v40  ;;  %v2075_v43 = vpop.f32.mrf.mxu2  ;;  %3418 = vmatmul.msk.f32.gmra.mxu3 %vm358_vm1, %v342_v39  ;;  %v346_v40 = vld [vmem:[%s6527_s0 + $0xa60] sm:$0xff] }
 0x251   :  { %2889 = vst.msk [vmem:[%s6529_s3 + $0x470] sm:$0xff] %vm2746_vm2, %v2550_v41  ;;  %v2076_v44 = vadd.f32 %v5267_v29, %v2075_v43 }
 0x252   :  { %3058 = vst.msk [vmem:[%s6529_s3 + $0x9b8] sm:$0xff] %vm2746_vm2, %v2719_v42 }
 0x253   :  { %v2635_v46 = vmax.f32 %v2076_v44, 0.0  ;;  %v1568_v47 = vpop.f32.mrf.mxu0  ;;  %v1823_v48 = vpop.f32.mrf.mxu1 }
 0x254   :  { %v1569_v51 = vadd.f32 %v5267_v29, %v1568_v47  ;;  %v1824_v52 = vadd.f32 %v5267_v29, %v1823_v48  ;;  %v2330_v53 = vpop.f32.mrf.mxu3 }
 0x255   :  { %2974 = vst.msk [vmem:[%s6529_s3 + $0x718] sm:$0xff] %vm2746_vm2, %v2635_v46  ;;  %3334 = vmatmul.msk.f32.gmra.mxu2 %vm358_vm1, %v258_v45  ;;  %v2331_v54 = vadd.f32 %v5267_v29, %v2330_v53  ;;  %v262_v46 = vld [vmem:[%s6527_s0 + $0x7c0] sm:$0xff] }
 0x256   :  { %v2466_v56 = vmax.f32 %v1569_v51, 0.0  ;;  %v2551_v57 = vmax.f32 %v1824_v52, 0.0  ;;  %3164 = vmatmul.msk.f32.gmra.mxu0 %vm358_vm1, %v88_v49  ;;  %3249 = vmatmul.msk.f32.gmra.mxu1 %vm358_vm1, %v173_v50  ;;  %v92_v50 = vld [vmem:[%s6527_s0 + $0x270] sm:$0xff]  ;;  %v177_v51 = vld [vmem:[%s6527_s0 + $0x518] sm:$0xff] }
 0x257   :  { %v2720_v58 = vmax.f32 %v2331_v54, 0.0 }
 0x258   :  { %2805 = vst.msk [vmem:[%s6529_s3 + $0x1d0] sm:$0xff] %vm2746_vm2, %v2466_v56  ;;  %v2078_v59 = vpop.f32.mrf.mxu2  ;;  %3419 = vmatmul.msk.f32.gmra.mxu3 %vm358_vm1, %v343_v55  ;;  %v347_v56 = vld [vmem:[%s6527_s0 + $0xa68] sm:$0xff] }
 0x259   :  { %2890 = vst.msk [vmem:[%s6529_s3 + $0x478] sm:$0xff] %vm2746_vm2, %v2551_v57  ;;  %v2079_v60 = vadd.f32 %v5267_v29, %v2078_v59 }
 0x25a   :  { %3059 = vst.msk [vmem:[%s6529_s3 + $0x9c0] sm:$0xff] %vm2746_vm2, %v2720_v58 }
 0x25b   :  { %v2636_v62 = vmax.f32 %v2079_v60, 0.0  ;;  %v1571_v63 = vpop.f32.mrf.mxu0  ;;  %v1826_v0 = vpop.f32.mrf.mxu1 }
 0x25c   :  { %v1572_v4 = vadd.f32 %v5267_v29, %v1571_v63  ;;  %v1827_v5 = vadd.f32 %v5267_v29, %v1826_v0  ;;  %v2333_v6 = vpop.f32.mrf.mxu3 }
 0x25d   :  { %2975 = vst.msk [vmem:[%s6529_s3 + $0x720] sm:$0xff] %vm2746_vm2, %v2636_v62  ;;  %3335 = vmatmul.msk.f32.gmra.mxu2 %vm358_vm1, %v259_v61  ;;  %v2334_v7 = vadd.f32 %v5267_v29, %v2333_v6  ;;  %v263_v62 = vld [vmem:[%s6527_s0 + $0x7c8] sm:$0xff] }
 0x25e   :  { %v2467_v9 = vmax.f32 %v1572_v4, 0.0  ;;  %v2552_v10 = vmax.f32 %v1827_v5, 0.0  ;;  %3165 = vmatmul.msk.f32.gmra.mxu0 %vm358_vm1, %v89_v1  ;;  %3250 = vmatmul.msk.f32.gmra.mxu1 %vm358_vm1, %v174_v3  ;;  %v93_v3 = vld [vmem:[%s6527_s0 + $0x278] sm:$0xff]  ;;  %v178_v4 = vld [vmem:[%s6527_s0 + $0x520] sm:$0xff] }
 0x25f   :  { %v2721_v11 = vmax.f32 %v2334_v7, 0.0 }
 0x260   :  { %2806 = vst.msk [vmem:[%s6529_s3 + $0x1d8] sm:$0xff] %vm2746_vm2, %v2467_v9  ;;  %v2081_v12 = vpop.f32.mrf.mxu2  ;;  %3420 = vmatmul.msk.f32.gmra.mxu3 %vm358_vm1, %v344_v8  ;;  %v348_v9 = vld [vmem:[%s6527_s0 + $0xa70] sm:$0xff] }
 0x261   :  { %2891 = vst.msk [vmem:[%s6529_s3 + $0x480] sm:$0xff] %vm2746_vm2, %v2552_v10  ;;  %v2082_v13 = vadd.f32 %v5267_v29, %v2081_v12 }
 0x262   :  { %3060 = vst.msk [vmem:[%s6529_s3 + $0x9c8] sm:$0xff] %vm2746_vm2, %v2721_v11 }
 0x263   :  { %v2637_v15 = vmax.f32 %v2082_v13, 0.0  ;;  %v1574_v16 = vpop.f32.mrf.mxu0  ;;  %v1829_v17 = vpop.f32.mrf.mxu1 }
 0x264   :  { %v1575_v20 = vadd.f32 %v5267_v29, %v1574_v16  ;;  %v1830_v21 = vadd.f32 %v5267_v29, %v1829_v17  ;;  %v2336_v22 = vpop.f32.mrf.mxu3 }
 0x265   :  { %2976 = vst.msk [vmem:[%s6529_s3 + $0x728] sm:$0xff] %vm2746_vm2, %v2637_v15  ;;  %3336 = vmatmul.msk.f32.gmra.mxu2 %vm358_vm1, %v260_v14  ;;  %v2337_v23 = vadd.f32 %v5267_v29, %v2336_v22  ;;  %v264_v15 = vld [vmem:[%s6527_s0 + $0x7d0] sm:$0xff] }
 0x266   :  { %v2468_v25 = vmax.f32 %v1575_v20, 0.0  ;;  %v2553_v26 = vmax.f32 %v1830_v21, 0.0  ;;  %3166 = vmatmul.msk.f32.gmra.mxu0 %vm358_vm1, %v90_v18  ;;  %3251 = vmatmul.msk.f32.gmra.mxu1 %vm358_vm1, %v175_v19  ;;  %v94_v19 = vld [vmem:[%s6527_s0 + $0x280] sm:$0xff] }
 0x267   :  { %v2722_v27 = vmax.f32 %v2337_v23, 0.0  ;;  %v6042_v20 = vld [vmem:[%s6528_s2] ss:$0 sm:$0xff] }
 0x268   :  { %2807 = vst.msk [vmem:[%s6529_s3 + $0x1e0] sm:$0xff] %vm2746_vm2, %v2468_v25  ;;  %v2084_v28 = vpop.f32.mrf.mxu2  ;;  %3421 = vmatmul.msk.f32.gmra.mxu3 %vm358_vm1, %v345_v24  ;;  %v349_v25 = vld [vmem:[%s6527_s0 + $0xa78] sm:$0xff] }
 0x269   :  { %2892 = vst.msk [vmem:[%s6529_s3 + $0x488] sm:$0xff] %vm2746_vm2, %v2553_v26  ;;  %v2085_v30 = vadd.f32 %v5267_v29, %v2084_v28 }
 0x26a   :  { %3061 = vst.msk [vmem:[%s6529_s3 + $0x9d0] sm:$0xff] %vm2746_vm2, %v2722_v27 }
 0x26b   :  { %v2638_v2 = vmax.f32 %v2085_v30, 0.0  ;;  %v1577_v32 = vpop.f32.mrf.mxu0  ;;  %v1832_v33 = vpop.f32.mrf.mxu1 }
 0x26c   :  { %v1578_v36 = vadd.f32 %v5267_v29, %v1577_v32  ;;  %v1833_v37 = vadd.f32 %v5267_v29, %v1832_v33  ;;  %v2339_v38 = vpop.f32.mrf.mxu3 }
 0x26d   :  { %2977 = vst.msk [vmem:[%s6529_s3 + $0x730] sm:$0xff] %vm2746_vm2, %v2638_v2  ;;  %3337 = vmatmul.msk.f32.gmra.mxu2 %vm358_vm1, %v261_v31  ;;  %v2340_v39 = vadd.f32 %v5267_v29, %v2339_v38  ;;  %v265_v2 = vld [vmem:[%s6527_s0 + $0x7d8] sm:$0xff] }
 0x26e   :  { %v2469_v41 = vmax.f32 %v1578_v36, 0.0  ;;  %v2554_v42 = vmax.f32 %v1833_v37, 0.0  ;;  %3167 = vmatmul.msk.f32.gmra.mxu0 %vm358_vm1, %v91_v34  ;;  %3252 = vmatmul.msk.f32.gmra.mxu1 %vm358_vm1, %v176_v35  ;;  %v95_v35 = vld [vmem:[%s6527_s0 + $0x288] sm:$0xff]  ;;  %v180_v36 = vld [vmem:[%s6527_s0 + $0x530] sm:$0xff] }
 0x26f   :  { %v2723_v43 = vmax.f32 %v2340_v39, 0.0 }
 0x270   :  { %2808 = vst.msk [vmem:[%s6529_s3 + $0x1e8] sm:$0xff] %vm2746_vm2, %v2469_v41  ;;  %v2087_v44 = vpop.f32.mrf.mxu2  ;;  %3422 = vmatmul.msk.f32.gmra.mxu3 %vm358_vm1, %v346_v40  ;;  %v350_v41 = vld [vmem:[%s6527_s0 + $0xa80] sm:$0xff] }
 0x271   :  { %2893 = vst.msk [vmem:[%s6529_s3 + $0x490] sm:$0xff] %vm2746_vm2, %v2554_v42  ;;  %v2088_v45 = vadd.f32 %v5267_v29, %v2087_v44 }
 0x272   :  { %3062 = vst.msk [vmem:[%s6529_s3 + $0x9d8] sm:$0xff] %vm2746_vm2, %v2723_v43 }
 0x273   :  { %v2639_v47 = vmax.f32 %v2088_v45, 0.0  ;;  %v1580_v48 = vpop.f32.mrf.mxu0  ;;  %v1835_v49 = vpop.f32.mrf.mxu1 }
 0x274   :  { %v1581_v52 = vadd.f32 %v5267_v29, %v1580_v48  ;;  %v1836_v53 = vadd.f32 %v5267_v29, %v1835_v49  ;;  %v2342_v54 = vpop.f32.mrf.mxu3 }
 0x275   :  { %2978 = vst.msk [vmem:[%s6529_s3 + $0x738] sm:$0xff] %vm2746_vm2, %v2639_v47  ;;  %3338 = vmatmul.msk.f32.gmra.mxu2 %vm358_vm1, %v262_v46  ;;  %v2343_v55 = vadd.f32 %v5267_v29, %v2342_v54  ;;  %v266_v47 = vld [vmem:[%s6527_s0 + $0x7e0] sm:$0xff] }
 0x276   :  { %v2470_v57 = vmax.f32 %v1581_v52, 0.0  ;;  %v2555_v58 = vmax.f32 %v1836_v53, 0.0  ;;  %3168 = vmatmul.msk.f32.gmra.mxu0 %vm358_vm1, %v92_v50  ;;  %3253 = vmatmul.msk.f32.gmra.mxu1 %vm358_vm1, %v177_v51  ;;  %v96_v51 = vld [vmem:[%s6527_s0 + $0x290] sm:$0xff]  ;;  %v181_v52 = vld [vmem:[%s6527_s0 + $0x538] sm:$0xff] }
 0x277   :  { %v2724_v59 = vmax.f32 %v2343_v55, 0.0 }
 0x278   :  { %2809 = vst.msk [vmem:[%s6529_s3 + $0x1f0] sm:$0xff] %vm2746_vm2, %v2470_v57  ;;  %v2090_v60 = vpop.f32.mrf.mxu2  ;;  %3423 = vmatmul.msk.f32.gmra.mxu3 %vm358_vm1, %v347_v56  ;;  %v351_v57 = vld [vmem:[%s6527_s0 + $0xa88] sm:$0xff] }
 0x279   :  { %2894 = vst.msk [vmem:[%s6529_s3 + $0x498] sm:$0xff] %vm2746_vm2, %v2555_v58  ;;  %v2091_v61 = vadd.f32 %v5267_v29, %v2090_v60 }
 0x27a   :  { %3063 = vst.msk [vmem:[%s6529_s3 + $0x9e0] sm:$0xff] %vm2746_vm2, %v2724_v59 }
 0x27b   :  { %v2640_v63 = vmax.f32 %v2091_v61, 0.0  ;;  %v1583_v0 = vpop.f32.mrf.mxu0  ;;  %v1838_v1 = vpop.f32.mrf.mxu1 }
 0x27c   :  { %v1584_v5 = vadd.f32 %v5267_v29, %v1583_v0  ;;  %v1839_v6 = vadd.f32 %v5267_v29, %v1838_v1  ;;  %v2345_v7 = vpop.f32.mrf.mxu3 }
 0x27d   :  { %2979 = vst.msk [vmem:[%s6529_s3 + $0x740] sm:$0xff] %vm2746_vm2, %v2640_v63  ;;  %3339 = vmatmul.msk.f32.gmra.mxu2 %vm358_vm1, %v263_v62  ;;  %v2346_v8 = vadd.f32 %v5267_v29, %v2345_v7  ;;  %v267_v63 = vld [vmem:[%s6527_s0 + $0x7e8] sm:$0xff] }
 0x27e   :  { %v2471_v10 = vmax.f32 %v1584_v5, 0.0  ;;  %v2556_v11 = vmax.f32 %v1839_v6, 0.0  ;;  %3169 = vmatmul.msk.f32.gmra.mxu0 %vm358_vm1, %v93_v3  ;;  %3254 = vmatmul.msk.f32.gmra.mxu1 %vm358_vm1, %v178_v4  ;;  %v97_v4 = vld [vmem:[%s6527_s0 + $0x298] sm:$0xff]  ;;  %v182_v5 = vld [vmem:[%s6527_s0 + $0x540] sm:$0xff] }
 0x27f   :  { %v2725_v12 = vmax.f32 %v2346_v8, 0.0 }
 0x280   :  { %2810 = vst.msk [vmem:[%s6529_s3 + $0x1f8] sm:$0xff] %vm2746_vm2, %v2471_v10  ;;  %v2093_v13 = vpop.f32.mrf.mxu2  ;;  %3424 = vmatmul.msk.f32.gmra.mxu3 %vm358_vm1, %v348_v9 }
 0x281   :  { %2895 = vst.msk [vmem:[%s6529_s3 + $0x4a0] sm:$0xff] %vm2746_vm2, %v2556_v11  ;;  %v2094_v14 = vadd.f32 %v5267_v29, %v2093_v13  ;;  %v179_v29 = vld [vmem:[%s6527_s0 + $0x528] sm:$0xff] }
 0x282   :  { %3064 = vst.msk [vmem:[%s6529_s3 + $0x9e8] sm:$0xff] %vm2746_vm2, %v2725_v12 }
 0x283   :  { %v2641_v16 = vmax.f32 %v2094_v14, 0.0  ;;  %v1586_v17 = vpop.f32.mrf.mxu0  ;;  %v1841_v18 = vpop.f32.mrf.mxu1 }
 0x284   :  { %v1587_v21 = vadd.f32 %v6042_v20, %v1586_v17  ;;  %v1842_v22 = vadd.f32 %v6042_v20, %v1841_v18  ;;  %v2348_v23 = vpop.f32.mrf.mxu3 }
 0x285   :  { %2980 = vst.msk [vmem:[%s6529_s3 + $0x748] sm:$0xff] %vm2746_vm2, %v2641_v16  ;;  %3340 = vmatmul.msk.f32.gmra.mxu2 %vm358_vm1, %v264_v15  ;;  %v2349_v24 = vadd.f32 %v6042_v20, %v2348_v23  ;;  %v268_v15 = vld [vmem:[%s6527_s0 + $0x7f0] sm:$0xff] }
 0x286   :  { %v2472_v26 = vmax.f32 %v1587_v21, 0.0  ;;  %v2557_v27 = vmax.f32 %v1842_v22, 0.0  ;;  %3170 = vmatmul.msk.f32.gmra.mxu0 %vm358_vm1, %v94_v19  ;;  %3255 = vmatmul.msk.f32.gmra.mxu1 %vm358_vm1, %v179_v29  ;;  %v98_v19 = vld [vmem:[%s6527_s0 + $0x2a0] sm:$0xff]  ;;  %v183_v29 = vld [vmem:[%s6527_s0 + $0x548] sm:$0xff] }
 0x287   :  { %v2726_v28 = vmax.f32 %v2349_v24, 0.0 }
 0x288   :  { %2811 = vst.msk [vmem:[%s6529_s3 + $0x200] sm:$0xff] %vm2746_vm2, %v2472_v26  ;;  %v2096_v30 = vpop.f32.mrf.mxu2  ;;  %3425 = vmatmul.msk.f32.gmra.mxu3 %vm358_vm1, %v349_v25 }
 0x289   :  { %2896 = vst.msk [vmem:[%s6529_s3 + $0x4a8] sm:$0xff] %vm2746_vm2, %v2557_v27  ;;  %v2097_v31 = vadd.f32 %v6042_v20, %v2096_v30 }
 0x28a   :  { %3065 = vst.msk [vmem:[%s6529_s3 + $0x9f0] sm:$0xff] %vm2746_vm2, %v2726_v28 }
 0x28b   :  { %v2642_v32 = vmax.f32 %v2097_v31, 0.0  ;;  %v1589_v33 = vpop.f32.mrf.mxu0  ;;  %v1844_v34 = vpop.f32.mrf.mxu1 }
 0x28c   :  { %v1590_v37 = vadd.f32 %v6042_v20, %v1589_v33  ;;  %v1845_v38 = vadd.f32 %v6042_v20, %v1844_v34  ;;  %v2351_v39 = vpop.f32.mrf.mxu3 }
 0x28d   :  { %2981 = vst.msk [vmem:[%s6529_s3 + $0x750] sm:$0xff] %vm2746_vm2, %v2642_v32  ;;  %3341 = vmatmul.msk.f32.gmra.mxu2 %vm358_vm1, %v265_v2  ;;  %v2352_v40 = vadd.f32 %v6042_v20, %v2351_v39 }
 0x28e   :  { %v2473_v42 = vmax.f32 %v1590_v37, 0.0  ;;  %v2558_v43 = vmax.f32 %v1845_v38, 0.0  ;;  %3171 = vmatmul.msk.f32.gmra.mxu0 %vm358_vm1, %v95_v35  ;;  %3256 = vmatmul.msk.f32.gmra.mxu1 %vm358_vm1, %v180_v36 }
 0x28f   :  { %v2727_v44 = vmax.f32 %v2352_v40, 0.0 }
 0x290   :  { %2812 = vst.msk [vmem:[%s6529_s3 + $0x208] sm:$0xff] %vm2746_vm2, %v2473_v42  ;;  %v2099_v45 = vpop.f32.mrf.mxu2  ;;  %3426 = vmatmul.msk.f32.gmra.mxu3 %vm358_vm1, %v350_v41 }
 0x291   :  { %2897 = vst.msk [vmem:[%s6529_s3 + $0x4b0] sm:$0xff] %vm2746_vm2, %v2558_v43  ;;  %v2100_v46 = vadd.f32 %v6042_v20, %v2099_v45 }
 0x292   :  { %3066 = vst.msk [vmem:[%s6529_s3 + $0x9f8] sm:$0xff] %vm2746_vm2, %v2727_v44 }
 0x293   :  { %v2643_v48 = vmax.f32 %v2100_v46, 0.0  ;;  %v1592_v49 = vpop.f32.mrf.mxu0  ;;  %v1847_v50 = vpop.f32.mrf.mxu1 }
 0x294   :  { %v1593_v53 = vadd.f32 %v6042_v20, %v1592_v49  ;;  %v1848_v54 = vadd.f32 %v6042_v20, %v1847_v50  ;;  %v2354_v55 = vpop.f32.mrf.mxu3 }
 0x295   :  { %2982 = vst.msk [vmem:[%s6529_s3 + $0x758] sm:$0xff] %vm2746_vm2, %v2643_v48  ;;  %3342 = vmatmul.msk.f32.gmra.mxu2 %vm358_vm1, %v266_v47  ;;  %v2355_v56 = vadd.f32 %v6042_v20, %v2354_v55 }
 0x296   :  { %v2474_v58 = vmax.f32 %v1593_v53, 0.0  ;;  %v2559_v59 = vmax.f32 %v1848_v54, 0.0  ;;  %3172 = vmatmul.msk.f32.gmra.mxu0 %vm358_vm1, %v96_v51  ;;  %3257 = vmatmul.msk.f32.gmra.mxu1 %vm358_vm1, %v181_v52 }
 0x297   :  { %v2728_v60 = vmax.f32 %v2355_v56, 0.0 }
 0x298   :  { %2813 = vst.msk [vmem:[%s6529_s3 + $0x210] sm:$0xff] %vm2746_vm2, %v2474_v58  ;;  %v2102_v61 = vpop.f32.mrf.mxu2  ;;  %3427 = vmatmul.msk.f32.gmra.mxu3 %vm358_vm1, %v351_v57 }
 0x299   :  { %2898 = vst.msk [vmem:[%s6529_s3 + $0x4b8] sm:$0xff] %vm2746_vm2, %v2559_v59  ;;  %v2103_v62 = vadd.f32 %v6042_v20, %v2102_v61 }
 0x29a   :  { %3067 = vst.msk [vmem:[%s6529_s3 + $0xa00] sm:$0xff] %vm2746_vm2, %v2728_v60 }
 0x29b   :  { %v2644_v0 = vmax.f32 %v2103_v62, 0.0  ;;  %v1595_v1 = vpop.f32.mrf.mxu0  ;;  %v1850_v3 = vpop.f32.mrf.mxu1 }
 0x29c   :  { %v1596_v6 = vadd.f32 %v6042_v20, %v1595_v1  ;;  %v1851_v7 = vadd.f32 %v6042_v20, %v1850_v3  ;;  %v2357_v8 = vpop.f32.mrf.mxu3 }
 0x29d   :  { %2983 = vst.msk [vmem:[%s6529_s3 + $0x760] sm:$0xff] %vm2746_vm2, %v2644_v0  ;;  %3343 = vmatmul.msk.f32.gmra.mxu2 %vm358_vm1, %v267_v63  ;;  %v2358_v9 = vadd.f32 %v6042_v20, %v2357_v8 }
 0x29e   :  { %v2475_v10 = vmax.f32 %v1596_v6, 0.0  ;;  %v2560_v11 = vmax.f32 %v1851_v7, 0.0  ;;  %3173 = vmatmul.msk.f32.gmra.mxu0 %vm358_vm1, %v97_v4  ;;  %3258 = vmatmul.msk.f32.gmra.mxu1 %vm358_vm1, %v182_v5 }
 0x29f   :  { %v2729_v12 = vmax.f32 %v2358_v9, 0.0 }
 0x2a0   :  { %2814 = vst.msk [vmem:[%s6529_s3 + $0x218] sm:$0xff] %vm2746_vm2, %v2475_v10  ;;  %v2105_v13 = vpop.f32.mrf.mxu2 }
 0x2a1   :  { %2899 = vst.msk [vmem:[%s6529_s3 + $0x4c0] sm:$0xff] %vm2746_vm2, %v2560_v11  ;;  %v2106_v14 = vadd.f32 %v6042_v20, %v2105_v13 }
 0x2a2   :  { %3068 = vst.msk [vmem:[%s6529_s3 + $0xa08] sm:$0xff] %vm2746_vm2, %v2729_v12 }
 0x2a3   :  { %v2645_v16 = vmax.f32 %v2106_v14, 0.0  ;;  %v1598_v17 = vpop.f32.mrf.mxu0  ;;  %v1853_v18 = vpop.f32.mrf.mxu1 }
 0x2a4   :  { %v1599_v21 = vadd.f32 %v6042_v20, %v1598_v17  ;;  %v1854_v22 = vadd.f32 %v6042_v20, %v1853_v18  ;;  %v2360_v23 = vpop.f32.mrf.mxu3 }
 0x2a5   :  { %2984 = vst.msk [vmem:[%s6529_s3 + $0x768] sm:$0xff] %vm2746_vm2, %v2645_v16  ;;  %3344 = vmatmul.msk.f32.gmra.mxu2 %vm358_vm1, %v268_v15  ;;  %v2361_v24 = vadd.f32 %v6042_v20, %v2360_v23 }
 0x2a6   :  { %v2476_v25 = vmax.f32 %v1599_v21, 0.0  ;;  %v2561_v26 = vmax.f32 %v1854_v22, 0.0  ;;  %3174 = vmatmul.msk.f32.gmra.mxu0 %vm358_vm1, %v98_v19  ;;  %3259 = vmatmul.msk.f32.gmra.mxu1 %vm358_vm1, %v183_v29 }
 0x2a7   :  { %v2730_v27 = vmax.f32 %v2361_v24, 0.0 }
 0x2a8   :  { %2815 = vst.msk [vmem:[%s6529_s3 + $0x220] sm:$0xff] %vm2746_vm2, %v2476_v25  ;;  %v2108_v28 = vpop.f32.mrf.mxu2 }
 0x2a9   :  { %2900 = vst.msk [vmem:[%s6529_s3 + $0x4c8] sm:$0xff] %vm2746_vm2, %v2561_v26  ;;  %v2109_v30 = vadd.f32 %v6042_v20, %v2108_v28 }
 0x2aa   :  { %3069 = vst.msk [vmem:[%s6529_s3 + $0xa10] sm:$0xff] %vm2746_vm2, %v2730_v27 }
 0x2ab   :  { %v2646_v31 = vmax.f32 %v2109_v30, 0.0  ;;  %v1601_v2 = vpop.f32.mrf.mxu0  ;;  %v1856_v32 = vpop.f32.mrf.mxu1 }
 0x2ac   :  { %v1602_v33 = vadd.f32 %v6042_v20, %v1601_v2  ;;  %v1857_v34 = vadd.f32 %v6042_v20, %v1856_v32  ;;  %v2363_v35 = vpop.f32.mrf.mxu3 }
 0x2ad   :  { %2985 = vst.msk [vmem:[%s6529_s3 + $0x770] sm:$0xff] %vm2746_vm2, %v2646_v31  ;;  %v2364_v36 = vadd.f32 %v6042_v20, %v2363_v35 }
 0x2ae   :  { %v2477_v37 = vmax.f32 %v1602_v33, 0.0  ;;  %v2562_v38 = vmax.f32 %v1857_v34, 0.0 }
 0x2af   :  { %v2731_v39 = vmax.f32 %v2364_v36, 0.0 }
 0x2b0   :  { %2816 = vst.msk [vmem:[%s6529_s3 + $0x228] sm:$0xff] %vm2746_vm2, %v2477_v37  ;;  %v2111_v40 = vpop.f32.mrf.mxu2 }
 0x2b1   :  { %2901 = vst.msk [vmem:[%s6529_s3 + $0x4d0] sm:$0xff] %vm2746_vm2, %v2562_v38  ;;  %v2112_v41 = vadd.f32 %v6042_v20, %v2111_v40 }
 0x2b2   :  { %3070 = vst.msk [vmem:[%s6529_s3 + $0xa18] sm:$0xff] %vm2746_vm2, %v2731_v39 }
 0x2b3   :  { %v2647_v42 = vmax.f32 %v2112_v41, 0.0  ;;  %v1604_v43 = vpop.f32.mrf.mxu0  ;;  %v1859_v44 = vpop.f32.mrf.mxu1 }
 0x2b4   :  { %v1605_v45 = vadd.f32 %v6042_v20, %v1604_v43  ;;  %v1860_v46 = vadd.f32 %v6042_v20, %v1859_v44  ;;  %v2366_v47 = vpop.f32.mrf.mxu3 }
 0x2b5   :  { %2986 = vst.msk [vmem:[%s6529_s3 + $0x778] sm:$0xff] %vm2746_vm2, %v2647_v42  ;;  %v2367_v48 = vadd.f32 %v6042_v20, %v2366_v47 }
 0x2b6   :  { %v2478_v49 = vmax.f32 %v1605_v45, 0.0  ;;  %v2563_v50 = vmax.f32 %v1860_v46, 0.0 }
 0x2b7   :  { %v2732_v51 = vmax.f32 %v2367_v48, 0.0 }
 0x2b8   :  { %2817 = vst.msk [vmem:[%s6529_s3 + $0x230] sm:$0xff] %vm2746_vm2, %v2478_v49  ;;  %v2114_v52 = vpop.f32.mrf.mxu2 }
 0x2b9   :  { %2902 = vst.msk [vmem:[%s6529_s3 + $0x4d8] sm:$0xff] %vm2746_vm2, %v2563_v50  ;;  %v2115_v53 = vadd.f32 %v6042_v20, %v2114_v52 }
 0x2ba   :  { %3071 = vst.msk [vmem:[%s6529_s3 + $0xa20] sm:$0xff] %vm2746_vm2, %v2732_v51 }
 0x2bb   :  { %v2648_v54 = vmax.f32 %v2115_v53, 0.0  ;;  %v1607_v55 = vpop.f32.mrf.mxu0  ;;  %v1862_v56 = vpop.f32.mrf.mxu1 }
 0x2bc   :  { %v1608_v57 = vadd.f32 %v6042_v20, %v1607_v55  ;;  %v1863_v58 = vadd.f32 %v6042_v20, %v1862_v56  ;;  %v2369_v59 = vpop.f32.mrf.mxu3 }
 0x2bd   :  { %2987 = vst.msk [vmem:[%s6529_s3 + $0x780] sm:$0xff] %vm2746_vm2, %v2648_v54  ;;  %v2370_v60 = vadd.f32 %v6042_v20, %v2369_v59 }
 0x2be   :  { %v2479_v61 = vmax.f32 %v1608_v57, 0.0  ;;  %v2564_v62 = vmax.f32 %v1863_v58, 0.0 }
 0x2bf   :  { %v2733_v63 = vmax.f32 %v2370_v60, 0.0 }
 0x2c0   :  { %2818 = vst.msk [vmem:[%s6529_s3 + $0x238] sm:$0xff] %vm2746_vm2, %v2479_v61  ;;  %v2117_v0 = vpop.f32.mrf.mxu2 }
 0x2c1   :  { %2903 = vst.msk [vmem:[%s6529_s3 + $0x4e0] sm:$0xff] %vm2746_vm2, %v2564_v62  ;;  %v2118_v1 = vadd.f32 %v6042_v20, %v2117_v0 }
 0x2c2   :  { %3072 = vst.msk [vmem:[%s6529_s3 + $0xa28] sm:$0xff] %vm2746_vm2, %v2733_v63 }
 0x2c3   :  { %v2649_v3 = vmax.f32 %v2118_v1, 0.0  ;;  %v1610_v4 = vpop.f32.mrf.mxu0  ;;  %v1865_v5 = vpop.f32.mrf.mxu1 }
 0x2c4   :  { %v1611_v6 = vadd.f32 %v6042_v20, %v1610_v4  ;;  %v1866_v7 = vadd.f32 %v6042_v20, %v1865_v5  ;;  %v2372_v8 = vpop.f32.mrf.mxu3 }
 0x2c5   :  { %2988 = vst.msk [vmem:[%s6529_s3 + $0x788] sm:$0xff] %vm2746_vm2, %v2649_v3  ;;  %v2373_v9 = vadd.f32 %v6042_v20, %v2372_v8 }
 0x2c6   :  { %v2480_v10 = vmax.f32 %v1611_v6, 0.0  ;;  %v2565_v11 = vmax.f32 %v1866_v7, 0.0 }
 0x2c7   :  { %v2734_v12 = vmax.f32 %v2373_v9, 0.0 }
 0x2c8   :  { %2819 = vst.msk [vmem:[%s6529_s3 + $0x240] sm:$0xff] %vm2746_vm2, %v2480_v10  ;;  %v2120_v13 = vpop.f32.mrf.mxu2 }
 0x2c9   :  { %2904 = vst.msk [vmem:[%s6529_s3 + $0x4e8] sm:$0xff] %vm2746_vm2, %v2565_v11  ;;  %v2121_v14 = vadd.f32 %v6042_v20, %v2120_v13 }
 0x2ca   :  { %3073 = vst.msk [vmem:[%s6529_s3 + $0xa30] sm:$0xff] %vm2746_vm2, %v2734_v12 }
 0x2cb   :  { %v2650_v15 = vmax.f32 %v2121_v14, 0.0  ;;  %v1613_v16 = vpop.f32.mrf.mxu0  ;;  %v1868_v17 = vpop.f32.mrf.mxu1 }
 0x2cc   :  { %v1614_v18 = vadd.f32 %v6042_v20, %v1613_v16  ;;  %v1869_v19 = vadd.f32 %v6042_v20, %v1868_v17  ;;  %v2375_v29 = vpop.f32.mrf.mxu3 }
 0x2cd   :  { %2989 = vst.msk [vmem:[%s6529_s3 + $0x790] sm:$0xff] %vm2746_vm2, %v2650_v15  ;;  %v2376_v21 = vadd.f32 %v6042_v20, %v2375_v29 }
 0x2ce   :  { %v2481_v22 = vmax.f32 %v1614_v18, 0.0  ;;  %v2566_v23 = vmax.f32 %v1869_v19, 0.0 }
 0x2cf   :  { %v2735_v24 = vmax.f32 %v2376_v21, 0.0 }
 0x2d0   :  { %2820 = vst.msk [vmem:[%s6529_s3 + $0x248] sm:$0xff] %vm2746_vm2, %v2481_v22  ;;  %v2123_v25 = vpop.f32.mrf.mxu2 }
 0x2d1   :  { %2905 = vst.msk [vmem:[%s6529_s3 + $0x4f0] sm:$0xff] %vm2746_vm2, %v2566_v23  ;;  %v2124_v26 = vadd.f32 %v6042_v20, %v2123_v25 }
 0x2d2   :  { %3074 = vst.msk [vmem:[%s6529_s3 + $0xa38] sm:$0xff] %vm2746_vm2, %v2735_v24 }
 0x2d3   :  { %v2651_v27 = vmax.f32 %v2124_v26, 0.0  ;;  %v1616_v28 = vpop.f32.mrf.mxu0  ;;  %v1871_v30 = vpop.f32.mrf.mxu1 }
 0x2d4   :  { %v1617_v31 = vadd.f32 %v6042_v20, %v1616_v28  ;;  %v1872_v2 = vadd.f32 %v6042_v20, %v1871_v30  ;;  %v2378_v32 = vpop.f32.mrf.mxu3 }
 0x2d5   :  { %2990 = vst.msk [vmem:[%s6529_s3 + $0x798] sm:$0xff] %vm2746_vm2, %v2651_v27  ;;  %v2379_v33 = vadd.f32 %v6042_v20, %v2378_v32 }
 0x2d6   :  { %v2482_v34 = vmax.f32 %v1617_v31, 0.0  ;;  %v2567_v35 = vmax.f32 %v1872_v2, 0.0 }
 0x2d7   :  { %v2736_v36 = vmax.f32 %v2379_v33, 0.0 }
 0x2d8   :  { %2821 = vst.msk [vmem:[%s6529_s3 + $0x250] sm:$0xff] %vm2746_vm2, %v2482_v34  ;;  %v2126_v37 = vpop.f32.mrf.mxu2 }
 0x2d9   :  { %2906 = vst.msk [vmem:[%s6529_s3 + $0x4f8] sm:$0xff] %vm2746_vm2, %v2567_v35  ;;  %v2127_v38 = vadd.f32 %v6042_v20, %v2126_v37 }
 0x2da   :  { %3075 = vst.msk [vmem:[%s6529_s3 + $0xa40] sm:$0xff] %vm2746_vm2, %v2736_v36 }
 0x2db   :  { %v2652_v39 = vmax.f32 %v2127_v38, 0.0  ;;  %v1619_v40 = vpop.f32.mrf.mxu0  ;;  %v1874_v41 = vpop.f32.mrf.mxu1 }
 0x2dc   :  { %v1620_v42 = vadd.f32 %v6042_v20, %v1619_v40  ;;  %v1875_v43 = vadd.f32 %v6042_v20, %v1874_v41  ;;  %v2381_v44 = vpop.f32.mrf.mxu3 }
 0x2dd   :  { %2991 = vst.msk [vmem:[%s6529_s3 + $0x7a0] sm:$0xff] %vm2746_vm2, %v2652_v39  ;;  %v2382_v45 = vadd.f32 %v6042_v20, %v2381_v44 }
 0x2de   :  { %v2483_v46 = vmax.f32 %v1620_v42, 0.0  ;;  %v2568_v47 = vmax.f32 %v1875_v43, 0.0 }
 0x2df   :  { %v2737_v48 = vmax.f32 %v2382_v45, 0.0 }
 0x2e0   :  { %2822 = vst.msk [vmem:[%s6529_s3 + $0x258] sm:$0xff] %vm2746_vm2, %v2483_v46  ;;  %v2129_v49 = vpop.f32.mrf.mxu2 }
 0x2e1   :  { %2907 = vst.msk [vmem:[%s6529_s3 + $0x500] sm:$0xff] %vm2746_vm2, %v2568_v47  ;;  %v2130_v50 = vadd.f32 %v6042_v20, %v2129_v49 }
 0x2e2   :  { %3076 = vst.msk [vmem:[%s6529_s3 + $0xa48] sm:$0xff] %vm2746_vm2, %v2737_v48 }
 0x2e3   :  { %v2653_v51 = vmax.f32 %v2130_v50, 0.0  ;;  %v1622_v52 = vpop.f32.mrf.mxu0  ;;  %v1877_v53 = vpop.f32.mrf.mxu1 }
 0x2e4   :  { %v1623_v54 = vadd.f32 %v6042_v20, %v1622_v52  ;;  %v1878_v55 = vadd.f32 %v6042_v20, %v1877_v53  ;;  %v2384_v56 = vpop.f32.mrf.mxu3 }
 0x2e5   :  { %2992 = vst.msk [vmem:[%s6529_s3 + $0x7a8] sm:$0xff] %vm2746_vm2, %v2653_v51  ;;  %v2385_v57 = vadd.f32 %v6042_v20, %v2384_v56 }
 0x2e6   :  { %v2484_v58 = vmax.f32 %v1623_v54, 0.0  ;;  %v2569_v59 = vmax.f32 %v1878_v55, 0.0 }
 0x2e7   :  { %v2738_v60 = vmax.f32 %v2385_v57, 0.0 }
 0x2e8   :  { %2823 = vst.msk [vmem:[%s6529_s3 + $0x260] sm:$0xff] %vm2746_vm2, %v2484_v58  ;;  %v2132_v61 = vpop.f32.mrf.mxu2 }
 0x2e9   :  { %2908 = vst.msk [vmem:[%s6529_s3 + $0x508] sm:$0xff] %vm2746_vm2, %v2569_v59  ;;  %v2133_v62 = vadd.f32 %v6042_v20, %v2132_v61 }
 0x2ea   :  { %3077 = vst.msk [vmem:[%s6529_s3 + $0xa50] sm:$0xff] %vm2746_vm2, %v2738_v60 }
 0x2eb   :  { %v2654_v63 = vmax.f32 %v2133_v62, 0.0  ;;  %v1625_v0 = vpop.f32.mrf.mxu0  ;;  %v1880_v1 = vpop.f32.mrf.mxu1 }
 0x2ec   :  { %v1626_v3 = vadd.f32 %v6042_v20, %v1625_v0  ;;  %v1881_v4 = vadd.f32 %v6042_v20, %v1880_v1  ;;  %v2387_v5 = vpop.f32.mrf.mxu3 }
 0x2ed   :  { %2993 = vst.msk [vmem:[%s6529_s3 + $0x7b0] sm:$0xff] %vm2746_vm2, %v2654_v63  ;;  %v2388_v6 = vadd.f32 %v6042_v20, %v2387_v5 }
 0x2ee   :  { %v2485_v7 = vmax.f32 %v1626_v3, 0.0  ;;  %v2570_v8 = vmax.f32 %v1881_v4, 0.0 }
 0x2ef   :  { %v2739_v9 = vmax.f32 %v2388_v6, 0.0 }
 0x2f0   :  { %2824 = vst.msk [vmem:[%s6529_s3 + $0x268] sm:$0xff] %vm2746_vm2, %v2485_v7  ;;  %v2135_v10 = vpop.f32.mrf.mxu2 }
 0x2f1   :  { %2909 = vst.msk [vmem:[%s6529_s3 + $0x510] sm:$0xff] %vm2746_vm2, %v2570_v8  ;;  %v2136_v11 = vadd.f32 %v6042_v20, %v2135_v10 }
 0x2f2   :  { %3078 = vst.msk [vmem:[%s6529_s3 + $0xa58] sm:$0xff] %vm2746_vm2, %v2739_v9 }
 0x2f3   :  { %v2655_v12 = vmax.f32 %v2136_v11, 0.0  ;;  %v1628_v13 = vpop.f32.mrf.mxu0  ;;  %v1883_v14 = vpop.f32.mrf.mxu1 }
 0x2f4   :  { %v1629_v15 = vadd.f32 %v6042_v20, %v1628_v13  ;;  %v1884_v16 = vadd.f32 %v6042_v20, %v1883_v14  ;;  %v2390_v17 = vpop.f32.mrf.mxu3 }
 0x2f5   :  { %2994 = vst.msk [vmem:[%s6529_s3 + $0x7b8] sm:$0xff] %vm2746_vm2, %v2655_v12  ;;  %v2391_v18 = vadd.f32 %v6042_v20, %v2390_v17 }
 0x2f6   :  { %v2486_v19 = vmax.f32 %v1629_v15, 0.0  ;;  %v2571_v29 = vmax.f32 %v1884_v16, 0.0 }
 0x2f7   :  { %v2740_v21 = vmax.f32 %v2391_v18, 0.0 }
 0x2f8   :  { %2825 = vst.msk [vmem:[%s6529_s3 + $0x270] sm:$0xff] %vm2746_vm2, %v2486_v19  ;;  %v2138_v22 = vpop.f32.mrf.mxu2 }
 0x2f9   :  { %2910 = vst.msk [vmem:[%s6529_s3 + $0x518] sm:$0xff] %vm2746_vm2, %v2571_v29  ;;  %v2139_v23 = vadd.f32 %v6042_v20, %v2138_v22 }
 0x2fa   :  { %3079 = vst.msk [vmem:[%s6529_s3 + $0xa60] sm:$0xff] %vm2746_vm2, %v2740_v21 }
 0x2fb   :  { %v2656_v24 = vmax.f32 %v2139_v23, 0.0  ;;  %v1631_v25 = vpop.f32.mrf.mxu0  ;;  %v1886_v26 = vpop.f32.mrf.mxu1 }
 0x2fc   :  { %v1632_v27 = vadd.f32 %v6042_v20, %v1631_v25  ;;  %v1887_v28 = vadd.f32 %v6042_v20, %v1886_v26  ;;  %v2393_v30 = vpop.f32.mrf.mxu3 }
 0x2fd   :  { %2995 = vst.msk [vmem:[%s6529_s3 + $0x7c0] sm:$0xff] %vm2746_vm2, %v2656_v24  ;;  %v2394_v31 = vadd.f32 %v6042_v20, %v2393_v30 }
 0x2fe   :  { %v2487_v2 = vmax.f32 %v1632_v27, 0.0  ;;  %v2572_v32 = vmax.f32 %v1887_v28, 0.0 }
 0x2ff   :  { %v2741_v33 = vmax.f32 %v2394_v31, 0.0 }
 0x300   :  { %2826 = vst.msk [vmem:[%s6529_s3 + $0x278] sm:$0xff] %vm2746_vm2, %v2487_v2  ;;  %v2141_v34 = vpop.f32.mrf.mxu2 }
 0x301   :  { %2911 = vst.msk [vmem:[%s6529_s3 + $0x520] sm:$0xff] %vm2746_vm2, %v2572_v32  ;;  %v2142_v35 = vadd.f32 %v6042_v20, %v2141_v34 }
 0x302   :  { %3080 = vst.msk [vmem:[%s6529_s3 + $0xa68] sm:$0xff] %vm2746_vm2, %v2741_v33 }
 0x303   :  { %v2657_v36 = vmax.f32 %v2142_v35, 0.0  ;;  %v1634_v37 = vpop.f32.mrf.mxu0  ;;  %v1889_v38 = vpop.f32.mrf.mxu1 }
 0x304   :  { %v1635_v39 = vadd.f32 %v6042_v20, %v1634_v37  ;;  %v1890_v40 = vadd.f32 %v6042_v20, %v1889_v38  ;;  %v2396_v41 = vpop.f32.mrf.mxu3 }
 0x305   :  { %2996 = vst.msk [vmem:[%s6529_s3 + $0x7c8] sm:$0xff] %vm2746_vm2, %v2657_v36  ;;  %v2397_v42 = vadd.f32 %v6042_v20, %v2396_v41 }
 0x306   :  { %v2488_v43 = vmax.f32 %v1635_v39, 0.0  ;;  %v2573_v44 = vmax.f32 %v1890_v40, 0.0 }
 0x307   :  { %v2742_v45 = vmax.f32 %v2397_v42, 0.0 }
 0x308   :  { %2827 = vst.msk [vmem:[%s6529_s3 + $0x280] sm:$0xff] %vm2746_vm2, %v2488_v43  ;;  %v2144_v46 = vpop.f32.mrf.mxu2 }
 0x309   :  { %2912 = vst.msk [vmem:[%s6529_s3 + $0x528] sm:$0xff] %vm2746_vm2, %v2573_v44  ;;  %v2145_v47 = vadd.f32 %v6042_v20, %v2144_v46 }
 0x30a   :  { %3081 = vst.msk [vmem:[%s6529_s3 + $0xa70] sm:$0xff] %vm2746_vm2, %v2742_v45 }
 0x30b   :  { %v2658_v48 = vmax.f32 %v2145_v47, 0.0  ;;  %v1637_v49 = vpop.f32.mrf.mxu0  ;;  %v1892_v50 = vpop.f32.mrf.mxu1 }
 0x30c   :  { %v1638_v51 = vadd.f32 %v6042_v20, %v1637_v49  ;;  %v1893_v52 = vadd.f32 %v6042_v20, %v1892_v50  ;;  %v2399_v53 = vpop.f32.mrf.mxu3 }
 0x30d   :  { %2997 = vst.msk [vmem:[%s6529_s3 + $0x7d0] sm:$0xff] %vm2746_vm2, %v2658_v48  ;;  %v2400_v54 = vadd.f32 %v6042_v20, %v2399_v53 }
 0x30e   :  { %v2489_v55 = vmax.f32 %v1638_v51, 0.0  ;;  %v2574_v56 = vmax.f32 %v1893_v52, 0.0 }
 0x30f   :  { %v2743_v57 = vmax.f32 %v2400_v54, 0.0 }
 0x310   :  { %2828 = vst.msk [vmem:[%s6529_s3 + $0x288] sm:$0xff] %vm2746_vm2, %v2489_v55  ;;  %v2147_v58 = vpop.f32.mrf.mxu2 }
 0x311   :  { %2913 = vst.msk [vmem:[%s6529_s3 + $0x530] sm:$0xff] %vm2746_vm2, %v2574_v56  ;;  %v2148_v59 = vadd.f32 %v6042_v20, %v2147_v58 }
 0x312   :  { %3082 = vst.msk [vmem:[%s6529_s3 + $0xa78] sm:$0xff] %vm2746_vm2, %v2743_v57 }
 0x313   :  { %v2659_v60 = vmax.f32 %v2148_v59, 0.0  ;;  %v1640_v61 = vpop.f32.mrf.mxu0  ;;  %v1895_v62 = vpop.f32.mrf.mxu1 }
 0x314   :  { %v1641_v63 = vadd.f32 %v6042_v20, %v1640_v61  ;;  %v1896_v0 = vadd.f32 %v6042_v20, %v1895_v62  ;;  %v2402_v1 = vpop.f32.mrf.mxu3 }
 0x315   :  { %2998 = vst.msk [vmem:[%s6529_s3 + $0x7d8] sm:$0xff] %vm2746_vm2, %v2659_v60  ;;  %v2403_v3 = vadd.f32 %v6042_v20, %v2402_v1 }
 0x316   :  { %v2490_v4 = vmax.f32 %v1641_v63, 0.0  ;;  %v2575_v5 = vmax.f32 %v1896_v0, 0.0 }
 0x317   :  { %v2744_v6 = vmax.f32 %v2403_v3, 0.0 }
 0x318   :  { %2829 = vst.msk [vmem:[%s6529_s3 + $0x290] sm:$0xff] %vm2746_vm2, %v2490_v4  ;;  %v2150_v7 = vpop.f32.mrf.mxu2 }
 0x319   :  { %2914 = vst.msk [vmem:[%s6529_s3 + $0x538] sm:$0xff] %vm2746_vm2, %v2575_v5  ;;  %v2151_v8 = vadd.f32 %v6042_v20, %v2150_v7 }
 0x31a   :  { %3083 = vst.msk [vmem:[%s6529_s3 + $0xa80] sm:$0xff] %vm2746_vm2, %v2744_v6 }
 0x31b   :  { %v2660_v9 = vmax.f32 %v2151_v8, 0.0  ;;  %v1643_v10 = vpop.f32.mrf.mxu0  ;;  %v1898_v11 = vpop.f32.mrf.mxu1 }
 0x31c   :  { %v1644_v12 = vadd.f32 %v6042_v20, %v1643_v10  ;;  %v1899_v13 = vadd.f32 %v6042_v20, %v1898_v11  ;;  %v2405_v14 = vpop.f32.mrf.mxu3 }
 0x31d   :  { %2999 = vst.msk [vmem:[%s6529_s3 + $0x7e0] sm:$0xff] %vm2746_vm2, %v2660_v9  ;;  %v2406_v15 = vadd.f32 %v6042_v20, %v2405_v14 }
 0x31e   :  { %v2491_v16 = vmax.f32 %v1644_v12, 0.0  ;;  %v2576_v17 = vmax.f32 %v1899_v13, 0.0 }
 0x31f   :  { %v2745_v18 = vmax.f32 %v2406_v15, 0.0 }
 0x320   :  { %2830 = vst.msk [vmem:[%s6529_s3 + $0x298] sm:$0xff] %vm2746_vm2, %v2491_v16  ;;  %v2153_v19 = vpop.f32.mrf.mxu2 }
 0x321   :  { %2915 = vst.msk [vmem:[%s6529_s3 + $0x540] sm:$0xff] %vm2746_vm2, %v2576_v17  ;;  %v2154_v29 = vadd.f32 %v6042_v20, %v2153_v19 }
 0x322   :  { %3084 = vst.msk [vmem:[%s6529_s3 + $0xa88] sm:$0xff] %vm2746_vm2, %v2745_v18 }
 0x323   :  { %v2661_v21 = vmax.f32 %v2154_v29, 0.0  ;;  %v1646_v22 = vpop.f32.mrf.mxu0  ;;  %v1901_v23 = vpop.f32.mrf.mxu1 }
 0x324   :  { %v1647_v24 = vadd.f32 %v6042_v20, %v1646_v22  ;;  %v1902_v25 = vadd.f32 %v6042_v20, %v1901_v23 }
 0x325   :  { %3000 = vst.msk [vmem:[%s6529_s3 + $0x7e8] sm:$0xff] %vm2746_vm2, %v2661_v21 }
 0x326   :  { %v2492_v26 = vmax.f32 %v1647_v24, 0.0  ;;  %v2577_v27 = vmax.f32 %v1902_v25, 0.0 }
 0x328   :  { %2831 = vst.msk [vmem:[%s6529_s3 + $0x2a0] sm:$0xff] %vm2746_vm2, %v2492_v26  ;;  %v2156_v28 = vpop.f32.mrf.mxu2 }
 0x329   :  { %2916 = vst.msk [vmem:[%s6529_s3 + $0x548] sm:$0xff] %vm2746_vm2, %v2577_v27  ;;  %v2157_v30 = vadd.f32 %v6042_v20, %v2156_v28 }
 0x32b   :  { %v2662_v31 = vmax.f32 %v2157_v30, 0.0 }
 0x32d   :  { %3001 = vst.msk [vmem:[%s6529_s3 + $0x7f0] sm:$0xff] %vm2746_vm2, %v2662_v31 }

// kernel: sunet_forward.4
= control target key start
LH: loop header
LB: loop body
LE: loop exit
PB: predicated region body
PF: predicated region fallthrough
CT: control target
= control target key end

     0   :  { %vm270_vm0 = vcmask 1045504   ;;  %vm86_vm1 = vcmask 441344   ;;  %vm535_vm2 = vcmask 130048   ;;  %vm596_vm3 = vcmask 125952   ;;  %s1280_s1 = inlined_call_operand.vmem [shape: f32[54,16], index: 1, kind: input, shape index: {}]   ;;  %s1281_s2 = inlined_call_operand.vmem [shape: f32[1,16], index: 2, kind: input, shape index: {}]   ;;  %s1282_s0 = inlined_call_operand.vmem [shape: f32[484,54], index: 0, kind: input, shape index: {}]   ;;  %s1283_s3 = inlined_call_operand.vmem [shape: f32[484,16], index: 3, kind: output, shape index: {}]  }
   0x1   :  { %v81_v0 = vld [vmem:[%s1280_s1 + $0x30] sm:$0x3f]  ;;  %v80_v1 = vld [vmem:[%s1280_s1 + $0x28] sm:$0xff]  ;;  %v79_v2 = vld [vmem:[%s1280_s1 + $0x20] sm:$0xff] }
   0x2   :  { %665 = vmatpush.msk.msra.mxu2 %vm270_vm0, %v81_v0  ;;  %666 = vmatpush.msk.msra.mxu3 %vm270_vm0, %v81_v0  ;;  %v78_v3 = vld [vmem:[%s1280_s1 + $0x18] sm:$0xff]  ;;  %v77_v4 = vld [vmem:[%s1280_s1 + $0x10] sm:$0xff]  ;;  %v76_v5 = vld [vmem:[%s1280_s1 + $0x8] sm:$0xff] }
   0x3   :  { %602 = vmatpush.msk.msra.mxu0 %vm270_vm0, %v81_v0  ;;  %664 = vmatpush.msk.msra.mxu1 %vm270_vm0, %v81_v0  ;;  %v75_v6 = vld [vmem:[%s1280_s1] sm:$0xff]  ;;  %v44_v7 = vld [vmem:[%s1282_s0 + $0xf0] sm:$0xff]  ;;  %v29_v10 = vld [vmem:[%s1282_s0 + $0x78] sm:$0xff] }
   0x4   :  { %668 = vmatpush.msra.mxu2 %v80_v1  ;;  %669 = vmatpush.msra.mxu3 %v80_v1  ;;  %v60_v8 = vld [vmem:[%s1282_s0 + $0x170] sm:$0xff]  ;;  %v14_v9 = vld [vmem:[%s1282_s0] sm:$0xff]  ;;  %v45_v11 = vld [vmem:[%s1282_s0 + $0xf8] sm:$0xff] }
   0x5   :  { %284 = vmatpush.msra.mxu0 %v80_v1  ;;  %667 = vmatpush.msra.mxu1 %v80_v1  ;;  %v61_v12 = vld [vmem:[%s1282_s0 + $0x178] sm:$0xff]  ;;  %v15_v13 = vld [vmem:[%s1282_s0 + $0x8] sm:$0xff]  ;;  %v30_v14 = vld [vmem:[%s1282_s0 + $0x80] sm:$0xff] }
   0x6   :  { %671 = vmatpush.msra.mxu2 %v79_v2  ;;  %672 = vmatpush.msra.mxu3 %v79_v2  ;;  %v46_v15 = vld [vmem:[%s1282_s0 + $0x100] sm:$0xff]  ;;  %v16_v17 = vld [vmem:[%s1282_s0 + $0x10] sm:$0xff]  ;;  %v31_v18 = vld [vmem:[%s1282_s0 + $0x88] sm:$0xff] }
   0x7   :  { %285 = vmatpush.msra.mxu0 %v79_v2  ;;  %670 = vmatpush.msra.mxu1 %v79_v2  ;;  %v62_v16 = vld [vmem:[%s1282_s0 + $0x180] sm:$0xff]  ;;  %v47_v19 = vld [vmem:[%s1282_s0 + $0x108] sm:$0xff]  ;;  %v17_v21 = vld [vmem:[%s1282_s0 + $0x18] sm:$0xff] }
   0x8   :  { %674 = vmatpush.msra.mxu2 %v78_v3  ;;  %675 = vmatpush.msra.mxu3 %v78_v3  ;;  %v63_v20 = vld [vmem:[%s1282_s0 + $0x188] sm:$0xff]  ;;  %v32_v22 = vld [vmem:[%s1282_s0 + $0x90] sm:$0xff]  ;;  %v18_v25 = vld [vmem:[%s1282_s0 + $0x20] sm:$0xff] }
   0x9   :  { %286 = vmatpush.msra.mxu0 %v78_v3  ;;  %673 = vmatpush.msra.mxu1 %v78_v3  ;;  %v48_v23 = vld [vmem:[%s1282_s0 + $0x110] sm:$0xff]  ;;  %v33_v26 = vld [vmem:[%s1282_s0 + $0x98] sm:$0xff]  ;;  %v19_v29 = vld [vmem:[%s1282_s0 + $0x28] sm:$0xff] }
   0xa   :  { %677 = vmatpush.msra.mxu2 %v77_v4  ;;  %678 = vmatpush.msra.mxu3 %v77_v4  ;;  %v64_v24 = vld [vmem:[%s1282_s0 + $0x190] sm:$0xff]  ;;  %v49_v27 = vld [vmem:[%s1282_s0 + $0x118] sm:$0xff]  ;;  %v34_v30 = vld [vmem:[%s1282_s0 + $0xa0] sm:$0xff] }
   0xb   :  { %287 = vmatpush.msra.mxu0 %v77_v4  ;;  %676 = vmatpush.msra.mxu1 %v77_v4  ;;  %v65_v28 = vld [vmem:[%s1282_s0 + $0x198] sm:$0xff]  ;;  %v50_v31 = vld [vmem:[%s1282_s0 + $0x120] sm:$0xff]  ;;  %v20_v33 = vld [vmem:[%s1282_s0 + $0x30] sm:$0xff] }
   0xc   :  { %680 = vmatpush.msra.mxu2 %v76_v5  ;;  %681 = vmatpush.msra.mxu3 %v76_v5  ;;  %v66_v32 = vld [vmem:[%s1282_s0 + $0x1a0] sm:$0xff]  ;;  %v35_v34 = vld [vmem:[%s1282_s0 + $0xa8] sm:$0xff]  ;;  %v21_v37 = vld [vmem:[%s1282_s0 + $0x38] sm:$0xff] }
   0xd   :  { %288 = vmatpush.msra.mxu0 %v76_v5  ;;  %679 = vmatpush.msra.mxu1 %v76_v5  ;;  %v51_v35 = vld [vmem:[%s1282_s0 + $0x128] sm:$0xff]  ;;  %v36_v38 = vld [vmem:[%s1282_s0 + $0xb0] sm:$0xff]  ;;  %v22_v41 = vld [vmem:[%s1282_s0 + $0x40] sm:$0xff] }
   0xe   :  { %683 = vmatpush.msra.mxu2 %v75_v6  ;;  %684 = vmatpush.msra.mxu3 %v75_v6  ;;  %v67_v36 = vld [vmem:[%s1282_s0 + $0x1a8] sm:$0xff]  ;;  %v52_v39 = vld [vmem:[%s1282_s0 + $0x130] sm:$0xff]  ;;  %v37_v42 = vld [vmem:[%s1282_s0 + $0xb8] sm:$0xff] }
   0xf   :  { %633 = vmatmul.msk.f32.vlgmr.msra.gmra.mxu2 %vm86_vm1, %v44_v7  ;;  %649 = vmatmul.msk.f32.vlgmr.msra.gmra.mxu3 %vm86_vm1, %v60_v8  ;;  %v68_v40 = vld [vmem:[%s1282_s0 + $0x1b0] sm:$0xff]  ;;  %v53_v43 = vld [vmem:[%s1282_s0 + $0x138] sm:$0xff]  ;;  %v23_v45 = vld [vmem:[%s1282_s0 + $0x48] sm:$0xff] }
  0x10   :  { %289 = vmatpush.msra.mxu0 %v75_v6  ;;  %682 = vmatpush.msra.mxu1 %v75_v6  ;;  %v69_v44 = vld [vmem:[%s1282_s0 + $0x1b8] sm:$0xff]  ;;  %v38_v46 = vld [vmem:[%s1282_s0 + $0xc0] sm:$0xff]  ;;  %v24_v49 = vld [vmem:[%s1282_s0 + $0x50] sm:$0xff] }
  0x11   :  { %603 = vmatmul.msk.f32.vlgmr.msra.gmra.mxu0 %vm86_vm1, %v14_v9  ;;  %618 = vmatmul.msk.f32.vlgmr.msra.gmra.mxu1 %vm86_vm1, %v29_v10  ;;  %v54_v47 = vld [vmem:[%s1282_s0 + $0x140] sm:$0xff]  ;;  %v39_v50 = vld [vmem:[%s1282_s0 + $0xc8] sm:$0xff]  ;;  %v25_v53 = vld [vmem:[%s1282_s0 + $0x58] sm:$0xff] }
  0x12   :  { %v70_v48 = vld [vmem:[%s1282_s0 + $0x1c0] sm:$0xff]  ;;  %v55_v51 = vld [vmem:[%s1282_s0 + $0x148] sm:$0xff]  ;;  %v40_v54 = vld [vmem:[%s1282_s0 + $0xd0] sm:$0xff] }
  0x13   :  { %v71_v52 = vld [vmem:[%s1282_s0 + $0x1c8] sm:$0xff]  ;;  %v56_v55 = vld [vmem:[%s1282_s0 + $0x150] sm:$0xff]  ;;  %v26_v57 = vld [vmem:[%s1282_s0 + $0x60] sm:$0xff] }
  0x14   :  { %v72_v56 = vld [vmem:[%s1282_s0 + $0x1d0] sm:$0xff]  ;;  %v41_v58 = vld [vmem:[%s1282_s0 + $0xd8] sm:$0xff]  ;;  %v27_v61 = vld [vmem:[%s1282_s0 + $0x68] sm:$0xff] }
  0x15   :  { %v57_v59 = vld [vmem:[%s1282_s0 + $0x158] sm:$0xff]  ;;  %v42_v62 = vld [vmem:[%s1282_s0 + $0xe0] sm:$0xff]  ;;  %v28_v1 = vld [vmem:[%s1282_s0 + $0x70] sm:$0xff] }
  0x16   :  { %v73_v60 = vld [vmem:[%s1282_s0 + $0x1d8] sm:$0xff]  ;;  %v58_v63 = vld [vmem:[%s1282_s0 + $0x160] sm:$0xff]  ;;  %v43_v2 = vld [vmem:[%s1282_s0 + $0xe8] sm:$0xff] }
  0x17   :  { %634 = vmatmul.msk.f32.gmra.mxu2 %vm86_vm1, %v45_v11  ;;  %650 = vmatmul.msk.f32.gmra.mxu3 %vm86_vm1, %v61_v12  ;;  %v74_v0 = vld [vmem:[%s1282_s0 + $0x1e0] sm:$0xf]  ;;  %v59_v3 = vld [vmem:[%s1282_s0 + $0x168] sm:$0xff] }
  0x18   :  { %v974_v4 = vld [vmem:[%s1281_s2] ss:$0 sm:$0xff] }
  0x19   :  { %604 = vmatmul.msk.f32.gmra.mxu0 %vm86_vm1, %v15_v13  ;;  %619 = vmatmul.msk.f32.gmra.mxu1 %vm86_vm1, %v30_v14 }
  0x1f   :  { %635 = vmatmul.msk.f32.gmra.mxu2 %vm86_vm1, %v46_v15  ;;  %651 = vmatmul.msk.f32.gmra.mxu3 %vm86_vm1, %v62_v16 }
  0x21   :  { %605 = vmatmul.msk.f32.gmra.mxu0 %vm86_vm1, %v16_v17  ;;  %620 = vmatmul.msk.f32.gmra.mxu1 %vm86_vm1, %v31_v18 }
  0x27   :  { %636 = vmatmul.msk.f32.gmra.mxu2 %vm86_vm1, %v47_v19  ;;  %652 = vmatmul.msk.f32.gmra.mxu3 %vm86_vm1, %v63_v20 }
  0x29   :  { %606 = vmatmul.msk.f32.gmra.mxu0 %vm86_vm1, %v17_v21  ;;  %621 = vmatmul.msk.f32.gmra.mxu1 %vm86_vm1, %v32_v22 }
  0x2f   :  { %637 = vmatmul.msk.f32.gmra.mxu2 %vm86_vm1, %v48_v23  ;;  %653 = vmatmul.msk.f32.gmra.mxu3 %vm86_vm1, %v64_v24 }
  0x31   :  { %607 = vmatmul.msk.f32.gmra.mxu0 %vm86_vm1, %v18_v25  ;;  %622 = vmatmul.msk.f32.gmra.mxu1 %vm86_vm1, %v33_v26 }
  0x37   :  { %638 = vmatmul.msk.f32.gmra.mxu2 %vm86_vm1, %v49_v27  ;;  %654 = vmatmul.msk.f32.gmra.mxu3 %vm86_vm1, %v65_v28 }
  0x39   :  { %608 = vmatmul.msk.f32.gmra.mxu0 %vm86_vm1, %v19_v29  ;;  %623 = vmatmul.msk.f32.gmra.mxu1 %vm86_vm1, %v34_v30 }
  0x3f   :  { %639 = vmatmul.msk.f32.gmra.mxu2 %vm86_vm1, %v50_v31  ;;  %655 = vmatmul.msk.f32.gmra.mxu3 %vm86_vm1, %v66_v32 }
  0x41   :  { %609 = vmatmul.msk.f32.gmra.mxu0 %vm86_vm1, %v20_v33  ;;  %624 = vmatmul.msk.f32.gmra.mxu1 %vm86_vm1, %v35_v34 }
  0x47   :  { %640 = vmatmul.msk.f32.gmra.mxu2 %vm86_vm1, %v51_v35  ;;  %656 = vmatmul.msk.f32.gmra.mxu3 %vm86_vm1, %v67_v36 }
  0x49   :  { %610 = vmatmul.msk.f32.gmra.mxu0 %vm86_vm1, %v21_v37  ;;  %625 = vmatmul.msk.f32.gmra.mxu1 %vm86_vm1, %v36_v38 }
  0x4f   :  { %641 = vmatmul.msk.f32.gmra.mxu2 %vm86_vm1, %v52_v39  ;;  %657 = vmatmul.msk.f32.gmra.mxu3 %vm86_vm1, %v68_v40 }
  0x51   :  { %611 = vmatmul.msk.f32.gmra.mxu0 %vm86_vm1, %v22_v41  ;;  %626 = vmatmul.msk.f32.gmra.mxu1 %vm86_vm1, %v37_v42 }
  0x57   :  { %642 = vmatmul.msk.f32.gmra.mxu2 %vm86_vm1, %v53_v43  ;;  %658 = vmatmul.msk.f32.gmra.mxu3 %vm86_vm1, %v69_v44 }
  0x59   :  { %612 = vmatmul.msk.f32.gmra.mxu0 %vm86_vm1, %v23_v45  ;;  %627 = vmatmul.msk.f32.gmra.mxu1 %vm86_vm1, %v38_v46 }
  0x5f   :  { %643 = vmatmul.msk.f32.gmra.mxu2 %vm86_vm1, %v54_v47  ;;  %659 = vmatmul.msk.f32.gmra.mxu3 %vm86_vm1, %v70_v48 }
  0x61   :  { %613 = vmatmul.msk.f32.gmra.mxu0 %vm86_vm1, %v24_v49  ;;  %628 = vmatmul.msk.f32.gmra.mxu1 %vm86_vm1, %v39_v50 }
  0x67   :  { %644 = vmatmul.msk.f32.gmra.mxu2 %vm86_vm1, %v55_v51  ;;  %660 = vmatmul.msk.f32.gmra.mxu3 %vm86_vm1, %v71_v52 }
  0x69   :  { %614 = vmatmul.msk.f32.gmra.mxu0 %vm86_vm1, %v25_v53  ;;  %629 = vmatmul.msk.f32.gmra.mxu1 %vm86_vm1, %v40_v54 }
  0x6f   :  { %645 = vmatmul.msk.f32.gmra.mxu2 %vm86_vm1, %v56_v55  ;;  %661 = vmatmul.msk.f32.gmra.mxu3 %vm86_vm1, %v72_v56 }
  0x71   :  { %615 = vmatmul.msk.f32.gmra.mxu0 %vm86_vm1, %v26_v57  ;;  %630 = vmatmul.msk.f32.gmra.mxu1 %vm86_vm1, %v41_v58 }
  0x77   :  { %646 = vmatmul.msk.f32.gmra.mxu2 %vm86_vm1, %v57_v59  ;;  %662 = vmatmul.msk.f32.gmra.mxu3 %vm86_vm1, %v73_v60 }
  0x79   :  { %616 = vmatmul.msk.f32.gmra.mxu0 %vm86_vm1, %v27_v61  ;;  %631 = vmatmul.msk.f32.gmra.mxu1 %vm86_vm1, %v42_v62 }
  0x7f   :  { %647 = vmatmul.msk.f32.gmra.mxu2 %vm86_vm1, %v58_v63  ;;  %663 = vmatmul.msk.f32.gmra.mxu3 %vm86_vm1, %v74_v0 }
  0x81   :  { %617 = vmatmul.msk.f32.gmra.mxu0 %vm86_vm1, %v28_v1  ;;  %632 = vmatmul.msk.f32.gmra.mxu1 %vm86_vm1, %v43_v2 }
  0x87   :  { %648 = vmatmul.msk.f32.gmra.mxu2 %vm86_vm1, %v59_v3 }
  0x8e   :  { %v291_v5 = vpop.f32.mrf.mxu0  ;;  %v336_v6 = vpop.f32.mrf.mxu1 }
  0x8f   :  { %v292_v7 = vadd.f32 %v974_v4, %v291_v5  ;;  %v337_v8 = vadd.f32 %v974_v4, %v336_v6 }
  0x91   :  { %v474_v9 = vmax.f32 %v292_v7, 0.0  ;;  %v489_v10 = vmax.f32 %v337_v8, 0.0 }
  0x92   :  { %v381_v11 = vpop.f32.mrf.mxu2  ;;  %v429_v12 = vpop.f32.mrf.mxu3 }
  0x93   :  { %v382_v13 = vadd.f32 %v974_v4, %v381_v11  ;;  %536 = vst.msk [vmem:[%s1283_s3] sm:$0xff] %vm535_vm2, %v474_v9  ;;  %v430_v14 = vadd.f32 %v974_v4, %v429_v12 }
  0x94   :  { %551 = vst.msk [vmem:[%s1283_s3 + $0x78] sm:$0xff] %vm535_vm2, %v489_v10 }
  0x95   :  { %v504_v15 = vmax.f32 %v382_v13, 0.0  ;;  %v520_v16 = vmax.f32 %v430_v14, 0.0 }
  0x96   :  { %v294_v17 = vpop.f32.mrf.mxu0  ;;  %v339_v18 = vpop.f32.mrf.mxu1 }
  0x97   :  { %566 = vst.msk [vmem:[%s1283_s3 + $0xf0] sm:$0xff] %vm535_vm2, %v504_v15  ;;  %v295_v19 = vadd.f32 %v974_v4, %v294_v17  ;;  %v340_v20 = vadd.f32 %v974_v4, %v339_v18 }
  0x98   :  { %582 = vst.msk [vmem:[%s1283_s3 + $0x170] sm:$0xff] %vm535_vm2, %v520_v16 }
  0x99   :  { %v475_v21 = vmax.f32 %v295_v19, 0.0  ;;  %v490_v22 = vmax.f32 %v340_v20, 0.0 }
  0x9a   :  { %v384_v23 = vpop.f32.mrf.mxu2  ;;  %v432_v24 = vpop.f32.mrf.mxu3 }
  0x9b   :  { %v385_v25 = vadd.f32 %v974_v4, %v384_v23  ;;  %537 = vst.msk [vmem:[%s1283_s3 + $0x8] sm:$0xff] %vm535_vm2, %v475_v21  ;;  %v433_v26 = vadd.f32 %v974_v4, %v432_v24 }
  0x9c   :  { %552 = vst.msk [vmem:[%s1283_s3 + $0x80] sm:$0xff] %vm535_vm2, %v490_v22 }
  0x9d   :  { %v505_v27 = vmax.f32 %v385_v25, 0.0  ;;  %v521_v28 = vmax.f32 %v433_v26, 0.0 }
  0x9e   :  { %v297_v29 = vpop.f32.mrf.mxu0  ;;  %v342_v30 = vpop.f32.mrf.mxu1 }
  0x9f   :  { %567 = vst.msk [vmem:[%s1283_s3 + $0xf8] sm:$0xff] %vm535_vm2, %v505_v27  ;;  %v298_v31 = vadd.f32 %v974_v4, %v297_v29  ;;  %v343_v32 = vadd.f32 %v974_v4, %v342_v30 }
  0xa0   :  { %583 = vst.msk [vmem:[%s1283_s3 + $0x178] sm:$0xff] %vm535_vm2, %v521_v28 }
  0xa1   :  { %v476_v33 = vmax.f32 %v298_v31, 0.0  ;;  %v491_v34 = vmax.f32 %v343_v32, 0.0 }
  0xa2   :  { %v387_v35 = vpop.f32.mrf.mxu2  ;;  %v435_v36 = vpop.f32.mrf.mxu3 }
  0xa3   :  { %v388_v37 = vadd.f32 %v974_v4, %v387_v35  ;;  %538 = vst.msk [vmem:[%s1283_s3 + $0x10] sm:$0xff] %vm535_vm2, %v476_v33  ;;  %v436_v38 = vadd.f32 %v974_v4, %v435_v36 }
  0xa4   :  { %553 = vst.msk [vmem:[%s1283_s3 + $0x88] sm:$0xff] %vm535_vm2, %v491_v34 }
  0xa5   :  { %v506_v39 = vmax.f32 %v388_v37, 0.0  ;;  %v522_v40 = vmax.f32 %v436_v38, 0.0 }
  0xa6   :  { %v300_v41 = vpop.f32.mrf.mxu0  ;;  %v345_v42 = vpop.f32.mrf.mxu1 }
  0xa7   :  { %568 = vst.msk [vmem:[%s1283_s3 + $0x100] sm:$0xff] %vm535_vm2, %v506_v39  ;;  %v301_v43 = vadd.f32 %v974_v4, %v300_v41  ;;  %v346_v44 = vadd.f32 %v974_v4, %v345_v42 }
  0xa8   :  { %584 = vst.msk [vmem:[%s1283_s3 + $0x180] sm:$0xff] %vm535_vm2, %v522_v40 }
  0xa9   :  { %v477_v45 = vmax.f32 %v301_v43, 0.0  ;;  %v492_v46 = vmax.f32 %v346_v44, 0.0 }
  0xaa   :  { %v390_v47 = vpop.f32.mrf.mxu2  ;;  %v438_v48 = vpop.f32.mrf.mxu3 }
  0xab   :  { %v391_v49 = vadd.f32 %v974_v4, %v390_v47  ;;  %539 = vst.msk [vmem:[%s1283_s3 + $0x18] sm:$0xff] %vm535_vm2, %v477_v45  ;;  %v439_v50 = vadd.f32 %v974_v4, %v438_v48 }
  0xac   :  { %554 = vst.msk [vmem:[%s1283_s3 + $0x90] sm:$0xff] %vm535_vm2, %v492_v46 }
  0xad   :  { %v507_v51 = vmax.f32 %v391_v49, 0.0  ;;  %v523_v52 = vmax.f32 %v439_v50, 0.0 }
  0xae   :  { %v303_v53 = vpop.f32.mrf.mxu0  ;;  %v348_v54 = vpop.f32.mrf.mxu1 }
  0xaf   :  { %569 = vst.msk [vmem:[%s1283_s3 + $0x108] sm:$0xff] %vm535_vm2, %v507_v51  ;;  %v304_v55 = vadd.f32 %v974_v4, %v303_v53  ;;  %v349_v56 = vadd.f32 %v974_v4, %v348_v54 }
  0xb0   :  { %585 = vst.msk [vmem:[%s1283_s3 + $0x188] sm:$0xff] %vm535_vm2, %v523_v52 }
  0xb1   :  { %v478_v57 = vmax.f32 %v304_v55, 0.0  ;;  %v493_v58 = vmax.f32 %v349_v56, 0.0 }
  0xb2   :  { %v393_v59 = vpop.f32.mrf.mxu2  ;;  %v441_v60 = vpop.f32.mrf.mxu3 }
  0xb3   :  { %v394_v61 = vadd.f32 %v974_v4, %v393_v59  ;;  %540 = vst.msk [vmem:[%s1283_s3 + $0x20] sm:$0xff] %vm535_vm2, %v478_v57  ;;  %v442_v62 = vadd.f32 %v974_v4, %v441_v60 }
  0xb4   :  { %555 = vst.msk [vmem:[%s1283_s3 + $0x98] sm:$0xff] %vm535_vm2, %v493_v58 }
  0xb5   :  { %v508_v63 = vmax.f32 %v394_v61, 0.0  ;;  %v524_v0 = vmax.f32 %v442_v62, 0.0 }
  0xb6   :  { %v306_v1 = vpop.f32.mrf.mxu0  ;;  %v351_v2 = vpop.f32.mrf.mxu1 }
  0xb7   :  { %570 = vst.msk [vmem:[%s1283_s3 + $0x110] sm:$0xff] %vm535_vm2, %v508_v63  ;;  %v307_v3 = vadd.f32 %v974_v4, %v306_v1  ;;  %v352_v5 = vadd.f32 %v974_v4, %v351_v2 }
  0xb8   :  { %586 = vst.msk [vmem:[%s1283_s3 + $0x190] sm:$0xff] %vm535_vm2, %v524_v0 }
  0xb9   :  { %v479_v6 = vmax.f32 %v307_v3, 0.0  ;;  %v494_v7 = vmax.f32 %v352_v5, 0.0 }
  0xba   :  { %v396_v8 = vpop.f32.mrf.mxu2  ;;  %v444_v9 = vpop.f32.mrf.mxu3 }
  0xbb   :  { %v397_v10 = vadd.f32 %v974_v4, %v396_v8  ;;  %541 = vst.msk [vmem:[%s1283_s3 + $0x28] sm:$0xff] %vm535_vm2, %v479_v6  ;;  %v445_v11 = vadd.f32 %v974_v4, %v444_v9 }
  0xbc   :  { %556 = vst.msk [vmem:[%s1283_s3 + $0xa0] sm:$0xff] %vm535_vm2, %v494_v7 }
  0xbd   :  { %v509_v12 = vmax.f32 %v397_v10, 0.0  ;;  %v525_v13 = vmax.f32 %v445_v11, 0.0 }
  0xbe   :  { %v309_v14 = vpop.f32.mrf.mxu0  ;;  %v354_v15 = vpop.f32.mrf.mxu1 }
  0xbf   :  { %571 = vst.msk [vmem:[%s1283_s3 + $0x118] sm:$0xff] %vm535_vm2, %v509_v12  ;;  %v310_v16 = vadd.f32 %v974_v4, %v309_v14  ;;  %v355_v17 = vadd.f32 %v974_v4, %v354_v15 }
  0xc0   :  { %587 = vst.msk [vmem:[%s1283_s3 + $0x198] sm:$0xff] %vm535_vm2, %v525_v13 }
  0xc1   :  { %v480_v18 = vmax.f32 %v310_v16, 0.0  ;;  %v495_v19 = vmax.f32 %v355_v17, 0.0 }
  0xc2   :  { %v399_v20 = vpop.f32.mrf.mxu2  ;;  %v447_v21 = vpop.f32.mrf.mxu3 }
  0xc3   :  { %v400_v22 = vadd.f32 %v974_v4, %v399_v20  ;;  %542 = vst.msk [vmem:[%s1283_s3 + $0x30] sm:$0xff] %vm535_vm2, %v480_v18  ;;  %v448_v23 = vadd.f32 %v974_v4, %v447_v21 }
  0xc4   :  { %557 = vst.msk [vmem:[%s1283_s3 + $0xa8] sm:$0xff] %vm535_vm2, %v495_v19 }
  0xc5   :  { %v510_v24 = vmax.f32 %v400_v22, 0.0  ;;  %v526_v25 = vmax.f32 %v448_v23, 0.0 }
  0xc6   :  { %v312_v26 = vpop.f32.mrf.mxu0  ;;  %v357_v27 = vpop.f32.mrf.mxu1 }
  0xc7   :  { %572 = vst.msk [vmem:[%s1283_s3 + $0x120] sm:$0xff] %vm535_vm2, %v510_v24  ;;  %v313_v28 = vadd.f32 %v974_v4, %v312_v26  ;;  %v358_v29 = vadd.f32 %v974_v4, %v357_v27 }
  0xc8   :  { %588 = vst.msk [vmem:[%s1283_s3 + $0x1a0] sm:$0xff] %vm535_vm2, %v526_v25 }
  0xc9   :  { %v481_v30 = vmax.f32 %v313_v28, 0.0  ;;  %v496_v31 = vmax.f32 %v358_v29, 0.0 }
  0xca   :  { %v402_v32 = vpop.f32.mrf.mxu2  ;;  %v450_v33 = vpop.f32.mrf.mxu3 }
  0xcb   :  { %v403_v34 = vadd.f32 %v974_v4, %v402_v32  ;;  %543 = vst.msk [vmem:[%s1283_s3 + $0x38] sm:$0xff] %vm535_vm2, %v481_v30  ;;  %v451_v35 = vadd.f32 %v974_v4, %v450_v33 }
  0xcc   :  { %558 = vst.msk [vmem:[%s1283_s3 + $0xb0] sm:$0xff] %vm535_vm2, %v496_v31 }
  0xcd   :  { %v511_v36 = vmax.f32 %v403_v34, 0.0  ;;  %v527_v37 = vmax.f32 %v451_v35, 0.0 }
  0xce   :  { %v315_v38 = vpop.f32.mrf.mxu0  ;;  %v360_v39 = vpop.f32.mrf.mxu1 }
  0xcf   :  { %573 = vst.msk [vmem:[%s1283_s3 + $0x128] sm:$0xff] %vm535_vm2, %v511_v36  ;;  %v316_v40 = vadd.f32 %v974_v4, %v315_v38  ;;  %v361_v41 = vadd.f32 %v974_v4, %v360_v39 }
  0xd0   :  { %589 = vst.msk [vmem:[%s1283_s3 + $0x1a8] sm:$0xff] %vm535_vm2, %v527_v37 }
  0xd1   :  { %v482_v42 = vmax.f32 %v316_v40, 0.0  ;;  %v497_v43 = vmax.f32 %v361_v41, 0.0 }
  0xd2   :  { %v405_v44 = vpop.f32.mrf.mxu2  ;;  %v453_v45 = vpop.f32.mrf.mxu3 }
  0xd3   :  { %v406_v46 = vadd.f32 %v974_v4, %v405_v44  ;;  %544 = vst.msk [vmem:[%s1283_s3 + $0x40] sm:$0xff] %vm535_vm2, %v482_v42  ;;  %v454_v47 = vadd.f32 %v974_v4, %v453_v45 }
  0xd4   :  { %559 = vst.msk [vmem:[%s1283_s3 + $0xb8] sm:$0xff] %vm535_vm2, %v497_v43 }
  0xd5   :  { %v512_v48 = vmax.f32 %v406_v46, 0.0  ;;  %v528_v49 = vmax.f32 %v454_v47, 0.0 }
  0xd6   :  { %v318_v50 = vpop.f32.mrf.mxu0  ;;  %v363_v51 = vpop.f32.mrf.mxu1 }
  0xd7   :  { %574 = vst.msk [vmem:[%s1283_s3 + $0x130] sm:$0xff] %vm535_vm2, %v512_v48  ;;  %v319_v52 = vadd.f32 %v974_v4, %v318_v50  ;;  %v364_v53 = vadd.f32 %v974_v4, %v363_v51 }
  0xd8   :  { %590 = vst.msk [vmem:[%s1283_s3 + $0x1b0] sm:$0xff] %vm535_vm2, %v528_v49 }
  0xd9   :  { %v483_v54 = vmax.f32 %v319_v52, 0.0  ;;  %v498_v55 = vmax.f32 %v364_v53, 0.0 }
  0xda   :  { %v408_v56 = vpop.f32.mrf.mxu2  ;;  %v456_v57 = vpop.f32.mrf.mxu3 }
  0xdb   :  { %v409_v58 = vadd.f32 %v974_v4, %v408_v56  ;;  %545 = vst.msk [vmem:[%s1283_s3 + $0x48] sm:$0xff] %vm535_vm2, %v483_v54  ;;  %v457_v59 = vadd.f32 %v974_v4, %v456_v57 }
  0xdc   :  { %560 = vst.msk [vmem:[%s1283_s3 + $0xc0] sm:$0xff] %vm535_vm2, %v498_v55 }
  0xdd   :  { %v513_v60 = vmax.f32 %v409_v58, 0.0  ;;  %v529_v61 = vmax.f32 %v457_v59, 0.0 }
  0xde   :  { %v321_v62 = vpop.f32.mrf.mxu0  ;;  %v366_v63 = vpop.f32.mrf.mxu1 }
  0xdf   :  { %575 = vst.msk [vmem:[%s1283_s3 + $0x138] sm:$0xff] %vm535_vm2, %v513_v60  ;;  %v322_v0 = vadd.f32 %v974_v4, %v321_v62  ;;  %v367_v1 = vadd.f32 %v974_v4, %v366_v63 }
  0xe0   :  { %591 = vst.msk [vmem:[%s1283_s3 + $0x1b8] sm:$0xff] %vm535_vm2, %v529_v61 }
  0xe1   :  { %v484_v2 = vmax.f32 %v322_v0, 0.0  ;;  %v499_v3 = vmax.f32 %v367_v1, 0.0 }
  0xe2   :  { %v411_v5 = vpop.f32.mrf.mxu2  ;;  %v459_v6 = vpop.f32.mrf.mxu3 }
  0xe3   :  { %v412_v7 = vadd.f32 %v974_v4, %v411_v5  ;;  %546 = vst.msk [vmem:[%s1283_s3 + $0x50] sm:$0xff] %vm535_vm2, %v484_v2  ;;  %v460_v8 = vadd.f32 %v974_v4, %v459_v6 }
  0xe4   :  { %561 = vst.msk [vmem:[%s1283_s3 + $0xc8] sm:$0xff] %vm535_vm2, %v499_v3 }
  0xe5   :  { %v514_v9 = vmax.f32 %v412_v7, 0.0  ;;  %v530_v10 = vmax.f32 %v460_v8, 0.0 }
  0xe6   :  { %v324_v11 = vpop.f32.mrf.mxu0  ;;  %v369_v12 = vpop.f32.mrf.mxu1 }
  0xe7   :  { %576 = vst.msk [vmem:[%s1283_s3 + $0x140] sm:$0xff] %vm535_vm2, %v514_v9  ;;  %v325_v13 = vadd.f32 %v974_v4, %v324_v11  ;;  %v370_v14 = vadd.f32 %v974_v4, %v369_v12 }
  0xe8   :  { %592 = vst.msk [vmem:[%s1283_s3 + $0x1c0] sm:$0xff] %vm535_vm2, %v530_v10 }
  0xe9   :  { %v485_v15 = vmax.f32 %v325_v13, 0.0  ;;  %v500_v16 = vmax.f32 %v370_v14, 0.0 }
  0xea   :  { %v414_v17 = vpop.f32.mrf.mxu2  ;;  %v462_v18 = vpop.f32.mrf.mxu3 }
  0xeb   :  { %v415_v19 = vadd.f32 %v974_v4, %v414_v17  ;;  %547 = vst.msk [vmem:[%s1283_s3 + $0x58] sm:$0xff] %vm535_vm2, %v485_v15  ;;  %v463_v20 = vadd.f32 %v974_v4, %v462_v18 }
  0xec   :  { %562 = vst.msk [vmem:[%s1283_s3 + $0xd0] sm:$0xff] %vm535_vm2, %v500_v16 }
  0xed   :  { %v515_v21 = vmax.f32 %v415_v19, 0.0  ;;  %v531_v22 = vmax.f32 %v463_v20, 0.0 }
  0xee   :  { %v327_v23 = vpop.f32.mrf.mxu0  ;;  %v372_v24 = vpop.f32.mrf.mxu1 }
  0xef   :  { %577 = vst.msk [vmem:[%s1283_s3 + $0x148] sm:$0xff] %vm535_vm2, %v515_v21  ;;  %v328_v25 = vadd.f32 %v974_v4, %v327_v23  ;;  %v373_v26 = vadd.f32 %v974_v4, %v372_v24 }
  0xf0   :  { %593 = vst.msk [vmem:[%s1283_s3 + $0x1c8] sm:$0xff] %vm535_vm2, %v531_v22 }
  0xf1   :  { %v486_v27 = vmax.f32 %v328_v25, 0.0  ;;  %v501_v28 = vmax.f32 %v373_v26, 0.0 }
  0xf2   :  { %v417_v29 = vpop.f32.mrf.mxu2  ;;  %v465_v30 = vpop.f32.mrf.mxu3 }
  0xf3   :  { %v418_v31 = vadd.f32 %v974_v4, %v417_v29  ;;  %548 = vst.msk [vmem:[%s1283_s3 + $0x60] sm:$0xff] %vm535_vm2, %v486_v27  ;;  %v466_v32 = vadd.f32 %v974_v4, %v465_v30 }
  0xf4   :  { %563 = vst.msk [vmem:[%s1283_s3 + $0xd8] sm:$0xff] %vm535_vm2, %v501_v28 }
  0xf5   :  { %v516_v33 = vmax.f32 %v418_v31, 0.0  ;;  %v532_v34 = vmax.f32 %v466_v32, 0.0 }
  0xf6   :  { %v330_v35 = vpop.f32.mrf.mxu0  ;;  %v375_v36 = vpop.f32.mrf.mxu1 }
  0xf7   :  { %578 = vst.msk [vmem:[%s1283_s3 + $0x150] sm:$0xff] %vm535_vm2, %v516_v33  ;;  %v331_v37 = vadd.f32 %v974_v4, %v330_v35  ;;  %v376_v38 = vadd.f32 %v974_v4, %v375_v36 }
  0xf8   :  { %594 = vst.msk [vmem:[%s1283_s3 + $0x1d0] sm:$0xff] %vm535_vm2, %v532_v34 }
  0xf9   :  { %v487_v39 = vmax.f32 %v331_v37, 0.0  ;;  %v502_v40 = vmax.f32 %v376_v38, 0.0 }
  0xfa   :  { %v420_v41 = vpop.f32.mrf.mxu2  ;;  %v468_v42 = vpop.f32.mrf.mxu3 }
  0xfb   :  { %v421_v43 = vadd.f32 %v974_v4, %v420_v41  ;;  %549 = vst.msk [vmem:[%s1283_s3 + $0x68] sm:$0xff] %vm535_vm2, %v487_v39  ;;  %v469_v44 = vadd.f32 %v974_v4, %v468_v42 }
  0xfc   :  { %564 = vst.msk [vmem:[%s1283_s3 + $0xe0] sm:$0xff] %vm535_vm2, %v502_v40 }
  0xfd   :  { %v517_v45 = vmax.f32 %v421_v43, 0.0  ;;  %v533_v46 = vmax.f32 %v469_v44, 0.0 }
  0xfe   :  { %v333_v47 = vpop.f32.mrf.mxu0  ;;  %v378_v48 = vpop.f32.mrf.mxu1 }
  0xff   :  { %579 = vst.msk [vmem:[%s1283_s3 + $0x158] sm:$0xff] %vm535_vm2, %v517_v45  ;;  %v334_v49 = vadd.f32 %v974_v4, %v333_v47  ;;  %v379_v50 = vadd.f32 %v974_v4, %v378_v48 }
 0x100   :  { %595 = vst.msk [vmem:[%s1283_s3 + $0x1d8] sm:$0xff] %vm535_vm2, %v533_v46 }
 0x101   :  { %v488_v51 = vmax.f32 %v334_v49, 0.0  ;;  %v503_v52 = vmax.f32 %v379_v50, 0.0 }
 0x102   :  { %v423_v53 = vpop.f32.mrf.mxu2  ;;  %v471_v54 = vpop.f32.mrf.mxu3 }
 0x103   :  { %v424_v55 = vadd.f32 %v974_v4, %v423_v53  ;;  %550 = vst.msk [vmem:[%s1283_s3 + $0x70] sm:$0xff] %vm535_vm2, %v488_v51  ;;  %v472_v56 = vadd.f32 %v974_v4, %v471_v54 }
 0x104   :  { %565 = vst.msk [vmem:[%s1283_s3 + $0xe8] sm:$0xff] %vm535_vm2, %v503_v52 }
 0x105   :  { %v518_v57 = vmax.f32 %v424_v55, 0.0  ;;  %v534_v58 = vmax.f32 %v472_v56, 0.0 }
 0x107   :  { %580 = vst.msk [vmem:[%s1283_s3 + $0x160] sm:$0xff] %vm535_vm2, %v518_v57 }
 0x108   :  { %597 = vst.msk [vmem:[%s1283_s3 + $0x1e0] sm:$0xf] %vm596_vm3, %v534_v58 }
 0x10a   :  { %v426_v59 = vpop.f32.mrf.mxu2 }
 0x10b   :  { %v427_v60 = vadd.f32 %v974_v4, %v426_v59 }
 0x10d   :  { %v519_v61 = vmax.f32 %v427_v60, 0.0 }
 0x10f   :  { %581 = vst.msk [vmem:[%s1283_s3 + $0x168] sm:$0xff] %vm535_vm2, %v519_v61 }

// kernel: sunet_forward.5
= control target key start
LH: loop header
LB: loop body
LE: loop exit
PB: predicated region body
PF: predicated region fallthrough
CT: control target
= control target key end

     0   :  { %s9288_s0 = inlined_call_operand.vmem [shape: f32[9,2,2,144], index: 0, kind: input, shape index: {}]   ;;  %s9289_s1 = inlined_call_operand.vmem [shape: f32[144,60], index: 1, kind: input, shape index: {}]   ;;  %s9290_s2 = inlined_call_operand.vmem [shape: f32[1,60], index: 2, kind: input, shape index: {}]   ;;  %s9291_s3 = inlined_call_operand.vmem [shape: bf16[2,9,60,420], index: 3, kind: input, shape index: {}]   ;;  %s9292_s4 = inlined_call_operand.vmem [shape: f32[1,420], index: 4, kind: input, shape index: {}]   ;;  %s9293_s5 = inlined_call_operand.vmem [shape: bf16[420,19], index: 5, kind: input, shape index: {}]   ;;  %s9294_s6 = inlined_call_operand.vmem [shape: f32[1,19], index: 6, kind: input, shape index: {}]   ;;  %s9295_s7 = inlined_call_operand.hbm [shape: f32[2,19], index: 7, kind: output, shape index: {}]  }
   0x1   :  { %v6337_v0 = vld [vmem:[%s9289_s1 + $0x78] sm:$0xff]  ;;  %v6342_v1 = vld [vmem:[%s9289_s1 + $0x88] sm:$0xff]  ;;  %v6347_v2 = vld [vmem:[%s9289_s1 + $0x70] sm:$0xff] }
   0x2   :  { %59 = vmatpush.msra.mxu0 %v6337_v0  ;;  %93 = vmatpush.msra.mxu2 %v6342_v1  ;;  %v6354_v3 = vld [vmem:[%s9289_s1 + $0x80] sm:$0xff]  ;;  %v6359_v4 = vld [vmem:[%s9289_s1 + $0x68] sm:$0xff]  ;;  %v6379_v7 = vld [vmem:[%s9289_s1 + $0x58] sm:$0xff] }
   0x3   :  { %160 = vmatpush.msra.mxu3 %v6342_v1  ;;  %v6368_v5 = vld [vmem:[%s9289_s1 + $0x60] sm:$0xff]  ;;  %v6386_v8 = vld [vmem:[%s9289_s1 + $0x50] sm:$0xff]  ;;  %v6393_v9 = vld [vmem:[%s9289_s1 + $0x48] sm:$0xff] }
   0x4   :  { %60 = vmatpush.msra.mxu0 %v6347_v2  ;;  %94 = vmatpush.msra.mxu2 %v6354_v3  ;;  %v28_v6 = vld [vmem:[%s9288_s0] sm:$0xf]  ;;  %v4254_v10 = vld [vmem:[%s9288_s0 + $0x8] sm:$0xf] }
   0x5   :  { %161 = vmatpush.msra.mxu3 %v6354_v3  ;;  %52 = vst [vmem:[#allocation1] ss:$4 sm:$0xff] %v28_v6 }
   0x6   :  { %126 = vmatpush.msrb.mxu2 %v6337_v0  ;;  %61 = vmatpush.msra.mxu0 %v6359_v4 }
   0x8   :  { %127 = vmatpush.msrb.mxu2 %v6347_v2  ;;  %62 = vmatpush.msra.mxu0 %v6368_v5 }
   0xa   :  { %128 = vmatpush.msrb.mxu2 %v6359_v4  ;;  %63 = vmatpush.msra.mxu0 %v6379_v7 }
   0xc   :  { %129 = vmatpush.msrb.mxu2 %v6368_v5  ;;  %64 = vmatpush.msra.mxu0 %v6386_v8 }
   0xd   :  { %12 = vsyncpa [#allocation3], 0  ;;  %v6403_v11 = vld [vmem:[%s9289_s1 + $0x40] sm:$0xff]  ;;  %vm56_vm0 = vcmask 130048   ;;  %v6410_v14 = vld [vmem:[%s9289_s1 + $0x38] sm:$0xff]  ;;  %vm265_vm1 = vcmask 1045504  }
   0xe   :  { %130 = vmatpush.msrb.mxu2 %v6379_v7  ;;  %65 = vmatpush.msra.mxu0 %v6393_v9  ;;  %v54_v12 = vld.sshfl [vmem:[#allocation1 + $0x8] sm:$0xff pattern:$0x73625140]  ;;  %v53_v13 = vld.sshfl [vmem:[#allocation1] sm:$0xff pattern:$0x73625140] }
   0xf   :  { %120 = vst [vmem:[#allocation1] ss:$4 sm:$0xff] %v4254_v10  ;;  %4253 = vmatmul.msk.f32.vlgmr.msra.gmra.mxu2 %vm56_vm0, %v54_v12  ;;  %v6418_v15 = vld [vmem:[%s9289_s1 + $0x30] sm:$0xff]  ;;  %v6425_v16 = vld [vmem:[%s9289_s1 + $0x28] sm:$0xff]  ;;  %v6432_v17 = vld [vmem:[%s9289_s1 + $0x20] sm:$0xff]  ;;  %vm261_vm2 = vcmask 490496  }
  0x10   :  { %131 = vmatpush.msrb.mxu2 %v6386_v8  ;;  %66 = vmatpush.msra.mxu0 %v6403_v11  ;;  %v6439_v19 = vld [vmem:[%s9289_s1 + $0x18] sm:$0xff]  ;;  %v4390_v20 = vld [vmem:[%s9291_s3 + $0x60] sm:$0xf]  ;;  %v5903_v21 = vld [vmem:[%s9291_s3 + $0x6c] sm:$0x30]  ;;  %vm4155_vm3 = vcmask 1041408  }
  0x11   :  { %v6453_v22 = vld [vmem:[%s9289_s1 + $0x10] sm:$0xff]  ;;  %v6460_v23 = vld [vmem:[%s9289_s1 + $0x8] sm:$0xff]  ;;  %v4391_v24 = vor.u32 %v5903_v21, %v4390_v20  ;;  %v5901_v25 = vld [vmem:[%s9291_s3 + $0x64] sm:$0xf]  ;;  %vm4151_vm4 = vcmask 293888   ;;  %vm4211_vm5 = vcmask 148480  }
  0x12   :  { %132 = vmatpush.msrb.mxu2 %v6393_v9  ;;  %67 = vmatpush.msra.mxu0 %v6410_v14  ;;  %v4392_v26 = vld [vmem:[%s9291_s3 + $0x70] sm:$0x30]  ;;  %v6473_v27 = vld [vmem:[%s9289_s1] sm:$0xff]  ;;  %v5899_v31 = vld [vmem:[%s9291_s3 + $0x4c] sm:$0xf0]  ;;  %s4244_s17 = sshll.u32 %s9295_s7, 4  ;;  %s4245_s17 = int_to_ptr.hbm [resolvable:$true] %s4244_s17 }
  0x13   :  { %v4395_v28 = vor.u32 %v5901_v25, %v4392_v26  ;;  %v410_v29 = vsel %vm265_vm1, %v4391_v24, 0  ;;  %v4374_v30 = vld [vmem:[%s9291_s3 + $0x40] sm:$0xf]  ;;  %v5897_v35 = vld [vmem:[%s9291_s3 + $0x44] sm:$0xf] }
  0x14   :  { %133 = vmatpush.msrb.mxu2 %v6403_v11  ;;  %68 = vmatpush.msra.mxu0 %v6418_v15  ;;  %v4375_v33 = vor.u32 %v5899_v31, %v4374_v30  ;;  %v4376_v36 = vld [vmem:[%s9291_s3 + $0x50] sm:$0xf0]  ;;  %v4358_v37 = vld [vmem:[%s9291_s3 + $0x20] sm:$0xf]  ;;  %v5895_v38 = vld [vmem:[%s9291_s3 + $0x2c] sm:$0xf0] }
  0x15   :  { %v413_v34 = vsel %vm265_vm1, %v4395_v28, 0  ;;  %v4379_v39 = vor.u32 %v5897_v35, %v4376_v36  ;;  %v4359_v40 = vor.u32 %v5895_v38, %v4358_v37  ;;  %v4342_v41 = vld [vmem:[%s9291_s3] sm:$0xf]  ;;  %v5891_v42 = vld [vmem:[%s9291_s3 + $0xc] sm:$0xf0] }
  0x16   :  { %134 = vmatpush.msrb.mxu2 %v6410_v14  ;;  %69 = vmatpush.msra.mxu0 %v6425_v16  ;;  %v122_v18 = vld.sshfl [vmem:[#allocation1 + $0x8] sm:$0xff pattern:$0x73625140]  ;;  %v121_v32 = vld.sshfl [vmem:[#allocation1] sm:$0xff pattern:$0x73625140]  ;;  %v4343_v43 = vor.u32 %v5891_v42, %v4342_v41 }
  0x17   :  { %4255 = vmatmul.msk.f32.vlgmr.msra.gmra.mxu3 %vm56_vm0, %v122_v18  ;;  %v5893_v44 = vld [vmem:[%s9291_s3 + $0x24] sm:$0xf]  ;;  %v4360_v45 = vld [vmem:[%s9291_s3 + $0x30] sm:$0xf0]  ;;  %v4322_v46 = vld [vmem:[%s9291_s3 + $0xe0] sm:$0xf] }
  0x18   :  { %135 = vmatpush.msrb.mxu2 %v6418_v15  ;;  %70 = vmatpush.msra.mxu0 %v6432_v17  ;;  %v4363_v47 = vor.u32 %v5893_v44, %v4360_v45  ;;  %v5919_v48 = vld [vmem:[%s9291_s3 + $0xec] sm:$0x30]  ;;  %v5917_v49 = vld [vmem:[%s9291_s3 + $0xe4] sm:$0xf]  ;;  %v4324_v50 = vld [vmem:[%s9291_s3 + $0xf0] sm:$0x30] }
  0x19   :  { %v4323_v51 = vor.u32 %v5919_v48, %v4322_v46  ;;  %v4327_v52 = vor.u32 %v5917_v49, %v4324_v50  ;;  %v5889_v55 = vld [vmem:[%s9291_s3 + $0x4] sm:$0xf]  ;;  %v4344_v56 = vld [vmem:[%s9291_s3 + $0x10] sm:$0xf0]  ;;  %v4306_v58 = vld [vmem:[%s9291_s3 + $0xc0] sm:$0xf] }
  0x1a   :  { %136 = vmatpush.msrb.mxu2 %v6425_v16  ;;  %71 = vmatpush.msra.mxu0 %v6439_v19  ;;  %v4347_v57 = vor.u32 %v5889_v55, %v4344_v56  ;;  %v5915_v59 = vld [vmem:[%s9291_s3 + $0xcc] sm:$0xf0]  ;;  %v5913_v60 = vld [vmem:[%s9291_s3 + $0xc4] sm:$0xf]  ;;  %v4308_v62 = vld [vmem:[%s9291_s3 + $0xd0] sm:$0xf0] }
  0x1b   :  { %v267_v53 = vsel %vm265_vm1, %v4323_v51, 0  ;;  %v270_v54 = vsel %vm265_vm1, %v4327_v52, 0  ;;  %v4307_v61 = vor.u32 %v5915_v59, %v4306_v58  ;;  %v4311_v63 = vor.u32 %v5913_v60, %v4308_v62  ;;  %v4290_v6 = vld [vmem:[%s9291_s3 + $0xa0] sm:$0xf]  ;;  %v5911_v10 = vld [vmem:[%s9291_s3 + $0xac] sm:$0xf0] }
  0x1c   :  { %137 = vmatpush.msrb.mxu2 %v6432_v17  ;;  %72 = vmatpush.msra.mxu0 %v6453_v22  ;;  %v4291_v12 = vor.u32 %v5911_v10, %v4290_v6  ;;  %v4292_v18 = vld [vmem:[%s9291_s3 + $0xb0] sm:$0xf0]  ;;  %v4274_v21 = vld [vmem:[%s9291_s3 + $0x80] sm:$0xf]  ;;  %v5907_v24 = vld [vmem:[%s9291_s3 + $0x8c] sm:$0xf0] }
  0x1d   :  { %282 = vmatpush.bf16.msra.mxu1 %v267_v53  ;;  %295 = vmatpush.bf16.msrb.mxu3 %v270_v54  ;;  %v5905_v25 = vld [vmem:[%s9291_s3 + $0x84] sm:$0xf]  ;;  %v4275_v26 = vor.u32 %v5907_v24, %v4274_v21  ;;  %v4276_v28 = vld [vmem:[%s9291_s3 + $0x90] sm:$0xf0]  ;;  %v4330_v30 = vld [vmem:[%s9291_s3 + $0xe8] sm:$0xf] }
  0x1e   :  { %138 = vmatpush.msrb.mxu2 %v6439_v19  ;;  %73 = vmatpush.msra.mxu0 %v6460_v23  ;;  %v5920_v31 = vld [vmem:[%s9291_s3 + $0xf4] sm:$0x30]  ;;  %v4408_v35 = vld [vmem:[%s9288_s0 + $0x10] sm:$0xf]  ;;  %v4314_v38 = vld [vmem:[%s9291_s3 + $0xc8] sm:$0xf] }
  0x1f   :  { %476 = vst [vmem:[#allocation1] ss:$4 sm:$0xff] %v4408_v35  ;;  %v5914_v42 = vld [vmem:[%s9291_s3 + $0xcc] sm:$0xf]  ;;  %v4298_v45 = vld [vmem:[%s9291_s3 + $0xa8] sm:$0xf] }
  0x20   :  { %139 = vmatpush.msrb.mxu2 %v6453_v22  ;;  %74 = vmatpush.msra.mxu0 %v6473_v27  ;;  %v5912_v46 = vld [vmem:[%s9291_s3 + $0xb4] sm:$0xf0]  ;;  %v4300_v48 = vld [vmem:[%s9291_s3 + $0xb8] sm:$0xf0]  ;;  %v4282_v51 = vld [vmem:[%s9291_s3 + $0x88] sm:$0xf] }
  0x21   :  { %75 = vmatmul.f32.vlgmr.msra.gmra.mxu0 %v53_v13  ;;  %283 = vmatpush.bf16.msra.mxu1 %v4307_v61  ;;  %v5909_v13 = vld [vmem:[%s9291_s3 + $0xa4] sm:$0xf]  ;;  %v4299_v49 = vor.u32 %v5912_v46, %v4298_v45  ;;  %v5908_v52 = vld [vmem:[%s9291_s3 + $0x94] sm:$0xf0]  ;;  %v5906_v53 = vld [vmem:[%s9291_s3 + $0x8c] sm:$0xf] }
  0x22   :  { %140 = vmatpush.msrb.mxu2 %v6460_v23  ;;  %425 = vmatpush.bf16.msrb.mxu0 %v410_v29  ;;  %v4295_v20 = vor.u32 %v5909_v13, %v4292_v18  ;;  %v4279_v29 = vor.u32 %v5905_v25, %v4276_v28  ;;  %v4284_v54 = vld [vmem:[%s9291_s3 + $0x98] sm:$0xf0]  ;;  %v4283_v55 = vor.u32 %v5908_v52, %v4282_v51  ;;  %v4398_v6 = vld [vmem:[%s9291_s3 + $0x68] sm:$0xf]  ;;  %v5904_v13 = vld [vmem:[%s9291_s3 + $0x74] sm:$0x30] }
  0x23   :  { %296 = vmatpush.bf16.msrb.mxu3 %v4311_v63  ;;  %v4287_v56 = vor.u32 %v5906_v53, %v4284_v54  ;;  %v5902_v18 = vld [vmem:[%s9291_s3 + $0x6c] sm:$0xf]  ;;  %v4399_v25 = vor.u32 %v5904_v13, %v4398_v6  ;;  %v4384_v35 = vld [vmem:[%s9291_s3 + $0x58] sm:$0xf0]  ;;  %v4350_v46 = vld [vmem:[%s9291_s3 + $0x8] sm:$0xf] }
  0x24   :  { %141 = vmatpush.msrb.mxu2 %v6473_v27  ;;  %v5933_v52 = vld [vmem:[%s9291_s3 + $0x164] sm:$0xf]  ;;  %v4478_v53 = vld [vmem:[%s9291_s3 + $0x170] sm:$0x30]  ;;  %v5935_v13 = vld [vmem:[%s9291_s3 + $0x16c] sm:$0x30] }
  0x25   :  { %142 = vmatmul.f32.vlgmr.msrb.gmra.mxu2 %v121_v32  ;;  %284 = vmatpush.bf16.msra.mxu1 %v4291_v12  ;;  %v5918_v32 = vld [vmem:[%s9291_s3 + $0xec] sm:$0xf]  ;;  %v4481_v54 = vor.u32 %v5933_v52, %v4478_v53  ;;  %v4430_v6 = vld [vmem:[%s9291_s3 + $0x110] sm:$0xf0]  ;;  %v4470_v52 = vld [vmem:[%s9291_s3 + $0x158] sm:$0xf0] }
  0x26   :  { %438 = vmatpush.bf16.msra.mxu2 %v413_v34  ;;  %426 = vmatpush.bf16.msrb.mxu0 %v4375_v33  ;;  %v4331_v33 = vor.u32 %v5920_v31, %v4330_v30  ;;  %v4332_v34 = vld [vmem:[%s9291_s3 + $0xf8] sm:$0x30]  ;;  %v5900_v30 = vld [vmem:[%s9291_s3 + $0x54] sm:$0xf0] }
  0x27   :  { %297 = vmatpush.bf16.msrb.mxu3 %v4295_v20  ;;  %v4335_v36 = vor.u32 %v5918_v32, %v4332_v34  ;;  %v4400_v20 = vld [vmem:[%s9291_s3 + $0x78] sm:$0x30]  ;;  %v416_v32 = vsel %vm265_vm1, %v4399_v25, 0  ;;  %v5898_v34 = vld [vmem:[%s9291_s3 + $0x4c] sm:$0xf] }
  0x28   :  { %v273_v37 = vsel %vm265_vm1, %v4331_v33, 0 }
  0x29   :  { %285 = vmatpush.bf16.msra.mxu1 %v4275_v26  ;;  %v4403_v26 = vor.u32 %v5902_v18, %v4400_v20  ;;  %v4484_v18 = vld [vmem:[%s9291_s3 + $0x168] sm:$0xf]  ;;  %v5936_v20 = vld [vmem:[%s9291_s3 + $0x174] sm:$0x30] }
  0x2a   :  { %439 = vmatpush.bf16.msra.mxu2 %v4379_v39  ;;  %427 = vmatpush.bf16.msrb.mxu0 %v4359_v40  ;;  %v5916_v39 = vld [vmem:[%s9291_s3 + $0xd4] sm:$0xf0]  ;;  %v276_v40 = vsel %vm265_vm1, %v4335_v36, 0 }
  0x2b   :  { %298 = vmatpush.bf16.msrb.mxu3 %v4279_v29  ;;  %v4315_v41 = vor.u32 %v5916_v39, %v4314_v38  ;;  %v4382_v29 = vld [vmem:[%s9291_s3 + $0x48] sm:$0xf]  ;;  %v419_v33 = vsel %vm265_vm1, %v4403_v26, 0  ;;  %v5896_v39 = vld [vmem:[%s9291_s3 + $0x34] sm:$0xf0] }
  0x2c   :  { %v4383_v36 = vor.u32 %v5900_v30, %v4382_v29  ;;  %v4366_v38 = vld [vmem:[%s9291_s3 + $0x28] sm:$0xf]  ;;  %v5931_v29 = vld [vmem:[%s9291_s3 + $0x14c] sm:$0xf0] }
  0x2d   :  { %308 = vmatpush.bf16.msrb.mxu1 %v273_v37  ;;  %v4387_v37 = vor.u32 %v5898_v34, %v4384_v35  ;;  %v4468_v30 = vld [vmem:[%s9291_s3 + $0x148] sm:$0xf]  ;;  %v4444_v34 = vld [vmem:[%s9291_s3 + $0x120] sm:$0xf]  ;;  %v5927_v35 = vld [vmem:[%s9291_s3 + $0x12c] sm:$0xf0] }
  0x2e   :  { %428 = vmatpush.bf16.msrb.mxu0 %v4343_v43  ;;  %440 = vmatpush.bf16.msra.mxu2 %v4363_v47  ;;  %v4316_v43 = vld [vmem:[%s9291_s3 + $0xd8] sm:$0xf0]  ;;  %v5910_v47 = vld [vmem:[%s9291_s3 + $0xac] sm:$0xf] }
  0x2f   :  { %321 = vmatpush.bf16.msra.mxu3 %v276_v40  ;;  %v4319_v44 = vor.u32 %v5914_v42, %v4316_v43  ;;  %v4303_v50 = vor.u32 %v5910_v47, %v4300_v48  ;;  %v5894_v40 = vld [vmem:[%s9291_s3 + $0x2c] sm:$0xf]  ;;  %v477_v43 = vld.sshfl [vmem:[#allocation1] sm:$0xff pattern:$0x73625140] }
  0x30   :  { %v478_v42 = vld.sshfl [vmem:[#allocation1 + $0x8] sm:$0xff pattern:$0x73625140]  ;;  %v5892_v47 = vld [vmem:[%s9291_s3 + $0x14] sm:$0xf0] }
  0x31   :  { %309 = vmatpush.bf16.msrb.mxu1 %v4315_v41  ;;  %v4368_v41 = vld [vmem:[%s9291_s3 + $0x38] sm:$0xf0]  ;;  %v5890_v48 = vld [vmem:[%s9291_s3 + $0xc] sm:$0xf] }
  0x32   :  { %482 = vmatpush.msra.mxu0 %v6337_v0  ;;  %441 = vmatpush.bf16.msra.mxu2 %v4347_v57  ;;  %v6642_v57 = vld [vmem:[%s9290_s2] ss:$0 sm:$0xff]  ;;  %v4371_v45 = vor.u32 %v5894_v40, %v4368_v41  ;;  %v5923_v41 = vld [vmem:[%s9291_s3 + $0x10c] sm:$0xf0] }
  0x33   :  { %322 = vmatpush.bf16.msra.mxu3 %v4319_v44  ;;  %v4367_v44 = vor.u32 %v5896_v39, %v4366_v38  ;;  %v5928_v38 = vld [vmem:[%s9291_s3 + $0x134] sm:$0xf0]  ;;  %v4428_v40 = vld [vmem:[%s9291_s3 + $0x100] sm:$0xf] }
  0x34   :  { %483 = vmatpush.msra.mxu0 %v6347_v2 }
  0x35   :  { %310 = vmatpush.bf16.msrb.mxu1 %v4299_v49  ;;  %v4352_v49 = vld [vmem:[%s9291_s3 + $0x18] sm:$0xf0] }
  0x36   :  { %484 = vmatpush.msra.mxu0 %v6359_v4  ;;  %516 = vmatpush.msrb.mxu2 %v6342_v1  ;;  %v4355_v51 = vor.u32 %v5890_v48, %v4352_v49 }
  0x37   :  { %323 = vmatpush.bf16.msra.mxu3 %v4303_v50  ;;  %v4351_v50 = vor.u32 %v5892_v47, %v4350_v46  ;;  %v5934_v46 = vld [vmem:[%s9291_s3 + $0x16c] sm:$0xf]  ;;  %v4486_v47 = vld [vmem:[%s9291_s3 + $0x178] sm:$0x30] }
  0x38   :  { %485 = vmatpush.msra.mxu0 %v6368_v5  ;;  %517 = vmatpush.msrb.mxu2 %v6354_v3  ;;  %v4489_v48 = vor.u32 %v5934_v46, %v4486_v47  ;;  %v5945_v46 = vld [vmem:[%s9291_s3 + $0x1c4] sm:$0xf]  ;;  %v4548_v47 = vld [vmem:[%s9291_s3 + $0x1d0] sm:$0xf0] }
  0x39   :  { %311 = vmatpush.bf16.msrb.mxu1 %v4283_v55  ;;  %v624_v55 = vsel %vm265_vm1, %v4481_v54, 0  ;;  %v5926_v54 = vld [vmem:[%s9291_s3 + $0x12c] sm:$0xf] }
  0x3a   :  { %486 = vmatpush.msra.mxu0 %v6379_v7  ;;  %v630_v49 = vsel %vm265_vm1, %v4489_v48, 0  ;;  %v4551_v48 = vor.u32 %v5945_v46, %v4548_v47  ;;  %v5938_v46 = vld [vmem:[%s9291_s3 + $0x18c] sm:$0xf]  ;;  %v4524_v47 = vld [vmem:[%s9291_s3 + $0x198] sm:$0xf0] }
  0x3b   :  { %324 = vmatpush.bf16.msra.mxu3 %v4287_v56  ;;  %v5929_v56 = vld [vmem:[%s9291_s3 + $0x144] sm:$0xf] }
  0x3c   :  { %487 = vmatpush.msra.mxu0 %v6386_v8 }
  0x3e   :  { %488 = vmatpush.msra.mxu0 %v6393_v9 }
  0x40   :  { %489 = vmatpush.msra.mxu0 %v6403_v11 }
  0x42   :  { %490 = vmatpush.msra.mxu0 %v6410_v14 }
  0x44   :  { %491 = vmatpush.msra.mxu0 %v6418_v15 }
  0x46   :  { %492 = vmatpush.msra.mxu0 %v6425_v16 }
  0x48   :  { %493 = vmatpush.msra.mxu0 %v6432_v17 }
  0x4a   :  { %494 = vmatpush.msra.mxu0 %v6439_v19 }
  0x4c   :  { %495 = vmatpush.msra.mxu0 %v6453_v22 }
  0x4e   :  { %496 = vmatpush.msra.mxu0 %v6460_v23 }
  0x50   :  { %497 = vmatpush.msra.mxu0 %v6473_v27 }
  0x92   :  { %v96_v58 = vpop.f32.mrf.mxu2 }
  0x9a   :  { %v163_v12 = vpop.f32.mrf.mxu3 }
  0x9e   :  { %v76_v59 = vpop.f32.mrf.mxu0 }
  0x9f   :  { %v77_v60 = vadd.f32 %v6642_v57, %v76_v59 }
  0xa1   :  { %v97_v61 = vadd.f32 %v96_v58, %v77_v60  ;;  %v4462_v58 = vld [vmem:[%s9291_s3 + $0x150] sm:$0xf0]  ;;  %v5925_v60 = vld [vmem:[%s9291_s3 + $0x124] sm:$0xf] }
  0xa2   :  { %v4465_v59 = vor.u32 %v5929_v56, %v4462_v58  ;;  %v4494_v58 = vld [vmem:[%s9288_s0 + $0x18] sm:$0xf] }
  0xa3   :  { %v99_v62 = vmax.f32 %v97_v61, 0.0  ;;  %v4446_v61 = vld [vmem:[%s9291_s3 + $0x130] sm:$0xf0]  ;;  %691 = vst [vmem:[#allocation1] ss:$4 sm:$0xff] %v4494_v58 }
  0xa4   :  { %v4570_v58 = vld [vmem:[%s9291_s3 + $0x1e8] sm:$0xf] }
  0xa5   :  { %v100_v63 = vpack.c.bf16 %v99_v62, %v99_v62  ;;  %v4449_v62 = vor.u32 %v5925_v60, %v4446_v61  ;;  %v5922_v61 = vld [vmem:[%s9291_s3 + $0x10c] sm:$0xf] }
  0xa7   :  { %4404 = vmatmul.msk.bf16.vlgmr.msrb.gmra.mxu0 %vm261_vm2, %v100_v63  ;;  %4405 = vmatmul.msk.bf16.vlgmr.msra.gmra.mxu2 %vm261_vm2, %v100_v63 }
  0xa8   :  { %v143_v10 = vpop.f32.mrf.mxu2  ;;  %731 = vmatpush.msrb.mxu0 %v6342_v1 }
  0xa9   :  { %v144_v21 = vadd.f32 %v6642_v57, %v143_v10  ;;  %v4476_v10 = vld [vmem:[%s9291_s3 + $0x160] sm:$0xf] }
  0xaa   :  { %732 = vmatpush.msrb.mxu0 %v6354_v3 }
  0xab   :  { %v164_v24 = vadd.f32 %v163_v12, %v144_v21  ;;  %v4477_v21 = vor.u32 %v5935_v13, %v4476_v10 }
  0xad   :  { %v166_v28 = vmax.f32 %v164_v24, 0.0  ;;  %v4485_v24 = vor.u32 %v5936_v20, %v4484_v18  ;;  %v621_v25 = vsel %vm265_vm1, %v4477_v21, 0  ;;  %v693_v21 = vld.sshfl [vmem:[#allocation1 + $0x8] sm:$0xff pattern:$0x73625140] }
  0xaf   :  { %v167_v31 = vpack.c.bf16 %v166_v28, %v166_v28  ;;  %v627_v26 = vsel %vm265_vm1, %v4485_v24, 0  ;;  %v4460_v28 = vld [vmem:[%s9291_s3 + $0x140] sm:$0xf] }
  0xb0   :  { %662 = vmatpush.bf16.msra.mxu2 %v627_v26 }
  0xb1   :  { %4336 = vmatmul.msk.bf16.vlgmr.msra.gmra.mxu1 %vm261_vm2, %v167_v31  ;;  %4337 = vmatmul.msk.bf16.vlgmr.msrb.gmra.mxu3 %vm261_vm2, %v167_v31 }
  0xb2   :  { %451 = vmatpush.bf16.msra.mxu1 %v416_v32  ;;  %464 = vmatpush.bf16.msrb.mxu3 %v419_v33  ;;  %v5932_v32 = vld [vmem:[%s9291_s3 + $0x154] sm:$0xf0] }
  0xb3   :  { %v4469_v33 = vor.u32 %v5932_v32, %v4468_v30 }
  0xb5   :  { %663 = vmatpush.bf16.msra.mxu2 %v4469_v33 }
  0xb6   :  { %452 = vmatpush.bf16.msra.mxu1 %v4383_v36  ;;  %465 = vmatpush.bf16.msrb.mxu3 %v4387_v37  ;;  %v4452_v36 = vld [vmem:[%s9291_s3 + $0x128] sm:$0xf]  ;;  %v4445_v37 = vor.u32 %v5927_v35, %v4444_v34 }
  0xb7   :  { %4409 = vmatmul.msk.f32.vlgmr.msrb.gmra.mxu2 %vm56_vm0, %v478_v42  ;;  %498 = vmatmul.f32.vlgmr.msra.gmra.mxu0 %v477_v43  ;;  %v4453_v39 = vor.u32 %v5928_v38, %v4452_v36  ;;  %v4436_v42 = vld [vmem:[%s9291_s3 + $0x108] sm:$0xf]  ;;  %v4429_v43 = vor.u32 %v5923_v41, %v4428_v40 }
  0xb9   :  { %664 = vmatpush.bf16.msra.mxu2 %v4453_v39 }
  0xba   :  { %453 = vmatpush.bf16.msra.mxu1 %v4367_v44  ;;  %466 = vmatpush.bf16.msrb.mxu3 %v4371_v45  ;;  %v5924_v44 = vld [vmem:[%s9291_s3 + $0x114] sm:$0xf0] }
  0xbb   :  { %v4437_v45 = vor.u32 %v5924_v44, %v4436_v42  ;;  %v5949_v42 = vld [vmem:[%s9291_s3 + $0x1e4] sm:$0xf] }
  0xbd   :  { %665 = vmatpush.bf16.msra.mxu2 %v4437_v45 }
  0xbe   :  { %454 = vmatpush.bf16.msra.mxu1 %v4351_v50  ;;  %467 = vmatpush.bf16.msrb.mxu3 %v4355_v51  ;;  %v5930_v51 = vld [vmem:[%s9291_s3 + $0x14c] sm:$0xf] }
  0xbf   :  { %v4473_v53 = vor.u32 %v5930_v51, %v4470_v52  ;;  %4495 = vmatmul.msk.f32.vlgmr.msrb.gmra.mxu0 %vm56_vm0, %v693_v21  ;;  %v5937_v52 = vld [vmem:[%s9291_s3 + $0x184] sm:$0xf]  ;;  %v4554_v21 = vld [vmem:[%s9291_s3 + $0x1c8] sm:$0xf] }
  0xc1   :  { %4338 = vmatmul.msk.bf16.vlgmr.msrb.gmra.mxu1 %vm261_vm2, %v167_v31  ;;  %4339 = vmatmul.msk.bf16.vlgmr.msra.gmra.mxu3 %vm261_vm2, %v167_v31  ;;  %v4461_v31 = vor.u32 %v5931_v29, %v4460_v28 }
  0xc2   :  { %649 = vmatpush.bf16.msra.mxu3 %v624_v55  ;;  %636 = vmatpush.bf16.msrb.mxu1 %v621_v25  ;;  %v4454_v55 = vld [vmem:[%s9291_s3 + $0x138] sm:$0xf0] }
  0xc3   :  { %v4457_v56 = vor.u32 %v5926_v54, %v4454_v55  ;;  %v4562_v54 = vld [vmem:[%s9291_s3 + $0x1e0] sm:$0xf] }
  0xc6   :  { %650 = vmatpush.bf16.msra.mxu3 %v4465_v59  ;;  %637 = vmatpush.bf16.msrb.mxu1 %v4461_v31 }
  0xca   :  { %651 = vmatpush.bf16.msra.mxu3 %v4449_v62  ;;  %638 = vmatpush.bf16.msrb.mxu1 %v4445_v37  ;;  %v4438_v62 = vld [vmem:[%s9291_s3 + $0x118] sm:$0xf0]  ;;  %v692_v37 = vld.sshfl [vmem:[#allocation1] sm:$0xff pattern:$0x73625140] }
  0xce   :  { %639 = vmatpush.bf16.msrb.mxu1 %v4429_v43  ;;  %v4564_v43 = vld [vmem:[%s9291_s3 + $0x1f0] sm:$0x30] }
  0xcf   :  { %v4567_v44 = vor.u32 %v5949_v42, %v4564_v43  ;;  %v5942_v43 = vld [vmem:[%s9291_s3 + $0x1ac] sm:$0xf] }
  0xd1   :  { %4406 = vmatmul.msk.bf16.vlgmr.msra.gmra.mxu1 %vm261_vm2, %v100_v63  ;;  %4407 = vmatmul.msk.bf16.vlgmr.msrb.gmra.mxu3 %vm261_vm2, %v100_v63  ;;  %v5921_v63 = vld [vmem:[%s9291_s3 + $0x104] sm:$0xf]  ;;  %v839_v45 = vsel %vm265_vm1, %v4567_v44, 0  ;;  %v4540_v44 = vld [vmem:[%s9291_s3 + $0x1b8] sm:$0xf0] }
  0xd2   :  { %v4433_v12 = vor.u32 %v5921_v63, %v4430_v6  ;;  %675 = vmatpush.bf16.msra.mxu1 %v630_v49  ;;  %v4441_v6 = vor.u32 %v5922_v61, %v4438_v62  ;;  %v5941_v49 = vld [vmem:[%s9291_s3 + $0x1a4] sm:$0xf] }
  0xd4   :  { %652 = vmatpush.bf16.msra.mxu3 %v4433_v12 }
  0xd6   :  { %676 = vmatpush.bf16.msra.mxu1 %v4473_v53  ;;  %v4516_v53 = vld [vmem:[%s9291_s3 + $0x190] sm:$0xf0] }
  0xd7   :  { %v4519_v55 = vor.u32 %v5937_v52, %v4516_v53 }
  0xd8   :  { %697 = vmatpush.msrb.mxu3 %v6337_v0 }
  0xda   :  { %698 = vmatpush.msrb.mxu3 %v6347_v2  ;;  %677 = vmatpush.bf16.msra.mxu1 %v4457_v56  ;;  %v5951_v56 = vld [vmem:[%s9291_s3 + $0x1ec] sm:$0x30] }
  0xdb   :  { %v4563_v61 = vor.u32 %v5951_v56, %v4562_v54 }
  0xdc   :  { %699 = vmatpush.msrb.mxu3 %v6359_v4 }
  0xde   :  { %700 = vmatpush.msrb.mxu3 %v6368_v5  ;;  %678 = vmatpush.bf16.msra.mxu1 %v4441_v6 }
  0xe0   :  { %701 = vmatpush.msrb.mxu3 %v6379_v7 }
  0xe2   :  { %702 = vmatpush.msrb.mxu3 %v6386_v8 }
  0xe4   :  { %703 = vmatpush.msrb.mxu3 %v6393_v9 }
  0xe6   :  { %704 = vmatpush.msrb.mxu3 %v6403_v11 }
  0xe8   :  { %705 = vmatpush.msrb.mxu3 %v6410_v14 }
  0xea   :  { %706 = vmatpush.msrb.mxu3 %v6418_v15 }
  0xec   :  { %707 = vmatpush.msrb.mxu3 %v6425_v16 }
  0xee   :  { %708 = vmatpush.msrb.mxu3 %v6432_v17 }
  0xf0   :  { %709 = vmatpush.msrb.mxu3 %v6439_v19 }
  0xf2   :  { %710 = vmatpush.msrb.mxu3 %v6453_v22 }
  0xf4   :  { %711 = vmatpush.msrb.mxu3 %v6460_v23 }
  0xf6   :  { %712 = vmatpush.msrb.mxu3 %v6473_v27 }
 0x124   :  { %v430_v50 = vpop.f32.mrf.mxu0 }
 0x12a   :  { %v6816_v59 = vpop.f32.mrf.mxu2 }
 0x12c   :  { %v432_v60 = vpop.f32.mrf.mxu0 }
 0x12d   :  { %v5952_v60 = vld [vmem:[%s9291_s3 + $0x1f4] sm:$0x30] }
 0x12e   :  { %v287_v63 = vpop.f32.mrf.mxu1  ;;  %v4571_v62 = vor.u32 %v5952_v60, %v4570_v58 }
 0x12f   :  { %v6826_v10 = vadd.f32 %v430_v50, %v287_v63  ;;  %v4532_v50 = vld [vmem:[%s9291_s3 + $0x1b0] sm:$0xf0]  ;;  %v836_v63 = vsel %vm265_vm1, %v4563_v61, 0  ;;  %v5961_v61 = vld [vmem:[%s9291_s3 + $0x244] sm:$0xf] }
 0x130   :  { %v4535_v51 = vor.u32 %v5941_v49, %v4532_v50  ;;  %v842_v6 = vsel %vm265_vm1, %v4571_v62, 0  ;;  %851 = vmatpush.bf16.msrb.mxu2 %v836_v63  ;;  %v4634_v62 = vld [vmem:[%s9291_s3 + $0x250] sm:$0xf0] }
 0x131   :  { %877 = vmatpush.bf16.msra.mxu0 %v842_v6  ;;  %v4637_v63 = vor.u32 %v5961_v61, %v4634_v62  ;;  %v5954_v62 = vld [vmem:[%s9291_s3 + $0x20c] sm:$0xf] }
 0x132   :  { %v445_v12 = vpop.f32.mrf.mxu2 }
 0x133   :  { %v4546_v12 = vld [vmem:[%s9291_s3 + $0x1c0] sm:$0xf] }
 0x134   :  { %v6830_v13 = vpop.f32.mrf.mxu3  ;;  %v499_v18 = vpop.f32.mrf.mxu0 }
 0x135   :  { %v500_v24 = vadd.f32 %v6642_v57, %v499_v18  ;;  %v5947_v18 = vld [vmem:[%s9291_s3 + $0x1cc] sm:$0xf0] }
 0x136   :  { %v289_v20 = vpop.f32.mrf.mxu1 }
 0x137   :  { %v4547_v20 = vor.u32 %v5947_v18, %v4546_v12  ;;  %v5953_v12 = vld [vmem:[%s9291_s3 + $0x204] sm:$0xf]  ;;  %v4602_v18 = vld [vmem:[%s9291_s3 + $0x210] sm:$0xf0] }
 0x139   :  { %852 = vmatpush.bf16.msrb.mxu2 %v4547_v20  ;;  %v4648_v20 = vld [vmem:[%s9291_s3 + $0x260] sm:$0xf] }
 0x13a   :  { %v519_v25 = vpop.f32.mrf.mxu2 }
 0x13b   :  { %v520_v26 = vadd.f32 %v519_v25, %v500_v24  ;;  %v5948_v24 = vld [vmem:[%s9291_s3 + $0x1d4] sm:$0xf0]  ;;  %v4530_v25 = vld [vmem:[%s9291_s3 + $0x1a0] sm:$0xf] }
 0x13c   :  { %v302_v28 = vpop.f32.mrf.mxu3 }
 0x13d   :  { %v522_v29 = vmax.f32 %v520_v26, 0.0  ;;  %v5943_v26 = vld [vmem:[%s9291_s3 + $0x1ac] sm:$0xf0]  ;;  %v4538_v28 = vld [vmem:[%s9291_s3 + $0x1a8] sm:$0xf] }
 0x13e   :  { %v313_v30 = vpop.f32.mrf.mxu1 }
 0x13f   :  { %v523_v31 = vpack.c.bf16 %v522_v29, %v522_v29 }
 0x141   :  { %4490 = vmatmul.msk.bf16.vlgmr.msrb.gmra.mxu1 %vm261_vm2, %v523_v31  ;;  %4491 = vmatmul.msk.bf16.vlgmr.msra.gmra.mxu3 %vm261_vm2, %v523_v31 }
 0x142   :  { %4492 = vmatmul.msk.bf16.vlgmr.msra.gmra.mxu2 %vm261_vm2, %v523_v31  ;;  %946 = vmatpush.msra.mxu3 %v6342_v1 }
 0x143   :  { %864 = vmatpush.bf16.msrb.mxu1 %v839_v45 }
 0x144   :  { %v326_v32 = vpop.f32.mrf.mxu3  ;;  %947 = vmatpush.msra.mxu3 %v6354_v3 }
 0x146   :  { %v315_v33 = vpop.f32.mrf.mxu1 }
 0x147   :  { %865 = vmatpush.bf16.msrb.mxu1 %v4551_v48 }
 0x14b   :  { %866 = vmatpush.bf16.msrb.mxu1 %v4535_v51 }
 0x14c   :  { %v328_v34 = vpop.f32.mrf.mxu3 }
 0x14d   :  { %v5950_v34 = vld [vmem:[%s9291_s3 + $0x1ec] sm:$0xf] }
 0x14e   :  { %v456_v35 = vpop.f32.mrf.mxu1 }
 0x14f   :  { %v6839_v36 = vadd.f32 %v456_v35, %v313_v30  ;;  %867 = vmatpush.bf16.msrb.mxu1 %v4519_v55  ;;  %v4514_v30 = vld [vmem:[%s9291_s3 + $0x180] sm:$0xf]  ;;  %v4572_v35 = vld [vmem:[%s9291_s3 + $0x1f8] sm:$0x30] }
 0x151   :  { %4493 = vmatmul.msk.bf16.vlgmr.msra.gmra.mxu1 %vm261_vm2, %v523_v31  ;;  %713 = vmatmul.f32.vlgmr.msrb.gmra.mxu3 %v692_v37  ;;  %v5939_v31 = vld [vmem:[%s9291_s3 + $0x18c] sm:$0xf0]  ;;  %v4575_v37 = vor.u32 %v5950_v34, %v4572_v35  ;;  %v7048_v35 = vld [vmem:[%s9289_s1 + $0x68] sm:$0xff] }
 0x153   :  { %912 = vmatpush.msra.mxu1 %v6337_v0  ;;  %v4555_v0 = vor.u32 %v5948_v24, %v4554_v21  ;;  %v4605_v21 = vor.u32 %v5953_v12, %v4602_v18  ;;  %v5967_v24 = vld [vmem:[%s9291_s3 + $0x26c] sm:$0x30] }
 0x154   :  { %v469_v38 = vpop.f32.mrf.mxu3  ;;  %v7173_v18 = vld [vmem:[%s9289_s1 + $0x10] sm:$0xff] }
 0x155   :  { %v6842_v39 = vadd.f32 %v469_v38, %v326_v32  ;;  %913 = vmatpush.msra.mxu1 %v6347_v2  ;;  %878 = vmatpush.bf16.msra.mxu0 %v4555_v0  ;;  %v4531_v2 = vor.u32 %v5943_v26, %v4530_v25  ;;  %v4515_v32 = vor.u32 %v5939_v31, %v4514_v30  ;;  %v845_v38 = vsel %vm265_vm1, %v4575_v37, 0  ;;  %v4656_v0 = vld [vmem:[%s9291_s3 + $0x268] sm:$0xf]  ;;  %v5968_v25 = vld [vmem:[%s9291_s3 + $0x274] sm:$0x30] }
 0x156   :  { %v458_v40 = vpop.f32.mrf.mxu1  ;;  %v4649_v26 = vor.u32 %v5967_v24, %v4648_v20  ;;  %v4632_v30 = vld [vmem:[%s9291_s3 + $0x240] sm:$0xf]  ;;  %v5963_v31 = vld [vmem:[%s9291_s3 + $0x24c] sm:$0xf0]  ;;  %v7182_v24 = vld [vmem:[%s9289_s1 + $0x8] sm:$0xff] }
 0x157   :  { %914 = vmatpush.msra.mxu1 %v6359_v4  ;;  %v5944_v4 = vld [vmem:[%s9291_s3 + $0x1b4] sm:$0xf0]  ;;  %853 = vmatpush.bf16.msrb.mxu2 %v4531_v2  ;;  %v4556_v40 = vld [vmem:[%s9291_s3 + $0x1d8] sm:$0xf0]  ;;  %v4616_v37 = vld [vmem:[%s9291_s3 + $0x220] sm:$0xf] }
 0x158   :  { %v4539_v29 = vor.u32 %v5944_v4, %v4538_v28  ;;  %v4657_v28 = vor.u32 %v5968_v25, %v4656_v0  ;;  %v1051_v2 = vsel %vm265_vm1, %v4649_v26, 0  ;;  %v7188_v26 = vld [vmem:[%s9289_s1] sm:$0xff] }
 0x159   :  { %915 = vmatpush.msra.mxu1 %v6368_v5  ;;  %v4522_v5 = vld [vmem:[%s9291_s3 + $0x188] sm:$0xf] }
 0x15a   :  { %879 = vmatpush.bf16.msra.mxu0 %v4539_v29  ;;  %v1057_v4 = vsel %vm265_vm1, %v4657_v28, 0  ;;  %v7024_v29 = vld [vmem:[%s9289_s1 + $0x78] sm:$0xff] }
 0x15b   :  { %916 = vmatpush.msra.mxu1 %v6379_v7  ;;  %v5940_v7 = vld [vmem:[%s9291_s3 + $0x194] sm:$0xf0]  ;;  %854 = vmatpush.bf16.msrb.mxu2 %v4515_v32  ;;  %v7039_v32 = vld [vmem:[%s9289_s1 + $0x70] sm:$0xff] }
 0x15c   :  { %v471_v41 = vpop.f32.mrf.mxu3  ;;  %v4523_v33 = vor.u32 %v5940_v7, %v4522_v5  ;;  %v4640_v5 = vld [vmem:[%s9291_s3 + $0x248] sm:$0xf]  ;;  %v4633_v7 = vor.u32 %v5963_v31, %v4632_v30 }
 0x15d   :  { %917 = vmatpush.msra.mxu1 %v6386_v8 }
 0x15e   :  { %880 = vmatpush.bf16.msra.mxu0 %v4523_v33  ;;  %v5964_v33 = vld [vmem:[%s9291_s3 + $0x254] sm:$0xf0] }
 0x15f   :  { %918 = vmatpush.msra.mxu1 %v6393_v9  ;;  %v5946_v9 = vld [vmem:[%s9291_s3 + $0x1cc] sm:$0xf]  ;;  %890 = vmatpush.bf16.msra.mxu2 %v845_v38  ;;  %v4641_v34 = vor.u32 %v5964_v33, %v4640_v5  ;;  %v4624_v38 = vld [vmem:[%s9291_s3 + $0x228] sm:$0xf] }
 0x160   :  { %v4559_v42 = vor.u32 %v5946_v9, %v4556_v40  ;;  %v7063_v9 = vld [vmem:[%s9289_s1 + $0x60] sm:$0xff] }
 0x161   :  { %919 = vmatpush.msra.mxu1 %v6403_v11  ;;  %v4580_v11 = vld [vmem:[%s9288_s0 + $0x20] sm:$0xf] }
 0x162   :  { %906 = vst [vmem:[#allocation1] ss:$4 sm:$0xff] %v4580_v11  ;;  %1066 = vmatpush.bf16.msrb.mxu0 %v1051_v2 }
 0x163   :  { %920 = vmatpush.msra.mxu1 %v6410_v14  ;;  %891 = vmatpush.bf16.msra.mxu2 %v4559_v42  ;;  %v4543_v14 = vor.u32 %v5942_v43, %v4540_v44  ;;  %v5960_v42 = vld [vmem:[%s9291_s3 + $0x234] sm:$0xf0]  ;;  %v4600_v44 = vld [vmem:[%s9291_s3 + $0x200] sm:$0xf] }
 0x164   :  { %v4625_v11 = vor.u32 %v5960_v42, %v4624_v38  ;;  %v7072_v43 = vld [vmem:[%s9289_s1 + $0x58] sm:$0xff]  ;;  %v5981_v38 = vld [vmem:[%s9291_s3 + $0x2e4] sm:$0xf] }
 0x165   :  { %921 = vmatpush.msra.mxu1 %v6418_v15 }
 0x166   :  { %1067 = vmatpush.bf16.msrb.mxu0 %v4633_v7 }
 0x167   :  { %922 = vmatpush.msra.mxu1 %v6425_v16  ;;  %892 = vmatpush.bf16.msra.mxu2 %v4543_v14  ;;  %v4608_v14 = vld [vmem:[%s9291_s3 + $0x208] sm:$0xf] }
 0x169   :  { %923 = vmatpush.msra.mxu1 %v6432_v17  ;;  %v908_v16 = vld.sshfl [vmem:[#allocation1 + $0x8] sm:$0xff pattern:$0x73625140]  ;;  %v5965_v17 = vld [vmem:[%s9291_s3 + $0x264] sm:$0xf] }
 0x16a   :  { %4581 = vmatmul.msk.f32.vlgmr.msra.gmra.mxu3 %vm56_vm0, %v908_v16  ;;  %v907_v60 = vld.sshfl [vmem:[#allocation1] sm:$0xff pattern:$0x73625140]  ;;  %v7096_v16 = vld [vmem:[%s9289_s1 + $0x48] sm:$0xff] }
 0x16b   :  { %924 = vmatpush.msra.mxu1 %v6439_v19  ;;  %v4650_v19 = vld [vmem:[%s9291_s3 + $0x270] sm:$0x30] }
 0x16c   :  { %v4653_v52 = vor.u32 %v5965_v17, %v4650_v19  ;;  %v7108_v17 = vld [vmem:[%s9289_s1 + $0x40] sm:$0xff] }
 0x16d   :  { %925 = vmatpush.msra.mxu1 %v6453_v22 }
 0x16e   :  { %v1054_v22 = vsel %vm265_vm1, %v4653_v52, 0  ;;  %v7115_v52 = vld [vmem:[%s9289_s1 + $0x38] sm:$0xff] }
 0x16f   :  { %926 = vmatpush.msra.mxu1 %v6460_v23  ;;  %1079 = vmatpush.bf16.msrb.mxu3 %v1054_v22  ;;  %v734_v23 = vpop.f32.mrf.mxu0  ;;  %v5962_v22 = vld [vmem:[%s9291_s3 + $0x24c] sm:$0xf] }
 0x171   :  { %927 = vmatpush.msra.mxu1 %v6473_v27 }
 0x173   :  { %1080 = vmatpush.bf16.msrb.mxu3 %v4637_v63  ;;  %v4610_v63 = vld [vmem:[%s9291_s3 + $0x218] sm:$0xf0] }
 0x174   :  { %v4613_v12 = vor.u32 %v5954_v62, %v4610_v63  ;;  %v5979_v62 = vld [vmem:[%s9291_s3 + $0x2cc] sm:$0xf0] }
 0x1be   :  { %v641_v8 = vpop.f32.mrf.mxu1 }
 0x1bf   :  { %v6941_v41 = vadd.f32 %v641_v8, %v6826_v10  ;;  %v444_v10 = vadd.f32 %v6816_v59, %v6830_v13  ;;  %v4527_v59 = vor.u32 %v5938_v46, %v4524_v47  ;;  %v5959_v8 = vld [vmem:[%s9291_s3 + $0x22c] sm:$0xf0]  ;;  %v5956_v47 = vld [vmem:[%s9291_s3 + $0x214] sm:$0xf0] }
 0x1c0   :  { %v4617_v40 = vor.u32 %v5959_v8, %v4616_v37  ;;  %v7203_v8 = vld [vmem:[%s9289_s1 + $0x88] sm:$0xff] }
 0x1c1   :  { %893 = vmatpush.bf16.msra.mxu2 %v4527_v59  ;;  %v5966_v59 = vld [vmem:[%s9291_s3 + $0x26c] sm:$0xf] }
 0x1c2   :  { %1068 = vmatpush.bf16.msrb.mxu0 %v4617_v40  ;;  %v4736_v40 = vld [vmem:[%s9291_s3 + $0x2f0] sm:$0x30] }
 0x1c3   :  { %v4739_v42 = vor.u32 %v5981_v38, %v4736_v40 }
 0x1c4   :  { %v654_v45 = vpop.f32.mrf.mxu3 }
 0x1c5   :  { %v6963_v48 = vadd.f32 %v654_v45, %v444_v10  ;;  %v6965_v49 = vpop.f32.mrf.mxu2  ;;  %v5955_v10 = vld [vmem:[%s9291_s3 + $0x20c] sm:$0xf0] }
 0x1c6   :  { %v643_v15 = vpop.f32.mrf.mxu1  ;;  %v7087_v45 = vld [vmem:[%s9289_s1 + $0x50] sm:$0xff]  ;;  %v4601_v46 = vor.u32 %v5955_v10, %v4600_v44  ;;  %v5977_v44 = vld [vmem:[%s9291_s3 + $0x2c4] sm:$0xf] }
 0x1c7   :  { %v4609_v15 = vor.u32 %v5956_v47, %v4608_v14  ;;  %v4720_v10 = vld [vmem:[%s9291_s3 + $0x2d0] sm:$0xf0] }
 0x1c8   :  { %1069 = vmatpush.bf16.msrb.mxu0 %v4601_v46  ;;  %v4723_v14 = vor.u32 %v5977_v44, %v4720_v10  ;;  %v5973_v46 = vld [vmem:[%s9291_s3 + $0x2a4] sm:$0xf]  ;;  %v4704_v47 = vld [vmem:[%s9291_s3 + $0x2b0] sm:$0xf0] }
 0x1cc   :  { %v656_v13 = vpop.f32.mrf.mxu3 }
 0x1cd   :  { %v669_v50 = vpop.f32.mrf.mxu2  ;;  %v4658_v13 = vld [vmem:[%s9291_s3 + $0x278] sm:$0x30] }
 0x1ce   :  { %v6976_v51 = vpop.f32.mrf.mxu1  ;;  %v4661_v50 = vor.u32 %v5966_v59, %v4658_v13  ;;  %v5969_v59 = vld [vmem:[%s9291_s3 + $0x284] sm:$0xf]  ;;  %v4688_v13 = vld [vmem:[%s9291_s3 + $0x290] sm:$0xf0] }
 0x1cf   :  { %v687_v5 = vadd.f32 %v6976_v51, %v6842_v39 }
 0x1d0   :  { %v1060_v19 = vsel %vm265_vm1, %v4661_v50, 0  ;;  %v4734_v50 = vld [vmem:[%s9291_s3 + $0x2e0] sm:$0xf] }
 0x1d4   :  { %v714_v53 = vpop.f32.mrf.mxu3 }
 0x1d5   :  { %v715_v54 = vadd.f32 %v6642_v57, %v714_v53  ;;  %v4642_v53 = vld [vmem:[%s9291_s3 + $0x258] sm:$0xf0] }
 0x1d6   :  { %v682_v55 = vpop.f32.mrf.mxu1 }
 0x1d7   :  { %v735_v27 = vadd.f32 %v734_v23, %v715_v54  ;;  %v7127_v23 = vld [vmem:[%s9289_s1 + $0x30] sm:$0xff]  ;;  %v4645_v54 = vor.u32 %v5962_v22, %v4642_v53  ;;  %v5958_v55 = vld [vmem:[%s9291_s3 + $0x22c] sm:$0xf]  ;;  %v4742_v53 = vld [vmem:[%s9291_s3 + $0x2e8] sm:$0xf] }
 0x1d8   :  { %v5983_v22 = vld [vmem:[%s9291_s3 + $0x2ec] sm:$0x30] }
 0x1d9   :  { %v737_v56 = vmax.f32 %v735_v27, 0.0  ;;  %v4626_v27 = vld [vmem:[%s9291_s3 + $0x238] sm:$0xf0] }
 0x1db   :  { %v738_v58 = vpack.c.bf16 %v737_v56, %v737_v56  ;;  %v7139_v56 = vld [vmem:[%s9289_s1 + $0x28] sm:$0xff] }
 0x1dd   :  { %4576 = vmatmul.msk.bf16.vlgmr.msrb.gmra.mxu2 %vm261_vm2, %v738_v58  ;;  %4577 = vmatmul.msk.bf16.vlgmr.msrb.gmra.mxu1 %vm261_vm2, %v738_v58 }
 0x1de   :  { %4578 = vmatmul.msk.bf16.vlgmr.msra.gmra.mxu0 %vm261_vm2, %v738_v58  ;;  %1161 = vmatpush.msrb.mxu1 %v6342_v1  ;;  %v5957_v1 = vld [vmem:[%s9291_s3 + $0x224] sm:$0xf] }
 0x1df   :  { %1092 = vmatpush.bf16.msrb.mxu2 %v1057_v4  ;;  %1105 = vmatpush.bf16.msra.mxu0 %v1060_v19  ;;  %v4691_v19 = vor.u32 %v5969_v59, %v4688_v13  ;;  %v5970_v59 = vld [vmem:[%s9291_s3 + $0x28c] sm:$0xf]  ;;  %v4696_v13 = vld [vmem:[%s9291_s3 + $0x298] sm:$0xf0] }
 0x1e0   :  { %1162 = vmatpush.msrb.mxu1 %v6354_v3  ;;  %v4618_v3 = vld [vmem:[%s9291_s3 + $0x230] sm:$0xf0] }
 0x1e1   :  { %v4621_v6 = vor.u32 %v5957_v1, %v4618_v3 }
 0x1e3   :  { %1081 = vmatpush.bf16.msrb.mxu3 %v4621_v6  ;;  %1093 = vmatpush.bf16.msrb.mxu2 %v4641_v34  ;;  %v7156_v6 = vld [vmem:[%s9289_s1 + $0x20] sm:$0xff] }
 0x1e4   :  { %1106 = vmatpush.bf16.msra.mxu0 %v4645_v54  ;;  %v5984_v54 = vld [vmem:[%s9291_s3 + $0x2f4] sm:$0x30] }
 0x1e7   :  { %1082 = vmatpush.bf16.msrb.mxu3 %v4605_v21  ;;  %1094 = vmatpush.bf16.msrb.mxu2 %v4625_v11  ;;  %v1269_v11 = vsel %vm265_vm1, %v4739_v42, 0  ;;  %v5978_v42 = vld [vmem:[%s9291_s3 + $0x2cc] sm:$0xf] }
 0x1eb   :  { %1127 = vmatpush.msra.mxu3 %v7024_v29  ;;  %1095 = vmatpush.bf16.msrb.mxu2 %v4609_v15  ;;  %v4707_v15 = vor.u32 %v5973_v46, %v4704_v47  ;;  %v5974_v46 = vld [vmem:[%s9291_s3 + $0x2ac] sm:$0xf]  ;;  %v4712_v47 = vld [vmem:[%s9291_s3 + $0x2b8] sm:$0xf0] }
 0x1ed   :  { %4579 = vmatmul.msk.bf16.vlgmr.msra.gmra.mxu2 %vm261_vm2, %v738_v58  ;;  %928 = vmatmul.f32.vlgmr.msra.gmra.mxu1 %v907_v60  ;;  %v4629_v58 = vor.u32 %v5958_v55, %v4626_v27  ;;  %v686_v60 = vadd.f32 %v6965_v49, %v6839_v36  ;;  %v4666_v36 = vld [vmem:[%s9288_s0 + $0x28] sm:$0xf]  ;;  %v949_v4 = vpop.f32.mrf.mxu3  ;;  %v4735_v55 = vor.u32 %v5983_v22, %v4734_v50 }
 0x1ee   :  { %1128 = vmatpush.msra.mxu3 %v7039_v32  ;;  %1121 = vst [vmem:[#allocation1] ss:$4 sm:$0xff] %v4666_v36  ;;  %v4743_v27 = vor.u32 %v5984_v54, %v4742_v53  ;;  %v5980_v36 = vld [vmem:[%s9291_s3 + $0x2d4] sm:$0xf0] }
 0x1ef   :  { %1107 = vmatpush.bf16.msra.mxu0 %v4629_v58  ;;  %v1266_v58 = vsel %vm265_vm1, %v4735_v55, 0  ;;  %v4699_v55 = vor.u32 %v5970_v59, %v4696_v13  ;;  %v5996_v13 = vld [vmem:[%s9291_s3 + $0x354] sm:$0xf0] }
 0x1f0   :  { %1129 = vmatpush.msra.mxu3 %v7048_v35  ;;  %1281 = vmatpush.bf16.msra.mxu2 %v1266_v58 }
 0x1f2   :  { %1130 = vmatpush.msra.mxu3 %v7063_v9 }
 0x1f3   :  { %1108 = vmatpush.bf16.msra.mxu0 %v4613_v12 }
 0x1f4   :  { %1131 = vmatpush.msra.mxu3 %v7072_v43 }
 0x1f5   :  { %v1123_v28 = vld.sshfl [vmem:[#allocation1 + $0x8] sm:$0xff pattern:$0x73625140]  ;;  %v1122_v51 = vld.sshfl [vmem:[#allocation1] sm:$0xff pattern:$0x73625140] }
 0x1f6   :  { %1132 = vmatpush.msra.mxu3 %v7087_v45  ;;  %4667 = vmatmul.msk.f32.vlgmr.msrb.gmra.mxu1 %vm56_vm0, %v1123_v28 }
 0x1f8   :  { %1133 = vmatpush.msra.mxu3 %v7096_v16 }
 0x1fa   :  { %1134 = vmatpush.msra.mxu3 %v7108_v17 }
 0x1fc   :  { %1135 = vmatpush.msra.mxu3 %v7115_v52 }
 0x1fe   :  { %1136 = vmatpush.msra.mxu3 %v7127_v23 }
 0x200   :  { %1137 = vmatpush.msra.mxu3 %v7139_v56 }
 0x202   :  { %1138 = vmatpush.msra.mxu3 %v7156_v6 }
 0x25a   :  { %v869_v61 = vpop.f32.mrf.mxu1 }
 0x25b   :  { %v7151_v1 = vadd.f32 %v869_v61, %v6963_v48  ;;  %v882_v3 = vpop.f32.mrf.mxu0  ;;  %v7167_v48 = vld [vmem:[%s9289_s1 + $0x18] sm:$0xff]  ;;  %v4718_v61 = vld [vmem:[%s9291_s3 + $0x2c0] sm:$0xf] }
 0x25c   :  { %v7162_v49 = vadd.f32 %v882_v3, %v686_v60  ;;  %1139 = vmatpush.msra.mxu3 %v7167_v48  ;;  %v1272_v60 = vsel %vm265_vm1, %v4743_v27, 0  ;;  %v4719_v63 = vor.u32 %v5979_v62, %v4718_v61  ;;  %v4726_v3 = vld [vmem:[%s9291_s3 + $0x2c8] sm:$0xf]  ;;  %v5997_v61 = vld [vmem:[%s9291_s3 + $0x364] sm:$0xf] }
 0x25d   :  { %1307 = vmatpush.bf16.msra.mxu1 %v1272_v60  ;;  %v4727_v12 = vor.u32 %v5980_v36, %v4726_v3  ;;  %v4822_v62 = vld [vmem:[%s9291_s3 + $0x370] sm:$0x30] }
 0x25e   :  { %1140 = vmatpush.msra.mxu3 %v7173_v18  ;;  %1282 = vmatpush.bf16.msra.mxu2 %v4719_v63  ;;  %v7353_v63 = vld [vmem:[%s9290_s2] ss:$0 sm:$0xff] }
 0x260   :  { %v856_v20 = vpop.f32.mrf.mxu2  ;;  %1141 = vmatpush.msra.mxu3 %v7182_v24 }
 0x261   :  { %v7177_v21 = vadd.f32 %v856_v20, %v6941_v41  ;;  %1308 = vmatpush.bf16.msra.mxu1 %v4727_v12  ;;  %v4702_v20 = vld [vmem:[%s9291_s3 + $0x2a0] sm:$0xf] }
 0x262   :  { %v871_v0 = vpop.f32.mrf.mxu1  ;;  %1142 = vmatpush.msra.mxu3 %v7188_v26 }
 0x263   :  { %v884_v25 = vpop.f32.mrf.mxu0  ;;  %v5975_v0 = vld [vmem:[%s9291_s3 + $0x2ac] sm:$0xf0] }
 0x264   :  { %v4710_v25 = vld [vmem:[%s9291_s3 + $0x2a8] sm:$0xf]  ;;  %v4703_v28 = vor.u32 %v5975_v0, %v4702_v20  ;;  %v4825_v20 = vor.u32 %v5997_v61, %v4822_v62  ;;  %v5987_v61 = vld [vmem:[%s9291_s3 + $0x30c] sm:$0xf0] }
 0x265   :  { %v4780_v62 = vld [vmem:[%s9291_s3 + $0x308] sm:$0xf] }
 0x266   :  { %1283 = vmatpush.bf16.msra.mxu2 %v4703_v28  ;;  %v1484_v28 = vsel %vm265_vm1, %v4825_v20, 0  ;;  %v5998_v20 = vld [vmem:[%s9291_s3 + $0x36c] sm:$0xf] }
 0x268   :  { %v858_v41 = vpop.f32.mrf.mxu2 }
 0x269   :  { %v5976_v41 = vld [vmem:[%s9291_s3 + $0x2b4] sm:$0xf0] }
 0x26a   :  { %v929_v2 = vpop.f32.mrf.mxu1 }
 0x26b   :  { %v930_v30 = vadd.f32 %v6642_v57, %v929_v2  ;;  %v7209_v57 = vld [vmem:[%s9289_s1 + $0x80] sm:$0xff]  ;;  %v4711_v2 = vor.u32 %v5976_v41, %v4710_v25 }
 0x26d   :  { %v950_v31 = vadd.f32 %v949_v4, %v930_v30  ;;  %1309 = vmatpush.bf16.msra.mxu1 %v4711_v2  ;;  %v4686_v4 = vld [vmem:[%s9291_s3 + $0x280] sm:$0xf]  ;;  %v5971_v30 = vld [vmem:[%s9291_s3 + $0x28c] sm:$0xf0]  ;;  %v5993_v2 = vld [vmem:[%s9291_s3 + $0x344] sm:$0xf] }
 0x26f   :  { %v952_v7 = vmax.f32 %v950_v31, 0.0  ;;  %v4694_v31 = vld [vmem:[%s9291_s3 + $0x288] sm:$0xf] }
 0x270   :  { %v895_v33 = vpop.f32.mrf.mxu2 }
 0x271   :  { %v953_v34 = vpack.c.bf16 %v952_v7, %v952_v7  ;;  %v7195_v37 = vadd.f32 %v895_v33, %v687_v5  ;;  %v4687_v5 = vor.u32 %v5971_v30, %v4686_v4  ;;  %v5972_v7 = vld [vmem:[%s9291_s3 + $0x294] sm:$0xf0]  ;;  %v4806_v4 = vld [vmem:[%s9291_s3 + $0x350] sm:$0xf0] }
 0x272   :  { %v4695_v33 = vor.u32 %v5972_v7, %v4694_v31  ;;  %v4809_v30 = vor.u32 %v5993_v2, %v4806_v4  ;;  %v5989_v31 = vld [vmem:[%s9291_s3 + $0x324] sm:$0xf]  ;;  %v4814_v2 = vld [vmem:[%s9291_s3 + $0x358] sm:$0xf0] }
 0x273   :  { %4662 = vmatmul.msk.bf16.vlgmr.msrb.gmra.mxu0 %vm261_vm2, %v953_v34  ;;  %4663 = vmatmul.msk.bf16.vlgmr.msrb.gmra.mxu3 %vm261_vm2, %v953_v34  ;;  %v1164_v60 = vpop.f32.mrf.mxu1 }
 0x274   :  { %4664 = vmatmul.msk.bf16.vlgmr.msrb.gmra.mxu2 %vm261_vm2, %v953_v34  ;;  %1376 = vmatpush.msrb.mxu3 %v7203_v8 }
 0x275   :  { %1294 = vmatpush.bf16.msrb.mxu0 %v1269_v11  ;;  %1284 = vmatpush.bf16.msra.mxu2 %v4687_v5  ;;  %v4728_v11 = vld [vmem:[%s9291_s3 + $0x2d8] sm:$0xf0]  ;;  %v4790_v5 = vld [vmem:[%s9291_s3 + $0x330] sm:$0xf0] }
 0x276   :  { %1377 = vmatpush.msrb.mxu3 %v7209_v57  ;;  %1310 = vmatpush.bf16.msra.mxu1 %v4695_v33  ;;  %v4731_v10 = vor.u32 %v5978_v42, %v4728_v11  ;;  %v4793_v7 = vor.u32 %v5989_v31, %v4790_v5  ;;  %v5985_v33 = vld [vmem:[%s9291_s3 + $0x304] sm:$0xf]  ;;  %v6000_v42 = vld [vmem:[%s9291_s3 + $0x374] sm:$0x30]  ;;  %v4798_v31 = vld [vmem:[%s9291_s3 + $0x338] sm:$0xf0] }
 0x278   :  { %v897_v39 = vpop.f32.mrf.mxu2 }
 0x279   :  { %1295 = vmatpush.bf16.msrb.mxu0 %v4723_v14  ;;  %v4744_v39 = vld [vmem:[%s9291_s3 + $0x2f8] sm:$0x30]  ;;  %v4752_v14 = vld [vmem:[%s9288_s0 + $0x30] sm:$0xf] }
 0x27a   :  { %1336 = vst [vmem:[#allocation1] ss:$4 sm:$0xff] %v4752_v14 }
 0x27d   :  { %1296 = vmatpush.bf16.msrb.mxu0 %v4707_v15 }
 0x281   :  { %1297 = vmatpush.bf16.msrb.mxu0 %v4691_v19  ;;  %v1338_v54 = vld.sshfl [vmem:[#allocation1 + $0x8] sm:$0xff pattern:$0x73625140]  ;;  %v1337_v41 = vld.sshfl [vmem:[#allocation1] sm:$0xff pattern:$0x73625140] }
 0x283   :  { %4665 = vmatmul.msk.bf16.vlgmr.msra.gmra.mxu0 %vm261_vm2, %v953_v34  ;;  %1143 = vmatmul.f32.vlgmr.msra.gmra.mxu3 %v1122_v51  ;;  %v5982_v34 = vld [vmem:[%s9291_s3 + $0x2ec] sm:$0xf] }
 0x284   :  { %v4747_v51 = vor.u32 %v5982_v34, %v4744_v39  ;;  %v4774_v34 = vld [vmem:[%s9291_s3 + $0x310] sm:$0xf0]  ;;  %v4820_v39 = vld [vmem:[%s9291_s3 + $0x360] sm:$0xf] }
 0x285   :  { %1342 = vmatpush.msra.mxu0 %v7024_v29 }
 0x286   :  { %v1275_v40 = vsel %vm265_vm1, %v4747_v51, 0  ;;  %v4777_v51 = vor.u32 %v5985_v33, %v4774_v34  ;;  %v5986_v33 = vld [vmem:[%s9291_s3 + $0x30c] sm:$0xf]  ;;  %v4782_v34 = vld [vmem:[%s9291_s3 + $0x318] sm:$0xf0] }
 0x287   :  { %1343 = vmatpush.msra.mxu0 %v7039_v32  ;;  %1320 = vmatpush.bf16.msrb.mxu2 %v1275_v40  ;;  %v4828_v40 = vld [vmem:[%s9291_s3 + $0x368] sm:$0xf] }
 0x289   :  { %1344 = vmatpush.msra.mxu0 %v7048_v35 }
 0x28b   :  { %1345 = vmatpush.msra.mxu0 %v7063_v9  ;;  %1321 = vmatpush.bf16.msrb.mxu2 %v4731_v10  ;;  %v4829_v10 = vor.u32 %v6000_v42, %v4828_v40  ;;  %v4785_v42 = vor.u32 %v5986_v33, %v4782_v34  ;;  %v4890_v33 = vld [vmem:[%s9291_s3 + $0x3c0] sm:$0xf]  ;;  %v6011_v34 = vld [vmem:[%s9291_s3 + $0x3cc] sm:$0xf0] }
 0x28c   :  { %4753 = vmatmul.msk.f32.vlgmr.msrb.gmra.mxu3 %vm56_vm0, %v1338_v54  ;;  %v5991_v54 = vld [vmem:[%s9291_s3 + $0x32c] sm:$0xf0] }
 0x28d   :  { %1346 = vmatpush.msra.mxu0 %v7072_v43 }
 0x28f   :  { %1347 = vmatpush.msra.mxu0 %v7087_v45 }
 0x291   :  { %1348 = vmatpush.msra.mxu0 %v7096_v16 }
 0x293   :  { %1349 = vmatpush.msra.mxu0 %v7108_v17 }
 0x295   :  { %1350 = vmatpush.msra.mxu0 %v7115_v52 }
 0x297   :  { %1351 = vmatpush.msra.mxu0 %v7127_v23 }
 0x299   :  { %1352 = vmatpush.msra.mxu0 %v7139_v56 }
 0x29b   :  { %1353 = vmatpush.msra.mxu0 %v7156_v6 }
 0x29d   :  { %1354 = vmatpush.msra.mxu0 %v7167_v48 }
 0x29f   :  { %1355 = vmatpush.msra.mxu0 %v7173_v18 }
 0x2a1   :  { %1356 = vmatpush.msra.mxu0 %v7182_v24 }
 0x2a3   :  { %1357 = vmatpush.msra.mxu0 %v7188_v26 }
 0x2f0   :  { %v1071_v38 = vpop.f32.mrf.mxu0 }
 0x2f1   :  { %v7310_v44 = vadd.f32 %v1071_v38, %v7177_v21  ;;  %v4715_v21 = vor.u32 %v5974_v46, %v4712_v47  ;;  %v5999_v38 = vld [vmem:[%s9291_s3 + $0x36c] sm:$0x30]  ;;  %v1487_v46 = vsel %vm265_vm1, %v4829_v10, 0  ;;  %v4804_v47 = vld [vmem:[%s9291_s3 + $0x340] sm:$0xf] }
 0x2f2   :  { %v4821_v11 = vor.u32 %v5999_v38, %v4820_v39  ;;  %1522 = vmatpush.bf16.msra.mxu3 %v1487_v46  ;;  %v4838_v38 = vld [vmem:[%s9288_s0 + $0x38] sm:$0xf] }
 0x2f3   :  { %1322 = vmatpush.bf16.msrb.mxu2 %v4715_v21  ;;  %v5995_v21 = vld [vmem:[%s9291_s3 + $0x34c] sm:$0xf0]  ;;  %1551 = vst [vmem:[#allocation1] ss:$4 sm:$0xff] %v4838_v38  ;;  %v4898_v38 = vld [vmem:[%s9291_s3 + $0x3c8] sm:$0xf] }
 0x2f4   :  { %v1481_v14 = vsel %vm265_vm1, %v4821_v11, 0  ;;  %v4805_v59 = vor.u32 %v5995_v21, %v4804_v47 }
 0x2f5   :  { %1496 = vmatpush.bf16.msrb.mxu1 %v1481_v14 }
 0x2f6   :  { %v1084_v15 = vpop.f32.mrf.mxu3 }
 0x2f7   :  { %v7331_v50 = vadd.f32 %v1084_v15, %v7151_v1  ;;  %v1097_v19 = vpop.f32.mrf.mxu2  ;;  %1323 = vmatpush.bf16.msrb.mxu2 %v4699_v55  ;;  %v4812_v15 = vld [vmem:[%s9291_s3 + $0x348] sm:$0xf] }
 0x2f8   :  { %v7335_v22 = vadd.f32 %v1097_v19, %v7162_v49  ;;  %v1073_v53 = vpop.f32.mrf.mxu0  ;;  %v4813_v19 = vor.u32 %v5996_v13, %v4812_v15  ;;  %v4796_v55 = vld [vmem:[%s9291_s3 + $0x328] sm:$0xf] }
 0x2f9   :  { %1497 = vmatpush.bf16.msrb.mxu1 %v4805_v59  ;;  %v4788_v53 = vld [vmem:[%s9291_s3 + $0x320] sm:$0xf] }
 0x2fa   :  { %1523 = vmatpush.bf16.msra.mxu3 %v4813_v19 }
 0x2fe   :  { %v1086_v1 = vpop.f32.mrf.mxu3 }
 0x2ff   :  { %v1099_v27 = vpop.f32.mrf.mxu2  ;;  %v4789_v1 = vor.u32 %v5991_v54, %v4788_v53  ;;  %v1552_v54 = vld.sshfl [vmem:[#allocation1] sm:$0xff pattern:$0x73625140] }
 0x300   :  { %v7342_v58 = vpop.f32.mrf.mxu0  ;;  %v5992_v27 = vld [vmem:[%s9291_s3 + $0x334] sm:$0xf0] }
 0x301   :  { %1498 = vmatpush.bf16.msrb.mxu1 %v4789_v1  ;;  %v4908_v1 = vld [vmem:[%s9291_s3 + $0x3f0] sm:$0x30] }
 0x306   :  { %v1144_v49 = vpop.f32.mrf.mxu3 }
 0x307   :  { %v1145_v3 = vadd.f32 %v7353_v63, %v1144_v49  ;;  %v4797_v49 = vor.u32 %v5992_v27, %v4796_v55  ;;  %v6013_v55 = vld [vmem:[%s9291_s3 + $0x3e4] sm:$0xf] }
 0x308   :  { %v1112_v36 = vpop.f32.mrf.mxu0  ;;  %v4911_v27 = vor.u32 %v6013_v55, %v4908_v1  ;;  %v6014_v55 = vld [vmem:[%s9291_s3 + $0x3ec] sm:$0xf]  ;;  %v4916_v1 = vld [vmem:[%s9291_s3 + $0x3f8] sm:$0x30] }
 0x309   :  { %v1165_v12 = vadd.f32 %v1164_v60, %v1145_v3  ;;  %1524 = vmatpush.bf16.msra.mxu3 %v4797_v49  ;;  %v4772_v60 = vld [vmem:[%s9291_s3 + $0x300] sm:$0xf]  ;;  %v5988_v36 = vld [vmem:[%s9291_s3 + $0x314] sm:$0xf0] }
 0x30a   :  { %v4773_v3 = vor.u32 %v5987_v61, %v4772_v60  ;;  %v1699_v49 = vsel %vm265_vm1, %v4911_v27, 0  ;;  %v6009_v60 = vld [vmem:[%s9291_s3 + $0x3c4] sm:$0xf]  ;;  %v4892_v61 = vld [vmem:[%s9291_s3 + $0x3d0] sm:$0xf0]  ;;  %v4919_v27 = vor.u32 %v6014_v55, %v4916_v1 }
 0x30b   :  { %v1167_v0 = vmax.f32 %v1165_v12, 0.0  ;;  %v4781_v12 = vor.u32 %v5988_v36, %v4780_v62  ;;  %v4895_v62 = vor.u32 %v6009_v60, %v4892_v61  ;;  %v4876_v36 = vld [vmem:[%s9291_s3 + $0x3b0] sm:$0xf0]  ;;  %v6010_v61 = vld [vmem:[%s9291_s3 + $0x3cc] sm:$0xf] }
 0x30c   :  { %1499 = vmatpush.bf16.msrb.mxu1 %v4773_v3  ;;  %v6005_v3 = vld [vmem:[%s9291_s3 + $0x3a4] sm:$0xf]  ;;  %v1705_v60 = vsel %vm265_vm1, %v4919_v27, 0  ;;  %v4946_v27 = vld [vmem:[%s9291_s3 + $0x410] sm:$0xf0] }
 0x30d   :  { %v1168_v25 = vpack.c.bf16 %v1167_v0, %v1167_v0  ;;  %v4830_v0 = vld [vmem:[%s9291_s3 + $0x378] sm:$0x30]  ;;  %1525 = vmatpush.bf16.msra.mxu3 %v4781_v12  ;;  %v4879_v12 = vor.u32 %v6005_v3, %v4876_v36  ;;  %v6017_v1 = vld [vmem:[%s9291_s3 + $0x404] sm:$0xf] }
 0x30f   :  { %4748 = vmatmul.msk.bf16.vlgmr.msra.gmra.mxu2 %vm261_vm2, %v1168_v25  ;;  %4749 = vmatmul.msk.bf16.vlgmr.msrb.gmra.mxu0 %vm261_vm2, %v1168_v25  ;;  %v1379_v21 = vpop.f32.mrf.mxu3 }
 0x310   :  { %4750 = vmatmul.msk.bf16.vlgmr.msra.gmra.mxu1 %vm261_vm2, %v1168_v25  ;;  %1509 = vmatpush.bf16.msra.mxu2 %v1484_v28 }
 0x311   :  { %1591 = vmatpush.msrb.mxu0 %v7203_v8 }
 0x313   :  { %1592 = vmatpush.msrb.mxu0 %v7209_v57 }
 0x314   :  { %1510 = vmatpush.bf16.msra.mxu2 %v4809_v30  ;;  %v5990_v30 = vld [vmem:[%s9291_s3 + $0x32c] sm:$0xf] }
 0x315   :  { %v4801_v5 = vor.u32 %v5990_v30, %v4798_v31 }
 0x318   :  { %1511 = vmatpush.bf16.msra.mxu2 %v4793_v7 }
 0x31c   :  { %1512 = vmatpush.bf16.msra.mxu2 %v4777_v51 }
 0x31f   :  { %4751 = vmatmul.msk.bf16.vlgmr.msrb.gmra.mxu2 %vm261_vm2, %v1168_v25  ;;  %1358 = vmatmul.f32.vlgmr.msra.gmra.mxu0 %v1337_v41  ;;  %v4833_v25 = vor.u32 %v5998_v20, %v4830_v0  ;;  %v5994_v41 = vld [vmem:[%s9291_s3 + $0x34c] sm:$0xf]  ;;  %v6001_v20 = vld [vmem:[%s9291_s3 + $0x384] sm:$0xf]  ;;  %v4860_v0 = vld [vmem:[%s9291_s3 + $0x390] sm:$0xf0] }
 0x320   :  { %1557 = vmatpush.msrb.mxu2 %v7024_v29  ;;  %v4817_v4 = vor.u32 %v5994_v41, %v4814_v2  ;;  %v6015_v41 = vld [vmem:[%s9291_s3 + $0x3ec] sm:$0x30]  ;;  %v4914_v2 = vld [vmem:[%s9291_s3 + $0x3e8] sm:$0xf] }
 0x321   :  { %v1490_v28 = vsel %vm265_vm1, %v4833_v25, 0  ;;  %v4906_v25 = vld [vmem:[%s9291_s3 + $0x3e0] sm:$0xf] }
 0x322   :  { %1558 = vmatpush.msrb.mxu2 %v7039_v32  ;;  %1535 = vmatpush.bf16.msra.mxu1 %v1490_v28  ;;  %v4863_v28 = vor.u32 %v6001_v20, %v4860_v0  ;;  %v4907_v30 = vor.u32 %v6015_v41, %v4906_v25  ;;  %v6006_v20 = vld [vmem:[%s9291_s3 + $0x3ac] sm:$0xf]  ;;  %v4884_v0 = vld [vmem:[%s9291_s3 + $0x3b8] sm:$0xf0] }
 0x323   :  { %v4868_v41 = vld [vmem:[%s9291_s3 + $0x398] sm:$0xf0] }
 0x324   :  { %1559 = vmatpush.msrb.mxu2 %v7048_v35 }
 0x326   :  { %1560 = vmatpush.msrb.mxu2 %v7063_v9  ;;  %1536 = vmatpush.bf16.msra.mxu1 %v4817_v4  ;;  %v6016_v4 = vld [vmem:[%s9291_s3 + $0x3f4] sm:$0x30] }
 0x327   :  { %v4915_v31 = vor.u32 %v6016_v4, %v4914_v2 }
 0x328   :  { %1561 = vmatpush.msrb.mxu2 %v7072_v43 }
 0x32a   :  { %1562 = vmatpush.msrb.mxu2 %v7087_v45  ;;  %1537 = vmatpush.bf16.msra.mxu1 %v4801_v5  ;;  %v1696_v5 = vsel %vm265_vm1, %v4907_v30, 0 }
 0x32b   :  { %1711 = vmatpush.bf16.msrb.mxu3 %v1696_v5 }
 0x32c   :  { %1563 = vmatpush.msrb.mxu2 %v7096_v16 }
 0x32e   :  { %1564 = vmatpush.msrb.mxu2 %v7108_v17  ;;  %1538 = vmatpush.bf16.msra.mxu1 %v4785_v42  ;;  %v6012_v42 = vld [vmem:[%s9291_s3 + $0x3d4] sm:$0xf0] }
 0x330   :  { %1565 = vmatpush.msrb.mxu2 %v7115_v52 }
 0x332   :  { %1566 = vmatpush.msrb.mxu2 %v7127_v23 }
 0x334   :  { %1567 = vmatpush.msrb.mxu2 %v7139_v56 }
 0x336   :  { %1568 = vmatpush.msrb.mxu2 %v7156_v6 }
 0x338   :  { %1569 = vmatpush.msrb.mxu2 %v7167_v48 }
 0x33a   :  { %1570 = vmatpush.msrb.mxu2 %v7173_v18 }
 0x33c   :  { %1571 = vmatpush.msrb.mxu2 %v7182_v24 }
 0x33e   :  { %1572 = vmatpush.msrb.mxu2 %v7188_v26 }
 0x38c   :  { %v1299_v7 = vpop.f32.mrf.mxu0 }
 0x38d   :  { %v7468_v39 = vadd.f32 %v1299_v7, %v7331_v50  ;;  %v1312_v51 = vpop.f32.mrf.mxu1  ;;  %v1702_v7 = vsel %vm265_vm1, %v4915_v31, 0 }
 0x38e   :  { %v7475_v40 = vadd.f32 %v1312_v51, %v7335_v22  ;;  %v1553_v22 = vld.sshfl [vmem:[#allocation1 + $0x8] sm:$0xff pattern:$0x73625140]  ;;  %1737 = vmatpush.bf16.msra.mxu0 %v1702_v7  ;;  %v4891_v51 = vor.u32 %v6011_v34, %v4890_v33 }
 0x38f   :  { %4839 = vmatmul.msk.f32.vlgmr.msrb.gmra.mxu0 %vm56_vm0, %v1553_v22  ;;  %v4882_v22 = vld [vmem:[%s9291_s3 + $0x3a8] sm:$0xf] }
 0x390   :  { %1712 = vmatpush.bf16.msrb.mxu3 %v4891_v51 }
 0x392   :  { %v1286_v11 = vpop.f32.mrf.mxu2 }
 0x393   :  { %v7480_v50 = vadd.f32 %v1286_v11, %v7310_v44  ;;  %v4899_v11 = vor.u32 %v6012_v42, %v4898_v38  ;;  %v6029_v38 = vld [vmem:[%s9291_s3 + $0x464] sm:$0xf]  ;;  %v4994_v42 = vld [vmem:[%s9291_s3 + $0x470] sm:$0x30] }
 0x394   :  { %v1301_v10 = vpop.f32.mrf.mxu0 }
 0x395   :  { %v1314_v14 = vpop.f32.mrf.mxu1  ;;  %1738 = vmatpush.bf16.msra.mxu0 %v4899_v11  ;;  %v4874_v10 = vld [vmem:[%s9291_s3 + $0x3a0] sm:$0xf] }
 0x396   :  { %v6007_v14 = vld [vmem:[%s9291_s3 + $0x3ac] sm:$0xf0] }
 0x39a   :  { %v1288_v46 = vpop.f32.mrf.mxu2 }
 0x39b   :  { %v4875_v46 = vor.u32 %v6007_v14, %v4874_v10 }
 0x39c   :  { %v1359_v47 = vpop.f32.mrf.mxu0 }
 0x39d   :  { %v1360_v15 = vadd.f32 %v7353_v63, %v1359_v47  ;;  %v6008_v47 = vld [vmem:[%s9291_s3 + $0x3b4] sm:$0xf0]  ;;  %1713 = vmatpush.bf16.msrb.mxu3 %v4875_v46 }
 0x39f   :  { %v1380_v59 = vadd.f32 %v1379_v21, %v1360_v15  ;;  %v4883_v21 = vor.u32 %v6008_v47, %v4882_v22  ;;  %v4858_v15 = vld [vmem:[%s9291_s3 + $0x380] sm:$0xf]  ;;  %v4997_v22 = vor.u32 %v6029_v38, %v4994_v42 }
 0x3a1   :  { %v1382_v13 = vmax.f32 %v1380_v59, 0.0  ;;  %1739 = vmatpush.bf16.msra.mxu0 %v4883_v21  ;;  %v6003_v59 = vld [vmem:[%s9291_s3 + $0x38c] sm:$0xf0]  ;;  %v1914_v21 = vsel %vm265_vm1, %v4997_v22, 0  ;;  %v4986_v22 = vld [vmem:[%s9291_s3 + $0x458] sm:$0xf0] }
 0x3a2   :  { %v7486_v19 = vpop.f32.mrf.mxu2 }
 0x3a3   :  { %v1383_v44 = vpack.c.bf16 %v1382_v13, %v1382_v13  ;;  %v4866_v13 = vld [vmem:[%s9291_s3 + $0x388] sm:$0xf] }
 0x3a5   :  { %4834 = vmatmul.msk.bf16.vlgmr.msrb.gmra.mxu1 %vm261_vm2, %v1383_v44  ;;  %4835 = vmatmul.msk.bf16.vlgmr.msra.gmra.mxu2 %vm261_vm2, %v1383_v44 }
 0x3a6   :  { %4836 = vmatmul.msk.bf16.vlgmr.msra.gmra.mxu3 %vm261_vm2, %v1383_v44  ;;  %1806 = vmatpush.msra.mxu2 %v7203_v8 }
 0x3a7   :  { %1724 = vmatpush.bf16.msrb.mxu1 %v1699_v49 }
 0x3a8   :  { %1807 = vmatpush.msra.mxu2 %v7209_v57 }
 0x3aa   :  { %v1327_v53 = vpop.f32.mrf.mxu2 }
 0x3ab   :  { %1725 = vmatpush.bf16.msrb.mxu1 %v4895_v62  ;;  %v6004_v53 = vld [vmem:[%s9291_s3 + $0x394] sm:$0xf0]  ;;  %v4900_v62 = vld [vmem:[%s9291_s3 + $0x3d8] sm:$0xf0] }
 0x3ac   :  { %v4903_v36 = vor.u32 %v6010_v61, %v4900_v62  ;;  %v6031_v61 = vld [vmem:[%s9291_s3 + $0x46c] sm:$0x30]  ;;  %v5000_v62 = vld [vmem:[%s9291_s3 + $0x468] sm:$0xf] }
 0x3af   :  { %1726 = vmatpush.bf16.msrb.mxu1 %v4879_v12  ;;  %v4924_v12 = vld [vmem:[%s9288_s0 + $0x40] sm:$0xf] }
 0x3b0   :  { %1766 = vst [vmem:[#allocation1] ss:$4 sm:$0xff] %v4924_v12 }
 0x3b3   :  { %1727 = vmatpush.bf16.msrb.mxu1 %v4863_v28  ;;  %v6002_v28 = vld [vmem:[%s9291_s3 + $0x38c] sm:$0xf] }
 0x3b4   :  { %v4871_v7 = vor.u32 %v6002_v28, %v4868_v41  ;;  %v6027_v28 = vld [vmem:[%s9291_s3 + $0x44c] sm:$0xf0]  ;;  %v4984_v41 = vld [vmem:[%s9291_s3 + $0x448] sm:$0xf] }
 0x3b5   :  { %4837 = vmatmul.msk.bf16.vlgmr.msra.gmra.mxu1 %vm261_vm2, %v1383_v44  ;;  %1573 = vmatmul.f32.vlgmr.msrb.gmra.mxu2 %v1552_v54  ;;  %v4859_v44 = vor.u32 %v6003_v59, %v4858_v15  ;;  %v4867_v54 = vor.u32 %v6004_v53, %v4866_v13  ;;  %v6025_v59 = vld [vmem:[%s9291_s3 + $0x444] sm:$0xf]  ;;  %v4978_v13 = vld [vmem:[%s9291_s3 + $0x450] sm:$0xf0] }
 0x3b6   :  { %v6021_v53 = vld [vmem:[%s9291_s3 + $0x424] sm:$0xf] }
 0x3b7   :  { %1772 = vmatpush.msra.mxu1 %v7024_v29  ;;  %1714 = vmatpush.bf16.msrb.mxu3 %v4859_v44  ;;  %v1768_v5 = vld.sshfl [vmem:[#allocation1 + $0x8] sm:$0xff pattern:$0x73625140]  ;;  %v1767_v15 = vld.sshfl [vmem:[#allocation1] sm:$0xff pattern:$0x73625140]  ;;  %v4981_v44 = vor.u32 %v6025_v59, %v4978_v13 }
 0x3b8   :  { %1740 = vmatpush.bf16.msra.mxu0 %v4867_v54  ;;  %v4962_v54 = vld [vmem:[%s9291_s3 + $0x430] sm:$0xf0] }
 0x3b9   :  { %1773 = vmatpush.msra.mxu1 %v7039_v32  ;;  %v4965_v55 = vor.u32 %v6021_v53, %v4962_v54 }
 0x3bb   :  { %1774 = vmatpush.msra.mxu1 %v7048_v35  ;;  %1750 = vmatpush.bf16.msra.mxu3 %v1705_v60  ;;  %v4949_v60 = vor.u32 %v6017_v1, %v4946_v27 }
 0x3bd   :  { %1775 = vmatpush.msra.mxu1 %v7063_v9  ;;  %4925 = vmatmul.msk.f32.vlgmr.msra.gmra.mxu2 %vm56_vm0, %v1768_v5  ;;  %v4960_v5 = vld [vmem:[%s9291_s3 + $0x420] sm:$0xf] }
 0x3bf   :  { %1776 = vmatpush.msra.mxu1 %v7072_v43  ;;  %1751 = vmatpush.bf16.msra.mxu3 %v4903_v36  ;;  %v6032_v36 = vld [vmem:[%s9291_s3 + $0x474] sm:$0x30] }
 0x3c1   :  { %1777 = vmatpush.msra.mxu1 %v7087_v45 }
 0x3c3   :  { %1778 = vmatpush.msra.mxu1 %v7096_v16 }
 0x3c5   :  { %1779 = vmatpush.msra.mxu1 %v7108_v17 }
 0x3c7   :  { %1780 = vmatpush.msra.mxu1 %v7115_v52 }
 0x3c9   :  { %1781 = vmatpush.msra.mxu1 %v7127_v23 }
 0x3cb   :  { %1782 = vmatpush.msra.mxu1 %v7139_v56 }
 0x3cd   :  { %1783 = vmatpush.msra.mxu1 %v7156_v6 }
 0x3cf   :  { %1784 = vmatpush.msra.mxu1 %v7167_v48 }
 0x3d1   :  { %1785 = vmatpush.msra.mxu1 %v7173_v18 }
 0x3d3   :  { %1786 = vmatpush.msra.mxu1 %v7182_v24 }
 0x3d5   :  { %1787 = vmatpush.msra.mxu1 %v7188_v26 }
 0x40c   :  { %v1594_v51 = vpop.f32.mrf.mxu0 }
 0x422   :  { %v1501_v49 = vpop.f32.mrf.mxu1 }
 0x423   :  { %v7591_v3 = vadd.f32 %v1501_v49, %v7480_v50  ;;  %v4887_v50 = vor.u32 %v6006_v20, %v4884_v0  ;;  %v4992_v49 = vld [vmem:[%s9291_s3 + $0x460] sm:$0xf]  ;;  %v5001_v20 = vor.u32 %v6032_v36, %v5000_v62  ;;  %v6045_v62 = vld [vmem:[%s9291_s3 + $0x4e4] sm:$0xf]  ;;  %v5080_v36 = vld [vmem:[%s9291_s3 + $0x4f0] sm:$0x30] }
 0x424   :  { %v4993_v12 = vor.u32 %v6031_v61, %v4992_v49 }
 0x425   :  { %1752 = vmatpush.bf16.msra.mxu3 %v4887_v50  ;;  %v1917_v50 = vsel %vm265_vm1, %v5001_v20, 0 }
 0x426   :  { %v1911_v0 = vsel %vm265_vm1, %v4993_v12, 0  ;;  %1952 = vmatpush.bf16.msrb.mxu2 %v1917_v50  ;;  %v5083_v12 = vor.u32 %v6045_v62, %v5080_v36  ;;  %v6037_v50 = vld [vmem:[%s9291_s3 + $0x4a4] sm:$0xf]  ;;  %v7912_v62 = vld [vmem:[%s9289_s1 + $0x38] sm:$0xff] }
 0x427   :  { %1926 = vmatpush.bf16.msrb.mxu0 %v1911_v0 }
 0x428   :  { %v1514_v25 = vpop.f32.mrf.mxu2  ;;  %v2129_v20 = vsel %vm265_vm1, %v5083_v12, 0  ;;  %v5096_v12 = vld [vmem:[%s9288_s0 + $0xc] sm:$0xf] }
 0x429   :  { %v7612_v2 = vadd.f32 %v1514_v25, %v7468_v39  ;;  %v1527_v4 = vpop.f32.mrf.mxu3  ;;  %1753 = vmatpush.bf16.msra.mxu3 %v4871_v7  ;;  %v4976_v25 = vld [vmem:[%s9291_s3 + $0x440] sm:$0xf]  ;;  %v6023_v7 = vld [vmem:[%s9291_s3 + $0x42c] sm:$0xf0] }
 0x42a   :  { %v7616_v30 = vadd.f32 %v1527_v4, %v7475_v40  ;;  %v1503_v31 = vpop.f32.mrf.mxu1  ;;  %v4977_v4 = vor.u32 %v6027_v28, %v4976_v25  ;;  %v5048_v25 = vld [vmem:[%s9291_s3 + $0x4b0] sm:$0xf0] }
 0x42b   :  { %v5051_v28 = vor.u32 %v6037_v50, %v5048_v25  ;;  %v6034_v25 = vld [vmem:[%s9291_s3 + $0x48c] sm:$0xf] }
 0x42c   :  { %1927 = vmatpush.bf16.msrb.mxu0 %v4977_v4  ;;  %v5032_v4 = vld [vmem:[%s9291_s3 + $0x490] sm:$0xf0] }
 0x430   :  { %v1516_v39 = vpop.f32.mrf.mxu2 }
 0x431   :  { %v1529_v33 = vpop.f32.mrf.mxu3  ;;  %v4961_v39 = vor.u32 %v6023_v7, %v4960_v5  ;;  %v6047_v5 = vld [vmem:[%s9291_s3 + $0x4ec] sm:$0x30]  ;;  %v5086_v7 = vld [vmem:[%s9291_s3 + $0x4e8] sm:$0xf] }
 0x432   :  { %v7623_v34 = vpop.f32.mrf.mxu1 }
 0x433   :  { %1928 = vmatpush.bf16.msrb.mxu0 %v4961_v39 }
 0x438   :  { %v1574_v40 = vpop.f32.mrf.mxu2 }
 0x439   :  { %v1575_v11 = vadd.f32 %v7353_v63, %v1574_v40  ;;  %v4944_v40 = vld [vmem:[%s9291_s3 + $0x400] sm:$0xf] }
 0x43a   :  { %v1542_v10 = vpop.f32.mrf.mxu1 }
 0x43b   :  { %v1595_v14 = vadd.f32 %v1594_v51, %v1575_v11  ;;  %v6019_v51 = vld [vmem:[%s9291_s3 + $0x40c] sm:$0xf0]  ;;  %v6030_v11 = vld [vmem:[%s9291_s3 + $0x46c] sm:$0xf]  ;;  %v5002_v10 = vld [vmem:[%s9291_s3 + $0x478] sm:$0x30] }
 0x43c   :  { %v4945_v38 = vor.u32 %v6019_v51, %v4944_v40  ;;  %v7812_v51 = vld [vmem:[%s9289_s1 + $0x78] sm:$0xff] }
 0x43d   :  { %v1597_v46 = vmax.f32 %v1595_v14, 0.0  ;;  %v5005_v14 = vor.u32 %v6030_v11, %v5002_v10  ;;  %v6044_v11 = vld [vmem:[%s9291_s3 + $0x4d4] sm:$0xf0]  ;;  %v7830_v10 = vld [vmem:[%s9289_s1 + $0x70] sm:$0xff] }
 0x43e   :  { %1929 = vmatpush.bf16.msrb.mxu0 %v4945_v38  ;;  %v6043_v38 = vld [vmem:[%s9291_s3 + $0x4cc] sm:$0xf0] }
 0x43f   :  { %v1598_v47 = vpack.c.bf16 %v1597_v46, %v1597_v46 }
 0x441   :  { %4920 = vmatmul.msk.bf16.vlgmr.msrb.gmra.mxu3 %vm261_vm2, %v1598_v47  ;;  %4921 = vmatmul.msk.bf16.vlgmr.msrb.gmra.mxu1 %vm261_vm2, %v1598_v47 }
 0x442   :  { %4922 = vmatmul.msk.bf16.vlgmr.msra.gmra.mxu0 %vm261_vm2, %v1598_v47  ;;  %1939 = vmatpush.bf16.msrb.mxu3 %v1914_v21 }
 0x443   :  { %2021 = vmatpush.msrb.mxu1 %v7203_v8 }
 0x445   :  { %2022 = vmatpush.msrb.mxu1 %v7209_v57 }
 0x446   :  { %1940 = vmatpush.bf16.msrb.mxu3 %v4981_v44 }
 0x44a   :  { %1941 = vmatpush.bf16.msrb.mxu3 %v4965_v55 }
 0x44e   :  { %1942 = vmatpush.bf16.msrb.mxu3 %v4949_v60 }
 0x451   :  { %4923 = vmatmul.msk.bf16.vlgmr.msra.gmra.mxu3 %vm261_vm2, %v1598_v47  ;;  %1788 = vmatmul.f32.vlgmr.msra.gmra.mxu1 %v1767_v15  ;;  %v4970_v47 = vld [vmem:[%s9291_s3 + $0x438] sm:$0xf0]  ;;  %v6018_v15 = vld [vmem:[%s9291_s3 + $0x40c] sm:$0xf] }
 0x452   :  { %1987 = vmatpush.msra.mxu3 %v7024_v29  ;;  %v6028_v29 = vld [vmem:[%s9291_s3 + $0x454] sm:$0xf0] }
 0x453   :  { %v4985_v31 = vor.u32 %v6028_v29, %v4984_v41  ;;  %v6033_v41 = vld [vmem:[%s9291_s3 + $0x484] sm:$0xf]  ;;  %v5078_v29 = vld [vmem:[%s9291_s3 + $0x4e0] sm:$0xf] }
 0x454   :  { %1988 = vmatpush.msra.mxu3 %v7039_v32  ;;  %v4968_v32 = vld [vmem:[%s9291_s3 + $0x428] sm:$0xf]  ;;  %v5079_v39 = vor.u32 %v6047_v5, %v5078_v29  ;;  %v1117_v5 = vadd.f32 %v7342_v58, %v7195_v37 }
 0x455   :  { %1953 = vmatpush.bf16.msrb.mxu2 %v4985_v31  ;;  %v5035_v31 = vor.u32 %v6033_v41, %v5032_v4  ;;  %v7947_v4 = vld [vmem:[%s9289_s1 + $0x20] sm:$0xff]  ;;  %v7973_v58 = vld [vmem:[%s9289_s1 + $0x8] sm:$0xff] }
 0x456   :  { %1989 = vmatpush.msra.mxu3 %v7048_v35  ;;  %v6024_v35 = vld [vmem:[%s9291_s3 + $0x434] sm:$0xf0] }
 0x457   :  { %v4969_v33 = vor.u32 %v6024_v35, %v4968_v32  ;;  %v6048_v32 = vld [vmem:[%s9291_s3 + $0x4f4] sm:$0x30] }
 0x458   :  { %1990 = vmatpush.msra.mxu3 %v7063_v9  ;;  %v4952_v9 = vld [vmem:[%s9291_s3 + $0x408] sm:$0xf]  ;;  %v5087_v35 = vor.u32 %v6048_v32, %v5086_v7  ;;  %v7958_v7 = vld [vmem:[%s9289_s1 + $0x18] sm:$0xff] }
 0x459   :  { %1954 = vmatpush.bf16.msrb.mxu2 %v4969_v33  ;;  %v2126_v33 = vsel %vm265_vm1, %v5079_v39, 0 }
 0x45a   :  { %1991 = vmatpush.msra.mxu3 %v7072_v43  ;;  %v6020_v43 = vld [vmem:[%s9291_s3 + $0x414] sm:$0xf0]  ;;  %v2132_v40 = vsel %vm265_vm1, %v5087_v35, 0  ;;  %v1332_v35 = vadd.f32 %v7486_v19, %v1117_v5 }
 0x45b   :  { %v4953_v42 = vor.u32 %v6020_v43, %v4952_v9  ;;  %v5062_v9 = vld [vmem:[%s9291_s3 + $0x4c0] sm:$0xf]  ;;  %2167 = vmatpush.bf16.msra.mxu1 %v2132_v40 }
 0x45c   :  { %1992 = vmatpush.msra.mxu3 %v7087_v45  ;;  %v1920_v45 = vsel %vm265_vm1, %v5005_v14, 0  ;;  %v5063_v43 = vor.u32 %v6043_v38, %v5062_v9  ;;  %v1547_v37 = vadd.f32 %v7623_v34, %v1332_v35  ;;  %v7980_v9 = vld [vmem:[%s9289_s1] sm:$0xff] }
 0x45d   :  { %1955 = vmatpush.bf16.msrb.mxu2 %v4953_v42  ;;  %1965 = vmatpush.bf16.msra.mxu0 %v1920_v45  ;;  %v5070_v42 = vld [vmem:[%s9291_s3 + $0x4c8] sm:$0xf]  ;;  %v5132_v35 = vld [vmem:[%s9291_s3 + $0x520] sm:$0xf] }
 0x45e   :  { %1993 = vmatpush.msra.mxu3 %v7096_v16  ;;  %v6026_v16 = vld [vmem:[%s9291_s3 + $0x44c] sm:$0xf]  ;;  %v5071_v14 = vor.u32 %v6044_v11, %v5070_v42  ;;  %v6061_v11 = vld [vmem:[%s9291_s3 + $0x564] sm:$0xf] }
 0x45f   :  { %v4989_v46 = vor.u32 %v6026_v16, %v4986_v22  ;;  %v7836_v45 = vld [vmem:[%s9289_s1 + $0x68] sm:$0xff]  ;;  %v5046_v16 = vld [vmem:[%s9291_s3 + $0x4a0] sm:$0xf]  ;;  %v6039_v22 = vld [vmem:[%s9291_s3 + $0x4ac] sm:$0xf0] }
 0x460   :  { %1994 = vmatpush.msra.mxu3 %v7108_v17  ;;  %v6022_v17 = vld [vmem:[%s9291_s3 + $0x42c] sm:$0xf]  ;;  %2168 = vmatpush.bf16.msra.mxu1 %v5071_v14 }
 0x461   :  { %1966 = vmatpush.bf16.msra.mxu0 %v4989_v46  ;;  %2141 = vmatpush.bf16.msra.mxu2 %v2126_v33  ;;  %v5054_v46 = vld [vmem:[%s9291_s3 + $0x4a8] sm:$0xf] }
 0x462   :  { %1995 = vmatpush.msra.mxu3 %v7115_v52  ;;  %v4973_v52 = vor.u32 %v6022_v17, %v4970_v47  ;;  %v7851_v17 = vld [vmem:[%s9289_s1 + $0x60] sm:$0xff]  ;;  %v5047_v47 = vor.u32 %v6039_v22, %v5046_v16 }
 0x464   :  { %1996 = vmatpush.msra.mxu3 %v7127_v23  ;;  %v4954_v23 = vld [vmem:[%s9291_s3 + $0x418] sm:$0xf0] }
 0x465   :  { %1967 = vmatpush.bf16.msra.mxu0 %v4973_v52  ;;  %v4957_v53 = vor.u32 %v6018_v15, %v4954_v23  ;;  %2142 = vmatpush.bf16.msra.mxu2 %v5063_v43  ;;  %v6040_v52 = vld [vmem:[%s9291_s3 + $0x4b4] sm:$0xf0]  ;;  %v5030_v23 = vld [vmem:[%s9291_s3 + $0x480] sm:$0xf] }
 0x466   :  { %1997 = vmatpush.msra.mxu3 %v7139_v56  ;;  %v5010_v56 = vld [vmem:[%s9288_s0 + $0x4] sm:$0xf]  ;;  %v7860_v15 = vld [vmem:[%s9289_s1 + $0x58] sm:$0xff] }
 0x467   :  { %1981 = vst [vmem:[#allocation1] ss:$4 sm:$0xff] %v5010_v56  ;;  %v5038_v56 = vld [vmem:[%s9291_s3 + $0x488] sm:$0xf] }
 0x468   :  { %1998 = vmatpush.msra.mxu3 %v7156_v6 }
 0x469   :  { %1968 = vmatpush.bf16.msra.mxu0 %v4957_v53  ;;  %2143 = vmatpush.bf16.msra.mxu2 %v5047_v47  ;;  %v7875_v53 = vld [vmem:[%s9289_s1 + $0x50] sm:$0xff] }
 0x46a   :  { %1999 = vmatpush.msra.mxu3 %v7167_v48  ;;  %v1809_v48 = vpop.f32.mrf.mxu2 }
 0x46c   :  { %2000 = vmatpush.msra.mxu3 %v7173_v18 }
 0x46e   :  { %2001 = vmatpush.msra.mxu3 %v7182_v24 }
 0x470   :  { %2002 = vmatpush.msra.mxu3 %v7188_v26  ;;  %v1982_v26 = vld.sshfl [vmem:[#allocation1] sm:$0xff pattern:$0x73625140] }
 0x4be   :  { %v1729_v21 = vpop.f32.mrf.mxu1 }
 0x4bf   :  { %v7744_v59 = vadd.f32 %v1729_v21, %v7612_v2  ;;  %v1742_v13 = vpop.f32.mrf.mxu0  ;;  %v5055_v21 = vor.u32 %v6040_v52, %v5054_v46 }
 0x4c0   :  { %v7751_v44 = vadd.f32 %v1742_v13, %v7616_v30  ;;  %v1983_v30 = vld.sshfl [vmem:[#allocation1 + $0x8] sm:$0xff pattern:$0x73625140]  ;;  %v6035_v13 = vld [vmem:[%s9291_s3 + $0x48c] sm:$0xf0] }
 0x4c1   :  { %5011 = vmatmul.msk.f32.vlgmr.msrb.gmra.mxu1 %vm56_vm0, %v1983_v30  ;;  %v7884_v30 = vld [vmem:[%s9289_s1 + $0x48] sm:$0xff]  ;;  %2196 = vst [vmem:[#allocation1] ss:$4 sm:$0xff] %v5096_v12  ;;  %v6064_v12 = vld [vmem:[%s9291_s3 + $0x574] sm:$0x30] }
 0x4c2   :  { %2169 = vmatpush.bf16.msra.mxu1 %v5055_v21 }
 0x4c4   :  { %v1716_v54 = vpop.f32.mrf.mxu3 }
 0x4c5   :  { %v7756_v2 = vadd.f32 %v1716_v54, %v7591_v3  ;;  %v5031_v54 = vor.u32 %v6035_v13, %v5030_v23  ;;  %v7999_v23 = vld [vmem:[%s9289_s1 + $0x88] sm:$0xff] }
 0x4c6   :  { %v1731_v6 = vpop.f32.mrf.mxu1 }
 0x4c7   :  { %v1744_v55 = vpop.f32.mrf.mxu0  ;;  %v6036_v6 = vld [vmem:[%s9291_s3 + $0x494] sm:$0xf0]  ;;  %2144 = vmatpush.bf16.msra.mxu2 %v5031_v54  ;;  %v5150_v54 = vld [vmem:[%s9291_s3 + $0x550] sm:$0xf0] }
 0x4c8   :  { %v5039_v55 = vor.u32 %v6036_v6, %v5038_v56  ;;  %v2198_v32 = vld.sshfl [vmem:[#allocation1 + $0x8] sm:$0xff pattern:$0x73625140]  ;;  %v2197_v13 = vld.sshfl [vmem:[#allocation1] sm:$0xff pattern:$0x73625140] }
 0x4c9   :  { %v6057_v56 = vld [vmem:[%s9291_s3 + $0x544] sm:$0xf] }
 0x4ca   :  { %2170 = vmatpush.bf16.msra.mxu1 %v5039_v55  ;;  %v5153_v6 = vor.u32 %v6057_v56, %v5150_v54  ;;  %v6053_v55 = vld [vmem:[%s9291_s3 + $0x524] sm:$0xf]  ;;  %v6054_v54 = vld [vmem:[%s9291_s3 + $0x52c] sm:$0xf] }
 0x4cc   :  { %v1718_v1 = vpop.f32.mrf.mxu3 }
 0x4cd   :  { %v6046_v1 = vld [vmem:[%s9291_s3 + $0x4ec] sm:$0xf] }
 0x4ce   :  { %v1789_v27 = vpop.f32.mrf.mxu1 }
 0x4cf   :  { %v1790_v49 = vadd.f32 %v7353_v63, %v1789_v27  ;;  %v5088_v27 = vld [vmem:[%s9291_s3 + $0x4f8] sm:$0x30] }
 0x4d1   :  { %v1810_v18 = vadd.f32 %v1809_v48, %v1790_v49  ;;  %v5091_v48 = vor.u32 %v6046_v1, %v5088_v27  ;;  %v7896_v49 = vld [vmem:[%s9289_s1 + $0x40] sm:$0xff]  ;;  %v5134_v1 = vld [vmem:[%s9291_s3 + $0x530] sm:$0xf0] }
 0x4d2   :  { %v5137_v27 = vor.u32 %v6053_v55, %v5134_v1 }
 0x4d3   :  { %v1812_v60 = vmax.f32 %v1810_v18, 0.0 }
 0x4d4   :  { %v7762_v61 = vpop.f32.mrf.mxu3 }
 0x4d5   :  { %v1813_v3 = vpack.c.bf16 %v1812_v60, %v1812_v60  ;;  %v2135_v60 = vsel %vm265_vm1, %v5091_v48, 0  ;;  %v1762_v19 = vadd.f32 %v7762_v61, %v1547_v37  ;;  %v5166_v61 = vld [vmem:[%s9291_s3 + $0x570] sm:$0x30]  ;;  %v6049_v48 = vld [vmem:[%s9291_s3 + $0x504] sm:$0xf] }
 0x4d6   :  { %v5169_v46 = vor.u32 %v6061_v11, %v5166_v61  ;;  %v6055_v37 = vld [vmem:[%s9291_s3 + $0x52c] sm:$0xf0]  ;;  %v5124_v11 = vld [vmem:[%s9291_s3 + $0x508] sm:$0xf] }
 0x4d7   :  { %5006 = vmatmul.msk.bf16.vlgmr.msrb.gmra.mxu0 %vm261_vm2, %v1813_v3  ;;  %5007 = vmatmul.msk.bf16.vlgmr.msrb.gmra.mxu3 %vm261_vm2, %v1813_v3 }
 0x4d8   :  { %5008 = vmatmul.msk.bf16.vlgmr.msrb.gmra.mxu2 %vm261_vm2, %v1813_v3  ;;  %2236 = vmatpush.msrb.mxu3 %v7203_v8  ;;  %v6041_v8 = vld [vmem:[%s9291_s3 + $0x4c4] sm:$0xf]  ;;  %v2344_v21 = vsel %vm265_vm1, %v5169_v46, 0  ;;  %v5174_v46 = vld [vmem:[%s9291_s3 + $0x578] sm:$0x30] }
 0x4d9   :  { %2154 = vmatpush.bf16.msrb.mxu0 %v2129_v20  ;;  %2180 = vmatpush.bf16.msrb.mxu2 %v2135_v60  ;;  %v6038_v20 = vld [vmem:[%s9291_s3 + $0x4ac] sm:$0xf]  ;;  %v5164_v60 = vld [vmem:[%s9291_s3 + $0x560] sm:$0xf] }
 0x4da   :  { %2237 = vmatpush.msrb.mxu3 %v7209_v57  ;;  %v5064_v57 = vld [vmem:[%s9291_s3 + $0x4d0] sm:$0xf0] }
 0x4db   :  { %v5067_v0 = vor.u32 %v6041_v8, %v5064_v57  ;;  %v7927_v8 = vld [vmem:[%s9289_s1 + $0x30] sm:$0xff]  ;;  %v7933_v57 = vld [vmem:[%s9289_s1 + $0x28] sm:$0xff] }
 0x4dc   :  { %v1757_v24 = vpop.f32.mrf.mxu3 }
 0x4dd   :  { %2155 = vmatpush.bf16.msrb.mxu0 %v5067_v0  ;;  %v5072_v24 = vld [vmem:[%s9291_s3 + $0x4d8] sm:$0xf0] }
 0x4e1   :  { %2156 = vmatpush.bf16.msrb.mxu0 %v5051_v28  ;;  %v5040_v28 = vld [vmem:[%s9291_s3 + $0x498] sm:$0xf0] }
 0x4e2   :  { %v5043_v39 = vor.u32 %v6034_v25, %v5040_v28  ;;  %v5148_v28 = vld [vmem:[%s9291_s3 + $0x540] sm:$0xf] }
 0x4e5   :  { %2157 = vmatpush.bf16.msrb.mxu0 %v5035_v31 }
 0x4e7   :  { %5009 = vmatmul.msk.bf16.vlgmr.msra.gmra.mxu0 %vm261_vm2, %v1813_v3  ;;  %2003 = vmatmul.f32.vlgmr.msra.gmra.mxu3 %v1982_v26  ;;  %v6042_v3 = vld [vmem:[%s9291_s3 + $0x4cc] sm:$0xf] }
 0x4e8   :  { %v5075_v36 = vor.u32 %v6042_v3, %v5072_v24  ;;  %v6063_v24 = vld [vmem:[%s9291_s3 + $0x56c] sm:$0x30] }
 0x4e9   :  { %2202 = vmatpush.msra.mxu0 %v7812_v51 }
 0x4ea   :  { %2181 = vmatpush.bf16.msrb.mxu2 %v5075_v36  ;;  %v5172_v36 = vld [vmem:[%s9291_s3 + $0x568] sm:$0xf] }
 0x4eb   :  { %2203 = vmatpush.msra.mxu0 %v7830_v10 }
 0x4ed   :  { %2204 = vmatpush.msra.mxu0 %v7836_v45 }
 0x4ef   :  { %2205 = vmatpush.msra.mxu0 %v7851_v17  ;;  %5097 = vmatmul.msk.f32.vlgmr.msrb.gmra.mxu3 %vm56_vm0, %v2198_v32  ;;  %v6060_v32 = vld [vmem:[%s9291_s3 + $0x554] sm:$0xf0] }
 0x4f1   :  { %2206 = vmatpush.msra.mxu0 %v7860_v15 }
 0x4f3   :  { %2207 = vmatpush.msra.mxu0 %v7875_v53 }
 0x4f5   :  { %2208 = vmatpush.msra.mxu0 %v7884_v30 }
 0x4f7   :  { %2209 = vmatpush.msra.mxu0 %v7896_v49 }
 0x4f9   :  { %2210 = vmatpush.msra.mxu0 %v7912_v62 }
 0x4fb   :  { %2211 = vmatpush.msra.mxu0 %v7927_v8 }
 0x4fd   :  { %2212 = vmatpush.msra.mxu0 %v7933_v57 }
 0x4ff   :  { %2213 = vmatpush.msra.mxu0 %v7947_v4 }
 0x501   :  { %2214 = vmatpush.msra.mxu0 %v7958_v7 }
 0x53e   :  { %v2024_v42 = vpop.f32.mrf.mxu1 }
 0x554   :  { %v1931_v18 = vpop.f32.mrf.mxu0 }
 0x555   :  { %v7907_v26 = vadd.f32 %v1931_v18, %v7756_v2  ;;  %v5056_v2 = vld [vmem:[%s9291_s3 + $0x4b8] sm:$0xf0]  ;;  %v5118_v18 = vld [vmem:[%s9291_s3 + $0x510] sm:$0xf0] }
 0x556   :  { %v5059_v0 = vor.u32 %v6038_v20, %v5056_v2  ;;  %v5121_v3 = vor.u32 %v6049_v48, %v5118_v18  ;;  %v5165_v20 = vor.u32 %v6063_v24, %v5164_v60  ;;  %v5173_v2 = vor.u32 %v6064_v12, %v5172_v36  ;;  %v6050_v48 = vld [vmem:[%s9291_s3 + $0x50c] sm:$0xf]  ;;  %v5126_v18 = vld [vmem:[%s9291_s3 + $0x518] sm:$0xf0] }
 0x557   :  { %v5129_v24 = vor.u32 %v6050_v48, %v5126_v18  ;;  %v6075_v48 = vld [vmem:[%s9291_s3 + $0x5cc] sm:$0xf0] }
 0x558   :  { %2182 = vmatpush.bf16.msrb.mxu2 %v5059_v0  ;;  %v2341_v0 = vsel %vm265_vm1, %v5165_v20, 0  ;;  %v2347_v25 = vsel %vm265_vm1, %v5173_v2, 0 }
 0x559   :  { %2356 = vmatpush.bf16.msrb.mxu1 %v2341_v0  ;;  %2382 = vmatpush.bf16.msra.mxu3 %v2347_v25 }
 0x55a   :  { %v7936_v50 = vpop.f32.mrf.mxu3 }
 0x55b   :  { %v1957_v41 = vpop.f32.mrf.mxu2  ;;  %v1975_v55 = vadd.f32 %v7936_v50, %v7744_v59  ;;  %v5182_v59 = vld [vmem:[%s9288_s0 + $0x14] sm:$0xf] }
 0x55c   :  { %v7951_v29 = vadd.f32 %v1957_v41, %v7751_v44  ;;  %v1933_v31 = vpop.f32.mrf.mxu0  ;;  %v7966_v44 = vld [vmem:[%s9289_s1 + $0x10] sm:$0xff]  ;;  %2183 = vmatpush.bf16.msrb.mxu2 %v5043_v39  ;;  %2411 = vst [vmem:[#allocation1] ss:$4 sm:$0xff] %v5182_v59  ;;  %v6076_v59 = vld [vmem:[%s9291_s3 + $0x5d4] sm:$0xf0] }
 0x55d   :  { %2215 = vmatpush.msra.mxu0 %v7966_v44  ;;  %v6059_v41 = vld [vmem:[%s9291_s3 + $0x54c] sm:$0xf0]  ;;  %v5156_v31 = vld [vmem:[%s9291_s3 + $0x548] sm:$0xf] }
 0x55e   :  { %v5149_v5 = vor.u32 %v6059_v41, %v5148_v28  ;;  %v5157_v39 = vor.u32 %v6060_v32, %v5156_v31  ;;  %v8135_v41 = vld [vmem:[%s9290_s2] ss:$0 sm:$0xff] }
 0x55f   :  { %2216 = vmatpush.msra.mxu0 %v7973_v58 }
 0x560   :  { %2357 = vmatpush.bf16.msrb.mxu1 %v5149_v5  ;;  %2383 = vmatpush.bf16.msra.mxu3 %v5157_v39 }
 0x561   :  { %2217 = vmatpush.msra.mxu0 %v7980_v9 }
 0x562   :  { %v1946_v33 = vpop.f32.mrf.mxu3 }
 0x563   :  { %v1959_v40 = vpop.f32.mrf.mxu2  ;;  %v5140_v33 = vld [vmem:[%s9291_s3 + $0x528] sm:$0xf] }
 0x564   :  { %v1970_v34 = vpop.f32.mrf.mxu0  ;;  %v6056_v40 = vld [vmem:[%s9291_s3 + $0x534] sm:$0xf0] }
 0x565   :  { %v7983_v38 = vadd.f32 %v1970_v34, %v1762_v19  ;;  %v5133_v19 = vor.u32 %v6055_v37, %v5132_v35  ;;  %v5141_v34 = vor.u32 %v6056_v40, %v5140_v33  ;;  %v2412_v33 = vld.sshfl [vmem:[#allocation1] sm:$0xff pattern:$0x73625140] }
 0x567   :  { %2358 = vmatpush.bf16.msrb.mxu1 %v5133_v19  ;;  %2384 = vmatpush.bf16.msra.mxu3 %v5141_v34  ;;  %v5252_v19 = vld [vmem:[%s9291_s3 + $0x5f0] sm:$0x30] }
 0x56a   :  { %v2004_v43 = vpop.f32.mrf.mxu3 }
 0x56b   :  { %v2005_v14 = vadd.f32 %v7353_v63, %v2004_v43  ;;  %v8005_v63 = vld [vmem:[%s9289_s1 + $0x80] sm:$0xff] }
 0x56c   :  { %v1972_v16 = vpop.f32.mrf.mxu0  ;;  %v5116_v43 = vld [vmem:[%s9291_s3 + $0x500] sm:$0xf] }
 0x56d   :  { %v2025_v22 = vadd.f32 %v2024_v42, %v2005_v14  ;;  %v6051_v42 = vld [vmem:[%s9291_s3 + $0x50c] sm:$0xf0]  ;;  %v6052_v14 = vld [vmem:[%s9291_s3 + $0x514] sm:$0xf0] }
 0x56e   :  { %v5117_v61 = vor.u32 %v6051_v42, %v5116_v43  ;;  %v5125_v16 = vor.u32 %v6052_v14, %v5124_v11  ;;  %v6073_v43 = vld [vmem:[%s9291_s3 + $0x5c4] sm:$0xf]  ;;  %v5236_v42 = vld [vmem:[%s9291_s3 + $0x5d0] sm:$0xf0] }
 0x56f   :  { %v2027_v47 = vmax.f32 %v2025_v22, 0.0  ;;  %v6062_v22 = vld [vmem:[%s9291_s3 + $0x56c] sm:$0xf]  ;;  %v5239_v11 = vor.u32 %v6073_v43, %v5236_v42  ;;  %v5220_v14 = vld [vmem:[%s9291_s3 + $0x5b0] sm:$0xf0] }
 0x570   :  { %2359 = vmatpush.bf16.msrb.mxu1 %v5117_v61  ;;  %2385 = vmatpush.bf16.msra.mxu3 %v5125_v16  ;;  %v6069_v61 = vld [vmem:[%s9291_s3 + $0x5a4] sm:$0xf]  ;;  %v5244_v43 = vld [vmem:[%s9291_s3 + $0x5d8] sm:$0xf0] }
 0x571   :  { %v2028_v52 = vpack.c.bf16 %v2027_v47, %v2027_v47  ;;  %v5177_v47 = vor.u32 %v6062_v22, %v5174_v46  ;;  %v5223_v16 = vor.u32 %v6069_v61, %v5220_v14  ;;  %v6065_v22 = vld [vmem:[%s9291_s3 + $0x584] sm:$0xf]  ;;  %v5204_v46 = vld [vmem:[%s9291_s3 + $0x590] sm:$0xf0]  ;;  %v5268_v61 = vld [vmem:[%s9288_s0 + $0x1c] sm:$0xf] }
 0x572   :  { %v2239_v28 = vpop.f32.mrf.mxu3  ;;  %v6070_v14 = vld [vmem:[%s9291_s3 + $0x5ac] sm:$0xf] }
 0x573   :  { %5092 = vmatmul.msk.bf16.vlgmr.msra.gmra.mxu2 %vm261_vm2, %v2028_v52  ;;  %5093 = vmatmul.msk.bf16.vlgmr.msrb.gmra.mxu0 %vm261_vm2, %v2028_v52 }
 0x574   :  { %5094 = vmatmul.msk.bf16.vlgmr.msra.gmra.mxu1 %vm261_vm2, %v2028_v52  ;;  %2369 = vmatpush.bf16.msra.mxu2 %v2344_v21  ;;  %v6058_v21 = vld [vmem:[%s9291_s3 + $0x54c] sm:$0xf] }
 0x575   :  { %2451 = vmatpush.msrb.mxu0 %v7999_v23 }
 0x577   :  { %2452 = vmatpush.msrb.mxu0 %v8005_v63 }
 0x578   :  { %2370 = vmatpush.bf16.msra.mxu2 %v5153_v6  ;;  %v5142_v6 = vld [vmem:[%s9291_s3 + $0x538] sm:$0xf0] }
 0x579   :  { %v5145_v1 = vor.u32 %v6054_v54, %v5142_v6 }
 0x57c   :  { %2371 = vmatpush.bf16.msra.mxu2 %v5137_v27 }
 0x580   :  { %2372 = vmatpush.bf16.msra.mxu2 %v5121_v3 }
 0x583   :  { %5095 = vmatmul.msk.bf16.vlgmr.msrb.gmra.mxu2 %vm261_vm2, %v2028_v52  ;;  %2218 = vmatmul.f32.vlgmr.msra.gmra.mxu0 %v2197_v13  ;;  %v2350_v52 = vsel %vm265_vm1, %v5177_v47, 0  ;;  %v5158_v13 = vld [vmem:[%s9291_s3 + $0x558] sm:$0xf0]  ;;  %v5250_v47 = vld [vmem:[%s9291_s3 + $0x5e0] sm:$0xf] }
 0x584   :  { %2417 = vmatpush.msrb.mxu2 %v7812_v51  ;;  %2395 = vmatpush.bf16.msra.mxu1 %v2350_v52  ;;  %v5161_v56 = vor.u32 %v6058_v21, %v5158_v13  ;;  %v5207_v52 = vor.u32 %v6065_v22, %v5204_v46  ;;  %v6079_v21 = vld [vmem:[%s9291_s3 + $0x5ec] sm:$0x30]  ;;  %v5258_v13 = vld [vmem:[%s9291_s3 + $0x5e8] sm:$0xf]  ;;  %v6066_v46 = vld [vmem:[%s9291_s3 + $0x58c] sm:$0xf] }
 0x585   :  { %v5251_v54 = vor.u32 %v6079_v21, %v5250_v47  ;;  %v5212_v47 = vld [vmem:[%s9291_s3 + $0x598] sm:$0xf0] }
 0x586   :  { %2418 = vmatpush.msrb.mxu2 %v7830_v10 }
 0x588   :  { %2419 = vmatpush.msrb.mxu2 %v7836_v45  ;;  %2396 = vmatpush.bf16.msra.mxu1 %v5161_v56  ;;  %v6080_v56 = vld [vmem:[%s9291_s3 + $0x5f4] sm:$0x30] }
 0x589   :  { %v5259_v6 = vor.u32 %v6080_v56, %v5258_v13 }
 0x58a   :  { %2420 = vmatpush.msrb.mxu2 %v7851_v17 }
 0x58c   :  { %2421 = vmatpush.msrb.mxu2 %v7860_v15  ;;  %2397 = vmatpush.bf16.msra.mxu1 %v5145_v1  ;;  %v2562_v1 = vsel %vm265_vm1, %v5259_v6, 0  ;;  %v5215_v6 = vor.u32 %v6066_v46, %v5212_v47  ;;  %v6092_v47 = vld [vmem:[%s9291_s3 + $0x654] sm:$0xf0] }
 0x58d   :  { %2597 = vmatpush.bf16.msra.mxu0 %v2562_v1 }
 0x58e   :  { %2422 = vmatpush.msrb.mxu2 %v7875_v53 }
 0x590   :  { %2423 = vmatpush.msrb.mxu2 %v7884_v30  ;;  %2398 = vmatpush.bf16.msra.mxu1 %v5129_v24 }
 0x592   :  { %2424 = vmatpush.msrb.mxu2 %v7896_v49 }
 0x594   :  { %2425 = vmatpush.msrb.mxu2 %v7912_v62 }
 0x596   :  { %2426 = vmatpush.msrb.mxu2 %v7927_v8 }
 0x598   :  { %2427 = vmatpush.msrb.mxu2 %v7933_v57 }
 0x59a   :  { %2428 = vmatpush.msrb.mxu2 %v7947_v4 }
 0x59c   :  { %2429 = vmatpush.msrb.mxu2 %v7958_v7 }
 0x59e   :  { %2430 = vmatpush.msrb.mxu2 %v7966_v44 }
 0x5a0   :  { %2431 = vmatpush.msrb.mxu2 %v7973_v58 }
 0x5a2   :  { %2432 = vmatpush.msrb.mxu2 %v7980_v9 }
 0x5f0   :  { %v2159_v27 = vpop.f32.mrf.mxu0 }
 0x5f1   :  { %v8115_v60 = vadd.f32 %v2159_v27, %v1975_v55  ;;  %v2172_v3 = vpop.f32.mrf.mxu1  ;;  %v2556_v55 = vsel %vm265_vm1, %v5251_v54, 0  ;;  %v5234_v27 = vld [vmem:[%s9291_s3 + $0x5c0] sm:$0xf] }
 0x5f2   :  { %v8122_v50 = vadd.f32 %v2172_v3, %v7951_v29  ;;  %v2413_v29 = vld.sshfl [vmem:[#allocation1 + $0x8] sm:$0xff pattern:$0x73625140]  ;;  %2571 = vmatpush.bf16.msrb.mxu3 %v2556_v55  ;;  %v5235_v18 = vor.u32 %v6075_v48, %v5234_v27 }
 0x5f3   :  { %5183 = vmatmul.msk.f32.vlgmr.msrb.gmra.mxu0 %vm56_vm0, %v2413_v29  ;;  %v5242_v3 = vld [vmem:[%s9291_s3 + $0x5c8] sm:$0xf]  ;;  %2626 = vst [vmem:[#allocation1] ss:$4 sm:$0xff] %v5268_v61 }
 0x5f4   :  { %v5243_v24 = vor.u32 %v6076_v59, %v5242_v3  ;;  %v5338_v3 = vld [vmem:[%s9291_s3 + $0x670] sm:$0x30] }
 0x5f6   :  { %v2146_v36 = vpop.f32.mrf.mxu2  ;;  %2572 = vmatpush.bf16.msrb.mxu3 %v5235_v18  ;;  %2598 = vmatpush.bf16.msra.mxu0 %v5243_v24  ;;  %v6093_v18 = vld [vmem:[%s9291_s3 + $0x664] sm:$0xf] }
 0x5f7   :  { %v8127_v12 = vadd.f32 %v2146_v36, %v7907_v26  ;;  %v5218_v36 = vld [vmem:[%s9291_s3 + $0x5a0] sm:$0xf] }
 0x5f8   :  { %v2161_v20 = vpop.f32.mrf.mxu0 }
 0x5f9   :  { %v2174_v2 = vpop.f32.mrf.mxu1  ;;  %v6071_v20 = vld [vmem:[%s9291_s3 + $0x5ac] sm:$0xf0] }
 0x5fa   :  { %v5226_v2 = vld [vmem:[%s9291_s3 + $0x5a8] sm:$0xf]  ;;  %v5219_v29 = vor.u32 %v6071_v20, %v5218_v36  ;;  %v5341_v20 = vor.u32 %v6093_v18, %v5338_v3 }
 0x5fb   :  { %v2628_v54 = vld.sshfl [vmem:[#allocation1 + $0x8] sm:$0xff pattern:$0x73625140] }
 0x5fc   :  { %2573 = vmatpush.bf16.msrb.mxu3 %v5219_v29  ;;  %v5296_v18 = vld [vmem:[%s9291_s3 + $0x608] sm:$0xf] }
 0x5fe   :  { %v2148_v0 = vpop.f32.mrf.mxu2 }
 0x5ff   :  { %v6072_v0 = vld [vmem:[%s9291_s3 + $0x5b4] sm:$0xf0] }
 0x600   :  { %v2219_v25 = vpop.f32.mrf.mxu0 }
 0x601   :  { %v2220_v26 = vadd.f32 %v8135_v41, %v2219_v25  ;;  %v5227_v25 = vor.u32 %v6072_v0, %v5226_v2  ;;  %v2627_v0 = vld.sshfl [vmem:[#allocation1] sm:$0xff pattern:$0x73625140] }
 0x603   :  { %v2240_v31 = vadd.f32 %v2239_v28, %v2220_v26  ;;  %2599 = vmatpush.bf16.msra.mxu0 %v5227_v25  ;;  %v5202_v28 = vld [vmem:[%s9291_s3 + $0x580] sm:$0xf]  ;;  %v6067_v26 = vld [vmem:[%s9291_s3 + $0x58c] sm:$0xf0]  ;;  %v6089_v25 = vld [vmem:[%s9291_s3 + $0x644] sm:$0xf] }
 0x605   :  { %v2242_v5 = vmax.f32 %v2240_v31, 0.0  ;;  %v5210_v31 = vld [vmem:[%s9291_s3 + $0x588] sm:$0xf] }
 0x606   :  { %v2185_v32 = vpop.f32.mrf.mxu2 }
 0x607   :  { %v2243_v39 = vpack.c.bf16 %v2242_v5, %v2242_v5  ;;  %v8139_v35 = vadd.f32 %v2185_v32, %v7983_v38  ;;  %v6077_v38 = vld [vmem:[%s9291_s3 + $0x5e4] sm:$0xf]  ;;  %v5203_v5 = vor.u32 %v6067_v26, %v5202_v28  ;;  %v6068_v32 = vld [vmem:[%s9291_s3 + $0x594] sm:$0xf0]  ;;  %v5322_v28 = vld [vmem:[%s9291_s3 + $0x650] sm:$0xf0] }
 0x608   :  { %v5255_v40 = vor.u32 %v6077_v38, %v5252_v19  ;;  %v5325_v26 = vor.u32 %v6089_v25, %v5322_v28  ;;  %v6086_v28 = vld [vmem:[%s9291_s3 + $0x62c] sm:$0xf] }
 0x609   :  { %5178 = vmatmul.msk.bf16.vlgmr.msrb.gmra.mxu1 %vm261_vm2, %v2243_v39  ;;  %5179 = vmatmul.msk.bf16.vlgmr.msra.gmra.mxu2 %vm261_vm2, %v2243_v39 }
 0x60a   :  { %5180 = vmatmul.msk.bf16.vlgmr.msra.gmra.mxu3 %vm261_vm2, %v2243_v39  ;;  %2666 = vmatpush.msra.mxu2 %v7999_v23  ;;  %v2559_v34 = vsel %vm265_vm1, %v5255_v40, 0 }
 0x60b   :  { %2584 = vmatpush.bf16.msrb.mxu1 %v2559_v34  ;;  %2574 = vmatpush.bf16.msrb.mxu3 %v5203_v5  ;;  %v6074_v34 = vld [vmem:[%s9291_s3 + $0x5cc] sm:$0xf]  ;;  %v5306_v5 = vld [vmem:[%s9291_s3 + $0x630] sm:$0xf0] }
 0x60c   :  { %2667 = vmatpush.msra.mxu2 %v8005_v63 }
 0x60e   :  { %v2187_v37 = vpop.f32.mrf.mxu2 }
 0x60f   :  { %2585 = vmatpush.bf16.msrb.mxu1 %v5239_v11  ;;  %v6078_v37 = vld [vmem:[%s9291_s3 + $0x5ec] sm:$0xf]  ;;  %v5247_v11 = vor.u32 %v6074_v34, %v5244_v43  ;;  %v6096_v34 = vld [vmem:[%s9291_s3 + $0x674] sm:$0x30] }
 0x613   :  { %2586 = vmatpush.bf16.msrb.mxu1 %v5223_v16  ;;  %v5228_v16 = vld [vmem:[%s9291_s3 + $0x5b8] sm:$0xf0] }
 0x617   :  { %2587 = vmatpush.bf16.msrb.mxu1 %v5207_v52 }
 0x619   :  { %5181 = vmatmul.msk.bf16.vlgmr.msra.gmra.mxu1 %vm261_vm2, %v2243_v39  ;;  %2433 = vmatmul.f32.vlgmr.msrb.gmra.mxu2 %v2412_v33  ;;  %v5211_v39 = vor.u32 %v6068_v32, %v5210_v31  ;;  %v5260_v33 = vld [vmem:[%s9291_s3 + $0x5f8] sm:$0x30]  ;;  %v6085_v31 = vld [vmem:[%s9291_s3 + $0x624] sm:$0xf] }
 0x61a   :  { %v5263_v38 = vor.u32 %v6078_v37, %v5260_v33  ;;  %v5309_v32 = vor.u32 %v6085_v31, %v5306_v5  ;;  %v5290_v37 = vld [vmem:[%s9291_s3 + $0x610] sm:$0xf0]  ;;  %v5336_v33 = vld [vmem:[%s9291_s3 + $0x660] sm:$0xf] }
 0x61b   :  { %2632 = vmatpush.msra.mxu1 %v7812_v51  ;;  %2600 = vmatpush.bf16.msra.mxu0 %v5211_v39  ;;  %v6081_v39 = vld [vmem:[%s9291_s3 + $0x604] sm:$0xf] }
 0x61c   :  { %v2565_v40 = vsel %vm265_vm1, %v5263_v38, 0  ;;  %v5293_v38 = vor.u32 %v6081_v39, %v5290_v37  ;;  %v5298_v39 = vld [vmem:[%s9291_s3 + $0x618] sm:$0xf0] }
 0x61d   :  { %2633 = vmatpush.msra.mxu1 %v7830_v10  ;;  %2610 = vmatpush.bf16.msra.mxu3 %v2565_v40  ;;  %v5344_v40 = vld [vmem:[%s9291_s3 + $0x668] sm:$0xf] }
 0x61f   :  { %2634 = vmatpush.msra.mxu1 %v7836_v45 }
 0x621   :  { %2635 = vmatpush.msra.mxu1 %v7851_v17  ;;  %2611 = vmatpush.bf16.msra.mxu3 %v5247_v11  ;;  %v5345_v11 = vor.u32 %v6096_v34, %v5344_v40 }
 0x622   :  { %5269 = vmatmul.msk.f32.vlgmr.msra.gmra.mxu2 %vm56_vm0, %v2628_v54  ;;  %v6087_v54 = vld [vmem:[%s9291_s3 + $0x62c] sm:$0xf0] }
 0x623   :  { %2636 = vmatpush.msra.mxu1 %v7860_v15 }
 0x625   :  { %2637 = vmatpush.msra.mxu1 %v7875_v53 }
 0x627   :  { %2638 = vmatpush.msra.mxu1 %v7884_v30 }
 0x629   :  { %2639 = vmatpush.msra.mxu1 %v7896_v49 }
 0x62b   :  { %2640 = vmatpush.msra.mxu1 %v7912_v62 }
 0x62d   :  { %2641 = vmatpush.msra.mxu1 %v7927_v8 }
 0x62f   :  { %2642 = vmatpush.msra.mxu1 %v7933_v57 }
 0x631   :  { %2643 = vmatpush.msra.mxu1 %v7947_v4 }
 0x633   :  { %2644 = vmatpush.msra.mxu1 %v7958_v7 }
 0x635   :  { %2645 = vmatpush.msra.mxu1 %v7966_v44 }
 0x637   :  { %2646 = vmatpush.msra.mxu1 %v7973_v58 }
 0x639   :  { %2647 = vmatpush.msra.mxu1 %v7980_v9 }
 0x670   :  { %v2454_v48 = vpop.f32.mrf.mxu0 }
 0x686   :  { %v2361_v19 = vpop.f32.mrf.mxu1 }
 0x687   :  { %v8244_v42 = vadd.f32 %v2361_v19, %v8127_v12  ;;  %v5231_v12 = vor.u32 %v6070_v14, %v5228_v16  ;;  %v6095_v19 = vld [vmem:[%s9291_s3 + $0x66c] sm:$0x30]  ;;  %v2777_v14 = vsel %vm265_vm1, %v5345_v11, 0  ;;  %v5320_v16 = vld [vmem:[%s9291_s3 + $0x640] sm:$0xf] }
 0x688   :  { %v5337_v43 = vor.u32 %v6095_v19, %v5336_v33  ;;  %2812 = vmatpush.bf16.msrb.mxu2 %v2777_v14 }
 0x689   :  { %2612 = vmatpush.bf16.msra.mxu3 %v5231_v12  ;;  %v6091_v12 = vld [vmem:[%s9291_s3 + $0x64c] sm:$0xf0] }
 0x68a   :  { %v2771_v61 = vsel %vm265_vm1, %v5337_v43, 0  ;;  %v5321_v46 = vor.u32 %v6091_v12, %v5320_v16 }
 0x68b   :  { %2786 = vmatpush.bf16.msrb.mxu0 %v2771_v61 }
 0x68c   :  { %v2374_v22 = vpop.f32.mrf.mxu2 }
 0x68d   :  { %v8265_v52 = vadd.f32 %v2374_v22, %v8115_v60  ;;  %v2387_v21 = vpop.f32.mrf.mxu3  ;;  %2613 = vmatpush.bf16.msra.mxu3 %v5215_v6  ;;  %v5328_v22 = vld [vmem:[%s9291_s3 + $0x648] sm:$0xf] }
 0x68e   :  { %v8269_v13 = vadd.f32 %v2387_v21, %v8122_v50  ;;  %v2363_v56 = vpop.f32.mrf.mxu1  ;;  %v5329_v21 = vor.u32 %v6092_v47, %v5328_v22  ;;  %v5312_v6 = vld [vmem:[%s9291_s3 + $0x628] sm:$0xf] }
 0x68f   :  { %2787 = vmatpush.bf16.msrb.mxu0 %v5321_v46  ;;  %v5304_v56 = vld [vmem:[%s9291_s3 + $0x620] sm:$0xf] }
 0x690   :  { %2813 = vmatpush.bf16.msrb.mxu2 %v5329_v21 }
 0x694   :  { %v2376_v60 = vpop.f32.mrf.mxu2 }
 0x695   :  { %v2389_v55 = vpop.f32.mrf.mxu3  ;;  %v5305_v60 = vor.u32 %v6087_v54, %v5304_v56 }
 0x696   :  { %v2400_v1 = vpop.f32.mrf.mxu1  ;;  %v6088_v55 = vld [vmem:[%s9291_s3 + $0x634] sm:$0xf0] }
 0x697   :  { %v8277_v50 = vadd.f32 %v2400_v1, %v8139_v35  ;;  %v2774_v35 = vsel %vm265_vm1, %v5341_v20, 0  ;;  %v5313_v1 = vor.u32 %v6088_v55, %v5312_v6  ;;  %2788 = vmatpush.bf16.msrb.mxu0 %v5305_v60  ;;  %v5346_v20 = vld [vmem:[%s9291_s3 + $0x678] sm:$0x30]  ;;  %v5424_v6 = vld [vmem:[%s9291_s3 + $0x6f0] sm:$0x30] }
 0x699   :  { %2814 = vmatpush.bf16.msrb.mxu2 %v5313_v1  ;;  %v6105_v1 = vld [vmem:[%s9291_s3 + $0x6c4] sm:$0xf] }
 0x69c   :  { %v2434_v27 = vpop.f32.mrf.mxu2 }
 0x69d   :  { %v2435_v59 = vadd.f32 %v8135_v41, %v2434_v27  ;;  %v5288_v27 = vld [vmem:[%s9291_s3 + $0x600] sm:$0xf] }
 0x69e   :  { %v2402_v24 = vpop.f32.mrf.mxu1 }
 0x69f   :  { %v2455_v36 = vadd.f32 %v2454_v48, %v2435_v59  ;;  %v6083_v48 = vld [vmem:[%s9291_s3 + $0x60c] sm:$0xf0]  ;;  %v6084_v59 = vld [vmem:[%s9291_s3 + $0x614] sm:$0xf0] }
 0x6a0   :  { %v5289_v3 = vor.u32 %v6083_v48, %v5288_v27  ;;  %v5297_v24 = vor.u32 %v6084_v59, %v5296_v18  ;;  %v5408_v27 = vld [vmem:[%s9291_s3 + $0x6d0] sm:$0xf0]  ;;  %v6101_v18 = vld [vmem:[%s9291_s3 + $0x6a4] sm:$0xf] }
 0x6a1   :  { %v2457_v2 = vmax.f32 %v2455_v36, 0.0  ;;  %v6094_v36 = vld [vmem:[%s9291_s3 + $0x66c] sm:$0xf]  ;;  %v5411_v48 = vor.u32 %v6105_v1, %v5408_v27 }
 0x6a2   :  { %2789 = vmatpush.bf16.msrb.mxu0 %v5289_v3  ;;  %2815 = vmatpush.bf16.msrb.mxu2 %v5297_v24  ;;  %v5392_v3 = vld [vmem:[%s9291_s3 + $0x6b0] sm:$0xf0]  ;;  %v6097_v24 = vld [vmem:[%s9291_s3 + $0x684] sm:$0xf] }
 0x6a3   :  { %v2458_v29 = vpack.c.bf16 %v2457_v2, %v2457_v2  ;;  %v5349_v2 = vor.u32 %v6094_v36, %v5346_v20  ;;  %v5395_v59 = vor.u32 %v6101_v18, %v5392_v3  ;;  %v5376_v36 = vld [vmem:[%s9291_s3 + $0x690] sm:$0xf0]  ;;  %v5422_v20 = vld [vmem:[%s9291_s3 + $0x6e0] sm:$0xf] }
 0x6a5   :  { %5264 = vmatmul.msk.bf16.vlgmr.msrb.gmra.mxu3 %vm261_vm2, %v2458_v29  ;;  %5265 = vmatmul.msk.bf16.vlgmr.msrb.gmra.mxu1 %vm261_vm2, %v2458_v29  ;;  %v2669_v16 = vpop.f32.mrf.mxu2 }
 0x6a6   :  { %5266 = vmatmul.msk.bf16.vlgmr.msra.gmra.mxu0 %vm261_vm2, %v2458_v29  ;;  %2799 = vmatpush.bf16.msrb.mxu3 %v2774_v35  ;;  %v6090_v35 = vld [vmem:[%s9291_s3 + $0x64c] sm:$0xf] }
 0x6a7   :  { %2881 = vmatpush.msrb.mxu1 %v7999_v23 }
 0x6a9   :  { %2882 = vmatpush.msrb.mxu1 %v8005_v63 }
 0x6aa   :  { %2800 = vmatpush.bf16.msrb.mxu3 %v5325_v26  ;;  %v5314_v26 = vld [vmem:[%s9291_s3 + $0x638] sm:$0xf0] }
 0x6ab   :  { %v5317_v31 = vor.u32 %v6086_v28, %v5314_v26 }
 0x6ae   :  { %2801 = vmatpush.bf16.msrb.mxu3 %v5309_v32  ;;  %v6082_v32 = vld [vmem:[%s9291_s3 + $0x60c] sm:$0xf] }
 0x6af   :  { %v5301_v40 = vor.u32 %v6082_v32, %v5298_v39  ;;  %v6107_v32 = vld [vmem:[%s9291_s3 + $0x6cc] sm:$0xf0] }
 0x6b2   :  { %2802 = vmatpush.bf16.msrb.mxu3 %v5293_v38  ;;  %v5354_v38 = vld [vmem:[%s9288_s0 + $0x24] sm:$0xf] }
 0x6b3   :  { %2841 = vst [vmem:[#allocation1] ss:$4 sm:$0xff] %v5354_v38  ;;  %v6108_v38 = vld [vmem:[%s9291_s3 + $0x6d4] sm:$0xf0] }
 0x6b5   :  { %5267 = vmatmul.msk.bf16.vlgmr.msra.gmra.mxu3 %vm261_vm2, %v2458_v29  ;;  %2648 = vmatmul.f32.vlgmr.msra.gmra.mxu1 %v2627_v0  ;;  %v2780_v29 = vsel %vm265_vm1, %v5349_v2, 0  ;;  %v5330_v0 = vld [vmem:[%s9291_s3 + $0x658] sm:$0xf0]  ;;  %v5379_v2 = vor.u32 %v6097_v24, %v5376_v36 }
 0x6b6   :  { %2847 = vmatpush.msra.mxu3 %v7812_v51  ;;  %2825 = vmatpush.bf16.msra.mxu0 %v2780_v29  ;;  %v5333_v25 = vor.u32 %v6090_v35, %v5330_v0  ;;  %v6111_v29 = vld [vmem:[%s9291_s3 + $0x6ec] sm:$0x30]  ;;  %v5430_v35 = vld [vmem:[%s9291_s3 + $0x6e8] sm:$0xf]  ;;  %v6112_v0 = vld [vmem:[%s9291_s3 + $0x6f4] sm:$0x30] }
 0x6b7   :  { %v5431_v28 = vor.u32 %v6112_v0, %v5430_v35  ;;  %v6121_v0 = vld [vmem:[%s9291_s3 + $0x744] sm:$0xf] }
 0x6b8   :  { %2848 = vmatpush.msra.mxu3 %v7830_v10 }
 0x6ba   :  { %2849 = vmatpush.msra.mxu3 %v7836_v45  ;;  %2826 = vmatpush.bf16.msra.mxu0 %v5333_v25  ;;  %v2842_v54 = vld.sshfl [vmem:[#allocation1] sm:$0xff pattern:$0x73625140]  ;;  %v5423_v25 = vor.u32 %v6111_v29, %v5422_v20 }
 0x6bc   :  { %2850 = vmatpush.msra.mxu3 %v7851_v17  ;;  %v2986_v26 = vsel %vm265_vm1, %v5423_v25, 0  ;;  %v5494_v25 = vld [vmem:[%s9291_s3 + $0x750] sm:$0xf0] }
 0x6bd   :  { %3001 = vmatpush.bf16.msra.mxu2 %v2986_v26 }
 0x6be   :  { %2851 = vmatpush.msra.mxu3 %v7860_v15  ;;  %2827 = vmatpush.bf16.msra.mxu0 %v5317_v31  ;;  %v2992_v31 = vsel %vm265_vm1, %v5431_v28, 0  ;;  %v5497_v28 = vor.u32 %v6121_v0, %v5494_v25 }
 0x6bf   :  { %3027 = vmatpush.bf16.msra.mxu1 %v2992_v31  ;;  %v6113_v31 = vld [vmem:[%s9291_s3 + $0x704] sm:$0xf] }
 0x6c0   :  { %2852 = vmatpush.msra.mxu3 %v7875_v53 }
 0x6c2   :  { %2853 = vmatpush.msra.mxu3 %v7884_v30  ;;  %2828 = vmatpush.bf16.msra.mxu0 %v5301_v40  ;;  %v5390_v40 = vld [vmem:[%s9291_s3 + $0x6a0] sm:$0xf] }
 0x6c4   :  { %2854 = vmatpush.msra.mxu3 %v7896_v49 }
 0x6c6   :  { %2855 = vmatpush.msra.mxu3 %v7912_v62 }
 0x6c8   :  { %2856 = vmatpush.msra.mxu3 %v7927_v8 }
 0x6ca   :  { %2857 = vmatpush.msra.mxu3 %v7933_v57 }
 0x6cc   :  { %2858 = vmatpush.msra.mxu3 %v7947_v4 }
 0x6ce   :  { %2859 = vmatpush.msra.mxu3 %v7958_v7 }
 0x6d0   :  { %2860 = vmatpush.msra.mxu3 %v7966_v44 }
 0x6d2   :  { %2861 = vmatpush.msra.mxu3 %v7973_v58 }
 0x6d4   :  { %2862 = vmatpush.msra.mxu3 %v7980_v9 }
 0x722   :  { %v2589_v5 = vpop.f32.mrf.mxu1 }
 0x723   :  { %v8398_v37 = vadd.f32 %v2589_v5, %v8265_v52  ;;  %v2602_v33 = vpop.f32.mrf.mxu0  ;;  %v5406_v5 = vld [vmem:[%s9291_s3 + $0x6c0] sm:$0xf] }
 0x724   :  { %v8405_v19 = vadd.f32 %v2602_v33, %v8269_v13  ;;  %v2843_v13 = vld.sshfl [vmem:[#allocation1 + $0x8] sm:$0xff pattern:$0x73625140]  ;;  %v5407_v39 = vor.u32 %v6107_v32, %v5406_v5  ;;  %v5462_v5 = vld [vmem:[%s9291_s3 + $0x710] sm:$0xf0] }
 0x725   :  { %5355 = vmatmul.msk.f32.vlgmr.msrb.gmra.mxu1 %vm56_vm0, %v2843_v13  ;;  %v5414_v33 = vld [vmem:[%s9291_s3 + $0x6c8] sm:$0xf]  ;;  %v5374_v13 = vld [vmem:[%s9291_s3 + $0x680] sm:$0xf] }
 0x726   :  { %3002 = vmatpush.bf16.msra.mxu2 %v5407_v39  ;;  %v5508_v32 = vld [vmem:[%s9291_s3 + $0x760] sm:$0xf]  ;;  %v5465_v39 = vor.u32 %v6113_v31, %v5462_v5  ;;  %v8754_v31 = vld [vmem:[%s9289_s1 + $0x10] sm:$0xff] }
 0x728   :  { %v2576_v34 = vpop.f32.mrf.mxu3 }
 0x729   :  { %v8410_v52 = vadd.f32 %v2576_v34, %v8244_v42  ;;  %v6103_v34 = vld [vmem:[%s9291_s3 + $0x6ac] sm:$0xf0] }
 0x72a   :  { %v2591_v43 = vpop.f32.mrf.mxu1 }
 0x72b   :  { %v2604_v11 = vpop.f32.mrf.mxu0  ;;  %v5398_v43 = vld [vmem:[%s9291_s3 + $0x6a8] sm:$0xf] }
 0x730   :  { %v2578_v61 = vpop.f32.mrf.mxu3 }
 0x731   :  { %v6099_v61 = vld [vmem:[%s9291_s3 + $0x68c] sm:$0xf0] }
 0x732   :  { %v2649_v14 = vpop.f32.mrf.mxu1 }
 0x733   :  { %v2650_v12 = vadd.f32 %v8135_v41, %v2649_v14  ;;  %v5375_v14 = vor.u32 %v6099_v61, %v5374_v13  ;;  %v6123_v13 = vld [vmem:[%s9291_s3 + $0x74c] sm:$0xf0]  ;;  %v5500_v61 = vld [vmem:[%s9291_s3 + $0x748] sm:$0xf] }
 0x735   :  { %v2670_v22 = vadd.f32 %v2669_v16, %v2650_v12  ;;  %v6110_v12 = vld [vmem:[%s9291_s3 + $0x6ec] sm:$0xf] }
 0x737   :  { %v2672_v46 = vmax.f32 %v2670_v22, 0.0  ;;  %v5432_v22 = vld [vmem:[%s9291_s3 + $0x6f8] sm:$0x30] }
 0x738   :  { %v2615_v47 = vpop.f32.mrf.mxu3 }
 0x739   :  { %v2673_v42 = vpack.c.bf16 %v2672_v46, %v2672_v46  ;;  %v8417_v21 = vadd.f32 %v2615_v47, %v8277_v50  ;;  %v6109_v50 = vld [vmem:[%s9291_s3 + $0x6e4] sm:$0xf]  ;;  %v5435_v46 = vor.u32 %v6110_v12, %v5432_v22  ;;  %v8630_v12 = vld [vmem:[%s9289_s1 + $0x68] sm:$0xff]  ;;  %v5476_v22 = vld [vmem:[%s9291_s3 + $0x720] sm:$0xf] }
 0x73a   :  { %v5427_v60 = vor.u32 %v6109_v50, %v5424_v6  ;;  %v6102_v50 = vld [vmem:[%s9291_s3 + $0x6ac] sm:$0xf]  ;;  %v5400_v6 = vld [vmem:[%s9291_s3 + $0x6b8] sm:$0xf0] }
 0x73b   :  { %5350 = vmatmul.msk.bf16.vlgmr.msrb.gmra.mxu0 %vm261_vm2, %v2673_v42  ;;  %5351 = vmatmul.msk.bf16.vlgmr.msrb.gmra.mxu3 %vm261_vm2, %v2673_v42  ;;  %v2995_v47 = vsel %vm265_vm1, %v5435_v46, 0  ;;  %v6119_v46 = vld [vmem:[%s9291_s3 + $0x72c] sm:$0xf0] }
 0x73c   :  { %5352 = vmatmul.msk.bf16.vlgmr.msrb.gmra.mxu2 %vm261_vm2, %v2673_v42  ;;  %3096 = vmatpush.msrb.mxu3 %v7999_v23  ;;  %v2989_v55 = vsel %vm265_vm1, %v5427_v60, 0  ;;  %v6098_v60 = vld [vmem:[%s9291_s3 + $0x68c] sm:$0xf] }
 0x73d   :  { %3014 = vmatpush.bf16.msrb.mxu0 %v2989_v55  ;;  %v5384_v55 = vld [vmem:[%s9291_s3 + $0x698] sm:$0xf0] }
 0x73e   :  { %3097 = vmatpush.msrb.mxu3 %v8005_v63  ;;  %v5387_v18 = vor.u32 %v6098_v60, %v5384_v55  ;;  %v6116_v55 = vld [vmem:[%s9291_s3 + $0x714] sm:$0xf0] }
 0x740   :  { %v2617_v56 = vpop.f32.mrf.mxu3 }
 0x741   :  { %3015 = vmatpush.bf16.msrb.mxu0 %v5411_v48 }
 0x745   :  { %3016 = vmatpush.bf16.msrb.mxu0 %v5395_v59 }
 0x749   :  { %3017 = vmatpush.bf16.msrb.mxu0 %v5379_v2 }
 0x74b   :  { %5353 = vmatmul.msk.bf16.vlgmr.msra.gmra.mxu0 %vm261_vm2, %v2673_v42  ;;  %2863 = vmatmul.f32.vlgmr.msra.gmra.mxu3 %v2842_v54  ;;  %v5416_v42 = vld [vmem:[%s9291_s3 + $0x6d8] sm:$0xf0] }
 0x74d   :  { %3062 = vmatpush.msra.mxu0 %v7812_v51  ;;  %v5415_v51 = vor.u32 %v6108_v38, %v5414_v33  ;;  %v6127_v33 = vld [vmem:[%s9291_s3 + $0x76c] sm:$0x30]  ;;  %v5516_v38 = vld [vmem:[%s9291_s3 + $0x768] sm:$0xf] }
 0x74f   :  { %3063 = vmatpush.msra.mxu0 %v7830_v10  ;;  %3028 = vmatpush.bf16.msra.mxu1 %v5415_v51  ;;  %v5391_v10 = vor.u32 %v6103_v34, %v5390_v40  ;;  %v6128_v51 = vld [vmem:[%s9291_s3 + $0x774] sm:$0x30]  ;;  %v5509_v40 = vor.u32 %v6127_v33, %v5508_v32  ;;  %v8763_v32 = vld [vmem:[%s9289_s1 + $0x8] sm:$0xff] }
 0x750   :  { %v5517_v34 = vor.u32 %v6128_v51, %v5516_v38  ;;  %v8769_v38 = vld [vmem:[%s9289_s1] sm:$0xff] }
 0x751   :  { %3064 = vmatpush.msra.mxu0 %v7836_v45  ;;  %v6104_v45 = vld [vmem:[%s9291_s3 + $0x6b4] sm:$0xf0]  ;;  %3003 = vmatpush.bf16.msra.mxu2 %v5391_v10 }
 0x752   :  { %v5399_v11 = vor.u32 %v6104_v45, %v5398_v43  ;;  %v3201_v43 = vsel %vm265_vm1, %v5509_v40, 0  ;;  %v3207_v10 = vsel %vm265_vm1, %v5517_v34, 0  ;;  %v8606_v45 = vld [vmem:[%s9289_s1 + $0x78] sm:$0xff] }
 0x753   :  { %3065 = vmatpush.msra.mxu0 %v7851_v17  ;;  %v5382_v17 = vld [vmem:[%s9291_s3 + $0x688] sm:$0xf]  ;;  %3242 = vmatpush.bf16.msra.mxu3 %v3207_v10 }
 0x754   :  { %3029 = vmatpush.bf16.msra.mxu1 %v5399_v11  ;;  %v5492_v11 = vld [vmem:[%s9291_s3 + $0x740] sm:$0xf] }
 0x755   :  { %3066 = vmatpush.msra.mxu0 %v7860_v15  ;;  %v6100_v15 = vld [vmem:[%s9291_s3 + $0x694] sm:$0xf0]  ;;  %3004 = vmatpush.bf16.msra.mxu2 %v5375_v14  ;;  %v5493_v14 = vor.u32 %v6123_v13, %v5492_v11 }
 0x756   :  { %v5383_v16 = vor.u32 %v6100_v15, %v5382_v17  ;;  %v8621_v17 = vld [vmem:[%s9289_s1 + $0x70] sm:$0xff]  ;;  %v6124_v15 = vld [vmem:[%s9291_s3 + $0x754] sm:$0xf0] }
 0x757   :  { %3067 = vmatpush.msra.mxu0 %v7875_v53 }
 0x758   :  { %3030 = vmatpush.bf16.msra.mxu1 %v5383_v16  ;;  %v5501_v16 = vor.u32 %v6124_v15, %v5500_v61  ;;  %v8783_v15 = vld [vmem:[%s9289_s1 + $0x88] sm:$0xff] }
 0x759   :  { %3068 = vmatpush.msra.mxu0 %v7884_v30  ;;  %v6106_v30 = vld [vmem:[%s9291_s3 + $0x6cc] sm:$0xf]  ;;  %3040 = vmatpush.bf16.msrb.mxu2 %v2995_v47  ;;  %v8645_v47 = vld [vmem:[%s9289_s1 + $0x60] sm:$0xff] }
 0x75a   :  { %v5419_v54 = vor.u32 %v6106_v30, %v5416_v42  ;;  %3243 = vmatpush.bf16.msra.mxu3 %v5501_v16  ;;  %v5477_v30 = vor.u32 %v6119_v46, %v5476_v22  ;;  %v6120_v42 = vld [vmem:[%s9291_s3 + $0x734] sm:$0xf0]  ;;  %v6141_v22 = vld [vmem:[%s9291_s3 + $0x7e4] sm:$0xf]  ;;  %v5596_v46 = vld [vmem:[%s9291_s3 + $0x7f0] sm:$0x30] }
 0x75b   :  { %3069 = vmatpush.msra.mxu0 %v7896_v49  ;;  %v5440_v49 = vld [vmem:[%s9288_s0 + $0x2c] sm:$0xf] }
 0x75c   :  { %3056 = vst [vmem:[#allocation1] ss:$4 sm:$0xff] %v5440_v49  ;;  %3216 = vmatpush.bf16.msrb.mxu1 %v3201_v43  ;;  %v8654_v49 = vld [vmem:[%s9289_s1 + $0x58] sm:$0xff] }
 0x75d   :  { %3070 = vmatpush.msra.mxu0 %v7912_v62  ;;  %3041 = vmatpush.bf16.msrb.mxu2 %v5419_v54  ;;  %v5403_v62 = vor.u32 %v6102_v50, %v5400_v6  ;;  %v5460_v50 = vld [vmem:[%s9291_s3 + $0x700] sm:$0xf]  ;;  %v6115_v6 = vld [vmem:[%s9291_s3 + $0x70c] sm:$0xf0] }
 0x75e   :  { %v5461_v60 = vor.u32 %v6115_v6, %v5460_v50  ;;  %v6133_v6 = vld [vmem:[%s9291_s3 + $0x7a4] sm:$0xf] }
 0x75f   :  { %3071 = vmatpush.msra.mxu0 %v7927_v8 }
 0x760   :  { %3217 = vmatpush.bf16.msrb.mxu1 %v5493_v14 }
 0x761   :  { %3072 = vmatpush.msra.mxu0 %v7933_v57  ;;  %3042 = vmatpush.bf16.msrb.mxu2 %v5403_v62  ;;  %v5468_v62 = vld [vmem:[%s9291_s3 + $0x708] sm:$0xf] }
 0x763   :  { %3073 = vmatpush.msra.mxu0 %v7947_v4  ;;  %v3058_v48 = vld.sshfl [vmem:[#allocation1 + $0x8] sm:$0xff pattern:$0x73625140]  ;;  %v3057_v35 = vld.sshfl [vmem:[#allocation1] sm:$0xff pattern:$0x73625140] }
 0x764   :  { %5441 = vmatmul.msk.f32.vlgmr.msrb.gmra.mxu3 %vm56_vm0, %v3058_v48  ;;  %3218 = vmatpush.bf16.msrb.mxu1 %v5477_v30  ;;  %v6126_v48 = vld [vmem:[%s9291_s3 + $0x76c] sm:$0xf] }
 0x765   :  { %3074 = vmatpush.msra.mxu0 %v7958_v7  ;;  %3043 = vmatpush.bf16.msrb.mxu2 %v5387_v18  ;;  %v6125_v7 = vld [vmem:[%s9291_s3 + $0x764] sm:$0xf]  ;;  %v5518_v18 = vld [vmem:[%s9291_s3 + $0x778] sm:$0x30] }
 0x767   :  { %3075 = vmatpush.msra.mxu0 %v7966_v44  ;;  %v5510_v44 = vld [vmem:[%s9291_s3 + $0x770] sm:$0x30] }
 0x768   :  { %v5513_v2 = vor.u32 %v6125_v7, %v5510_v44  ;;  %3219 = vmatpush.bf16.msrb.mxu1 %v5461_v60  ;;  %v5502_v7 = vld [vmem:[%s9291_s3 + $0x758] sm:$0xf0]  ;;  %v8709_v44 = vld [vmem:[%s9289_s1 + $0x30] sm:$0xff] }
 0x769   :  { %3076 = vmatpush.msra.mxu0 %v7973_v58 }
 0x76b   :  { %3077 = vmatpush.msra.mxu0 %v7980_v9 }
 0x7a2   :  { %v2884_v24 = vpop.f32.mrf.mxu1 }
 0x7b8   :  { %v2791_v53 = vpop.f32.mrf.mxu0 }
 0x7b9   :  { %v8522_v56 = vadd.f32 %v2791_v53, %v8410_v52  ;;  %v5484_v53 = vld [vmem:[%s9291_s3 + $0x728] sm:$0xf] }
 0x7ba   :  { %v5485_v54 = vor.u32 %v6120_v42, %v5484_v53  ;;  %v5599_v53 = vor.u32 %v6141_v22, %v5596_v46  ;;  %v6137_v42 = vld [vmem:[%s9291_s3 + $0x7c4] sm:$0xf] }
 0x7bc   :  { %3244 = vmatpush.bf16.msra.mxu3 %v5485_v54  ;;  %v3419_v30 = vsel %vm265_vm1, %v5599_v53, 0  ;;  %v5580_v54 = vld [vmem:[%s9291_s3 + $0x7d0] sm:$0xf0]  ;;  %v6138_v53 = vld [vmem:[%s9291_s3 + $0x7cc] sm:$0xf] }
 0x7bd   :  { %v5583_v50 = vor.u32 %v6137_v42, %v5580_v54 }
 0x7be   :  { %v2804_v52 = vpop.f32.mrf.mxu3 }
 0x7bf   :  { %v8543_v1 = vadd.f32 %v2804_v52, %v8398_v37  ;;  %v2817_v27 = vpop.f32.mrf.mxu2  ;;  %v8669_v52 = vld [vmem:[%s9289_s1 + $0x50] sm:$0xff] }
 0x7c0   :  { %v8547_v8 = vadd.f32 %v2817_v27, %v8405_v19  ;;  %v2793_v57 = vpop.f32.mrf.mxu0  ;;  %v5469_v27 = vor.u32 %v6116_v55, %v5468_v62  ;;  %v5564_v62 = vld [vmem:[%s9291_s3 + $0x7b0] sm:$0xf0]  ;;  %v6129_v55 = vld [vmem:[%s9291_s3 + $0x784] sm:$0xf] }
 0x7c1   :  { %v8678_v57 = vld [vmem:[%s9289_s1 + $0x48] sm:$0xff]  ;;  %v5567_v60 = vor.u32 %v6133_v6, %v5564_v62  ;;  %v5572_v62 = vld [vmem:[%s9291_s3 + $0x7b8] sm:$0xf0] }
 0x7c2   :  { %3245 = vmatpush.bf16.msra.mxu3 %v5469_v27  ;;  %v5548_v27 = vld [vmem:[%s9291_s3 + $0x790] sm:$0xf0]  ;;  %v6134_v6 = vld [vmem:[%s9291_s3 + $0x7ac] sm:$0xf] }
 0x7c6   :  { %v2806_v37 = vpop.f32.mrf.mxu3 }
 0x7c7   :  { %v2819_v3 = vpop.f32.mrf.mxu2  ;;  %v5521_v37 = vor.u32 %v6126_v48, %v5518_v18  ;;  %v5594_v48 = vld [vmem:[%s9291_s3 + $0x7e0] sm:$0xf]  ;;  %v5551_v18 = vor.u32 %v6129_v55, %v5548_v27  ;;  %v6130_v55 = vld [vmem:[%s9291_s3 + $0x78c] sm:$0xf]  ;;  %v5556_v27 = vld [vmem:[%s9291_s3 + $0x798] sm:$0xf0] }
 0x7c8   :  { %v2830_v4 = vpop.f32.mrf.mxu0  ;;  %v8690_v3 = vld [vmem:[%s9289_s1 + $0x40] sm:$0xff] }
 0x7c9   :  { %v8555_v19 = vadd.f32 %v2830_v4, %v8417_v21  ;;  %v3204_v21 = vsel %vm265_vm1, %v5513_v2, 0  ;;  %v3210_v4 = vsel %vm265_vm1, %v5521_v37, 0  ;;  %v8721_v2 = vld [vmem:[%s9289_s1 + $0x28] sm:$0xff]  ;;  %v6143_v37 = vld [vmem:[%s9291_s3 + $0x7ec] sm:$0x30] }
 0x7ce   :  { %v2864_v59 = vpop.f32.mrf.mxu3 }
 0x7cf   :  { %v2865_v58 = vadd.f32 %v8135_v41, %v2864_v59  ;;  %v8697_v59 = vld [vmem:[%s9289_s1 + $0x38] sm:$0xff] }
 0x7d0   :  { %v2832_v36 = vpop.f32.mrf.mxu0 }
 0x7d1   :  { %v2885_v20 = vadd.f32 %v2884_v24, %v2865_v58  ;;  %v6122_v24 = vld [vmem:[%s9291_s3 + $0x74c] sm:$0xf] }
 0x7d2   :  { %v5505_v58 = vor.u32 %v6122_v24, %v5502_v7  ;;  %v6118_v36 = vld [vmem:[%s9291_s3 + $0x72c] sm:$0xf]  ;;  %v6144_v24 = vld [vmem:[%s9291_s3 + $0x7f4] sm:$0x30]  ;;  %v5595_v7 = vor.u32 %v6143_v37, %v5594_v48 }
 0x7d3   :  { %v2887_v9 = vmax.f32 %v2885_v20, 0.0  ;;  %v5486_v20 = vld [vmem:[%s9291_s3 + $0x738] sm:$0xf0] }
 0x7d5   :  { %v2888_v29 = vpack.c.bf16 %v2887_v9, %v2887_v9  ;;  %v5489_v9 = vor.u32 %v6118_v36, %v5486_v20  ;;  %v3416_v36 = vsel %vm265_vm1, %v5595_v7, 0  ;;  %v5559_v7 = vor.u32 %v6130_v55, %v5556_v27  ;;  %v5648_v55 = vld [vmem:[%s9291_s3 + $0x820] sm:$0xf]  ;;  %v6151_v27 = vld [vmem:[%s9291_s3 + $0x82c] sm:$0xf0] }
 0x7d6   :  { %3431 = vmatpush.bf16.msrb.mxu3 %v3416_v36 }
 0x7d7   :  { %5436 = vmatmul.msk.bf16.vlgmr.msra.gmra.mxu2 %vm261_vm2, %v2888_v29  ;;  %5437 = vmatmul.msk.bf16.vlgmr.msrb.gmra.mxu0 %vm261_vm2, %v2888_v29 }
 0x7d8   :  { %5438 = vmatmul.msk.bf16.vlgmr.msra.gmra.mxu1 %vm261_vm2, %v2888_v29  ;;  %3229 = vmatpush.bf16.msra.mxu2 %v3204_v21  ;;  %v6114_v21 = vld [vmem:[%s9291_s3 + $0x70c] sm:$0xf] }
 0x7d9   :  { %3311 = vmatpush.msrb.mxu0 %v7999_v23  ;;  %v6117_v23 = vld [vmem:[%s9291_s3 + $0x724] sm:$0xf]  ;;  %3255 = vmatpush.bf16.msra.mxu1 %v3210_v4  ;;  %v5602_v4 = vld [vmem:[%s9291_s3 + $0x7e8] sm:$0xf] }
 0x7db   :  { %3312 = vmatpush.msrb.mxu0 %v8005_v63  ;;  %v5478_v63 = vld [vmem:[%s9291_s3 + $0x730] sm:$0xf0] }
 0x7dc   :  { %3230 = vmatpush.bf16.msra.mxu2 %v5497_v28  ;;  %v5481_v26 = vor.u32 %v6117_v23, %v5478_v63  ;;  %v8736_v28 = vld [vmem:[%s9289_s1 + $0x20] sm:$0xff]  ;;  %v5526_v23 = vld [vmem:[%s9288_s0 + $0x34] sm:$0xf] }
 0x7dd   :  { %3256 = vmatpush.bf16.msra.mxu1 %v5505_v58  ;;  %3271 = vst [vmem:[#allocation1] ss:$4 sm:$0xff] %v5526_v23  ;;  %v5603_v58 = vor.u32 %v6144_v24, %v5602_v4 }
 0x7df   :  { %v3422_v20 = vsel %vm265_vm1, %v5603_v58, 0 }
 0x7e0   :  { %3231 = vmatpush.bf16.msra.mxu2 %v5481_v26 }
 0x7e1   :  { %3257 = vmatpush.bf16.msra.mxu1 %v5489_v9  ;;  %v5578_v9 = vld [vmem:[%s9291_s3 + $0x7c0] sm:$0xf] }
 0x7e4   :  { %3232 = vmatpush.bf16.msra.mxu2 %v5465_v39  ;;  %v3273_v51 = vld.sshfl [vmem:[#allocation1 + $0x8] sm:$0xff pattern:$0x73625140]  ;;  %v3272_v16 = vld.sshfl [vmem:[#allocation1] sm:$0xff pattern:$0x73625140] }
 0x7e7   :  { %5439 = vmatmul.msk.bf16.vlgmr.msrb.gmra.mxu2 %vm261_vm2, %v2888_v29  ;;  %3078 = vmatmul.f32.vlgmr.msra.gmra.mxu0 %v3057_v35  ;;  %v5470_v35 = vld [vmem:[%s9291_s3 + $0x718] sm:$0xf0]  ;;  %v3099_v34 = vpop.f32.mrf.mxu3 }
 0x7e8   :  { %3277 = vmatpush.msrb.mxu2 %v8606_v45  ;;  %v5473_v26 = vor.u32 %v6114_v21, %v5470_v35  ;;  %3457 = vmatpush.bf16.msra.mxu0 %v3422_v20  ;;  %v5586_v35 = vld [vmem:[%s9291_s3 + $0x7c8] sm:$0xf] }
 0x7ea   :  { %3278 = vmatpush.msrb.mxu2 %v8621_v17  ;;  %3258 = vmatpush.bf16.msra.mxu1 %v5473_v26  ;;  %v5562_v26 = vld [vmem:[%s9291_s3 + $0x7a0] sm:$0xf] }
 0x7ec   :  { %3279 = vmatpush.msrb.mxu2 %v8630_v12 }
 0x7ee   :  { %3280 = vmatpush.msrb.mxu2 %v8645_v47 }
 0x7ef   :  { %5527 = vmatmul.msk.f32.vlgmr.msrb.gmra.mxu0 %vm56_vm0, %v3273_v51  ;;  %v6136_v51 = vld [vmem:[%s9291_s3 + $0x7b4] sm:$0xf0] }
 0x7f0   :  { %3281 = vmatpush.msrb.mxu2 %v8654_v49 }
 0x7f2   :  { %3282 = vmatpush.msrb.mxu2 %v8669_v52 }
 0x7f4   :  { %3283 = vmatpush.msrb.mxu2 %v8678_v57 }
 0x7f6   :  { %3284 = vmatpush.msrb.mxu2 %v8690_v3 }
 0x7f8   :  { %3285 = vmatpush.msrb.mxu2 %v8697_v59 }
 0x7fa   :  { %3286 = vmatpush.msrb.mxu2 %v8709_v44 }
 0x7fc   :  { %3287 = vmatpush.msrb.mxu2 %v8721_v2 }
 0x7fe   :  { %3288 = vmatpush.msrb.mxu2 %v8736_v28 }
 0x854   :  { %v3019_v29 = vpop.f32.mrf.mxu0 }
 0x855   :  { %v8731_v0 = vadd.f32 %v3019_v29, %v8543_v1  ;;  %v3032_v25 = vpop.f32.mrf.mxu1  ;;  %v8748_v1 = vld [vmem:[%s9289_s1 + $0x18] sm:$0xff]  ;;  %v6139_v29 = vld [vmem:[%s9291_s3 + $0x7cc] sm:$0xf0] }
 0x856   :  { %v8743_v63 = vadd.f32 %v3032_v25, %v8547_v8  ;;  %3289 = vmatpush.msrb.mxu2 %v8748_v1  ;;  %v5579_v21 = vor.u32 %v6139_v29, %v5578_v9  ;;  %v6140_v25 = vld [vmem:[%s9291_s3 + $0x7d4] sm:$0xf0]  ;;  %v6157_v29 = vld [vmem:[%s9291_s3 + $0x864] sm:$0xf] }
 0x857   :  { %v5587_v23 = vor.u32 %v6140_v25, %v5586_v35  ;;  %v8934_v35 = vld [vmem:[%s9290_s2] ss:$0 sm:$0xff] }
 0x858   :  { %3290 = vmatpush.msrb.mxu2 %v8754_v31  ;;  %3432 = vmatpush.bf16.msrb.mxu3 %v5579_v21  ;;  %v5682_v21 = vld [vmem:[%s9291_s3 + $0x870] sm:$0x30] }
 0x859   :  { %3458 = vmatpush.bf16.msra.mxu0 %v5587_v23 }
 0x85a   :  { %v3006_v5 = vpop.f32.mrf.mxu2  ;;  %3291 = vmatpush.msrb.mxu2 %v8763_v32 }
 0x85b   :  { %v8758_v8 = vadd.f32 %v3006_v5, %v8522_v56  ;;  %v6135_v5 = vld [vmem:[%s9291_s3 + $0x7ac] sm:$0xf0] }
 0x85c   :  { %v3021_v39 = vpop.f32.mrf.mxu0  ;;  %3292 = vmatpush.msrb.mxu2 %v8769_v38 }
 0x85d   :  { %v3034_v33 = vpop.f32.mrf.mxu1  ;;  %v5570_v39 = vld [vmem:[%s9291_s3 + $0x7a8] sm:$0xf] }
 0x85e   :  { %v5563_v33 = vor.u32 %v6135_v5, %v5562_v26  ;;  %v5685_v26 = vor.u32 %v6157_v29, %v5682_v21  ;;  %v5674_v29 = vld [vmem:[%s9291_s3 + $0x858] sm:$0xf0] }
 0x860   :  { %3433 = vmatpush.bf16.msrb.mxu3 %v5563_v33  ;;  %v3634_v33 = vsel %vm265_vm1, %v5685_v26, 0 }
 0x862   :  { %v3008_v56 = vpop.f32.mrf.mxu2 }
 0x863   :  { %v5571_v56 = vor.u32 %v6136_v51, %v5570_v39 }
 0x864   :  { %v3079_v40 = vpop.f32.mrf.mxu0 }
 0x865   :  { %v3080_v43 = vadd.f32 %v8135_v41, %v3079_v40  ;;  %v8789_v41 = vld [vmem:[%s9289_s1 + $0x80] sm:$0xff]  ;;  %3459 = vmatpush.bf16.msra.mxu0 %v5571_v56 }
 0x866   :  { %v5546_v40 = vld [vmem:[%s9291_s3 + $0x780] sm:$0xf]  ;;  %v6153_v56 = vld [vmem:[%s9291_s3 + $0x844] sm:$0xf] }
 0x867   :  { %v3100_v10 = vadd.f32 %v3099_v34, %v3080_v43  ;;  %v6131_v34 = vld [vmem:[%s9291_s3 + $0x78c] sm:$0xf0]  ;;  %v5554_v43 = vld [vmem:[%s9291_s3 + $0x788] sm:$0xf] }
 0x869   :  { %v3102_v11 = vmax.f32 %v3100_v10, 0.0  ;;  %v5547_v10 = vor.u32 %v6131_v34, %v5546_v40  ;;  %v5666_v40 = vld [vmem:[%s9291_s3 + $0x850] sm:$0xf0] }
 0x86a   :  { %v3045_v13 = vpop.f32.mrf.mxu2  ;;  %v5669_v34 = vor.u32 %v6153_v56, %v5666_v40 }
 0x86b   :  { %v3103_v61 = vpack.c.bf16 %v3102_v11, %v3102_v11  ;;  %v8775_v14 = vadd.f32 %v3045_v13, %v8555_v19  ;;  %v6132_v11 = vld [vmem:[%s9291_s3 + $0x794] sm:$0xf0]  ;;  %3434 = vmatpush.bf16.msrb.mxu3 %v5547_v10  ;;  %v6145_v10 = vld [vmem:[%s9291_s3 + $0x804] sm:$0xf] }
 0x86c   :  { %v5555_v13 = vor.u32 %v6132_v11, %v5554_v43  ;;  %v3314_v9 = vpop.f32.mrf.mxu0  ;;  %v5634_v11 = vld [vmem:[%s9291_s3 + $0x810] sm:$0xf0] }
 0x86d   :  { %5522 = vmatmul.msk.bf16.vlgmr.msrb.gmra.mxu1 %vm261_vm2, %v3103_v61  ;;  %5523 = vmatmul.msk.bf16.vlgmr.msra.gmra.mxu2 %vm261_vm2, %v3103_v61 }
 0x86e   :  { %5524 = vmatmul.msk.bf16.vlgmr.msra.gmra.mxu3 %vm261_vm2, %v3103_v61  ;;  %3526 = vmatpush.msra.mxu2 %v8783_v15 }
 0x86f   :  { %3444 = vmatpush.bf16.msrb.mxu1 %v3419_v30  ;;  %3460 = vmatpush.bf16.msra.mxu0 %v5555_v13  ;;  %v5588_v30 = vld [vmem:[%s9291_s3 + $0x7d8] sm:$0xf0]  ;;  %v5680_v13 = vld [vmem:[%s9291_s3 + $0x860] sm:$0xf] }
 0x870   :  { %3527 = vmatpush.msra.mxu2 %v8789_v41  ;;  %v5591_v54 = vor.u32 %v6138_v53, %v5588_v30 }
 0x872   :  { %v3047_v19 = vpop.f32.mrf.mxu2 }
 0x873   :  { %3445 = vmatpush.bf16.msrb.mxu1 %v5583_v50  ;;  %v5604_v19 = vld [vmem:[%s9291_s3 + $0x7f8] sm:$0x30] }
 0x874   :  { %v5612_v50 = vld [vmem:[%s9288_s0 + $0x3c] sm:$0xf] }
 0x875   :  { %3486 = vst [vmem:[#allocation1] ss:$4 sm:$0xff] %v5612_v50  ;;  %v5664_v50 = vld [vmem:[%s9291_s3 + $0x840] sm:$0xf] }
 0x877   :  { %3446 = vmatpush.bf16.msrb.mxu1 %v5567_v60 }
 0x87b   :  { %3447 = vmatpush.bf16.msrb.mxu1 %v5551_v18 }
 0x87c   :  { %v3488_v24 = vld.sshfl [vmem:[#allocation1 + $0x8] sm:$0xff pattern:$0x73625140]  ;;  %v3487_v51 = vld.sshfl [vmem:[#allocation1] sm:$0xff pattern:$0x73625140] }
 0x87d   :  { %5525 = vmatmul.msk.bf16.vlgmr.msra.gmra.mxu1 %vm261_vm2, %v3103_v61  ;;  %3293 = vmatmul.f32.vlgmr.msrb.gmra.mxu2 %v3272_v16  ;;  %v6142_v61 = vld [vmem:[%s9291_s3 + $0x7ec] sm:$0xf] }
 0x87e   :  { %v5607_v16 = vor.u32 %v6142_v61, %v5604_v19  ;;  %v5637_v61 = vor.u32 %v6145_v10, %v5634_v11  ;;  %v6159_v19 = vld [vmem:[%s9291_s3 + $0x86c] sm:$0x30]  ;;  %v5766_v11 = vld [vmem:[%s9291_s3 + $0x8e0] sm:$0xf] }
 0x87f   :  { %3492 = vmatpush.msra.mxu1 %v8606_v45 }
 0x880   :  { %v3425_v46 = vsel %vm265_vm1, %v5607_v16, 0  ;;  %v5688_v16 = vld [vmem:[%s9291_s3 + $0x868] sm:$0xf] }
 0x881   :  { %3493 = vmatpush.msra.mxu1 %v8621_v17  ;;  %3470 = vmatpush.bf16.msra.mxu3 %v3425_v46  ;;  %v5681_v46 = vor.u32 %v6159_v19, %v5680_v13  ;;  %v6173_v13 = vld [vmem:[%s9291_s3 + $0x8e4] sm:$0xf]  ;;  %v5768_v19 = vld [vmem:[%s9291_s3 + $0x8f0] sm:$0x30] }
 0x883   :  { %3494 = vmatpush.msra.mxu1 %v8630_v12  ;;  %v3631_v30 = vsel %vm265_vm1, %v5681_v46, 0  ;;  %v5771_v46 = vor.u32 %v6173_v13, %v5768_v19  ;;  %v6200_v13 = vld [vmem:[%s9293_s5 + $0xb8] sm:$0xff]  ;;  %v6191_v19 = vld [vmem:[%s9293_s5 + $0x70] sm:$0xff] }
 0x884   :  { %3646 = vmatpush.bf16.msrb.mxu0 %v3631_v30 }
 0x885   :  { %3495 = vmatpush.msra.mxu1 %v8645_v47  ;;  %3471 = vmatpush.bf16.msra.mxu3 %v5591_v54 }
 0x886   :  { %5613 = vmatmul.msk.f32.vlgmr.msra.gmra.mxu2 %vm56_vm0, %v3488_v24  ;;  %v5632_v24 = vld [vmem:[%s9291_s3 + $0x800] sm:$0xf] }
 0x887   :  { %3496 = vmatpush.msra.mxu1 %v8654_v49 }
 0x889   :  { %3497 = vmatpush.msra.mxu1 %v8669_v52 }
 0x88b   :  { %3498 = vmatpush.msra.mxu1 %v8678_v57 }
 0x88d   :  { %3499 = vmatpush.msra.mxu1 %v8690_v3 }
 0x88f   :  { %3500 = vmatpush.msra.mxu1 %v8697_v59 }
 0x891   :  { %3501 = vmatpush.msra.mxu1 %v8709_v44 }
 0x893   :  { %3502 = vmatpush.msra.mxu1 %v8721_v2 }
 0x895   :  { %3503 = vmatpush.msra.mxu1 %v8736_v28 }
 0x897   :  { %3504 = vmatpush.msra.mxu1 %v8748_v1 }
 0x899   :  { %3505 = vmatpush.msra.mxu1 %v8754_v31 }
 0x89b   :  { %3506 = vmatpush.msra.mxu1 %v8763_v32 }
 0x89d   :  { %3507 = vmatpush.msra.mxu1 %v8769_v38 }
 0x8ea   :  { %v3221_v22 = vpop.f32.mrf.mxu1 }
 0x8eb   :  { %v8890_v42 = vadd.f32 %v3221_v22, %v8758_v8  ;;  %v5575_v8 = vor.u32 %v6134_v6, %v5572_v62  ;;  %v6160_v22 = vld [vmem:[%s9291_s3 + $0x874] sm:$0x30]  ;;  %v6155_v6 = vld [vmem:[%s9291_s3 + $0x84c] sm:$0xf0]  ;;  %v5672_v62 = vld [vmem:[%s9291_s3 + $0x848] sm:$0xf] }
 0x8ec   :  { %v5689_v53 = vor.u32 %v6160_v22, %v5688_v16  ;;  %v5774_v16 = vld [vmem:[%s9291_s3 + $0x8e8] sm:$0xf]  ;;  %v6176_v22 = vld [vmem:[%s9291_s3 + $0x8f4] sm:$0x30] }
 0x8ed   :  { %3472 = vmatpush.bf16.msra.mxu3 %v5575_v8  ;;  %v5665_v8 = vor.u32 %v6155_v6, %v5664_v50  ;;  %v5750_v6 = vld [vmem:[%s9291_s3 + $0x8c0] sm:$0xf] }
 0x8ee   :  { %v3637_v54 = vsel %vm265_vm1, %v5689_v53, 0  ;;  %v5775_v53 = vor.u32 %v6176_v22, %v5774_v16  ;;  %v6199_v16 = vld [vmem:[%s9293_s5 + $0xb0] sm:$0xff] }
 0x8ef   :  { %3672 = vmatpush.bf16.msrb.mxu2 %v3637_v54  ;;  %3647 = vmatpush.bf16.msrb.mxu0 %v5665_v8  ;;  %v3849_v54 = vsel %vm265_vm1, %v5771_v46, 0  ;;  %v6183_v22 = vld [vmem:[%s9293_s5 + $0x30] sm:$0xff]  ;;  %v6198_v46 = vld [vmem:[%s9293_s5 + $0xa8] sm:$0xff] }
 0x8f0   :  { %v3234_v60 = vpop.f32.mrf.mxu2  ;;  %v3852_v50 = vsel %vm265_vm1, %v5775_v53, 0 }
 0x8f1   :  { %v8911_v48 = vadd.f32 %v3234_v60, %v8731_v0  ;;  %v3247_v18 = vpop.f32.mrf.mxu3  ;;  %3473 = vmatpush.bf16.msra.mxu3 %v5559_v7  ;;  %v6147_v7 = vld [vmem:[%s9291_s3 + $0x80c] sm:$0xf0] }
 0x8f2   :  { %v8915_v37 = vadd.f32 %v3247_v18, %v8743_v63  ;;  %v3223_v4 = vpop.f32.mrf.mxu1  ;;  %v5649_v18 = vor.u32 %v6151_v27, %v5648_v55  ;;  %v5758_v55 = vld [vmem:[%s9291_s3 + $0x8c8] sm:$0xf] }
 0x8f4   :  { %3648 = vmatpush.bf16.msrb.mxu0 %v5649_v18 }
 0x8f8   :  { %v3236_v0 = vpop.f32.mrf.mxu2 }
 0x8f9   :  { %v3249_v58 = vpop.f32.mrf.mxu3  ;;  %v5633_v0 = vor.u32 %v6147_v7, %v5632_v24  ;;  %v6165_v24 = vld [vmem:[%s9291_s3 + $0x8a4] sm:$0xf] }
 0x8fa   :  { %v3260_v36 = vpop.f32.mrf.mxu1 }
 0x8fb   :  { %v8923_v63 = vadd.f32 %v3260_v36, %v8775_v14  ;;  %v6158_v36 = vld [vmem:[%s9291_s3 + $0x86c] sm:$0xf]  ;;  %3649 = vmatpush.bf16.msrb.mxu0 %v5633_v0  ;;  %v5742_v0 = vld [vmem:[%s9291_s3 + $0x8a8] sm:$0xf] }
 0x900   :  { %v3294_v20 = vpop.f32.mrf.mxu2 }
 0x901   :  { %v3295_v25 = vadd.f32 %v8934_v35, %v3294_v20  ;;  %v5690_v20 = vld [vmem:[%s9291_s3 + $0x878] sm:$0x30] }
 0x902   :  { %v3262_v23 = vpop.f32.mrf.mxu1 }
 0x903   :  { %v3315_v14 = vadd.f32 %v3314_v9, %v3295_v25  ;;  %v5693_v9 = vor.u32 %v6158_v36, %v5690_v20  ;;  %v5658_v25 = vld [vmem:[%s9291_s3 + $0x838] sm:$0xf0]  ;;  %v5718_v20 = vld [vmem:[%s9291_s3 + $0x880] sm:$0xf] }
 0x905   :  { %v3317_v5 = vmax.f32 %v3315_v14, 0.0  ;;  %v6146_v14 = vld [vmem:[%s9291_s3 + $0x80c] sm:$0xf] }
 0x907   :  { %v3318_v39 = vpack.c.bf16 %v3317_v5, %v3317_v5 }
 0x909   :  { %5608 = vmatmul.msk.bf16.vlgmr.msrb.gmra.mxu3 %vm261_vm2, %v3318_v39  ;;  %5609 = vmatmul.msk.bf16.vlgmr.msrb.gmra.mxu1 %vm261_vm2, %v3318_v39 }
 0x90a   :  { %5610 = vmatmul.msk.bf16.vlgmr.msra.gmra.mxu0 %vm261_vm2, %v3318_v39  ;;  %3659 = vmatpush.bf16.msrb.mxu3 %v3634_v33 }
 0x90b   :  { %3741 = vmatpush.msrb.mxu1 %v8783_v15  ;;  %v6149_v15 = vld [vmem:[%s9291_s3 + $0x824] sm:$0xf] }
 0x90d   :  { %3742 = vmatpush.msrb.mxu1 %v8789_v41  ;;  %v5650_v41 = vld [vmem:[%s9291_s3 + $0x830] sm:$0xf0] }
 0x90e   :  { %3660 = vmatpush.bf16.msrb.mxu3 %v5669_v34  ;;  %v5653_v43 = vor.u32 %v6149_v15, %v5650_v41 }
 0x912   :  { %3661 = vmatpush.bf16.msrb.mxu3 %v5653_v43 }
 0x916   :  { %3662 = vmatpush.bf16.msrb.mxu3 %v5637_v61 }
 0x919   :  { %5611 = vmatmul.msk.bf16.vlgmr.msra.gmra.mxu3 %vm261_vm2, %v3318_v39  ;;  %3508 = vmatmul.f32.vlgmr.msra.gmra.mxu1 %v3487_v51 }
 0x91a   :  { %3707 = vmatpush.msra.mxu3 %v8606_v45  ;;  %v6156_v45 = vld [vmem:[%s9291_s3 + $0x854] sm:$0xf0]  ;;  %3887 = vmatpush.bf16.msra.mxu1 %v3852_v50 }
 0x91b   :  { %v5673_v60 = vor.u32 %v6156_v45, %v5672_v62  ;;  %v6171_v62 = vld [vmem:[%s9291_s3 + $0x8cc] sm:$0xf0]  ;;  %v6169_v45 = vld [vmem:[%s9291_s3 + $0x8c4] sm:$0xf] }
 0x91c   :  { %3708 = vmatpush.msra.mxu3 %v8621_v17  ;;  %v5656_v17 = vld [vmem:[%s9291_s3 + $0x828] sm:$0xf]  ;;  %v5751_v8 = vor.u32 %v6171_v62, %v5750_v6 }
 0x91d   :  { %3673 = vmatpush.bf16.msrb.mxu2 %v5673_v60  ;;  %v5752_v60 = vld [vmem:[%s9291_s3 + $0x8d0] sm:$0xf0] }
 0x91e   :  { %3709 = vmatpush.msra.mxu3 %v8630_v12  ;;  %v6152_v12 = vld [vmem:[%s9291_s3 + $0x834] sm:$0xf0]  ;;  %v5755_v27 = vor.u32 %v6169_v45, %v5752_v60  ;;  %v6197_v45 = vld [vmem:[%s9293_s5 + $0xa0] sm:$0xff] }
 0x91f   :  { %v5657_v4 = vor.u32 %v6152_v12, %v5656_v17  ;;  %v6172_v17 = vld [vmem:[%s9291_s3 + $0x8d4] sm:$0xf0]  ;;  %v5734_v12 = vld [vmem:[%s9291_s3 + $0x8a0] sm:$0xf] }
 0x920   :  { %3710 = vmatpush.msra.mxu3 %v8645_v47  ;;  %v5640_v47 = vld [vmem:[%s9291_s3 + $0x808] sm:$0xf]  ;;  %v5759_v18 = vor.u32 %v6172_v17, %v5758_v55  ;;  %v6181_v60 = vld [vmem:[%s9293_s5 + $0x20] sm:$0xff]  ;;  %v6196_v17 = vld [vmem:[%s9293_s5 + $0x98] sm:$0xff] }
 0x921   :  { %3674 = vmatpush.bf16.msrb.mxu2 %v5657_v4  ;;  %v6167_v4 = vld [vmem:[%s9291_s3 + $0x8ac] sm:$0xf0] }
 0x922   :  { %3711 = vmatpush.msra.mxu3 %v8654_v49  ;;  %v6148_v49 = vld [vmem:[%s9291_s3 + $0x814] sm:$0xf0]  ;;  %3888 = vmatpush.bf16.msra.mxu1 %v5759_v18  ;;  %v5735_v7 = vor.u32 %v6167_v4, %v5734_v12  ;;  %v6187_v18 = vld [vmem:[%s9293_s5 + $0x50] sm:$0xff] }
 0x923   :  { %v5641_v58 = vor.u32 %v6148_v49, %v5640_v47  ;;  %v5736_v47 = vld [vmem:[%s9291_s3 + $0x8b0] sm:$0xf0]  ;;  %v6168_v49 = vld [vmem:[%s9291_s3 + $0x8b4] sm:$0xf0] }
 0x924   :  { %3712 = vmatpush.msra.mxu3 %v8669_v52  ;;  %v3640_v52 = vsel %vm265_vm1, %v5693_v9, 0  ;;  %v5743_v36 = vor.u32 %v6168_v49, %v5742_v0  ;;  %v6163_v9 = vld [vmem:[%s9291_s3 + $0x88c] sm:$0xf0]  ;;  %v6180_v4 = vld [vmem:[%s9293_s5 + $0x18] sm:$0xff]  ;;  %v6185_v0 = vld [vmem:[%s9293_s5 + $0x40] sm:$0xff] }
 0x925   :  { %3675 = vmatpush.bf16.msrb.mxu2 %v5641_v58  ;;  %3685 = vmatpush.bf16.msra.mxu0 %v3640_v52  ;;  %v5739_v58 = vor.u32 %v6165_v24, %v5736_v47  ;;  %v6161_v52 = vld [vmem:[%s9291_s3 + $0x884] sm:$0xf]  ;;  %v6195_v12 = vld [vmem:[%s9293_s5 + $0x90] sm:$0xff]  ;;  %v6186_v24 = vld [vmem:[%s9293_s5 + $0x48] sm:$0xff] }
 0x926   :  { %3713 = vmatpush.msra.mxu3 %v8678_v57  ;;  %v6154_v57 = vld [vmem:[%s9291_s3 + $0x84c] sm:$0xf]  ;;  %3889 = vmatpush.bf16.msra.mxu1 %v5743_v36  ;;  %v6179_v47 = vld [vmem:[%s9293_s5 + $0x10] sm:$0xff]  ;;  %v6193_v49 = vld [vmem:[%s9293_s5 + $0x80] sm:$0xff] }
 0x927   :  { %v5677_v21 = vor.u32 %v6154_v57, %v5674_v29  ;;  %v5719_v57 = vor.u32 %v6163_v9, %v5718_v20  ;;  %v5720_v29 = vld [vmem:[%s9291_s3 + $0x890] sm:$0xf0]  ;;  %v6177_v36 = vld [vmem:[%s9293_s5] sm:$0xff]  ;;  %v3987_v20 = vld [vmem:[%s9293_s5 + $0xd0] sm:$0x3] }
 0x928   :  { %3714 = vmatpush.msra.mxu3 %v8690_v3  ;;  %v6150_v3 = vld [vmem:[%s9291_s3 + $0x82c] sm:$0xf]  ;;  %v4097_v9 = vunpack.c.l.b16 %v3987_v20 }
 0x929   :  { %3686 = vmatpush.bf16.msra.mxu0 %v5677_v21  ;;  %v5726_v21 = vld [vmem:[%s9291_s3 + $0x888] sm:$0xf] }
 0x92a   :  { %3715 = vmatpush.msra.mxu3 %v8697_v59  ;;  %v5661_v59 = vor.u32 %v6150_v3, %v5658_v25  ;;  %v6164_v3 = vld [vmem:[%s9291_s3 + $0x894] sm:$0xf0]  ;;  %v5723_v25 = vor.u32 %v6161_v52, %v5720_v29  ;;  %v4124_v52 = vpack.c.b16 %v4097_v9, %v4097_v9  ;;  %v6202_v29 = vld [vmem:[%s9293_s5 + $0xc8] sm:$0xff] }
 0x92c   :  { %3716 = vmatpush.msra.mxu3 %v8709_v44  ;;  %v5642_v44 = vld [vmem:[%s9291_s3 + $0x818] sm:$0xf0] }
 0x92d   :  { %3687 = vmatpush.bf16.msra.mxu0 %v5661_v59  ;;  %v5645_v33 = vor.u32 %v6146_v14, %v5642_v44  ;;  %v5727_v59 = vor.u32 %v6164_v3, %v5726_v21  ;;  %v5776_v14 = vld [vmem:[%s9291_s3 + $0x8f8] sm:$0x30]  ;;  %v6201_v21 = vld [vmem:[%s9293_s5 + $0xc0] sm:$0xff] }
 0x92e   :  { %3717 = vmatpush.msra.mxu3 %v8721_v2  ;;  %v5698_v2 = vld [vmem:[%s9288_s0 + $0x44] sm:$0xf]  ;;  %v3913_v3 = vld [vmem:[%s9292_s4] sm:$0xf] }
 0x92f   :  { %3701 = vst [vmem:[#allocation1] ss:$4 sm:$0xff] %v5698_v2  ;;  %3890 = vmatpush.bf16.msra.mxu1 %v5727_v59 }
 0x930   :  { %3718 = vmatpush.msra.mxu3 %v8736_v28 }
 0x931   :  { %3688 = vmatpush.bf16.msra.mxu0 %v5645_v33  ;;  %v6170_v33 = vld [vmem:[%s9291_s3 + $0x8cc] sm:$0xf] }
 0x932   :  { %3719 = vmatpush.msra.mxu3 %v8748_v1  ;;  %v3529_v1 = vpop.f32.mrf.mxu2 }
 0x934   :  { %3720 = vmatpush.msra.mxu3 %v8754_v31 }
 0x936   :  { %3721 = vmatpush.msra.mxu3 %v8763_v32 }
 0x938   :  { %3722 = vmatpush.msra.mxu3 %v8769_v38  ;;  %v3702_v38 = vld.sshfl [vmem:[#allocation1] sm:$0xff pattern:$0x73625140] }
 0x986   :  { %v3449_v23 = vpop.f32.mrf.mxu1 }
 0x987   :  { %v9049_v26 = vadd.f32 %v3449_v23, %v8911_v48  ;;  %v3462_v5 = vpop.f32.mrf.mxu0  ;;  %v6174_v23 = vld [vmem:[%s9291_s3 + $0x8ec] sm:$0xf] }
 0x988   :  { %v9056_v39 = vadd.f32 %v3462_v5, %v8915_v37  ;;  %v3703_v37 = vld.sshfl [vmem:[#allocation1 + $0x8] sm:$0xff pattern:$0x73625140]  ;;  %v5779_v44 = vor.u32 %v6174_v23, %v5776_v14  ;;  %v3917_v23 = vperm.slane %v3913_v3, 2 }
 0x989   :  { %5699 = vmatmul.msk.f32.vlgmr.msrb.gmra.mxu1 %vm56_vm0, %v3703_v37  ;;  %v6166_v37 = vld [vmem:[%s9291_s3 + $0x8ac] sm:$0xf] }
 0x98a   :  { %v3855_v2 = vsel %vm265_vm1, %v5779_v44, 0 }
 0x98c   :  { %v3436_v51 = vpop.f32.mrf.mxu3 }
 0x98d   :  { %v9061_v48 = vadd.f32 %v3436_v51, %v8890_v42  ;;  %v5760_v51 = vld [vmem:[%s9291_s3 + $0x8d8] sm:$0xf0] }
 0x98e   :  { %v3451_v28 = vpop.f32.mrf.mxu1 }
 0x98f   :  { %v3464_v56 = vpop.f32.mrf.mxu0 }
 0x990   :  { %v5763_v56 = vor.u32 %v6170_v33, %v5760_v51 }
 0x994   :  { %v3438_v40 = vpop.f32.mrf.mxu3 }
 0x995   :  { %v5744_v40 = vld [vmem:[%s9291_s3 + $0x8b8] sm:$0xf0] }
 0x996   :  { %v3509_v34 = vpop.f32.mrf.mxu1 }
 0x997   :  { %v3510_v15 = vadd.f32 %v8934_v35, %v3509_v34  ;;  %v5747_v34 = vor.u32 %v6166_v37, %v5744_v40 }
 0x999   :  { %v3530_v31 = vadd.f32 %v3529_v1, %v3510_v15  ;;  %v6162_v15 = vld [vmem:[%s9291_s3 + $0x88c] sm:$0xf] }
 0x99b   :  { %v3532_v41 = vmax.f32 %v3530_v31, 0.0 }
 0x99c   :  { %v3475_v43 = vpop.f32.mrf.mxu3 }
 0x99d   :  { %v3533_v42 = vpack.c.bf16 %v3532_v41, %v3532_v41  ;;  %v9068_v10 = vadd.f32 %v3475_v43, %v8923_v63  ;;  %v6175_v63 = vld [vmem:[%s9291_s3 + $0x8ec] sm:$0x30] }
 0x99e   :  { %v5767_v61 = vor.u32 %v6175_v63, %v5766_v11  ;;  %v6192_v63 = vld [vmem:[%s9293_s5 + $0x78] sm:$0xff] }
 0x99f   :  { %5694 = vmatmul.msk.bf16.vlgmr.msrb.gmra.mxu0 %vm261_vm2, %v3533_v42  ;;  %5695 = vmatmul.msk.bf16.vlgmr.msrb.gmra.mxu3 %vm261_vm2, %v3533_v42 }
 0x9a0   :  { %5696 = vmatmul.msk.bf16.vlgmr.msrb.gmra.mxu2 %vm261_vm2, %v3533_v42  ;;  %v3846_v30 = vsel %vm265_vm1, %v5767_v61, 0  ;;  %3874 = vmatpush.bf16.msrb.mxu0 %v3849_v54  ;;  %v6182_v54 = vld [vmem:[%s9293_s5 + $0x28] sm:$0xff] }
 0x9a1   :  { %3861 = vmatpush.bf16.msra.mxu2 %v3846_v30  ;;  %4172 = vmatpush.bf16.msrb.mxu1 %v6192_v63 }
 0x9a2   :  { %4185 = vmatpush.bf16.msrb.mxu3 %v6200_v13 }
 0x9a4   :  { %v3477_v32 = vpop.f32.mrf.mxu3  ;;  %3875 = vmatpush.bf16.msrb.mxu0 %v5755_v27 }
 0x9a5   :  { %3862 = vmatpush.bf16.msra.mxu2 %v5751_v8  ;;  %4173 = vmatpush.bf16.msrb.mxu1 %v6191_v19  ;;  %v6189_v8 = vld [vmem:[%s9293_s5 + $0x60] sm:$0xff] }
 0x9a6   :  { %4186 = vmatpush.bf16.msrb.mxu3 %v6199_v16 }
 0x9a8   :  { %3876 = vmatpush.bf16.msrb.mxu0 %v5739_v58  ;;  %v6178_v58 = vld [vmem:[%s9293_s5 + $0x8] sm:$0xff] }
 0x9a9   :  { %3863 = vmatpush.bf16.msra.mxu2 %v5735_v7  ;;  %v6194_v7 = vld [vmem:[%s9293_s5 + $0x88] sm:$0xff] }
 0x9aa   :  { %4187 = vmatpush.bf16.msrb.mxu3 %v6198_v46 }
 0x9ac   :  { %3877 = vmatpush.bf16.msrb.mxu0 %v5723_v25  ;;  %v3916_v25 = vperm.slane %v3913_v3, 1 }
 0x9ad   :  { %3864 = vmatpush.bf16.msra.mxu2 %v5719_v57  ;;  %v4157_v57 = vsel %vm4155_vm3, %v4124_v52, 0 }
 0x9ae   :  { %4188 = vmatpush.bf16.msrb.mxu3 %v6197_v45 }
 0x9af   :  { %5697 = vmatmul.msk.bf16.vlgmr.msra.gmra.mxu0 %vm261_vm2, %v3533_v42  ;;  %3723 = vmatmul.f32.vlgmr.msra.gmra.mxu3 %v3702_v38 }
 0x9b1   :  { %3900 = vmatpush.bf16.msrb.mxu2 %v3855_v2 }
 0x9b2   :  { %4189 = vmatpush.bf16.msrb.mxu3 %v6196_v17 }
 0x9b5   :  { %3901 = vmatpush.bf16.msrb.mxu2 %v5763_v56  ;;  %v3915_v56 = vperm.slane %v3913_v3, 0 }
 0x9b6   :  { %4190 = vmatpush.bf16.msrb.mxu3 %v6195_v12 }
 0x9b9   :  { %3902 = vmatpush.bf16.msrb.mxu2 %v5747_v34 }
 0x9ba   :  { %4191 = vmatpush.bf16.msrb.mxu3 %v6194_v7 }
 0x9be   :  { %4192 = vmatpush.bf16.msrb.mxu3 %v6193_v49 }
 0xa06   :  { %v3744_v30 = vpop.f32.mrf.mxu1 }
 0xa1c   :  { %v3651_v5 = vpop.f32.mrf.mxu0 }
 0xa1d   :  { %v9163_v28 = vadd.f32 %v3651_v5, %v9061_v48  ;;  %v5728_v48 = vld [vmem:[%s9291_s3 + $0x898] sm:$0xf0] }
 0xa1e   :  { %v5731_v32 = vor.u32 %v6162_v15, %v5728_v48 }
 0xa20   :  { %3903 = vmatpush.bf16.msrb.mxu2 %v5731_v32 }
 0xa22   :  { %v3664_v1 = vpop.f32.mrf.mxu3 }
 0xa23   :  { %v9178_v31 = vadd.f32 %v3664_v1, %v9049_v26  ;;  %v3677_v41 = vpop.f32.mrf.mxu2 }
 0xa24   :  { %v9181_v43 = vadd.f32 %v3677_v41, %v9056_v39  ;;  %v3653_v42 = vpop.f32.mrf.mxu0  ;;  %v6184_v39 = vld [vmem:[%s9293_s5 + $0x38] sm:$0xff] }
 0xa25   :  { %4159 = vmatpush.bf16.msra.mxu0 %v6184_v39 }
 0xa29   :  { %4160 = vmatpush.bf16.msra.mxu0 %v6183_v22 }
 0xa2a   :  { %v3666_v38 = vpop.f32.mrf.mxu3 }
 0xa2b   :  { %v3679_v11 = vpop.f32.mrf.mxu2 }
 0xa2c   :  { %v3690_v26 = vpop.f32.mrf.mxu0 }
 0xa2d   :  { %v9193_v61 = vadd.f32 %v3690_v26, %v9068_v10  ;;  %v6190_v10 = vld [vmem:[%s9293_s5 + $0x68] sm:$0xff]  ;;  %4161 = vmatpush.bf16.msra.mxu0 %v6182_v54 }
 0xa2e   :  { %4174 = vmatpush.bf16.msrb.mxu1 %v6190_v10 }
 0xa31   :  { %4162 = vmatpush.bf16.msra.mxu0 %v6181_v60 }
 0xa32   :  { %v3724_v53 = vpop.f32.mrf.mxu3  ;;  %4175 = vmatpush.bf16.msrb.mxu1 %v6189_v8 }
 0xa33   :  { %v3725_v50 = vadd.f32 %v8934_v35, %v3724_v53  ;;  %v6188_v35 = vld [vmem:[%s9293_s5 + $0x58] sm:$0xff]  ;;  %v6205_v53 = vld [vmem:[%s9294_s6] ss:$0 sm:$0xff]  ;;  %s6293_s6 = smov [#allocation2]  }
 0xa34   :  { %v3692_v6 = vpop.f32.mrf.mxu0  ;;  %s4242_s2 = sshll.u32 %s6293_s6, 4  ;;  %s4243_s2 = int_to_ptr.vmem [resolvable:$true] %s4242_s2 }
 0xa35   :  { %v3745_v62 = vadd.f32 %v3744_v30, %v3725_v50  ;;  %4163 = vmatpush.bf16.msra.mxu0 %v6180_v4 }
 0xa36   :  { %4176 = vmatpush.bf16.msrb.mxu1 %v6188_v35 }
 0xa37   :  { %v3747_v55 = vmax.f32 %v3745_v62, 0.0 }
 0xa39   :  { %v3748_v27 = vpack.c.bf16 %v3747_v55, %v3747_v55  ;;  %4164 = vmatpush.bf16.msra.mxu0 %v6179_v47 }
 0xa3a   :  { %4177 = vmatpush.bf16.msrb.mxu1 %v6187_v18 }
 0xa3b   :  { %5780 = vmatmul.msk.bf16.vlgmr.msra.gmra.mxu2 %vm261_vm2, %v3748_v27  ;;  %5781 = vmatmul.msk.bf16.vlgmr.msrb.gmra.mxu0 %vm261_vm2, %v3748_v27 }
 0xa3c   :  { %5782 = vmatmul.msk.bf16.vlgmr.msra.gmra.mxu1 %vm261_vm2, %v3748_v27  ;;  %4203 = vmatpush.bf16.msra.mxu2 %v4157_v57 }
 0xa3d   :  { %4165 = vmatpush.bf16.msra.mxu0 %v6178_v58 }
 0xa3e   :  { %4178 = vmatpush.bf16.msrb.mxu1 %v6186_v24 }
 0xa40   :  { %4204 = vmatpush.bf16.msra.mxu2 %v6202_v29 }
 0xa41   :  { %4166 = vmatpush.bf16.msra.mxu0 %v6177_v36 }
 0xa42   :  { %4179 = vmatpush.bf16.msrb.mxu1 %v6185_v0 }
 0xa44   :  { %4205 = vmatpush.bf16.msra.mxu2 %v6201_v21 }
 0xa4b   :  { %5783 = vmatmul.msk.bf16.vlgmr.msrb.gmra.mxu2 %vm261_vm2, %v3748_v27 }
 0xab8   :  { %v3879_v59 = vpop.f32.mrf.mxu0 }
 0xab9   :  { %v3910_v14 = vadd.f32 %v3879_v59, %v9178_v31  ;;  %v3892_v44 = vpop.f32.mrf.mxu1 }
 0xaba   :  { %v3911_v5 = vadd.f32 %v3892_v44, %v9181_v43  ;;  %v3918_v43 = vperm.slane %v3913_v3, 3 }
 0xabb   :  { %v3924_v2 = vadd.f32 %v3916_v25, %v3910_v14 }
 0xabc   :  { %v3925_v33 = vadd.f32 %v3917_v23, %v3911_v5 }
 0xabd   :  { %v3928_v51 = vmax.f32 %v3924_v2, 0.0 }
 0xabe   :  { %v3929_v37 = vmax.f32 %v3925_v33, 0.0  ;;  %v3866_v40 = vpop.f32.mrf.mxu2 }
 0xabf   :  { %v3932_v34 = vpack.c.bf16 %v3928_v51, %v3928_v51  ;;  %v3909_v1 = vadd.f32 %v3866_v40, %v9163_v28 }
 0xac0   :  { %v3933_v15 = vpack.c.bf16 %v3929_v37, %v3929_v37  ;;  %v3881_v48 = vpop.f32.mrf.mxu0 }
 0xac1   :  { %v3923_v41 = vadd.f32 %v3915_v56, %v3909_v1  ;;  %v3894_v42 = vpop.f32.mrf.mxu1  ;;  %4180 = vmatmul.bf16.vlgmr.msrb.gmra.mxu1 %v3932_v34 }
 0xac2   :  { %4193 = vmatmul.bf16.vlgmr.msrb.gmra.mxu3 %v3933_v15 }
 0xac3   :  { %v3927_v32 = vmax.f32 %v3923_v41, 0.0 }
 0xac5   :  { %v3931_v31 = vpack.c.bf16 %v3927_v32, %v3927_v32 }
 0xac6   :  { %v3868_v38 = vpop.f32.mrf.mxu2 }
 0xac7   :  { %4167 = vmatmul.bf16.vlgmr.msra.gmra.mxu0 %v3931_v31 }
 0xace   :  { %v3905_v11 = vpop.f32.mrf.mxu2 }
 0xacf   :  { %v3912_v63 = vadd.f32 %v3905_v11, %v9193_v61 }
 0xad1   :  { %v3926_v13 = vadd.f32 %v3918_v43, %v3912_v63 }
 0xad3   :  { %v3930_v26 = vmax.f32 %v3926_v13, 0.0 }
 0xad5   :  { %v3934_v39 = vpack.c.bf16 %v3930_v26, %v3930_v26 }
 0xad6   :  { %v3907_v19 = vpop.f32.mrf.mxu2 }
 0xad7   :  { %5888 = vmatmul.msk.bf16.vlgmr.msra.gmra.mxu2 %vm4151_vm4, %v3934_v39 }
 0xb3e   :  { %v4181_v28 = vpop.f32.mrf.mxu1 }
 0xb44   :  { %v4168_v16 = vpop.f32.mrf.mxu0 }
 0xb45   :  { %v4194_v22 = vpop.f32.mrf.mxu3  ;;  %v4169_v54 = vadd.f32 %v6205_v53, %v4168_v16 }
 0xb46   :  { %v4183_v10 = vpop.f32.mrf.mxu1 }
 0xb47   :  { %v4182_v50 = vadd.f32 %v4181_v28, %v4169_v54 }
 0xb49   :  { %v4195_v6 = vadd.f32 %v4194_v22, %v4182_v50 }
 0xb4c   :  { %v4170_v46 = vpop.f32.mrf.mxu0 }
 0xb4d   :  { %v4196_v30 = vpop.f32.mrf.mxu3 }
 0xb5a   :  { %v4207_v61 = vpop.f32.mrf.mxu2 }
 0xb5b   :  { %v4208_v62 = vadd.f32 %v4207_v61, %v4195_v6 }
 0xb5d   :  { %v4212_v8 = vsel %vm4211_vm5, %v4208_v62, -inf }
 0xb5e   :  { %4213 = vmax.xlane.f32.xlu0 %v4212_v8 }
 0xb62   :  { %v4209_v45 = vpop.f32.mrf.mxu2 }
 0xbd1   :  { %v4214_v60 = vpop.xlane.xlu0 %4213 }
 0xbd2   :  { %v4215_v55 = vsub.f32 %v4208_v62, %v4214_v60 }
 0xbd4   :  { %v4216_v27 = vmul.f32 1.442695, %v4215_v55 }
 0xbd6   :  { %6206 = vpow2.f32 %v4216_v27 }
 0xbdc   :  { %v6207_v35 = vpop.eup %6206 }
 0xbdd   :  { %v4218_v17 = vsel %vm4211_vm5, %v6207_v35, 0.0 }
 0xbde   :  { %4219 = vadd.xlane.f32.xlu0 %v4218_v17 }
 0xc51   :  { %v4220_v18 = vpop.xlane.xlu0 %4219 }
 0xc52   :  { %6208 = vrcp.f32 %v4220_v18  ;;  %v4232_v7 = vand.u32 2147483648, %v4220_v18  ;;  %v4230_v0 = vand.u32 2147483647, %v4220_v18  ;;  %vm4226_vm7 = vweird.f32 %v4220_v18 }
 0xc54   :  { %v4233_v58 = vor.u32 1.1754944e-38, %v4232_v7  ;;  %vm4231_vm9 = vcmp.eq.f32.partialorder %v4230_v0, 8.507059e+37 }
 0xc58   :  { %v6209_v12 = vpop.eup %6208 }
 0xc59   :  { %v4222_v4 = vmul.f32 %v6209_v12, %v4220_v18  ;;  %vm4227_vm6 = vweird.f32 %v6209_v12 }
 0xc5a   :  { %vm4228_vm8 = vmor %vm4226_vm7, %vm4227_vm6 }
 0xc5b   :  { %v4223_v24 = vsub.f32 1.0, %v4222_v4 }
 0xc5d   :  { %v4224_v47 = vmul.f32 %v6209_v12, %v4223_v24 }
 0xc5f   :  { %v4225_v49 = vadd.f32 %v6209_v12, %v4224_v47 }
 0xc61   :  { %v4229_v36 = vsel %vm4228_vm8, %v6209_v12, %v4225_v49 }
 0xc62   :  { %v4234_v20 = vsel %vm4231_vm9, %v4233_v58, %v4229_v36 }
 0xc63   :  { %v4235_v9 = vmul.f32 %v6207_v35, %v4234_v20 }
 0xc65   :  { %4236 = vst.msk [vmem:[#allocation2] sm:$0x3] %vm4211_vm5, %v4235_v9 }
 0xc66   :  { %4247 = dma.vmem_to_hbm [thread:$0]  %s4243_s2, 32, %s4245_s17, [#allocation3]  }
 0xc67   :  { %6291 = dma.done.wait [#allocation3], 32  }
 0xc68   :  { %6292 = vsyncadd [#allocation3], 4294967264 }
 0xc69   :  { %4252 = vsyncpa [#allocation3], 1 }

</bundles_post_ra>
